<compile_context>
chip_gen: v7x
topology: tpu7x:2x2x1
jax: 0.10.0
libtpu: 0.0.40
codegen_flags: <defaults>
</compile_context>

<pallas_src>
import functools

import jax
import jax.numpy as jnp
from jax import lax
from jax.experimental import pallas as pl
from jax.experimental.pallas import tpu as pltpu


# ----------------------------------------------------------------------------
# Pallas kernels
# ----------------------------------------------------------------------------
def _fused_matmul_kernel(a_ref, b_ref, bias_ref, o_ref, *, act):
    """o = act(a @ b + bias); bf16 operands, f32 accumulation + epilogue."""
    acc = jnp.dot(a_ref[...], b_ref[...], preferred_element_type=jnp.float32)
    y = acc + bias_ref[...]
    if act == "relu":
        y = jnp.maximum(y, 0.0)
    elif act == "tanh":
        y = jnp.tanh(y)
    o_ref[...] = y.astype(o_ref.dtype)


def _fc_pair_kernel(x_ref, w1_ref, b1_ref, w2_ref, b2_ref, o_ref):
    """Fused Linear(1600,512)(+BN1d) -> Linear(512,1600); batch is tiny."""
    h = jnp.dot(x_ref[...], w1_ref[...], preferred_element_type=jnp.float32)
    h = h + b1_ref[...]
    y = jnp.dot(h.astype(jnp.bfloat16), w2_ref[...],
                preferred_element_type=jnp.float32) + b2_ref[...]
    o_ref[...] = y.astype(o_ref.dtype)


# ----------------------------------------------------------------------------
# Kernel wrappers
# ----------------------------------------------------------------------------
def _pick_tile(L, max_tile=2048):
    """Largest tile dividing L (multiple of 128), >=2 grid steps when L allows."""
    if L % 128 != 0:
        return L                      # tiny layer: single full-extent block
    tile = min(L, max_tile)
    while L % tile != 0:
        tile -= 128
    if tile == L and L >= 256:
        half = L // 2
        if half % 128 == 0:
            tile = half               # give v7x's two TensorCores something to split
    return tile


def fused_matmul(a, b, bias_col, act="none", out_dtype=jnp.bfloat16, max_tile=2048):
    """out = act(a @ b + bias_col), tiled along the last (lane) dim of b / out.

    a: (R, K), b: (K, L), bias_col: (R, 1).  a/b go to the MXU in bf16; accumulation
    and the bias/activation epilogue stay in f32.  The output's last dim is the big
    L = N*OH*OW axis -> lane-dense stores.
    """
    R, K = a.shape
    K2, L = b.shape
    assert K == K2 and bias_col.shape == (R, 1)
    tile = _pick_tile(L, max_tile)
    grid = L // tile

    kernel = functools.partial(_fused_matmul_kernel, act=act)
    return pl.pallas_call(
        kernel,
        out_shape=jax.ShapeDtypeStruct((R, L), out_dtype),
        grid_spec=pltpu.PrefetchScalarGridSpec(
            num_scalar_prefetch=0,
            grid=(grid,),
            in_specs=[
                pl.BlockSpec((R, K), lambda i: (0, 0)),      # weights: VMEM-resident
                pl.BlockSpec((K, tile), lambda i: (0, i)),   # patches: streamed
                pl.BlockSpec((R, 1), lambda i: (0, 0)),      # per-channel bias
            ],
            out_specs=pl.BlockSpec((R, tile), lambda i: (0, i)),  # lane-dense
        ),
        compiler_params=pltpu.CompilerParams(dimension_semantics=("parallel",)),
    )(a.astype(jnp.bfloat16), b.astype(jnp.bfloat16), bias_col.astype(jnp.float32))


def fc_pair(x, w1m, b1, w2m, b2, out_dtype=jnp.bfloat16):
    """One pallas_call for Linear(1600,512)+BN1d followed by Linear(512,1600)."""
    M, K1 = x.shape
    _, N1 = w1m.shape
    _, N2 = w2m.shape
    return pl.pallas_call(
        _fc_pair_kernel,
        out_shape=jax.ShapeDtypeStruct((M, N2), out_dtype),
        grid_spec=pltpu.PrefetchScalarGridSpec(
            num_scalar_prefetch=0,
            grid=(1,),
            in_specs=[
                pl.BlockSpec((M, K1), lambda i: (0, 0)),
                pl.BlockSpec((K1, N1), lambda i: (0, 0)),
                pl.BlockSpec((1, N1), lambda i: (0, 0)),
                pl.BlockSpec((N1, N2), lambda i: (0, 0)),
                pl.BlockSpec((1, N2), lambda i: (0, 0)),
            ],
            out_specs=pl.BlockSpec((M, N2), lambda i: (0, 0)),
        ),
        compiler_params=pltpu.CompilerParams(dimension_semantics=("arbitrary",)),
    )(x.astype(jnp.bfloat16), w1m.astype(jnp.bfloat16),
      b1.reshape(1, N1).astype(jnp.float32),
      w2m.astype(jnp.bfloat16), b2.reshape(1, N2).astype(jnp.float32))


# ----------------------------------------------------------------------------
# Plain-JAX glue: BN folding, transposed im2col, conv / conv-transpose wrappers
# ----------------------------------------------------------------------------
def fold_bn(conv_bias, gamma, beta, mean, var, eps=1e-5):
    scale = gamma / jnp.sqrt(var + eps)
    bias = (conv_bias - mean) * scale + beta
    return scale, bias


def im2col_T(x_cf, k, stride, pad):
    """x: (C, N, H, W) -> patches^T (k*k*C, N*OH*OW), rows ordered (kh, kw, c)."""
    C, N, H, W = x_cf.shape
    (pt, pb), (pleft, pright) = pad
    xp = jnp.pad(x_cf, ((0, 0), (0, 0), (pt, pb), (pleft, pright)))
    OH = (H + pt + pb - k) // stride + 1
    OW = (W + pleft + pright - k) // stride + 1
    taps = []
    for di in range(k):
        for dj in range(k):
            taps.append(xp[:, :, di:di + (OH - 1) * stride + 1:stride,
                               dj:dj + (OW - 1) * stride + 1:stride])
    cols = jnp.stack(taps, axis=0)                 # (k*k, C, N, OH, OW)
    return cols.reshape(k * k * C, N * OH * OW), (N, OH, OW)


def conv2d_cf(x_cf, w_ochw, bias, stride, pad, act, scale=None,
              out_dtype=jnp.bfloat16):
    """Conv2d (+folded BN) (+act) on channel-first-flat activations.

    x: (C, N, H, W); w: (OC, IC, KH, KW) correlation weights (PyTorch Conv2d layout).
    Computes out^T = (scale*W)_mat @ patches^T.  Returns (OC, N, OH, OW).
    """
    OC, IC, KH, KW = w_ochw.shape
    a = jnp.transpose(w_ochw, (0, 2, 3, 1)).reshape(OC, KH * KW * IC)
    if scale is not None:
        a = a * scale[:, None]                     # fold BN scale into the weights
    cols, (N, OH, OW) = im2col_T(x_cf, KH, stride, pad)
    out = fused_matmul(a, cols, bias[:, None], act=act, out_dtype=out_dtype)
    return out.reshape(OC, N, OH, OW)


def conv_transpose2d_s1_cf(x_cf, w_iohw, bias, act, out_dtype=jnp.bfloat16):
    """ConvTranspose2d(k=4, stride=1, pad=0) == conv(flipped+swapped W, pad=3)."""
    KH = w_iohw.shape[2]
    w_conv = jnp.transpose(w_iohw[:, :, ::-1, ::-1], (1, 0, 2, 3))
    p = KH - 1
    return conv2d_cf(x_cf, w_conv, bias, 1, ((p, p), (p, p)), act, out_dtype=out_dtype)


def conv_transpose2d_s2_cf(x_cf, w_iohw, bias, act, out_dtype=jnp.bfloat16):
    """ConvTranspose2d(k=4, stride=2, pad=1) via sub-pixel decomposition.

    out[:, :, 2q+rh, 2p+rw] is a stride-1 2x2 conv of the *undilated* input with the
    phase-(rh, rw) taps of W -> no dilation zeros (4x fewer FLOPs / patch bytes).
    """
    OC = w_iohw.shape[1]
    C, N, H, W = x_cf.shape
    phases = []
    for rh in (0, 1):
        for rw in (0, 1):
            # taps kh in [3-rh, 1-rh], kw in [3-rw, 1-rw] (correlation order)
            w_sub = jnp.transpose(
                w_iohw[:, :, (3 - rh)::-2, (3 - rw)::-2], (1, 0, 2, 3))  # (OC,IC,2,2)
            pad = ((1 - rh, rh), (1 - rw, rw))
            phases.append(conv2d_cf(x_cf, w_sub, bias, 1, pad, act,
                                    out_dtype=out_dtype))
    ph = jnp.stack(phases, axis=0).reshape(2, 2, OC, N, H, W)       # (rh,rw,c,n,q,p)
    return jnp.transpose(ph, (2, 3, 4, 0, 5, 1)).reshape(OC, N, 2 * H, 2 * W)


# ----------------------------------------------------------------------------
# Deterministic parameter initialization (shapes from DCA.__init__)
# ----------------------------------------------------------------------------
def init_params(key):
    keys = jax.random.split(key, 40)
    it = iter(keys)
    nk = lambda: next(it)

    params = {}

    enc_cfg = [(1, 8, 2.0), (8, 16, 2.0), (16, 32, 2.0), (32, 32, 2.0), (32, 64, 1.0)]
    for i, (ic, oc, gain) in enumerate(enc_cfg):
        fan_in = ic * 16
        w = jax.random.normal(nk(), (oc, ic, 4, 4), jnp.float32) * (gain / fan_in) ** 0.5
        b = jax.random.normal(nk(), (oc,), jnp.float32) * 0.01
        g = 1.0 + jax.random.normal(nk(), (oc,), jnp.float32) * 0.01
        bt = jax.random.normal(nk(), (oc,), jnp.float32) * 0.01
        params[f"enc{i}"] = (w, b, g, bt, jnp.zeros((oc,)), jnp.ones((oc,)))

    w1 = jax.random.normal(nk(), (512, 1600), jnp.float32) / (1600.0 ** 0.5)
    b1 = jax.random.normal(nk(), (512,), jnp.float32) * 0.01
    g1 = 1.0 + jax.random.normal(nk(), (512,), jnp.float32) * 0.01
    bt1 = jax.random.normal(nk(), (512,), jnp.float32) * 0.01
    params["fc1"] = (w1, b1, g1, bt1, jnp.zeros((512,)), jnp.ones((512,)))

    w2 = jax.random.normal(nk(), (1600, 512), jnp.float32) / (512.0 ** 0.5)
    b2 = jax.random.normal(nk(), (1600,), jnp.float32) * 0.01
    params["fc2"] = (w2, b2)

    dec_cfg = [(64, 32, 2.0), (32, 32, 2.0), (32, 16, 2.0), (16, 8, 2.0), (8, 2, 1.0)]
    for i, (ic, oc, gain) in enumerate(dec_cfg):
        w = jax.random.normal(nk(), (ic, oc, 4, 4), jnp.float32) * (gain / (ic * 16.0)) ** 0.5
        b = jax.random.normal(nk(), (oc,), jnp.float32) * 0.01
        params[f"dec{i}"] = (w, b)

    return params


# ----------------------------------------------------------------------------
# DCA forward (Pallas path)
# ----------------------------------------------------------------------------
def dca_forward(params, x_nchw):
    # channel-first-flat (C, N, H, W): conv matmul outputs are (OC, N*OH*OW) so the
    # big spatial axis is the lane dim of every Pallas output block.
    x = jnp.transpose(x_nchw, (1, 0, 2, 3)).astype(jnp.bfloat16)

    enc_cfg = [(2, 1, "relu"), (2, 1, "relu"), (2, 1, "relu"),
               (2, 1, "relu"), (1, 0, "none")]
    for i, (s, p, act) in enumerate(enc_cfg):
        w, b, g, bt, m, v = params[f"enc{i}"]
        scale, bias = fold_bn(b, g, bt, m, v)
        x = conv2d_cf(x, w, bias, s, ((p, p), (p, p)), act, scale=scale)

    # nn.Flatten() is NCHW-ordered: (C,N,H,W) -> (N, C*H*W) = (N, 1600)
    C, N, H, W = x.shape
    xf = jnp.transpose(x, (1, 0, 2, 3)).reshape(N, C * H * W)

    # Linear(1600,512) + BatchNorm1d(512) + Linear(512,1600), fused into one call.
    w1, b1, g1, bt1, m1, v1 = params["fc1"]
    s1, bias1 = fold_bn(b1, g1, bt1, m1, v1)
    w2, b2 = params["fc2"]
    xf = fc_pair(xf, w1.T * s1[None, :], bias1, w2.T, b2)

    # reshape(-1, 64, 5, 5) (NCHW) -> channel-first-flat for the decoder
    x = jnp.transpose(xf.reshape(N, 64, 5, 5), (1, 0, 2, 3))

    w, b = params["dec0"]
    x = conv_transpose2d_s1_cf(x, w, b, "relu")
    for i, act in [(1, "relu"), (2, "relu"), (3, "relu"), (4, "tanh")]:
        w, b = params[f"dec{i}"]
        out_dtype = jnp.float32 if i == 4 else jnp.bfloat16
        x = conv_transpose2d_s2_cf(x, w, b, act, out_dtype=out_dtype)

    return jnp.transpose(x, (1, 0, 2, 3))   # (C,N,H,W) -> NCHW: (N, 2, 128, 128)


# ----------------------------------------------------------------------------
# Pure-JAX (lax conv) reference with the same bf16-operand / f32-accumulate policy
# ----------------------------------------------------------------------------
def ref_forward(params, x_nchw):
    dn = ("NCHW", "OIHW", "NCHW")
    bf = jnp.bfloat16

    def conv(x, w, stride, pad, lhs_dil=1):
        return lax.conv_general_dilated(
            x.astype(bf), w.astype(bf), (stride, stride),
            [(pad, pad), (pad, pad)], lhs_dilation=(lhs_dil, lhs_dil),
            dimension_numbers=dn, preferred_element_type=jnp.float32)

    x = x_nchw
    enc_cfg = [(2, 1, "relu"), (2, 1, "relu"), (2, 1, "relu"),
               (2, 1, "relu"), (1, 0, "none")]
    for i, (s, p, act) in enumerate(enc_cfg):
        w, b, g, bt, m, v = params[f"enc{i}"]
        scale, bias = fold_bn(b, g, bt, m, v)
        y = conv(x, w * scale[:, None, None, None], s, p) + bias[None, :, None, None]
        x = (jnp.maximum(y, 0.0) if act == "relu" else y).astype(bf)

    N = x.shape[0]
    xf = x.reshape(N, -1)
    w1, b1, g1, bt1, m1, v1 = params["fc1"]
    s1, bias1 = fold_bn(b1, g1, bt1, m1, v1)
    xf = (jnp.dot(xf.astype(bf), (w1.T * s1[None, :]).astype(bf),
                  preferred_element_type=jnp.float32) + bias1[None, :]).astype(bf)
    w2, b2 = params["fc2"]
    xf = (jnp.dot(xf, w2.T.astype(bf), preferred_element_type=jnp.float32)
          + b2[None, :]).astype(bf)

    x = xf.reshape(N, 64, 5, 5)
    dec_cfg = [(1, 0, "relu"), (2, 1, "relu"), (2, 1, "relu"),
               (2, 1, "relu"), (2, 1, "tanh")]
    for i, (s, p, act) in enumerate(dec_cfg):
        w, b = params[f"dec{i}"]                       # (IC, OC, KH, KW)
        wc = jnp.transpose(w[:, :, ::-1, ::-1], (1, 0, 2, 3))
        y = conv(x, wc, 1, 3 - p, lhs_dil=s) + b[None, :, None, None]
        if act == "relu":
            y = jnp.maximum(y, 0.0)
        elif act == "tanh":
            y = jnp.tanh(y)
        x = y.astype(bf) if i < 4 else y
    return x


if __name__ == "__main__":
    key = jax.random.PRNGKey(0)
    pkey, xkey = jax.random.split(key)
    params = init_params(pkey)

    # Linear(1600, 512) pins the input size: encoder bottleneck is 64x5x5 -> 128x128.
    x = jax.random.normal(xkey, (2, 1, 128, 128), jnp.float32)

    out = jax.block_until_ready(jax.jit(dca_forward)(params, x))
    assert out.shape == (2, 2, 128, 128), out.shape
    assert out.dtype == jnp.float32
    assert bool(jnp.all(jnp.isfinite(out)))

    # Silent self-check vs a pure-JAX lax-conv reference using the same bf16-operand /
    # f32-accumulate policy (guards layout plumbing, BN folding, the sub-pixel
    # ConvTranspose decomposition and the NCHW flatten ordering).
    ref = jax.block_until_ready(jax.jit(ref_forward)(params, x))
    max_err = float(jnp.max(jnp.abs(out - ref.astype(jnp.float32))))
    assert max_err < 0.1, f"mismatch vs reference: {max_err}"

    print("KERNEL_OK")
</pallas_src>

<mosaic_0001>
module attributes {stable_mosaic.version = 11 : i64} {
  func.func @_fused_matmul_kernel(%arg0: i32, %arg1: memref<8x16xbf16, #tpu.memory_space<vmem>>, %arg2: memref<16x2048xbf16, #tpu.memory_space<vmem>>, %arg3: memref<8x1xf32, #tpu.memory_space<vmem>>, %arg4: memref<8x2048xbf16, #tpu.memory_space<vmem>>) attributes {dimension_semantics = [#tpu.dimension_semantics<parallel>], iteration_bounds = array<i64: 4>, scalar_prefetch = 0 : i64, scratch_operands = 0 : i64, tpu.core_type = #tpu.core_type<tc>, window_params = [{pipeline_mode = #tpu.pipeline_mode<synchronous>, transform_indices = @transform_0, window_bounds = array<i64: 8, 16>}, {transform_indices = @transform_1, window_bounds = array<i64: 16, 2048>}, {pipeline_mode = #tpu.pipeline_mode<synchronous>, transform_indices = @transform_2, window_bounds = array<i64: 8, 1>}, {transform_indices = @transform_3, window_bounds = array<i64: 8, 2048>}]} {
    %c0 = arith.constant 0 : index
    %c0_0 = arith.constant 0 : index
    %0 = vector.load %arg1[%c0, %c0_0] : memref<8x16xbf16, #tpu.memory_space<vmem>>, vector<8x16xbf16>
    %c0_1 = arith.constant 0 : index
    %c0_2 = arith.constant 0 : index
    %1 = vector.load %arg2[%c0_1, %c0_2] : memref<16x2048xbf16, #tpu.memory_space<vmem>>, vector<16x2048xbf16>
    %cst = arith.constant dense<0.000000e+00> : vector<8x2048xf32>
    %2 = tpu.matmul %0, %1, %cst {dimension_numbers = #tpu.dot_dimension_numbers<[1], [0], [0], [1], [0, 0, 1, 1], [], []>} : vector<8x16xbf16>, vector<16x2048xbf16>, vector<8x2048xf32> -> vector<8x2048xf32>
    %c0_3 = arith.constant 0 : index
    %c0_4 = arith.constant 0 : index
    %3 = vector.load %arg3[%c0_3, %c0_4] : memref<8x1xf32, #tpu.memory_space<vmem>>, vector<8x1xf32>
    %4 = vector.broadcast %3 : vector<8x1xf32> to vector<8x2048xf32>
    %5 = arith.addf %2, %4 : vector<8x2048xf32>
    %cst_5 = arith.constant 0.000000e+00 : f32
    %6 = vector.broadcast %cst_5 : f32 to vector<8x2048xf32>
    %7 = arith.maximumf %5, %6 : vector<8x2048xf32>
    %8 = arith.truncf %7 : vector<8x2048xf32> to vector<8x2048xbf16>
    %c0_6 = arith.constant 0 : index
    %c0_7 = arith.constant 0 : index
    %9 = vector.load %arg4[%c0_6, %c0_7] : memref<8x2048xbf16, #tpu.memory_space<vmem>>, vector<8x2048xbf16>
    tpu.vector_store %arg4[%c0_6, %c0_7], %8 {strides = array<i32>} : memref<8x2048xbf16, #tpu.memory_space<vmem>>, vector<8x2048xbf16>,
    return
  }
  func.func @transform_0(%arg0: i32) -> (i32, i32) {
    %c0_i32 = arith.constant 0 : i32
    %c0_i32_0 = arith.constant 0 : i32
    %c0_i32_1 = arith.constant 0 : i32
    return %c0_i32, %c0_i32_0 : i32, i32
  }
  func.func @transform_1(%arg0: i32) -> (i32, i32) {
    %c0_i32 = arith.constant 0 : i32
    %c0_i32_0 = arith.constant 0 : i32
    return %c0_i32, %arg0 : i32, i32
  }
  func.func @transform_2(%arg0: i32) -> (i32, i32) {
    %c0_i32 = arith.constant 0 : i32
    %c0_i32_0 = arith.constant 0 : i32
    %c0_i32_1 = arith.constant 0 : i32
    return %c0_i32, %c0_i32_0 : i32, i32
  }
  func.func @transform_3(%arg0: i32) -> (i32, i32) {
    %c0_i32 = arith.constant 0 : i32
    %c0_i32_0 = arith.constant 0 : i32
    return %c0_i32, %arg0 : i32, i32
  }
}

module attributes {stable_mosaic.version = 11 : i64} {
  func.func @_fused_matmul_kernel(%arg0: i32, %arg1: memref<16x128xbf16, #tpu.memory_space<vmem>>, %arg2: memref<128x1024xbf16, #tpu.memory_space<vmem>>, %arg3: memref<16x1xf32, #tpu.memory_space<vmem>>, %arg4: memref<16x1024xbf16, #tpu.memory_space<vmem>>) attributes {dimension_semantics = [#tpu.dimension_semantics<parallel>], iteration_bounds = array<i64: 2>, scalar_prefetch = 0 : i64, scratch_operands = 0 : i64, tpu.core_type = #tpu.core_type<tc>, window_params = [{pipeline_mode = #tpu.pipeline_mode<synchronous>, transform_indices = @transform_0, window_bounds = array<i64: 16, 128>}, {transform_indices = @transform_1, window_bounds = array<i64: 128, 1024>}, {pipeline_mode = #tpu.pipeline_mode<synchronous>, transform_indices = @transform_2, window_bounds = array<i64: 16, 1>}, {transform_indices = @transform_3, window_bounds = array<i64: 16, 1024>}]} {
    %c0 = arith.constant 0 : index
    %c0_0 = arith.constant 0 : index
    %0 = vector.load %arg1[%c0, %c0_0] : memref<16x128xbf16, #tpu.memory_space<vmem>>, vector<16x128xbf16>
    %c0_1 = arith.constant 0 : index
    %c0_2 = arith.constant 0 : index
    %1 = vector.load %arg2[%c0_1, %c0_2] : memref<128x1024xbf16, #tpu.memory_space<vmem>>, vector<128x1024xbf16>
    %cst = arith.constant dense<0.000000e+00> : vector<16x1024xf32>
    %2 = tpu.matmul %0, %1, %cst {dimension_numbers = #tpu.dot_dimension_numbers<[1], [0], [0], [1], [0, 0, 1, 1], [], []>} : vector<16x128xbf16>, vector<128x1024xbf16>, vector<16x1024xf32> -> vector<16x1024xf32>
    %c0_3 = arith.constant 0 : index
    %c0_4 = arith.constant 0 : index
    %3 = vector.load %arg3[%c0_3, %c0_4] : memref<16x1xf32, #tpu.memory_space<vmem>>, vector<16x1xf32>
    %4 = vector.broadcast %3 : vector<16x1xf32> to vector<16x1024xf32>
    %5 = arith.addf %2, %4 : vector<16x1024xf32>
    %cst_5 = arith.constant 0.000000e+00 : f32
    %6 = vector.broadcast %cst_5 : f32 to vector<16x1024xf32>
    %7 = arith.maximumf %5, %6 : vector<16x1024xf32>
    %8 = arith.truncf %7 : vector<16x1024xf32> to vector<16x1024xbf16>
    %c0_6 = arith.constant 0 : index
    %c0_7 = arith.constant 0 : index
    %9 = vector.load %arg4[%c0_6, %c0_7] : memref<16x1024xbf16, #tpu.memory_space<vmem>>, vector<16x1024xbf16>
    tpu.vector_store %arg4[%c0_6, %c0_7], %8 {strides = array<i32>} : memref<16x1024xbf16, #tpu.memory_space<vmem>>, vector<16x1024xbf16>,
    return
  }
  func.func @transform_0(%arg0: i32) -> (i32, i32) {
    %c0_i32 = arith.constant 0 : i32
    %c0_i32_0 = arith.constant 0 : i32
    %c0_i32_1 = arith.constant 0 : i32
    return %c0_i32, %c0_i32_0 : i32, i32
  }
  func.func @transform_1(%arg0: i32) -> (i32, i32) {
    %c0_i32 = arith.constant 0 : i32
    %c0_i32_0 = arith.constant 0 : i32
    return %c0_i32, %arg0 : i32, i32
  }
  func.func @transform_2(%arg0: i32) -> (i32, i32) {
    %c0_i32 = arith.constant 0 : i32
    %c0_i32_0 = arith.constant 0 : i32
    %c0_i32_1 = arith.constant 0 : i32
    return %c0_i32, %c0_i32_0 : i32, i32
  }
  func.func @transform_3(%arg0: i32) -> (i32, i32) {
    %c0_i32 = arith.constant 0 : i32
    %c0_i32_0 = arith.constant 0 : i32
    return %c0_i32, %arg0 : i32, i32
  }
}

module attributes {stable_mosaic.version = 11 : i64} {
  func.func @_fused_matmul_kernel(%arg0: i32, %arg1: memref<32x256xbf16, #tpu.memory_space<vmem>>, %arg2: memref<256x256xbf16, #tpu.memory_space<vmem>>, %arg3: memref<32x1xf32, #tpu.memory_space<vmem>>, %arg4: memref<32x256xbf16, #tpu.memory_space<vmem>>) attributes {dimension_semantics = [#tpu.dimension_semantics<parallel>], iteration_bounds = array<i64: 2>, scalar_prefetch = 0 : i64, scratch_operands = 0 : i64, tpu.core_type = #tpu.core_type<tc>, window_params = [{pipeline_mode = #tpu.pipeline_mode<synchronous>, transform_indices = @transform_0, window_bounds = array<i64: 32, 256>}, {transform_indices = @transform_1, window_bounds = array<i64: 256, 256>}, {pipeline_mode = #tpu.pipeline_mode<synchronous>, transform_indices = @transform_2, window_bounds = array<i64: 32, 1>}, {transform_indices = @transform_3, window_bounds = array<i64: 32, 256>}]} {
    %c0 = arith.constant 0 : index
    %c0_0 = arith.constant 0 : index
    %0 = vector.load %arg1[%c0, %c0_0] : memref<32x256xbf16, #tpu.memory_space<vmem>>, vector<32x256xbf16>
    %c0_1 = arith.constant 0 : index
    %c0_2 = arith.constant 0 : index
    %1 = vector.load %arg2[%c0_1, %c0_2] : memref<256x256xbf16, #tpu.memory_space<vmem>>, vector<256x256xbf16>
    %cst = arith.constant dense<0.000000e+00> : vector<32x256xf32>
    %2 = tpu.matmul %0, %1, %cst {dimension_numbers = #tpu.dot_dimension_numbers<[1], [0], [0], [1], [0, 0, 1, 1], [], []>} : vector<32x256xbf16>, vector<256x256xbf16>, vector<32x256xf32> -> vector<32x256xf32>
    %c0_3 = arith.constant 0 : index
    %c0_4 = arith.constant 0 : index
    %3 = vector.load %arg3[%c0_3, %c0_4] : memref<32x1xf32, #tpu.memory_space<vmem>>, vector<32x1xf32>
    %4 = vector.broadcast %3 : vector<32x1xf32> to vector<32x256xf32>
    %5 = arith.addf %2, %4 : vector<32x256xf32>
    %cst_5 = arith.constant 0.000000e+00 : f32
    %6 = vector.broadcast %cst_5 : f32 to vector<32x256xf32>
    %7 = arith.maximumf %5, %6 : vector<32x256xf32>
    %8 = arith.truncf %7 : vector<32x256xf32> to vector<32x256xbf16>
    %c0_6 = arith.constant 0 : index
    %c0_7 = arith.constant 0 : index
    %9 = vector.load %arg4[%c0_6, %c0_7] : memref<32x256xbf16, #tpu.memory_space<vmem>>, vector<32x256xbf16>
    tpu.vector_store %arg4[%c0_6, %c0_7], %8 {strides = array<i32>} : memref<32x256xbf16, #tpu.memory_space<vmem>>, vector<32x256xbf16>,
    return
  }
  func.func @transform_0(%arg0: i32) -> (i32, i32) {
    %c0_i32 = arith.constant 0 : i32
    %c0_i32_0 = arith.constant 0 : i32
    %c0_i32_1 = arith.constant 0 : i32
    return %c0_i32, %c0_i32_0 : i32, i32
  }
  func.func @transform_1(%arg0: i32) -> (i32, i32) {
    %c0_i32 = arith.constant 0 : i32
    %c0_i32_0 = arith.constant 0 : i32
    return %c0_i32, %arg0 : i32, i32
  }
  func.func @transform_2(%arg0: i32) -> (i32, i32) {
    %c0_i32 = arith.constant 0 : i32
    %c0_i32_0 = arith.constant 0 : i32
    %c0_i32_1 = arith.constant 0 : i32
    return %c0_i32, %c0_i32_0 : i32, i32
  }
  func.func @transform_3(%arg0: i32) -> (i32, i32) {
    %c0_i32 = arith.constant 0 : i32
    %c0_i32_0 = arith.constant 0 : i32
    return %c0_i32, %arg0 : i32, i32
  }
}

module attributes {stable_mosaic.version = 11 : i64} {
  func.func @_fused_matmul_kernel(%arg0: i32, %arg1: memref<32x512xbf16, #tpu.memory_space<vmem>>, %arg2: memref<512x128xbf16, #tpu.memory_space<vmem>>, %arg3: memref<32x1xf32, #tpu.memory_space<vmem>>, %arg4: memref<32x128xbf16, #tpu.memory_space<vmem>>) attributes {dimension_semantics = [#tpu.dimension_semantics<parallel>], iteration_bounds = array<i64: 1>, scalar_prefetch = 0 : i64, scratch_operands = 0 : i64, tpu.core_type = #tpu.core_type<tc>, window_params = [{pipeline_mode = #tpu.pipeline_mode<synchronous>, transform_indices = @transform_0, window_bounds = array<i64: 32, 512>}, {transform_indices = @transform_1, window_bounds = array<i64: 512, 128>}, {pipeline_mode = #tpu.pipeline_mode<synchronous>, transform_indices = @transform_2, window_bounds = array<i64: 32, 1>}, {transform_indices = @transform_3, window_bounds = array<i64: 32, 128>}]} {
    %c0 = arith.constant 0 : index
    %c0_0 = arith.constant 0 : index
    %0 = vector.load %arg1[%c0, %c0_0] : memref<32x512xbf16, #tpu.memory_space<vmem>>, vector<32x512xbf16>
    %c0_1 = arith.constant 0 : index
    %c0_2 = arith.constant 0 : index
    %1 = vector.load %arg2[%c0_1, %c0_2] : memref<512x128xbf16, #tpu.memory_space<vmem>>, vector<512x128xbf16>
    %cst = arith.constant dense<0.000000e+00> : vector<32x128xf32>
    %2 = tpu.matmul %0, %1, %cst {dimension_numbers = #tpu.dot_dimension_numbers<[1], [0], [0], [1], [0, 0, 1, 1], [], []>} : vector<32x512xbf16>, vector<512x128xbf16>, vector<32x128xf32> -> vector<32x128xf32>
    %c0_3 = arith.constant 0 : index
    %c0_4 = arith.constant 0 : index
    %3 = vector.load %arg3[%c0_3, %c0_4] : memref<32x1xf32, #tpu.memory_space<vmem>>, vector<32x1xf32>
    %4 = vector.broadcast %3 : vector<32x1xf32> to vector<32x128xf32>
    %5 = arith.addf %2, %4 : vector<32x128xf32>
    %cst_5 = arith.constant 0.000000e+00 : f32
    %6 = vector.broadcast %cst_5 : f32 to vector<32x128xf32>
    %7 = arith.maximumf %5, %6 : vector<32x128xf32>
    %8 = arith.truncf %7 : vector<32x128xf32> to vector<32x128xbf16>
    %c0_6 = arith.constant 0 : index
    %c0_7 = arith.constant 0 : index
    %9 = vector.load %arg4[%c0_6, %c0_7] : memref<32x128xbf16, #tpu.memory_space<vmem>>, vector<32x128xbf16>
    tpu.vector_store %arg4[%c0_6, %c0_7], %8 {strides = array<i32>} : memref<32x128xbf16, #tpu.memory_space<vmem>>, vector<32x128xbf16>,
    return
  }
  func.func @transform_0(%arg0: i32) -> (i32, i32) {
    %c0_i32 = arith.constant 0 : i32
    %c0_i32_0 = arith.constant 0 : i32
    %c0_i32_1 = arith.constant 0 : i32
    return %c0_i32, %c0_i32_0 : i32, i32
  }
  func.func @transform_1(%arg0: i32) -> (i32, i32) {
    %c0_i32 = arith.constant 0 : i32
    %c0_i32_0 = arith.constant 0 : i32
    return %c0_i32, %arg0 : i32, i32
  }
  func.func @transform_2(%arg0: i32) -> (i32, i32) {
    %c0_i32 = arith.constant 0 : i32
    %c0_i32_0 = arith.constant 0 : i32
    %c0_i32_1 = arith.constant 0 : i32
    return %c0_i32, %c0_i32_0 : i32, i32
  }
  func.func @transform_3(%arg0: i32) -> (i32, i32) {
    %c0_i32 = arith.constant 0 : i32
    %c0_i32_0 = arith.constant 0 : i32
    return %c0_i32, %arg0 : i32, i32
  }
}

module attributes {stable_mosaic.version = 11 : i64} {
  func.func @_fused_matmul_kernel(%arg0: i32, %arg1: memref<64x512xbf16, #tpu.memory_space<vmem>>, %arg2: memref<512x50xbf16, #tpu.memory_space<vmem>>, %arg3: memref<64x1xf32, #tpu.memory_space<vmem>>, %arg4: memref<64x50xbf16, #tpu.memory_space<vmem>>) attributes {dimension_semantics = [#tpu.dimension_semantics<parallel>], iteration_bounds = array<i64: 1>, scalar_prefetch = 0 : i64, scratch_operands = 0 : i64, tpu.core_type = #tpu.core_type<tc>, window_params = [{pipeline_mode = #tpu.pipeline_mode<synchronous>, transform_indices = @transform_0, window_bounds = array<i64: 64, 512>}, {transform_indices = @transform_1, window_bounds = array<i64: 512, 50>}, {pipeline_mode = #tpu.pipeline_mode<synchronous>, transform_indices = @transform_2, window_bounds = array<i64: 64, 1>}, {transform_indices = @transform_3, window_bounds = array<i64: 64, 50>}]} {
    %c0 = arith.constant 0 : index
    %c0_0 = arith.constant 0 : index
    %0 = vector.load %arg1[%c0, %c0_0] : memref<64x512xbf16, #tpu.memory_space<vmem>>, vector<64x512xbf16>
    %c0_1 = arith.constant 0 : index
    %c0_2 = arith.constant 0 : index
    %1 = vector.load %arg2[%c0_1, %c0_2] : memref<512x50xbf16, #tpu.memory_space<vmem>>, vector<512x50xbf16>
    %cst = arith.constant dense<0.000000e+00> : vector<64x50xf32>
    %2 = tpu.matmul %0, %1, %cst {dimension_numbers = #tpu.dot_dimension_numbers<[1], [0], [0], [1], [0, 0, 1, 1], [], []>} : vector<64x512xbf16>, vector<512x50xbf16>, vector<64x50xf32> -> vector<64x50xf32>
    %c0_3 = arith.constant 0 : index
    %c0_4 = arith.constant 0 : index
    %3 = vector.load %arg3[%c0_3, %c0_4] : memref<64x1xf32, #tpu.memory_space<vmem>>, vector<64x1xf32>
    %4 = vector.broadcast %3 : vector<64x1xf32> to vector<64x50xf32>
    %5 = arith.addf %2, %4 : vector<64x50xf32>
    %6 = arith.truncf %5 : vector<64x50xf32> to vector<64x50xbf16>
    %c0_5 = arith.constant 0 : index
    %c0_6 = arith.constant 0 : index
    %7 = vector.load %arg4[%c0_5, %c0_6] : memref<64x50xbf16, #tpu.memory_space<vmem>>, vector<64x50xbf16>
    tpu.vector_store %arg4[%c0_5, %c0_6], %6 {strides = array<i32>} : memref<64x50xbf16, #tpu.memory_space<vmem>>, vector<64x50xbf16>,
    return
  }
  func.func @transform_0(%arg0: i32) -> (i32, i32) {
    %c0_i32 = arith.constant 0 : i32
    %c0_i32_0 = arith.constant 0 : i32
    %c0_i32_1 = arith.constant 0 : i32
    return %c0_i32, %c0_i32_0 : i32, i32
  }
  func.func @transform_1(%arg0: i32) -> (i32, i32) {
    %c0_i32 = arith.constant 0 : i32
    %c0_i32_0 = arith.constant 0 : i32
    return %c0_i32, %arg0 : i32, i32
  }
  func.func @transform_2(%arg0: i32) -> (i32, i32) {
    %c0_i32 = arith.constant 0 : i32
    %c0_i32_0 = arith.constant 0 : i32
    %c0_i32_1 = arith.constant 0 : i32
    return %c0_i32, %c0_i32_0 : i32, i32
  }
  func.func @transform_3(%arg0: i32) -> (i32, i32) {
    %c0_i32 = arith.constant 0 : i32
    %c0_i32_0 = arith.constant 0 : i32
    return %c0_i32, %arg0 : i32, i32
  }
}

module attributes {stable_mosaic.version = 11 : i64} {
  func.func @_fc_pair_kernel(%arg0: i32, %arg1: memref<2x1600xbf16, #tpu.memory_space<vmem>>, %arg2: memref<1600x512xbf16, #tpu.memory_space<vmem>>, %arg3: memref<1x512xf32, #tpu.memory_space<vmem>>, %arg4: memref<512x1600xbf16, #tpu.memory_space<vmem>>, %arg5: memref<1x1600xf32, #tpu.memory_space<vmem>>, %arg6: memref<2x1600xbf16, #tpu.memory_space<vmem>>) attributes {dimension_semantics = [#tpu.dimension_semantics<arbitrary>], iteration_bounds = array<i64: 1>, scalar_prefetch = 0 : i64, scratch_operands = 0 : i64, tpu.core_type = #tpu.core_type<tc>, window_params = [{pipeline_mode = #tpu.pipeline_mode<synchronous>, transform_indices = @transform_0, window_bounds = array<i64: 2, 1600>}, {pipeline_mode = #tpu.pipeline_mode<synchronous>, transform_indices = @transform_1, window_bounds = array<i64: 1600, 512>}, {pipeline_mode = #tpu.pipeline_mode<synchronous>, transform_indices = @transform_2, window_bounds = array<i64: 1, 512>}, {pipeline_mode = #tpu.pipeline_mode<synchronous>, transform_indices = @transform_3, window_bounds = array<i64: 512, 1600>}, {pipeline_mode = #tpu.pipeline_mode<synchronous>, transform_indices = @transform_4, window_bounds = array<i64: 1, 1600>}, {pipeline_mode = #tpu.pipeline_mode<synchronous>, transform_indices = @transform_5, window_bounds = array<i64: 2, 1600>}]} {
    %c0 = arith.constant 0 : index
    %c0_0 = arith.constant 0 : index
    %0 = vector.load %arg1[%c0, %c0_0] : memref<2x1600xbf16, #tpu.memory_space<vmem>>, vector<2x1600xbf16>
    %c0_1 = arith.constant 0 : index
    %c0_2 = arith.constant 0 : index
    %1 = vector.load %arg2[%c0_1, %c0_2] : memref<1600x512xbf16, #tpu.memory_space<vmem>>, vector<1600x512xbf16>
    %cst = arith.constant dense<0.000000e+00> : vector<2x512xf32>
    %2 = tpu.matmul %0, %1, %cst {dimension_numbers = #tpu.dot_dimension_numbers<[1], [0], [0], [1], [0, 0, 1, 1], [], []>} : vector<2x1600xbf16>, vector<1600x512xbf16>, vector<2x512xf32> -> vector<2x512xf32>
    %c0_3 = arith.constant 0 : index
    %c0_4 = arith.constant 0 : index
    %3 = vector.load %arg3[%c0_3, %c0_4] : memref<1x512xf32, #tpu.memory_space<vmem>>, vector<1x512xf32>
    %4 = vector.broadcast %3 : vector<1x512xf32> to vector<2x512xf32>
    %5 = arith.addf %2, %4 : vector<2x512xf32>
    %6 = arith.truncf %5 : vector<2x512xf32> to vector<2x512xbf16>
    %c0_5 = arith.constant 0 : index
    %c0_6 = arith.constant 0 : index
    %7 = vector.load %arg4[%c0_5, %c0_6] : memref<512x1600xbf16, #tpu.memory_space<vmem>>, vector<512x1600xbf16>
    %cst_7 = arith.constant dense<0.000000e+00> : vector<2x1600xf32>
    %8 = tpu.matmul %6, %7, %cst_7 {dimension_numbers = #tpu.dot_dimension_numbers<[1], [0], [0], [1], [0, 0, 1, 1], [], []>} : vector<2x512xbf16>, vector<512x1600xbf16>, vector<2x1600xf32> -> vector<2x1600xf32>
    %c0_8 = arith.constant 0 : index
    %c0_9 = arith.constant 0 : index
    %9 = vector.load %arg5[%c0_8, %c0_9] : memref<1x1600xf32, #tpu.memory_space<vmem>>, vector<1x1600xf32>
    %10 = vector.broadcast %9 : vector<1x1600xf32> to vector<2x1600xf32>
    %11 = arith.addf %8, %10 : vector<2x1600xf32>
    %12 = arith.truncf %11 : vector<2x1600xf32> to vector<2x1600xbf16>
    %c0_10 = arith.constant 0 : index
    %c0_11 = arith.constant 0 : index
    %13 = vector.load %arg6[%c0_10, %c0_11] : memref<2x1600xbf16, #tpu.memory_space<vmem>>, vector<2x1600xbf16>
    tpu.vector_store %arg6[%c0_10, %c0_11], %12 {strides = array<i32>} : memref<2x1600xbf16, #tpu.memory_space<vmem>>, vector<2x1600xbf16>,
    return
  }
  func.func @transform_0(%arg0: i32) -> (i32, i32) {
    %c0_i32 = arith.constant 0 : i32
    %c0_i32_0 = arith.constant 0 : i32
    %c0_i32_1 = arith.constant 0 : i32
    return %c0_i32, %c0_i32_0 : i32, i32
  }
  func.func @transform_1(%arg0: i32) -> (i32, i32) {
    %c0_i32 = arith.constant 0 : i32
    %c0_i32_0 = arith.constant 0 : i32
    %c0_i32_1 = arith.constant 0 : i32
    return %c0_i32, %c0_i32_0 : i32, i32
  }
  func.func @transform_2(%arg0: i32) -> (i32, i32) {
    %c0_i32 = arith.constant 0 : i32
    %c0_i32_0 = arith.constant 0 : i32
    %c0_i32_1 = arith.constant 0 : i32
    return %c0_i32, %c0_i32_0 : i32, i32
  }
  func.func @transform_3(%arg0: i32) -> (i32, i32) {
    %c0_i32 = arith.constant 0 : i32
    %c0_i32_0 = arith.constant 0 : i32
    %c0_i32_1 = arith.constant 0 : i32
    return %c0_i32, %c0_i32_0 : i32, i32
  }
  func.func @transform_4(%arg0: i32) -> (i32, i32) {
    %c0_i32 = arith.constant 0 : i32
    %c0_i32_0 = arith.constant 0 : i32
    %c0_i32_1 = arith.constant 0 : i32
    return %c0_i32, %c0_i32_0 : i32, i32
  }
  func.func @transform_5(%arg0: i32) -> (i32, i32) {
    %c0_i32 = arith.constant 0 : i32
    %c0_i32_0 = arith.constant 0 : i32
    %c0_i32_1 = arith.constant 0 : i32
    return %c0_i32, %c0_i32_0 : i32, i32
  }
}

module attributes {stable_mosaic.version = 11 : i64} {
  func.func @_fused_matmul_kernel(%arg0: i32, %arg1: memref<32x1024xbf16, #tpu.memory_space<vmem>>, %arg2: memref<1024x128xbf16, #tpu.memory_space<vmem>>, %arg3: memref<32x1xf32, #tpu.memory_space<vmem>>, %arg4: memref<32x128xbf16, #tpu.memory_space<vmem>>) attributes {dimension_semantics = [#tpu.dimension_semantics<parallel>], iteration_bounds = array<i64: 1>, scalar_prefetch = 0 : i64, scratch_operands = 0 : i64, tpu.core_type = #tpu.core_type<tc>, window_params = [{pipeline_mode = #tpu.pipeline_mode<synchronous>, transform_indices = @transform_0, window_bounds = array<i64: 32, 1024>}, {transform_indices = @transform_1, window_bounds = array<i64: 1024, 128>}, {pipeline_mode = #tpu.pipeline_mode<synchronous>, transform_indices = @transform_2, window_bounds = array<i64: 32, 1>}, {transform_indices = @transform_3, window_bounds = array<i64: 32, 128>}]} {
    %c0 = arith.constant 0 : index
    %c0_0 = arith.constant 0 : index
    %0 = vector.load %arg1[%c0, %c0_0] : memref<32x1024xbf16, #tpu.memory_space<vmem>>, vector<32x1024xbf16>
    %c0_1 = arith.constant 0 : index
    %c0_2 = arith.constant 0 : index
    %1 = vector.load %arg2[%c0_1, %c0_2] : memref<1024x128xbf16, #tpu.memory_space<vmem>>, vector<1024x128xbf16>
    %cst = arith.constant dense<0.000000e+00> : vector<32x128xf32>
    %2 = tpu.matmul %0, %1, %cst {dimension_numbers = #tpu.dot_dimension_numbers<[1], [0], [0], [1], [0, 0, 1, 1], [], []>} : vector<32x1024xbf16>, vector<1024x128xbf16>, vector<32x128xf32> -> vector<32x128xf32>
    %c0_3 = arith.constant 0 : index
    %c0_4 = arith.constant 0 : index
    %3 = vector.load %arg3[%c0_3, %c0_4] : memref<32x1xf32, #tpu.memory_space<vmem>>, vector<32x1xf32>
    %4 = vector.broadcast %3 : vector<32x1xf32> to vector<32x128xf32>
    %5 = arith.addf %2, %4 : vector<32x128xf32>
    %cst_5 = arith.constant 0.000000e+00 : f32
    %6 = vector.broadcast %cst_5 : f32 to vector<32x128xf32>
    %7 = arith.maximumf %5, %6 : vector<32x128xf32>
    %8 = arith.truncf %7 : vector<32x128xf32> to vector<32x128xbf16>
    %c0_6 = arith.constant 0 : index
    %c0_7 = arith.constant 0 : index
    %9 = vector.load %arg4[%c0_6, %c0_7] : memref<32x128xbf16, #tpu.memory_space<vmem>>, vector<32x128xbf16>
    tpu.vector_store %arg4[%c0_6, %c0_7], %8 {strides = array<i32>} : memref<32x128xbf16, #tpu.memory_space<vmem>>, vector<32x128xbf16>,
    return
  }
  func.func @transform_0(%arg0: i32) -> (i32, i32) {
    %c0_i32 = arith.constant 0 : i32
    %c0_i32_0 = arith.constant 0 : i32
    %c0_i32_1 = arith.constant 0 : i32
    return %c0_i32, %c0_i32_0 : i32, i32
  }
  func.func @transform_1(%arg0: i32) -> (i32, i32) {
    %c0_i32 = arith.constant 0 : i32
    %c0_i32_0 = arith.constant 0 : i32
    return %c0_i32, %arg0 : i32, i32
  }
  func.func @transform_2(%arg0: i32) -> (i32, i32) {
    %c0_i32 = arith.constant 0 : i32
    %c0_i32_0 = arith.constant 0 : i32
    %c0_i32_1 = arith.constant 0 : i32
    return %c0_i32, %c0_i32_0 : i32, i32
  }
  func.func @transform_3(%arg0: i32) -> (i32, i32) {
    %c0_i32 = arith.constant 0 : i32
    %c0_i32_0 = arith.constant 0 : i32
    return %c0_i32, %arg0 : i32, i32
  }
}

module attributes {stable_mosaic.version = 11 : i64} {
  func.func @_fused_matmul_kernel(%arg0: i32, %arg1: memref<32x128xbf16, #tpu.memory_space<vmem>>, %arg2: memref<128x128xbf16, #tpu.memory_space<vmem>>, %arg3: memref<32x1xf32, #tpu.memory_space<vmem>>, %arg4: memref<32x128xbf16, #tpu.memory_space<vmem>>) attributes {dimension_semantics = [#tpu.dimension_semantics<parallel>], iteration_bounds = array<i64: 1>, scalar_prefetch = 0 : i64, scratch_operands = 0 : i64, tpu.core_type = #tpu.core_type<tc>, window_params = [{pipeline_mode = #tpu.pipeline_mode<synchronous>, transform_indices = @transform_0, window_bounds = array<i64: 32, 128>}, {transform_indices = @transform_1, window_bounds = array<i64: 128, 128>}, {pipeline_mode = #tpu.pipeline_mode<synchronous>, transform_indices = @transform_2, window_bounds = array<i64: 32, 1>}, {transform_indices = @transform_3, window_bounds = array<i64: 32, 128>}]} {
    %c0 = arith.constant 0 : index
    %c0_0 = arith.constant 0 : index
    %0 = vector.load %arg1[%c0, %c0_0] : memref<32x128xbf16, #tpu.memory_space<vmem>>, vector<32x128xbf16>
    %c0_1 = arith.constant 0 : index
    %c0_2 = arith.constant 0 : index
    %1 = vector.load %arg2[%c0_1, %c0_2] : memref<128x128xbf16, #tpu.memory_space<vmem>>, vector<128x128xbf16>
    %cst = arith.constant dense<0.000000e+00> : vector<32x128xf32>
    %2 = tpu.matmul %0, %1, %cst {dimension_numbers = #tpu.dot_dimension_numbers<[1], [0], [0], [1], [0, 0, 1, 1], [], []>} : vector<32x128xbf16>, vector<128x128xbf16>, vector<32x128xf32> -> vector<32x128xf32>
    %c0_3 = arith.constant 0 : index
    %c0_4 = arith.constant 0 : index
    %3 = vector.load %arg3[%c0_3, %c0_4] : memref<32x1xf32, #tpu.memory_space<vmem>>, vector<32x1xf32>
    %4 = vector.broadcast %3 : vector<32x1xf32> to vector<32x128xf32>
    %5 = arith.addf %2, %4 : vector<32x128xf32>
    %cst_5 = arith.constant 0.000000e+00 : f32
    %6 = vector.broadcast %cst_5 : f32 to vector<32x128xf32>
    %7 = arith.maximumf %5, %6 : vector<32x128xf32>
    %8 = arith.truncf %7 : vector<32x128xf32> to vector<32x128xbf16>
    %c0_6 = arith.constant 0 : index
    %c0_7 = arith.constant 0 : index
    %9 = vector.load %arg4[%c0_6, %c0_7] : memref<32x128xbf16, #tpu.memory_space<vmem>>, vector<32x128xbf16>
    tpu.vector_store %arg4[%c0_6, %c0_7], %8 {strides = array<i32>} : memref<32x128xbf16, #tpu.memory_space<vmem>>, vector<32x128xbf16>,
    return
  }
  func.func @transform_0(%arg0: i32) -> (i32, i32) {
    %c0_i32 = arith.constant 0 : i32
    %c0_i32_0 = arith.constant 0 : i32
    %c0_i32_1 = arith.constant 0 : i32
    return %c0_i32, %c0_i32_0 : i32, i32
  }
  func.func @transform_1(%arg0: i32) -> (i32, i32) {
    %c0_i32 = arith.constant 0 : i32
    %c0_i32_0 = arith.constant 0 : i32
    return %c0_i32, %arg0 : i32, i32
  }
  func.func @transform_2(%arg0: i32) -> (i32, i32) {
    %c0_i32 = arith.constant 0 : i32
    %c0_i32_0 = arith.constant 0 : i32
    %c0_i32_1 = arith.constant 0 : i32
    return %c0_i32, %c0_i32_0 : i32, i32
  }
  func.func @transform_3(%arg0: i32) -> (i32, i32) {
    %c0_i32 = arith.constant 0 : i32
    %c0_i32_0 = arith.constant 0 : i32
    return %c0_i32, %arg0 : i32, i32
  }
}

module attributes {stable_mosaic.version = 11 : i64} {
  func.func @_fused_matmul_kernel(%arg0: i32, %arg1: memref<16x128xbf16, #tpu.memory_space<vmem>>, %arg2: memref<128x256xbf16, #tpu.memory_space<vmem>>, %arg3: memref<16x1xf32, #tpu.memory_space<vmem>>, %arg4: memref<16x256xbf16, #tpu.memory_space<vmem>>) attributes {dimension_semantics = [#tpu.dimension_semantics<parallel>], iteration_bounds = array<i64: 2>, scalar_prefetch = 0 : i64, scratch_operands = 0 : i64, tpu.core_type = #tpu.core_type<tc>, window_params = [{pipeline_mode = #tpu.pipeline_mode<synchronous>, transform_indices = @transform_0, window_bounds = array<i64: 16, 128>}, {transform_indices = @transform_1, window_bounds = array<i64: 128, 256>}, {pipeline_mode = #tpu.pipeline_mode<synchronous>, transform_indices = @transform_2, window_bounds = array<i64: 16, 1>}, {transform_indices = @transform_3, window_bounds = array<i64: 16, 256>}]} {
    %c0 = arith.constant 0 : index
    %c0_0 = arith.constant 0 : index
    %0 = vector.load %arg1[%c0, %c0_0] : memref<16x128xbf16, #tpu.memory_space<vmem>>, vector<16x128xbf16>
    %c0_1 = arith.constant 0 : index
    %c0_2 = arith.constant 0 : index
    %1 = vector.load %arg2[%c0_1, %c0_2] : memref<128x256xbf16, #tpu.memory_space<vmem>>, vector<128x256xbf16>
    %cst = arith.constant dense<0.000000e+00> : vector<16x256xf32>
    %2 = tpu.matmul %0, %1, %cst {dimension_numbers = #tpu.dot_dimension_numbers<[1], [0], [0], [1], [0, 0, 1, 1], [], []>} : vector<16x128xbf16>, vector<128x256xbf16>, vector<16x256xf32> -> vector<16x256xf32>
    %c0_3 = arith.constant 0 : index
    %c0_4 = arith.constant 0 : index
    %3 = vector.load %arg3[%c0_3, %c0_4] : memref<16x1xf32, #tpu.memory_space<vmem>>, vector<16x1xf32>
    %4 = vector.broadcast %3 : vector<16x1xf32> to vector<16x256xf32>
    %5 = arith.addf %2, %4 : vector<16x256xf32>
    %cst_5 = arith.constant 0.000000e+00 : f32
    %6 = vector.broadcast %cst_5 : f32 to vector<16x256xf32>
    %7 = arith.maximumf %5, %6 : vector<16x256xf32>
    %8 = arith.truncf %7 : vector<16x256xf32> to vector<16x256xbf16>
    %c0_6 = arith.constant 0 : index
    %c0_7 = arith.constant 0 : index
    %9 = vector.load %arg4[%c0_6, %c0_7] : memref<16x256xbf16, #tpu.memory_space<vmem>>, vector<16x256xbf16>
    tpu.vector_store %arg4[%c0_6, %c0_7], %8 {strides = array<i32>} : memref<16x256xbf16, #tpu.memory_space<vmem>>, vector<16x256xbf16>,
    return
  }
  func.func @transform_0(%arg0: i32) -> (i32, i32) {
    %c0_i32 = arith.constant 0 : i32
    %c0_i32_0 = arith.constant 0 : i32
    %c0_i32_1 = arith.constant 0 : i32
    return %c0_i32, %c0_i32_0 : i32, i32
  }
  func.func @transform_1(%arg0: i32) -> (i32, i32) {
    %c0_i32 = arith.constant 0 : i32
    %c0_i32_0 = arith.constant 0 : i32
    return %c0_i32, %arg0 : i32, i32
  }
  func.func @transform_2(%arg0: i32) -> (i32, i32) {
    %c0_i32 = arith.constant 0 : i32
    %c0_i32_0 = arith.constant 0 : i32
    %c0_i32_1 = arith.constant 0 : i32
    return %c0_i32, %c0_i32_0 : i32, i32
  }
  func.func @transform_3(%arg0: i32) -> (i32, i32) {
    %c0_i32 = arith.constant 0 : i32
    %c0_i32_0 = arith.constant 0 : i32
    return %c0_i32, %arg0 : i32, i32
  }
}

module attributes {stable_mosaic.version = 11 : i64} {
  func.func @_fused_matmul_kernel(%arg0: i32, %arg1: memref<8x64xbf16, #tpu.memory_space<vmem>>, %arg2: memref<64x1024xbf16, #tpu.memory_space<vmem>>, %arg3: memref<8x1xf32, #tpu.memory_space<vmem>>, %arg4: memref<8x1024xbf16, #tpu.memory_space<vmem>>) attributes {dimension_semantics = [#tpu.dimension_semantics<parallel>], iteration_bounds = array<i64: 2>, scalar_prefetch = 0 : i64, scratch_operands = 0 : i64, tpu.core_type = #tpu.core_type<tc>, window_params = [{pipeline_mode = #tpu.pipeline_mode<synchronous>, transform_indices = @transform_0, window_bounds = array<i64: 8, 64>}, {transform_indices = @transform_1, window_bounds = array<i64: 64, 1024>}, {pipeline_mode = #tpu.pipeline_mode<synchronous>, transform_indices = @transform_2, window_bounds = array<i64: 8, 1>}, {transform_indices = @transform_3, window_bounds = array<i64: 8, 1024>}]} {
    %c0 = arith.constant 0 : index
    %c0_0 = arith.constant 0 : index
    %0 = vector.load %arg1[%c0, %c0_0] : memref<8x64xbf16, #tpu.memory_space<vmem>>, vector<8x64xbf16>
    %c0_1 = arith.constant 0 : index
    %c0_2 = arith.constant 0 : index
    %1 = vector.load %arg2[%c0_1, %c0_2] : memref<64x1024xbf16, #tpu.memory_space<vmem>>, vector<64x1024xbf16>
    %cst = arith.constant dense<0.000000e+00> : vector<8x1024xf32>
    %2 = tpu.matmul %0, %1, %cst {dimension_numbers = #tpu.dot_dimension_numbers<[1], [0], [0], [1], [0, 0, 1, 1], [], []>} : vector<8x64xbf16>, vector<64x1024xbf16>, vector<8x1024xf32> -> vector<8x1024xf32>
    %c0_3 = arith.constant 0 : index
    %c0_4 = arith.constant 0 : index
    %3 = vector.load %arg3[%c0_3, %c0_4] : memref<8x1xf32, #tpu.memory_space<vmem>>, vector<8x1xf32>
    %4 = vector.broadcast %3 : vector<8x1xf32> to vector<8x1024xf32>
    %5 = arith.addf %2, %4 : vector<8x1024xf32>
    %cst_5 = arith.constant 0.000000e+00 : f32
    %6 = vector.broadcast %cst_5 : f32 to vector<8x1024xf32>
    %7 = arith.maximumf %5, %6 : vector<8x1024xf32>
    %8 = arith.truncf %7 : vector<8x1024xf32> to vector<8x1024xbf16>
    %c0_6 = arith.constant 0 : index
    %c0_7 = arith.constant 0 : index
    %9 = vector.load %arg4[%c0_6, %c0_7] : memref<8x1024xbf16, #tpu.memory_space<vmem>>, vector<8x1024xbf16>
    tpu.vector_store %arg4[%c0_6, %c0_7], %8 {strides = array<i32>} : memref<8x1024xbf16, #tpu.memory_space<vmem>>, vector<8x1024xbf16>,
    return
  }
  func.func @transform_0(%arg0: i32) -> (i32, i32) {
    %c0_i32 = arith.constant 0 : i32
    %c0_i32_0 = arith.constant 0 : i32
    %c0_i32_1 = arith.constant 0 : i32
    return %c0_i32, %c0_i32_0 : i32, i32
  }
  func.func @transform_1(%arg0: i32) -> (i32, i32) {
    %c0_i32 = arith.constant 0 : i32
    %c0_i32_0 = arith.constant 0 : i32
    return %c0_i32, %arg0 : i32, i32
  }
  func.func @transform_2(%arg0: i32) -> (i32, i32) {
    %c0_i32 = arith.constant 0 : i32
    %c0_i32_0 = arith.constant 0 : i32
    %c0_i32_1 = arith.constant 0 : i32
    return %c0_i32, %c0_i32_0 : i32, i32
  }
  func.func @transform_3(%arg0: i32) -> (i32, i32) {
    %c0_i32 = arith.constant 0 : i32
    %c0_i32_0 = arith.constant 0 : i32
    return %c0_i32, %arg0 : i32, i32
  }
}

module attributes {stable_mosaic.version = 11 : i64} {
  func.func @_fused_matmul_kernel(%arg0: i32, %arg1: memref<2x32xbf16, #tpu.memory_space<vmem>>, %arg2: memref<32x2048xbf16, #tpu.memory_space<vmem>>, %arg3: memref<2x1xf32, #tpu.memory_space<vmem>>, %arg4: memref<2x2048xf32, #tpu.memory_space<vmem>>) attributes {dimension_semantics = [#tpu.dimension_semantics<parallel>], iteration_bounds = array<i64: 4>, scalar_prefetch = 0 : i64, scratch_operands = 0 : i64, tpu.core_type = #tpu.core_type<tc>, window_params = [{pipeline_mode = #tpu.pipeline_mode<synchronous>, transform_indices = @transform_0, window_bounds = array<i64: 2, 32>}, {transform_indices = @transform_1, window_bounds = array<i64: 32, 2048>}, {pipeline_mode = #tpu.pipeline_mode<synchronous>, transform_indices = @transform_2, window_bounds = array<i64: 2, 1>}, {transform_indices = @transform_3, window_bounds = array<i64: 2, 2048>}]} {
    %c0 = arith.constant 0 : index
    %c0_0 = arith.constant 0 : index
    %0 = vector.load %arg1[%c0, %c0_0] : memref<2x32xbf16, #tpu.memory_space<vmem>>, vector<2x32xbf16>
    %c0_1 = arith.constant 0 : index
    %c0_2 = arith.constant 0 : index
    %1 = vector.load %arg2[%c0_1, %c0_2] : memref<32x2048xbf16, #tpu.memory_space<vmem>>, vector<32x2048xbf16>
    %cst = arith.constant dense<0.000000e+00> : vector<2x2048xf32>
    %2 = tpu.matmul %0, %1, %cst {dimension_numbers = #tpu.dot_dimension_numbers<[1], [0], [0], [1], [0, 0, 1, 1], [], []>} : vector<2x32xbf16>, vector<32x2048xbf16>, vector<2x2048xf32> -> vector<2x2048xf32>
    %c0_3 = arith.constant 0 : index
    %c0_4 = arith.constant 0 : index
    %3 = vector.load %arg3[%c0_3, %c0_4] : memref<2x1xf32, #tpu.memory_space<vmem>>, vector<2x1xf32>
    %4 = vector.broadcast %3 : vector<2x1xf32> to vector<2x2048xf32>
    %5 = arith.addf %2, %4 : vector<2x2048xf32>
    %6 = math.tanh %5 : vector<2x2048xf32>
    %c0_5 = arith.constant 0 : index
    %c0_6 = arith.constant 0 : index
    %7 = vector.load %arg4[%c0_5, %c0_6] : memref<2x2048xf32, #tpu.memory_space<vmem>>, vector<2x2048xf32>
    tpu.vector_store %arg4[%c0_5, %c0_6], %6 {strides = array<i32>} : memref<2x2048xf32, #tpu.memory_space<vmem>>, vector<2x2048xf32>,
    return
  }
  func.func @transform_0(%arg0: i32) -> (i32, i32) {
    %c0_i32 = arith.constant 0 : i32
    %c0_i32_0 = arith.constant 0 : i32
    %c0_i32_1 = arith.constant 0 : i32
    return %c0_i32, %c0_i32_0 : i32, i32
  }
  func.func @transform_1(%arg0: i32) -> (i32, i32) {
    %c0_i32 = arith.constant 0 : i32
    %c0_i32_0 = arith.constant 0 : i32
    return %c0_i32, %arg0 : i32, i32
  }
  func.func @transform_2(%arg0: i32) -> (i32, i32) {
    %c0_i32 = arith.constant 0 : i32
    %c0_i32_0 = arith.constant 0 : i32
    %c0_i32_1 = arith.constant 0 : i32
    return %c0_i32, %c0_i32_0 : i32, i32
  }
  func.func @transform_3(%arg0: i32) -> (i32, i32) {
    %c0_i32 = arith.constant 0 : i32
    %c0_i32_0 = arith.constant 0 : i32
    return %c0_i32, %arg0 : i32, i32
  }
}

</mosaic_0001>

<bundles_post_ra>
// kernel: dca_forward.23
= control target key start
LH: loop header
LB: loop body
LE: loop exit
PB: predicated region body
PF: predicated region fallthrough
CT: control target
= control target key end

     0   :  { %s934_s12 = smov 0   ;;  %s936_s13 = smov 0   ;;  %s1073_s0 = inlined_call_operand.vmem [shape: bf16[8,16], index: 0, kind: input, shape index: {}]   ;;  %s1074_s1 = inlined_call_operand.vmem [shape: bf16[16,8192], index: 1, kind: input, shape index: {}]   ;;  %s1075_s2 = inlined_call_operand.vmem [shape: f32[8,1], index: 2, kind: input, shape index: {}]   ;;  %s1076_s3 = inlined_call_operand.vmem [shape: bf16[8,8192], index: 3, kind: output, shape index: {}]  }
   0x1   :  { %s938_s14 = smov 0  }
   0x2 LB: > { %s809_s15 = sadd.s32 4294967295, %s911_s14   ;;  %s951_s16 = sadd.s32 1, %s911_s14   ;;  %s911_s14 = sphi %s938_s14, %s1079_s14   ;;  %s907_s13 = sphi %s936_s13, %s1078_s13   ;;  %s903_s12 = sphi %s934_s12, %s1077_s12  }
   0x3   : > { %s38_s17 = ssub.s32 %s911_s14, %s951_s16  ;;  %s41_s18 = sadd.s32 1, %s907_s13 }
   0x4   : > { %p39_p0 = scmp.eq.s32.totalorder %s38_s17, 0  ;;  %p48_p1 = scmp.ne.s32.totalorder %s907_s13, %s903_s12 }
   0x5   : > { %p49_p2 = scmp.eq.s32.totalorder %s911_s14, 0  ;;  %p812_p4 = scmp.ge.s32.totalorder %s911_s14, 4 }
   0x6   : > { %s960_s19 = scalar_select %p39_p0, %s907_s13, %s41_s18  }
   0x7   : > { %p50_p3 = por %p49_p2, %p48_p1  ;;  %127 = sbr.rel (%p812_p4) target bundleno = 26 (0x1a), region = 24 }
   0xe   : > { %130 = sbr.rel (!%p50_p3) target bundleno = 26 (0x1a), region = 28  ;;  %s132_s20 = sand.u32 (%p50_p3), 1, %s907_s13  }
   0xf   : > { %s854_s21 = sshll.u32 (%p50_p3), %s911_s14, 6  ;;  %s813_s22 = sshll.u32 (%p50_p3), %s132_s20, 7 }
  0x10   : > { %s968_s25 = scalar_lea.vmem (%p50_p3), %s1074_s1, %s854_s21  ;;  %s134_s26 = scalar_lea.vmem (%p50_p3), [#allocation2], %s813_s22 }
  0x11   : > { %v150_v0 = vld [vmem:[%s968_s25] sm:$0xff] (%p50_p3)  ;;  %v152_v1 = vld [vmem:[%s968_s25 + $0x8] sm:$0xff] (%p50_p3)  ;;  %v154_v2 = vld [vmem:[%s968_s25 + $0x10] sm:$0xff] (%p50_p3) }
  0x12   : > { %151 = vst [vmem:[%s134_s26] sm:$0xff] (%p50_p3), %v150_v0  ;;  %153 = vst [vmem:[%s134_s26 + $0x8] sm:$0xff] (%p50_p3), %v152_v1  ;;  %v156_v3 = vld [vmem:[%s968_s25 + $0x18] sm:$0xff] (%p50_p3)  ;;  %v158_v4 = vld [vmem:[%s968_s25 + $0x20] sm:$0xff] (%p50_p3) }
  0x13   : > { %155 = vst [vmem:[%s134_s26 + $0x10] sm:$0xff] (%p50_p3), %v154_v2  ;;  %v160_v5 = vld [vmem:[%s968_s25 + $0x28] sm:$0xff] (%p50_p3)  ;;  %157 = vst [vmem:[%s134_s26 + $0x18] sm:$0xff] (%p50_p3), %v156_v3  ;;  %v162_v6 = vld [vmem:[%s968_s25 + $0x30] sm:$0xff] (%p50_p3) }
  0x14   : > { %159 = vst [vmem:[%s134_s26 + $0x20] sm:$0xff] (%p50_p3), %v158_v4  ;;  %161 = vst [vmem:[%s134_s26 + $0x28] sm:$0xff] (%p50_p3), %v160_v5  ;;  %v164_v7 = vld [vmem:[%s968_s25 + $0x38] sm:$0xff] (%p50_p3)  ;;  %v166_v8 = vld [vmem:[%s968_s25 + $0x100] sm:$0xff] (%p50_p3) }
  0x15   : > { %163 = vst [vmem:[%s134_s26 + $0x30] sm:$0xff] %v162_v6  ;;  %165 = vst [vmem:[%s134_s26 + $0x38] sm:$0xff] %v164_v7  ;;  %v168_v9 = vld [vmem:[%s968_s25 + $0x108] sm:$0xff]  ;;  %v170_v10 = vld [vmem:[%s968_s25 + $0x110] sm:$0xff] }
  0x16   : > { %167 = vst [vmem:[%s134_s26 + $0x40] sm:$0xff] %v166_v8  ;;  %v172_v11 = vld [vmem:[%s968_s25 + $0x118] sm:$0xff]  ;;  %169 = vst [vmem:[%s134_s26 + $0x48] sm:$0xff] %v168_v9  ;;  %v174_v12 = vld [vmem:[%s968_s25 + $0x120] sm:$0xff] }
  0x17   : > { %171 = vst [vmem:[%s134_s26 + $0x50] sm:$0xff] %v170_v10  ;;  %173 = vst [vmem:[%s134_s26 + $0x58] sm:$0xff] %v172_v11  ;;  %v176_v13 = vld [vmem:[%s968_s25 + $0x128] sm:$0xff]  ;;  %v178_v14 = vld [vmem:[%s968_s25 + $0x130] sm:$0xff] }
  0x18   : > { %175 = vst [vmem:[%s134_s26 + $0x60] sm:$0xff] %v174_v12  ;;  %177 = vst [vmem:[%s134_s26 + $0x68] sm:$0xff] %v176_v13  ;;  %v180_v15 = vld [vmem:[%s968_s25 + $0x138] sm:$0xff] }
  0x19   : > { %179 = vst [vmem:[%s134_s26 + $0x70] sm:$0xff] %v178_v14  ;;  %181 = vst [vmem:[%s134_s26 + $0x78] sm:$0xff] %v180_v15 }
  0x1a PF: > { %p816_p5 = scmp.ge.s32.totalorder %s911_s14, 1  ;;  %p186_p6 = scmp.lt.s32.totalorder %s911_s14, 5 }
  0x1c   : > { %p187_p7 = pnand %p816_p5, %p186_p6 }
  0x1d   : > { %s193_s27 = sand.u32 (!%p187_p7), 1, %s903_s12   ;;  %v241_v16 = vld [vmem:[%s1075_s2] sm:$0xff] (!%p187_p7)  ;;  %v913_v17 = vmov (!%p187_p7), 0   ;;  %vm327_vm0 = vcmask (!%p187_p7), 130048   ;;  %s818_s7 = sshll.u32 (!%p187_p7), %s809_s15, 4 }
  0x1e   : > { %190 = sbr.rel (%p187_p7) target bundleno = 284 (0x11c), region = 51  ;;  %s817_s30 = sshll.u32 (!%p187_p7), %s193_s27, 7  ;;  %363 = vmatprep.mubr.bf16.mxu0 (!%p187_p7), %v913_v17  ;;  %404 = vmatprep.mubr.bf16.mxu1 (!%p187_p7), %v913_v17  ;;  %v224_v34 = vld [vmem:[%s1073_s0] sm:$0xf] (!%p187_p7) }
  0x1f   : > { %888 = vset.pattern.permute.xlu0 (!%p187_p7), %v913_v17  ;;  %s995_s4 = scalar_lea.vmem (!%p187_p7), [#allocation2], %s817_s30  ;;  %p218_p8 = scmp.lt.s32.totalorder (!%p187_p7), %s818_s7, 63 }
  0x20   : > { %v225_v18 = vld [vmem:[%s995_s4] sm:$0xff] (!%p187_p7)  ;;  %v226_v20 = vld [vmem:[%s995_s4 + $0x8] sm:$0xff] (!%p187_p7)  ;;  %244 = vperm.xlu0 (!%p187_p7), %888, %v241_v16   ;;  %v227_v24 = vld [vmem:[%s995_s4 + $0x10] sm:$0xff] (!%p187_p7) }
  0x21   : > { %v233_v19 = vld [vmem:[%s995_s4 + $0x40] sm:$0xff] (!%p187_p7)  ;;  %v234_v22 = vld [vmem:[%s995_s4 + $0x48] sm:$0xff] (!%p187_p7)  ;;  %v235_v25 = vld [vmem:[%s995_s4 + $0x50] sm:$0xff] (!%p187_p7) }
  0x22   : > { %v821_v21 = vcombine.high (!%p187_p7), %v225_v18, %v233_v19  ;;  %v820_v23 = vcombine.low (!%p187_p7), %v225_v18, %v233_v19  ;;  %v823_v26 = vcombine.high (!%p187_p7), %v226_v20, %v234_v22  ;;  %v822_v27 = vcombine.low (!%p187_p7), %v226_v20, %v234_v22  ;;  %v228_v29 = vld [vmem:[%s995_s4 + $0x18] sm:$0xff] (!%p187_p7)  ;;  %v229_v32 = vld [vmem:[%s995_s4 + $0x20] sm:$0xff] (!%p187_p7)  ;;  %v230_v36 = vld [vmem:[%s995_s4 + $0x28] sm:$0xff] (!%p187_p7) }
  0x23   : > { %v825_v28 = vcombine.high (!%p187_p7), %v227_v24, %v235_v25  ;;  %v236_v30 = vld [vmem:[%s995_s4 + $0x58] sm:$0xff] (!%p187_p7)  ;;  %v237_v33 = vld [vmem:[%s995_s4 + $0x60] sm:$0xff] (!%p187_p7)  ;;  %v824_v35 = vcombine.low (!%p187_p7), %v227_v24, %v235_v25  ;;  %v238_v37 = vld [vmem:[%s995_s4 + $0x68] sm:$0xff] (!%p187_p7) }
  0x24   : > { %331 = vmatprep.subr.bf16.mxu0 (!%p187_p7), %v821_v21  ;;  %v827_v31 = vcombine.high (!%p187_p7), %v228_v29, %v236_v30  ;;  %372 = vmatprep.subr.bf16.mxu1 (!%p187_p7), %v823_v26  ;;  %v826_v38 = vcombine.low (!%p187_p7), %v228_v29, %v236_v30  ;;  %v829_v39 = vcombine.high (!%p187_p7), %v229_v32, %v237_v33  ;;  %v231_v41 = vld [vmem:[%s995_s4 + $0x30] sm:$0xff] (!%p187_p7)  ;;  %v232_v44 = vld [vmem:[%s995_s4 + $0x38] sm:$0xff] (!%p187_p7) }
  0x25   : > { %332 = vmatpush1.bf16.msra.mxu0 %v820_v23  ;;  %373 = vmatpush1.bf16.msra.mxu1 %v822_v27  ;;  %v831_v40 = vcombine.high %v230_v36, %v238_v37  ;;  %v239_v42 = vld [vmem:[%s995_s4 + $0x70] sm:$0xff]  ;;  %v828_v43 = vcombine.low %v229_v32, %v237_v33  ;;  %v240_v45 = vld [vmem:[%s995_s4 + $0x78] sm:$0xff]  ;;  %v830_v46 = vcombine.low %v230_v36, %v238_v37  ;;  %s1081_s7 = smov (!%p218_p8, %s818_s7), 63 }
  0x26   : > { %413 = vmatprep.subr.bf16.mxu0 %v825_v28  ;;  %454 = vmatprep.subr.bf16.mxu1 %v827_v31  ;;  %v833_v47 = vcombine.high %v231_v41, %v239_v42  ;;  %v835_v48 = vcombine.high %v232_v44, %v240_v45  ;;  %v832_v49 = vcombine.low %v231_v41, %v239_v42  ;;  %s819_s8 = sshll.u32 %s1081_s7, 2 }
  0x27   : > { %v834_v50 = vcombine.low %v232_v44, %v240_v45  ;;  %s1041_s11 = scalar_lea.vmem %s1076_s3, %s819_s8 }
  0x28   : > { %836 = vmatmul.mubr.msk.bf16.vlgmr.msra.gmra.mrb[0].mxu0 %vm327_vm0, %v224_v34  ;;  %837 = vmatmul.mubr.msk.bf16.vlgmr.msra.gmra.mrb[0].mxu1 %vm327_vm0, %v224_v34 }
  0x29   : > { %414 = vmatpush1.bf16.msra.mxu0 %v824_v35  ;;  %455 = vmatpush1.bf16.msra.mxu1 %v826_v38 }
  0x2a   : > { %445 = vmatprep.mubr.bf16.mxu0 %v913_v17  ;;  %486 = vmatprep.mubr.bf16.mxu1 %v913_v17 }
  0x2b   : > { %495 = vmatprep.subr.bf16.mxu0 %v829_v39  ;;  %536 = vmatprep.subr.bf16.mxu1 %v831_v40 }
  0x30   : > { %838 = vmatmul.mubr.msk.bf16.vlgmr.msra.gmra.mrb[4].mxu0 %vm327_vm0, %v224_v34  ;;  %839 = vmatmul.mubr.msk.bf16.vlgmr.msra.gmra.mrb[4].mxu1 %vm327_vm0, %v224_v34 }
  0x31   : > { %496 = vmatpush1.bf16.msra.mxu0 %v828_v43  ;;  %537 = vmatpush1.bf16.msra.mxu1 %v830_v46 }
  0x32   : > { %527 = vmatprep.mubr.bf16.mxu0 %v913_v17  ;;  %568 = vmatprep.mubr.bf16.mxu1 %v913_v17 }
  0x33   : > { %577 = vmatprep.subr.bf16.mxu0 %v833_v47  ;;  %618 = vmatprep.subr.bf16.mxu1 %v835_v48 }
  0x38   : > { %840 = vmatmul.mubr.msk.bf16.vlgmr.msra.gmra.mrb[8].mxu0 %vm327_vm0, %v224_v34  ;;  %841 = vmatmul.mubr.msk.bf16.vlgmr.msra.gmra.mrb[8].mxu1 %vm327_vm0, %v224_v34 }
  0x39   : > { %578 = vmatpush1.bf16.msra.mxu0 %v832_v49  ;;  %619 = vmatpush1.bf16.msra.mxu1 %v834_v50 }
  0x3a   : > { %609 = vmatprep.mubr.bf16.mxu0 %v913_v17  ;;  %650 = vmatprep.mubr.bf16.mxu1 %v913_v17 }
  0x40   : > { %842 = vmatmul.mubr.msk.bf16.vlgmr.msra.gmra.mrb[12].mxu0 %vm327_vm0, %v224_v34  ;;  %843 = vmatmul.mubr.msk.bf16.vlgmr.msra.gmra.mrb[12].mxu1 %vm327_vm0, %v224_v34 }
  0x9f   : > { %v1032_v51 = vpop.permute.xlu0 %244 }
  0xfb   : > { %v365_v52 = vpop.f32.mrb[0].mxu0  ;;  %v406_v53 = vpop.f32.mrb[0].mxu1 }
  0xfc   : > { %v366_v54 = vadd.f32 %v365_v52, %v1032_v51  ;;  %v367_v55 = vpop.f32.mrb[1].mxu0  ;;  %v407_v57 = vadd.f32 %v406_v53, %v1032_v51  ;;  %v408_v58 = vpop.f32.mrb[1].mxu1 }
  0xfd   : > { %v368_v56 = vadd.f32 %v367_v55, %v1032_v51  ;;  %v369_v59 = vpop.f32.mrb[2].mxu0  ;;  %v409_v61 = vadd.f32 %v408_v58, %v1032_v51  ;;  %v410_v62 = vpop.f32.mrb[2].mxu1 }
  0xfe   : > { %v659_v60 = vmax.f32 %v366_v54, 0.0  ;;  %v370_v63 = vpop.f32.mrb[3].mxu0  ;;  %v661_v1 = vmax.f32 %v407_v57, 0.0  ;;  %v411_v2 = vpop.f32.mrb[3].mxu1 }
  0xff   : > { %v660_v0 = vmax.f32 %v368_v56, 0.0  ;;  %v662_v3 = vmax.f32 %v409_v61, 0.0 }
 0x101   : > { %v855_v4 = vpack.c.bf16 %v660_v0, %v659_v60  ;;  %v856_v5 = vpack.c.bf16 %v662_v3, %v661_v1 }
 0x103   : > { %739 = vst [vmem:[%s1041_s11] sm:$0xff] %v855_v4  ;;  %v447_v6 = vpop.f32.mrb[4].mxu0  ;;  %740 = vst [vmem:[%s1041_s11 + $0x8] sm:$0xff] %v856_v5  ;;  %v488_v8 = vpop.f32.mrb[4].mxu1 }
 0x104   : > { %v448_v7 = vadd.f32 %v447_v6, %v1032_v51  ;;  %v449_v9 = vpop.f32.mrb[5].mxu0  ;;  %v489_v10 = vadd.f32 %v488_v8, %v1032_v51  ;;  %v490_v12 = vpop.f32.mrb[5].mxu1 }
 0x105   : > { %v450_v11 = vadd.f32 %v449_v9, %v1032_v51  ;;  %v451_v13 = vpop.f32.mrb[6].mxu0  ;;  %v491_v15 = vadd.f32 %v490_v12, %v1032_v51  ;;  %v492_v16 = vpop.f32.mrb[6].mxu1 }
 0x106   : > { %v663_v14 = vmax.f32 %v448_v7, 0.0  ;;  %v452_v17 = vpop.f32.mrb[7].mxu0  ;;  %v665_v18 = vmax.f32 %v489_v10, 0.0  ;;  %v493_v20 = vpop.f32.mrb[7].mxu1 }
 0x107   : > { %v664_v19 = vmax.f32 %v450_v11, 0.0  ;;  %v666_v21 = vmax.f32 %v491_v15, 0.0 }
 0x109   : > { %v857_v22 = vpack.c.bf16 %v664_v19, %v663_v14  ;;  %v858_v23 = vpack.c.bf16 %v666_v21, %v665_v18 }
 0x10b   : > { %741 = vst [vmem:[%s1041_s11 + $0x10] sm:$0xff] %v857_v22  ;;  %v529_v24 = vpop.f32.mrb[8].mxu0  ;;  %742 = vst [vmem:[%s1041_s11 + $0x18] sm:$0xff] %v858_v23  ;;  %v570_v26 = vpop.f32.mrb[8].mxu1 }
 0x10c   : > { %v530_v25 = vadd.f32 %v529_v24, %v1032_v51  ;;  %v531_v27 = vpop.f32.mrb[9].mxu0  ;;  %v571_v28 = vadd.f32 %v570_v26, %v1032_v51  ;;  %v572_v30 = vpop.f32.mrb[9].mxu1 }
 0x10d   : > { %v532_v29 = vadd.f32 %v531_v27, %v1032_v51  ;;  %v533_v31 = vpop.f32.mrb[10].mxu0  ;;  %v573_v33 = vadd.f32 %v572_v30, %v1032_v51  ;;  %v574_v34 = vpop.f32.mrb[10].mxu1 }
 0x10e   : > { %v667_v32 = vmax.f32 %v530_v25, 0.0  ;;  %v534_v35 = vpop.f32.mrb[11].mxu0  ;;  %v669_v36 = vmax.f32 %v571_v28, 0.0  ;;  %v575_v38 = vpop.f32.mrb[11].mxu1 }
 0x10f   : > { %v668_v37 = vmax.f32 %v532_v29, 0.0  ;;  %v670_v39 = vmax.f32 %v573_v33, 0.0 }
 0x111   : > { %v859_v40 = vpack.c.bf16 %v668_v37, %v667_v32  ;;  %v860_v41 = vpack.c.bf16 %v670_v39, %v669_v36 }
 0x113   : > { %743 = vst [vmem:[%s1041_s11 + $0x20] sm:$0xff] %v859_v40  ;;  %v611_v42 = vpop.f32.mrb[12].mxu0  ;;  %744 = vst [vmem:[%s1041_s11 + $0x28] sm:$0xff] %v860_v41  ;;  %v652_v44 = vpop.f32.mrb[12].mxu1 }
 0x114   : > { %v612_v43 = vadd.f32 %v611_v42, %v1032_v51  ;;  %v613_v45 = vpop.f32.mrb[13].mxu0  ;;  %v653_v46 = vadd.f32 %v652_v44, %v1032_v51  ;;  %v654_v48 = vpop.f32.mrb[13].mxu1 }
 0x115   : > { %v614_v47 = vadd.f32 %v613_v45, %v1032_v51  ;;  %v615_v49 = vpop.f32.mrb[14].mxu0  ;;  %v655_v52 = vadd.f32 %v654_v48, %v1032_v51  ;;  %v656_v53 = vpop.f32.mrb[14].mxu1 }
 0x116   : > { %v671_v50 = vmax.f32 %v612_v43, 0.0  ;;  %v616_v54 = vpop.f32.mrb[15].mxu0  ;;  %v673_v55 = vmax.f32 %v653_v46, 0.0  ;;  %v657_v57 = vpop.f32.mrb[15].mxu1 }
 0x117   : > { %v672_v56 = vmax.f32 %v614_v47, 0.0  ;;  %v674_v58 = vmax.f32 %v655_v52, 0.0 }
 0x119   : > { %v861_v59 = vpack.c.bf16 %v672_v56, %v671_v50  ;;  %v862_v60 = vpack.c.bf16 %v674_v58, %v673_v55 }
 0x11b   : > { %745 = vst [vmem:[%s1041_s11 + $0x30] sm:$0xff] %v861_v59  ;;  %746 = vst [vmem:[%s1041_s11 + $0x38] sm:$0xff] %v862_v60 }
 0x11c PF: > { %p10_p9 = scmp.ge.s32.totalorder %s951_s16, 6   ;;  %s1077_s12 = smov %s907_s13 }
 0x11d   : > { %s1078_s13 = smov %s960_s19  ;;  %s1079_s14 = smov %s951_s16 }
 0x11e   :  { %12 = sbr.rel (!%p10_p9) target bundleno = 2 (0x2), region = 90 }

// kernel: dca_forward.24
= control target key start
LH: loop header
LB: loop body
LE: loop exit
PB: predicated region body
PF: predicated region fallthrough
CT: control target
= control target key end

     0   :  { %s1229_s12 = smov 0   ;;  %s1231_s13 = smov 0   ;;  %s1529_s0 = inlined_call_operand.vmem [shape: bf16[16,128], index: 0, kind: input, shape index: {}]   ;;  %s1530_s1 = inlined_call_operand.vmem [shape: bf16[128,2048], index: 1, kind: input, shape index: {}]   ;;  %s1531_s2 = inlined_call_operand.vmem [shape: f32[16,1], index: 2, kind: input, shape index: {}]   ;;  %s1532_s3 = inlined_call_operand.vmem [shape: bf16[16,2048], index: 3, kind: output, shape index: {}]  }
   0x1   :  { %s1233_s14 = smov 0  }
   0x2 LB: > { %s1059_s15 = sadd.s32 4294967295, %s1206_s14   ;;  %s1246_s16 = sadd.s32 1, %s1206_s14   ;;  %s1206_s14 = sphi %s1233_s14, %s1536_s14   ;;  %s1202_s13 = sphi %s1231_s13, %s1535_s13   ;;  %s1198_s12 = sphi %s1229_s12, %s1534_s12  }
   0x3   : > { %s38_s17 = ssub.s32 %s1206_s14, %s1246_s16  ;;  %s41_s18 = sadd.s32 1, %s1202_s13 }
   0x4   : > { %p39_p0 = scmp.eq.s32.totalorder %s38_s17, 0  ;;  %p48_p1 = scmp.ne.s32.totalorder %s1202_s13, %s1198_s12 }
   0x5   : > { %p49_p2 = scmp.eq.s32.totalorder %s1206_s14, 0  ;;  %p99_p3 = scmp.eq.s32.totalorder %s1059_s15, 1 }
   0x6   : > { %s1257_s19 = scalar_select %p39_p0, %s1202_s13, %s41_s18  }
   0x7   : > { %p50_p4 = por %p49_p2, %p48_p1  ;;  %p1259_p5 = por %p99_p3, %p48_p1 }
   0x8   : > { %p1062_p6 = scmp.ge.s32.totalorder %s1206_s14, 2 }
   0xa   : > { %127 = sbr.rel (%p1062_p6) target bundleno = 53 (0x35), region = 24 }
  0x11   : > { %130 = sbr.rel (!%p50_p4) target bundleno = 53 (0x35), region = 28  ;;  %s132_s21 = sand.u32 (%p50_p4), 1, %s1202_s13  }
  0x12   : > { %s1147_s22 = sshll.u32 (%p50_p4), %s1206_s14, 5  ;;  %s1063_s23 = sshll.u32 (%p50_p4), %s132_s21, 9 }
  0x13   : > { %s1269_s26 = scalar_lea.vmem (%p50_p4), %s1530_s1, %s1147_s22  ;;  %s1274_s27 = scalar_lea.vmem (%p50_p4), [#allocation2], %s1063_s23 }
  0x14   : > { %v150_v0 = vld [vmem:[%s1269_s26] sm:$0xff] (%p50_p4)  ;;  %v152_v1 = vld [vmem:[%s1269_s26 + $0x8] sm:$0xff] (%p50_p4)  ;;  %v154_v2 = vld [vmem:[%s1269_s26 + $0x10] sm:$0xff] (%p50_p4) }
  0x15   : > { %151 = vst [vmem:[%s1274_s27] sm:$0xff] (%p50_p4), %v150_v0  ;;  %153 = vst [vmem:[%s1274_s27 + $0x8] sm:$0xff] (%p50_p4), %v152_v1  ;;  %v156_v3 = vld [vmem:[%s1269_s26 + $0x18] sm:$0xff] (%p50_p4)  ;;  %v158_v4 = vld [vmem:[%s1269_s26 + $0x40] sm:$0xff] (%p50_p4) }
  0x16   : > { %155 = vst [vmem:[%s1274_s27 + $0x10] sm:$0xff] (%p50_p4), %v154_v2  ;;  %v160_v5 = vld [vmem:[%s1269_s26 + $0x48] sm:$0xff] (%p50_p4)  ;;  %157 = vst [vmem:[%s1274_s27 + $0x18] sm:$0xff] (%p50_p4), %v156_v3  ;;  %v162_v6 = vld [vmem:[%s1269_s26 + $0x50] sm:$0xff] (%p50_p4) }
  0x17   : > { %159 = vst [vmem:[%s1274_s27 + $0x20] sm:$0xff] (%p50_p4), %v158_v4  ;;  %161 = vst [vmem:[%s1274_s27 + $0x28] sm:$0xff] (%p50_p4), %v160_v5  ;;  %v164_v7 = vld [vmem:[%s1269_s26 + $0x58] sm:$0xff] (%p50_p4)  ;;  %v166_v8 = vld [vmem:[%s1269_s26 + $0x80] sm:$0xff] (%p50_p4) }
  0x18   : > { %163 = vst [vmem:[%s1274_s27 + $0x30] sm:$0xff] %v162_v6  ;;  %165 = vst [vmem:[%s1274_s27 + $0x38] sm:$0xff] %v164_v7  ;;  %v168_v9 = vld [vmem:[%s1269_s26 + $0x88] sm:$0xff]  ;;  %v170_v10 = vld [vmem:[%s1269_s26 + $0x90] sm:$0xff] }
  0x19   : > { %167 = vst [vmem:[%s1274_s27 + $0x40] sm:$0xff] %v166_v8  ;;  %v172_v11 = vld [vmem:[%s1269_s26 + $0x98] sm:$0xff]  ;;  %169 = vst [vmem:[%s1274_s27 + $0x48] sm:$0xff] %v168_v9  ;;  %v174_v12 = vld [vmem:[%s1269_s26 + $0xc0] sm:$0xff] }
  0x1a   : > { %171 = vst [vmem:[%s1274_s27 + $0x50] sm:$0xff] %v170_v10  ;;  %173 = vst [vmem:[%s1274_s27 + $0x58] sm:$0xff] %v172_v11  ;;  %v176_v13 = vld [vmem:[%s1269_s26 + $0xc8] sm:$0xff]  ;;  %v178_v14 = vld [vmem:[%s1269_s26 + $0xd0] sm:$0xff] }
  0x1b   : > { %175 = vst [vmem:[%s1274_s27 + $0x60] sm:$0xff] %v174_v12  ;;  %177 = vst [vmem:[%s1274_s27 + $0x68] sm:$0xff] %v176_v13  ;;  %v180_v15 = vld [vmem:[%s1269_s26 + $0xd8] sm:$0xff]  ;;  %v182_v16 = vld [vmem:[%s1269_s26 + $0x100] sm:$0xff] }
  0x1c   : > { %179 = vst [vmem:[%s1274_s27 + $0x70] sm:$0xff] %v178_v14  ;;  %v184_v17 = vld [vmem:[%s1269_s26 + $0x108] sm:$0xff]  ;;  %181 = vst [vmem:[%s1274_s27 + $0x78] sm:$0xff] %v180_v15  ;;  %v186_v18 = vld [vmem:[%s1269_s26 + $0x110] sm:$0xff] }
  0x1d   : > { %183 = vst [vmem:[%s1274_s27 + $0x80] sm:$0xff] %v182_v16  ;;  %185 = vst [vmem:[%s1274_s27 + $0x88] sm:$0xff] %v184_v17  ;;  %v188_v19 = vld [vmem:[%s1269_s26 + $0x118] sm:$0xff]  ;;  %v190_v20 = vld [vmem:[%s1269_s26 + $0x140] sm:$0xff] }
  0x1e   : > { %187 = vst [vmem:[%s1274_s27 + $0x90] sm:$0xff] %v186_v18  ;;  %189 = vst [vmem:[%s1274_s27 + $0x98] sm:$0xff] %v188_v19  ;;  %v192_v21 = vld [vmem:[%s1269_s26 + $0x148] sm:$0xff]  ;;  %v194_v22 = vld [vmem:[%s1269_s26 + $0x150] sm:$0xff] }
  0x1f   : > { %191 = vst [vmem:[%s1274_s27 + $0xa0] sm:$0xff] %v190_v20  ;;  %v196_v23 = vld [vmem:[%s1269_s26 + $0x158] sm:$0xff]  ;;  %193 = vst [vmem:[%s1274_s27 + $0xa8] sm:$0xff] %v192_v21  ;;  %v198_v24 = vld [vmem:[%s1269_s26 + $0x180] sm:$0xff] }
  0x20   : > { %195 = vst [vmem:[%s1274_s27 + $0xb0] sm:$0xff] %v194_v22  ;;  %197 = vst [vmem:[%s1274_s27 + $0xb8] sm:$0xff] %v196_v23  ;;  %v200_v25 = vld [vmem:[%s1269_s26 + $0x188] sm:$0xff]  ;;  %v202_v26 = vld [vmem:[%s1269_s26 + $0x190] sm:$0xff] }
  0x21   : > { %199 = vst [vmem:[%s1274_s27 + $0xc0] sm:$0xff] %v198_v24  ;;  %201 = vst [vmem:[%s1274_s27 + $0xc8] sm:$0xff] %v200_v25  ;;  %v204_v27 = vld [vmem:[%s1269_s26 + $0x198] sm:$0xff]  ;;  %v206_v28 = vld [vmem:[%s1269_s26 + $0x1c0] sm:$0xff] }
  0x22   : > { %203 = vst [vmem:[%s1274_s27 + $0xd0] sm:$0xff] %v202_v26  ;;  %v208_v29 = vld [vmem:[%s1269_s26 + $0x1c8] sm:$0xff]  ;;  %205 = vst [vmem:[%s1274_s27 + $0xd8] sm:$0xff] %v204_v27  ;;  %v210_v30 = vld [vmem:[%s1269_s26 + $0x1d0] sm:$0xff] }
  0x23   : > { %207 = vst [vmem:[%s1274_s27 + $0xe0] sm:$0xff] %v206_v28  ;;  %209 = vst [vmem:[%s1274_s27 + $0xe8] sm:$0xff] %v208_v29  ;;  %v212_v31 = vld [vmem:[%s1269_s26 + $0x1d8] sm:$0xff]  ;;  %v214_v32 = vld [vmem:[%s1269_s26 + $0x200] sm:$0xff] }
  0x24   : > { %211 = vst [vmem:[%s1274_s27 + $0xf0] sm:$0xff] %v210_v30  ;;  %213 = vst [vmem:[%s1274_s27 + $0xf8] sm:$0xff] %v212_v31  ;;  %v216_v33 = vld [vmem:[%s1269_s26 + $0x208] sm:$0xff]  ;;  %v218_v34 = vld [vmem:[%s1269_s26 + $0x210] sm:$0xff] }
  0x25   : > { %215 = vst [vmem:[%s1274_s27 + $0x100] sm:$0xff] %v214_v32  ;;  %v220_v35 = vld [vmem:[%s1269_s26 + $0x218] sm:$0xff]  ;;  %217 = vst [vmem:[%s1274_s27 + $0x108] sm:$0xff] %v216_v33  ;;  %v222_v36 = vld [vmem:[%s1269_s26 + $0x240] sm:$0xff] }
  0x26   : > { %219 = vst [vmem:[%s1274_s27 + $0x110] sm:$0xff] %v218_v34  ;;  %221 = vst [vmem:[%s1274_s27 + $0x118] sm:$0xff] %v220_v35  ;;  %v224_v37 = vld [vmem:[%s1269_s26 + $0x248] sm:$0xff]  ;;  %v226_v38 = vld [vmem:[%s1269_s26 + $0x250] sm:$0xff] }
  0x27   : > { %223 = vst [vmem:[%s1274_s27 + $0x120] sm:$0xff] %v222_v36  ;;  %225 = vst [vmem:[%s1274_s27 + $0x128] sm:$0xff] %v224_v37  ;;  %v228_v39 = vld [vmem:[%s1269_s26 + $0x258] sm:$0xff]  ;;  %v230_v40 = vld [vmem:[%s1269_s26 + $0x280] sm:$0xff] }
  0x28   : > { %227 = vst [vmem:[%s1274_s27 + $0x130] sm:$0xff] %v226_v38  ;;  %v232_v41 = vld [vmem:[%s1269_s26 + $0x288] sm:$0xff]  ;;  %229 = vst [vmem:[%s1274_s27 + $0x138] sm:$0xff] %v228_v39  ;;  %v234_v42 = vld [vmem:[%s1269_s26 + $0x290] sm:$0xff] }
  0x29   : > { %231 = vst [vmem:[%s1274_s27 + $0x140] sm:$0xff] %v230_v40  ;;  %233 = vst [vmem:[%s1274_s27 + $0x148] sm:$0xff] %v232_v41  ;;  %v236_v43 = vld [vmem:[%s1269_s26 + $0x298] sm:$0xff]  ;;  %v238_v44 = vld [vmem:[%s1269_s26 + $0x2c0] sm:$0xff] }
  0x2a   : > { %235 = vst [vmem:[%s1274_s27 + $0x150] sm:$0xff] %v234_v42  ;;  %237 = vst [vmem:[%s1274_s27 + $0x158] sm:$0xff] %v236_v43  ;;  %v240_v45 = vld [vmem:[%s1269_s26 + $0x2c8] sm:$0xff]  ;;  %v242_v46 = vld [vmem:[%s1269_s26 + $0x2d0] sm:$0xff] }
  0x2b   : > { %239 = vst [vmem:[%s1274_s27 + $0x160] sm:$0xff] %v238_v44  ;;  %v244_v47 = vld [vmem:[%s1269_s26 + $0x2d8] sm:$0xff]  ;;  %241 = vst [vmem:[%s1274_s27 + $0x168] sm:$0xff] %v240_v45  ;;  %v246_v48 = vld [vmem:[%s1269_s26 + $0x300] sm:$0xff] }
  0x2c   : > { %243 = vst [vmem:[%s1274_s27 + $0x170] sm:$0xff] %v242_v46  ;;  %245 = vst [vmem:[%s1274_s27 + $0x178] sm:$0xff] %v244_v47  ;;  %v248_v49 = vld [vmem:[%s1269_s26 + $0x308] sm:$0xff]  ;;  %v250_v50 = vld [vmem:[%s1269_s26 + $0x310] sm:$0xff] }
  0x2d   : > { %247 = vst [vmem:[%s1274_s27 + $0x180] sm:$0xff] %v246_v48  ;;  %249 = vst [vmem:[%s1274_s27 + $0x188] sm:$0xff] %v248_v49  ;;  %v252_v51 = vld [vmem:[%s1269_s26 + $0x318] sm:$0xff]  ;;  %v254_v52 = vld [vmem:[%s1269_s26 + $0x340] sm:$0xff] }
  0x2e   : > { %251 = vst [vmem:[%s1274_s27 + $0x190] sm:$0xff] %v250_v50  ;;  %v256_v53 = vld [vmem:[%s1269_s26 + $0x348] sm:$0xff]  ;;  %253 = vst [vmem:[%s1274_s27 + $0x198] sm:$0xff] %v252_v51  ;;  %v258_v54 = vld [vmem:[%s1269_s26 + $0x350] sm:$0xff] }
  0x2f   : > { %255 = vst [vmem:[%s1274_s27 + $0x1a0] sm:$0xff] %v254_v52  ;;  %257 = vst [vmem:[%s1274_s27 + $0x1a8] sm:$0xff] %v256_v53  ;;  %v260_v55 = vld [vmem:[%s1269_s26 + $0x358] sm:$0xff]  ;;  %v262_v56 = vld [vmem:[%s1269_s26 + $0x380] sm:$0xff] }
  0x30   : > { %259 = vst [vmem:[%s1274_s27 + $0x1b0] sm:$0xff] %v258_v54  ;;  %261 = vst [vmem:[%s1274_s27 + $0x1b8] sm:$0xff] %v260_v55  ;;  %v264_v57 = vld [vmem:[%s1269_s26 + $0x388] sm:$0xff]  ;;  %v266_v58 = vld [vmem:[%s1269_s26 + $0x390] sm:$0xff] }
  0x31   : > { %263 = vst [vmem:[%s1274_s27 + $0x1c0] sm:$0xff] %v262_v56  ;;  %v268_v59 = vld [vmem:[%s1269_s26 + $0x398] sm:$0xff]  ;;  %265 = vst [vmem:[%s1274_s27 + $0x1c8] sm:$0xff] %v264_v57  ;;  %v270_v60 = vld [vmem:[%s1269_s26 + $0x3c0] sm:$0xff] }
  0x32   : > { %267 = vst [vmem:[%s1274_s27 + $0x1d0] sm:$0xff] %v266_v58  ;;  %269 = vst [vmem:[%s1274_s27 + $0x1d8] sm:$0xff] %v268_v59  ;;  %v272_v61 = vld [vmem:[%s1269_s26 + $0x3c8] sm:$0xff]  ;;  %v274_v62 = vld [vmem:[%s1269_s26 + $0x3d0] sm:$0xff] }
  0x33   : > { %271 = vst [vmem:[%s1274_s27 + $0x1e0] sm:$0xff] %v270_v60  ;;  %273 = vst [vmem:[%s1274_s27 + $0x1e8] sm:$0xff] %v272_v61  ;;  %v276_v63 = vld [vmem:[%s1269_s26 + $0x3d8] sm:$0xff] }
  0x34   : > { %275 = vst [vmem:[%s1274_s27 + $0x1f0] sm:$0xff] %v274_v62  ;;  %277 = vst [vmem:[%s1274_s27 + $0x1f8] sm:$0xff] %v276_v63 }
  0x35 PF: > { %p1066_p7 = scmp.ge.s32.totalorder %s1206_s14, 1  ;;  %p282_p8 = scmp.lt.s32.totalorder %s1206_s14, 3 }
  0x37   : > { %p283_p9 = pnand %p1066_p7, %p282_p8 }
  0x38   : > { %s289_s28 = sand.u32 (!%p283_p9), 1, %s1198_s12   ;;  %v1208_v0 = vmov (!%p283_p9), 0   ;;  %v380_v1 = vld [vmem:[%s1531_s2] sm:$0xff] (!%p283_p9)  ;;  %v381_v21 = vld [vmem:[%s1531_s2 + $0x8] sm:$0xff] (!%p283_p9) }
  0x39   : > { %286 = sbr.rel (%p283_p9) target bundleno = 357 (0x165), region = 51  ;;  %s1067_s29 = sshll.u32 (!%p283_p9), %s289_s28, 9  ;;  %750 = vmatprep.mubr.bf16.mxu0 (!%p283_p9), %v1208_v0  ;;  %793 = vmatprep.mubr.bf16.mxu1 (!%p283_p9), %v1208_v0 }
  0x3a   : > { %1182 = vset.pattern.permute.xlu0 (!%p283_p9), %v1208_v0  ;;  %s1412_s5 = scalar_lea.vmem (!%p283_p9), [#allocation2], %s1067_s29  ;;  %s1068_s10 = sshll.u32 (!%p283_p9), %s289_s28, 6 }
  0x3b   : > { %v316_v2 = vld [vmem:[%s1412_s5] sm:$0xff] (!%p283_p9)  ;;  %v317_v4 = vld [vmem:[%s1412_s5 + $0x8] sm:$0xff] (!%p283_p9)  ;;  %384 = vperm.xlu0 (!%p283_p9), %1182, %v380_v1   ;;  %s1494_s11 = scalar_lea.vmem (!%p283_p9), [#allocation3], %s1068_s10 }
  0x3c   : > { %v320_v3 = vld [vmem:[%s1412_s5 + $0x20] sm:$0xff] (!%p283_p9)  ;;  %v321_v6 = vld [vmem:[%s1412_s5 + $0x28] sm:$0xff] (!%p283_p9) }
  0x3d   : > { %v1071_v5 = vcombine.high (!%p283_p9), %v316_v2, %v320_v3  ;;  %v1070_v7 = vcombine.low (!%p283_p9), %v316_v2, %v320_v3  ;;  %v324_v8 = vld [vmem:[%s1412_s5 + $0x40] sm:$0xff] (!%p283_p9)  ;;  %v1073_v10 = vcombine.high (!%p283_p9), %v317_v4, %v321_v6  ;;  %v1072_v11 = vcombine.low (!%p283_p9), %v317_v4, %v321_v6  ;;  %v325_v13 = vld [vmem:[%s1412_s5 + $0x48] sm:$0xff] (!%p283_p9)  ;;  %v318_v2 = vld [vmem:[%s1412_s5 + $0x10] sm:$0xff] (!%p283_p9) }
  0x3e   : > { %v328_v9 = vld [vmem:[%s1412_s5 + $0x60] sm:$0xff] (!%p283_p9)  ;;  %v329_v14 = vld [vmem:[%s1412_s5 + $0x68] sm:$0xff] (!%p283_p9)  ;;  %v322_v3 = vld [vmem:[%s1412_s5 + $0x30] sm:$0xff] (!%p283_p9) }
  0x3f   : > { %v1079_v12 = vcombine.high (!%p283_p9), %v324_v8, %v328_v9  ;;  %v332_v15 = vld [vmem:[%s1412_s5 + $0x80] sm:$0xff] (!%p283_p9)  ;;  %718 = vmatprep.subr.bf16.mxu0 (!%p283_p9), %v1071_v5  ;;  %v1081_v16 = vcombine.high (!%p283_p9), %v325_v13, %v329_v14  ;;  %v333_v18 = vld [vmem:[%s1412_s5 + $0x88] sm:$0xff] (!%p283_p9)  ;;  %761 = vmatprep.subr.bf16.mxu1 (!%p283_p9), %v1073_v10  ;;  %v1078_v20 = vcombine.low (!%p283_p9), %v324_v8, %v328_v9  ;;  %v319_v4 = vld [vmem:[%s1412_s5 + $0x18] sm:$0xff] (!%p283_p9) }
  0x40   : > { %v336_v17 = vld [vmem:[%s1412_s5 + $0xa0] sm:$0xff]  ;;  %v337_v19 = vld [vmem:[%s1412_s5 + $0xa8] sm:$0xff]  ;;  %719 = vmatpush1.bf16.msra.mxu0 %v1070_v7  ;;  %762 = vmatpush1.bf16.msra.mxu1 %v1072_v11  ;;  %v1080_v22 = vcombine.low %v325_v13, %v329_v14  ;;  %v323_v5 = vld [vmem:[%s1412_s5 + $0x38] sm:$0xff]  ;;  %v1075_v8 = vcombine.high %v318_v2, %v322_v3  ;;  %s1156_s12 = sshll.u32 (%p1259_p5), %s1059_s15, 5 }
  0x41   : > { %720 = vmatprep.subr.bf16.mxu0 %v1079_v12  ;;  %v1087_v23 = vcombine.high %v332_v15, %v336_v17  ;;  %763 = vmatprep.subr.bf16.mxu1 %v1081_v16  ;;  %v1089_v24 = vcombine.high %v333_v18, %v337_v19  ;;  %v340_v25 = vld [vmem:[%s1412_s5 + $0xc0] sm:$0xff]  ;;  %v341_v27 = vld [vmem:[%s1412_s5 + $0xc8] sm:$0xff]  ;;  %v1086_v29 = vcombine.low %v332_v15, %v336_v17  ;;  %v326_v10 = vld [vmem:[%s1412_s5 + $0x50] sm:$0xff]  ;;  %s971_s21 = scalar_lea.vmem (%p1259_p5), %s1532_s3, %s1156_s12 }
  0x42   : > { %v344_v26 = vld [vmem:[%s1412_s5 + $0xe0] sm:$0xff]  ;;  %v345_v28 = vld [vmem:[%s1412_s5 + $0xe8] sm:$0xff]  ;;  %389 = vperm.xlu0 %1182, %v381_v21   ;;  %v1088_v30 = vcombine.low %v333_v18, %v337_v19  ;;  %v1077_v9 = vcombine.high %v319_v4, %v323_v5  ;;  %v330_v11 = vld [vmem:[%s1412_s5 + $0x70] sm:$0xff]  ;;  %v1074_v15 = vcombine.low %v318_v2, %v322_v3  ;;  %v1076_v16 = vcombine.low %v319_v4, %v323_v5 }
  0x43   : > { %v1095_v31 = vcombine.high %v340_v25, %v344_v26  ;;  %v1097_v32 = vcombine.high %v341_v27, %v345_v28  ;;  %v348_v33 = vld [vmem:[%s1412_s5 + $0x100] sm:$0xff]  ;;  %v349_v35 = vld [vmem:[%s1412_s5 + $0x108] sm:$0xff]  ;;  %v1094_v37 = vcombine.low %v340_v25, %v344_v26  ;;  %v1096_v38 = vcombine.low %v341_v27, %v345_v28  ;;  %v327_v13 = vld [vmem:[%s1412_s5 + $0x58] sm:$0xff] }
  0x44   : > { %721 = vmatpush1.bf16.msra.mxu0 %v1078_v20  ;;  %764 = vmatpush1.bf16.msra.mxu1 %v1080_v22  ;;  %v352_v34 = vld [vmem:[%s1412_s5 + $0x120] sm:$0xff]  ;;  %v353_v36 = vld [vmem:[%s1412_s5 + $0x128] sm:$0xff]  ;;  %v331_v14 = vld [vmem:[%s1412_s5 + $0x78] sm:$0xff]  ;;  %v1083_v17 = vcombine.high %v326_v10, %v330_v11 }
  0x45   : > { %722 = vmatprep.subr.bf16.mxu0 %v1087_v23  ;;  %765 = vmatprep.subr.bf16.mxu1 %v1089_v24  ;;  %v1103_v39 = vcombine.high %v348_v33, %v352_v34  ;;  %v1105_v40 = vcombine.high %v349_v35, %v353_v36  ;;  %v356_v41 = vld [vmem:[%s1412_s5 + $0x140] sm:$0xff]  ;;  %v357_v43 = vld [vmem:[%s1412_s5 + $0x148] sm:$0xff]  ;;  %v1102_v45 = vcombine.low %v348_v33, %v352_v34  ;;  %v334_v19 = vld [vmem:[%s1412_s5 + $0x90] sm:$0xff] }
  0x46   : > { %v360_v42 = vld [vmem:[%s1412_s5 + $0x160] sm:$0xff]  ;;  %v361_v44 = vld [vmem:[%s1412_s5 + $0x168] sm:$0xff]  ;;  %v1104_v46 = vcombine.low %v349_v35, %v353_v36  ;;  %v1085_v18 = vcombine.high %v327_v13, %v331_v14  ;;  %v338_v20 = vld [vmem:[%s1412_s5 + $0xb0] sm:$0xff]  ;;  %v1082_v23 = vcombine.low %v326_v10, %v330_v11  ;;  %v1084_v24 = vcombine.low %v327_v13, %v331_v14 }
  0x47   : > { %v1111_v47 = vcombine.high %v356_v41, %v360_v42  ;;  %v1113_v48 = vcombine.high %v357_v43, %v361_v44  ;;  %v364_v49 = vld [vmem:[%s1412_s5 + $0x180] sm:$0xff]  ;;  %v365_v51 = vld [vmem:[%s1412_s5 + $0x188] sm:$0xff]  ;;  %v1110_v53 = vcombine.low %v356_v41, %v360_v42  ;;  %v1112_v54 = vcombine.low %v357_v43, %v361_v44  ;;  %v335_v21 = vld [vmem:[%s1412_s5 + $0x98] sm:$0xff] }
  0x48   : > { %723 = vmatpush1.bf16.msra.mxu0 %v1086_v29  ;;  %766 = vmatpush1.bf16.msra.mxu1 %v1088_v30  ;;  %v368_v50 = vld [vmem:[%s1412_s5 + $0x1a0] sm:$0xff]  ;;  %v369_v52 = vld [vmem:[%s1412_s5 + $0x1a8] sm:$0xff]  ;;  %v339_v22 = vld [vmem:[%s1412_s5 + $0xb8] sm:$0xff]  ;;  %v1091_v25 = vcombine.high %v334_v19, %v338_v20 }
  0x49   : > { %724 = vmatprep.subr.bf16.mxu0 %v1095_v31  ;;  %767 = vmatprep.subr.bf16.mxu1 %v1097_v32  ;;  %v1119_v55 = vcombine.high %v364_v49, %v368_v50  ;;  %v1121_v56 = vcombine.high %v365_v51, %v369_v52  ;;  %v372_v57 = vld [vmem:[%s1412_s5 + $0x1c0] sm:$0xff]  ;;  %v373_v59 = vld [vmem:[%s1412_s5 + $0x1c8] sm:$0xff]  ;;  %v1118_v61 = vcombine.low %v364_v49, %v368_v50  ;;  %v342_v27 = vld [vmem:[%s1412_s5 + $0xd0] sm:$0xff] }
  0x4a   : > { %v376_v58 = vld [vmem:[%s1412_s5 + $0x1e0] sm:$0xff]  ;;  %v377_v60 = vld [vmem:[%s1412_s5 + $0x1e8] sm:$0xff]  ;;  %v1120_v62 = vcombine.low %v365_v51, %v369_v52  ;;  %v1093_v26 = vcombine.high %v335_v21, %v339_v22  ;;  %v346_v28 = vld [vmem:[%s1412_s5 + $0xf0] sm:$0xff]  ;;  %v1090_v31 = vcombine.low %v334_v19, %v338_v20  ;;  %v1092_v32 = vcombine.low %v335_v21, %v339_v22 }
  0x4b   : > { %v1127_v63 = vcombine.high %v372_v57, %v376_v58  ;;  %v1129_v1 = vcombine.high %v373_v59, %v377_v60  ;;  %v1126_v6 = vcombine.low %v372_v57, %v376_v58  ;;  %v1128_v7 = vcombine.low %v373_v59, %v377_v60  ;;  %v1458_v12 = vld [vmem:[%s1529_s0] sm:$0xff]   ;;  %v343_v29 = vld [vmem:[%s1412_s5 + $0xd8] sm:$0xff]  ;;  %v350_v35 = vld [vmem:[%s1412_s5 + $0x110] sm:$0xff] }
  0x4c   : > { %725 = vmatpush1.bf16.msra.mxu0 %v1094_v37  ;;  %768 = vmatpush1.bf16.msra.mxu1 %v1096_v38  ;;  %v347_v30 = vld [vmem:[%s1412_s5 + $0xf8] sm:$0xff]  ;;  %v1099_v33 = vcombine.high %v342_v27, %v346_v28  ;;  %v354_v36 = vld [vmem:[%s1412_s5 + $0x130] sm:$0xff] }
  0x4d   : > { %726 = vmatprep.subr.bf16.mxu0 %v1103_v39  ;;  %769 = vmatprep.subr.bf16.mxu1 %v1105_v40  ;;  %v1101_v34 = vcombine.high %v343_v29, %v347_v30  ;;  %v351_v37 = vld [vmem:[%s1412_s5 + $0x118] sm:$0xff]  ;;  %v1098_v39 = vcombine.low %v342_v27, %v346_v28  ;;  %v1107_v40 = vcombine.high %v350_v35, %v354_v36  ;;  %v358_v42 = vld [vmem:[%s1412_s5 + $0x150] sm:$0xff] }
  0x4e   : > { %v355_v38 = vld [vmem:[%s1412_s5 + $0x138] sm:$0xff]  ;;  %v362_v43 = vld [vmem:[%s1412_s5 + $0x170] sm:$0xff] }
  0x4f   : > { %v1109_v41 = vcombine.high %v351_v37, %v355_v38  ;;  %v359_v44 = vld [vmem:[%s1412_s5 + $0x158] sm:$0xff]  ;;  %v366_v50 = vld [vmem:[%s1412_s5 + $0x190] sm:$0xff] }
  0x50   : > { %727 = vmatpush1.bf16.msra.mxu0 %v1102_v45  ;;  %770 = vmatpush1.bf16.msra.mxu1 %v1104_v46  ;;  %v363_v45 = vld [vmem:[%s1412_s5 + $0x178] sm:$0xff]  ;;  %v1106_v46 = vcombine.low %v350_v35, %v354_v36  ;;  %v370_v51 = vld [vmem:[%s1412_s5 + $0x1b0] sm:$0xff] }
  0x51   : > { %728 = vmatprep.subr.bf16.mxu0 %v1111_v47  ;;  %771 = vmatprep.subr.bf16.mxu1 %v1113_v48  ;;  %v1108_v47 = vcombine.low %v351_v37, %v355_v38  ;;  %v1115_v48 = vcombine.high %v358_v42, %v362_v43  ;;  %v1117_v49 = vcombine.high %v359_v44, %v363_v45  ;;  %v367_v52 = vld [vmem:[%s1412_s5 + $0x198] sm:$0xff]  ;;  %v374_v58 = vld [vmem:[%s1412_s5 + $0x1d0] sm:$0xff] }
  0x52   : > { %v378_v59 = vld [vmem:[%s1412_s5 + $0x1f0] sm:$0xff]  ;;  %v375_v60 = vld [vmem:[%s1412_s5 + $0x1d8] sm:$0xff] }
  0x53   : > { %v1130_v3 = vcombine.low %v374_v58, %v378_v59 }
  0x54   : > { %729 = vmatpush1.bf16.msra.mxu0 %v1110_v53  ;;  %772 = vmatpush1.bf16.msra.mxu1 %v1112_v54  ;;  %v371_v53 = vld [vmem:[%s1412_s5 + $0x1b8] sm:$0xff]  ;;  %v1114_v54 = vcombine.low %v358_v42, %v362_v43 }
  0x55   : > { %730 = vmatprep.subr.bf16.mxu0 %v1119_v55  ;;  %773 = vmatprep.subr.bf16.mxu1 %v1121_v56  ;;  %v1116_v55 = vcombine.low %v359_v44, %v363_v45  ;;  %v1123_v56 = vcombine.high %v366_v50, %v370_v51  ;;  %v1125_v57 = vcombine.high %v367_v52, %v371_v53 }
  0x58   : > { %731 = vmatpush1.bf16.msra.mxu0 %v1118_v61  ;;  %774 = vmatpush1.bf16.msra.mxu1 %v1120_v62  ;;  %v379_v61 = vld [vmem:[%s1412_s5 + $0x1f8] sm:$0xff]  ;;  %v1122_v62 = vcombine.low %v366_v50, %v370_v51 }
  0x59   : > { %732 = vmatprep.subr.bf16.mxu0 %v1127_v63  ;;  %775 = vmatprep.subr.bf16.mxu1 %v1129_v1  ;;  %v1124_v63 = vcombine.low %v367_v52, %v371_v53  ;;  %v1131_v1 = vcombine.high %v374_v58, %v378_v59  ;;  %v1133_v2 = vcombine.high %v375_v60, %v379_v61 }
  0x5a   : > { %v1132_v4 = vcombine.low %v375_v60, %v379_v61 }
  0x5c   : > { %733 = vmatpush1.bf16.msra.mxu0 %v1126_v6  ;;  %776 = vmatpush1.bf16.msra.mxu1 %v1128_v7 }
  0x5d   : > { %804 = vmatprep.subr.bf16.mxu0 %v1075_v8  ;;  %847 = vmatprep.subr.bf16.mxu1 %v1077_v9 }
  0x5f   : > { %751 = vmatmul.mubr.bf16.vlgmr.msra.gmra.mrb[0].mxu0 %v1458_v12  ;;  %794 = vmatmul.mubr.bf16.vlgmr.msra.gmra.mrb[0].mxu1 %v1458_v12 }
  0x60   : > { %805 = vmatpush1.bf16.msra.mxu0 %v1074_v15  ;;  %848 = vmatpush1.bf16.msra.mxu1 %v1076_v16 }
  0x61   : > { %806 = vmatprep.subr.bf16.mxu0 %v1083_v17  ;;  %849 = vmatprep.subr.bf16.mxu1 %v1085_v18 }
  0x62   : > { %836 = vmatprep.mubr.bf16.mxu0 %v1208_v0  ;;  %879 = vmatprep.mubr.bf16.mxu1 %v1208_v0  ;;  %v1100_v0 = vcombine.low %v343_v29, %v347_v30 }
  0x64   : > { %807 = vmatpush1.bf16.msra.mxu0 %v1082_v23  ;;  %850 = vmatpush1.bf16.msra.mxu1 %v1084_v24 }
  0x65   : > { %808 = vmatprep.subr.bf16.mxu0 %v1091_v25  ;;  %851 = vmatprep.subr.bf16.mxu1 %v1093_v26 }
  0x68   : > { %809 = vmatpush1.bf16.msra.mxu0 %v1090_v31  ;;  %852 = vmatpush1.bf16.msra.mxu1 %v1092_v32 }
  0x69   : > { %810 = vmatprep.subr.bf16.mxu0 %v1099_v33  ;;  %853 = vmatprep.subr.bf16.mxu1 %v1101_v34 }
  0x6c   : > { %811 = vmatpush1.bf16.msra.mxu0 %v1098_v39  ;;  %854 = vmatpush1.bf16.msra.mxu1 %v1100_v0 }
  0x6d   : > { %812 = vmatprep.subr.bf16.mxu0 %v1107_v40  ;;  %855 = vmatprep.subr.bf16.mxu1 %v1109_v41 }
  0x70   : > { %813 = vmatpush1.bf16.msra.mxu0 %v1106_v46  ;;  %856 = vmatpush1.bf16.msra.mxu1 %v1108_v47 }
  0x71   : > { %814 = vmatprep.subr.bf16.mxu0 %v1115_v48  ;;  %857 = vmatprep.subr.bf16.mxu1 %v1117_v49 }
  0x74   : > { %815 = vmatpush1.bf16.msra.mxu0 %v1114_v54  ;;  %858 = vmatpush1.bf16.msra.mxu1 %v1116_v55 }
  0x75   : > { %816 = vmatprep.subr.bf16.mxu0 %v1123_v56  ;;  %859 = vmatprep.subr.bf16.mxu1 %v1125_v57 }
  0x78   : > { %817 = vmatpush1.bf16.msra.mxu0 %v1122_v62  ;;  %860 = vmatpush1.bf16.msra.mxu1 %v1124_v63 }
  0x79   : > { %818 = vmatprep.subr.bf16.mxu0 %v1131_v1  ;;  %861 = vmatprep.subr.bf16.mxu1 %v1133_v2 }
  0x7c   : > { %819 = vmatpush1.bf16.msra.mxu0 %v1130_v3  ;;  %862 = vmatpush1.bf16.msra.mxu1 %v1132_v4 }
  0x7f   : > { %837 = vmatmul.mubr.bf16.vlgmr.msra.gmra.mrb[4].mxu0 %v1458_v12  ;;  %880 = vmatmul.mubr.bf16.vlgmr.msra.gmra.mrb[4].mxu1 %v1458_v12 }
  0xba   : > { %v385_v5 = vpop.permute.xlu0 %384 }
  0xc1   : > { %v390_v7 = vpop.permute.xlu0 %389 }
 0x132   : > { %v752_v6 = vpop.f32.mrb[0].mxu0  ;;  %v795_v9 = vpop.f32.mrb[0].mxu1 }
 0x133   : > { %v753_v8 = vadd.f32 %v752_v6, %v385_v5  ;;  %v754_v10 = vpop.f32.mrb[1].mxu0  ;;  %v796_v11 = vadd.f32 %v795_v9, %v385_v5  ;;  %v797_v14 = vpop.f32.mrb[1].mxu1 }
 0x134   : > { %v755_v13 = vadd.f32 %v754_v10, %v385_v5  ;;  %v756_v15 = vpop.f32.mrb[2].mxu0  ;;  %v798_v17 = vadd.f32 %v797_v14, %v385_v5  ;;  %v799_v19 = vpop.f32.mrb[2].mxu1 }
 0x135   : > { %v890_v16 = vmax.f32 %v753_v8, 0.0  ;;  %v757_v18 = vadd.f32 %v756_v15, %v390_v7  ;;  %v758_v20 = vpop.f32.mrb[3].mxu0  ;;  %v892_v21 = vmax.f32 %v796_v11, 0.0  ;;  %v800_v12 = vadd.f32 %v799_v19, %v390_v7  ;;  %v801_v24 = vpop.f32.mrb[3].mxu1 }
 0x136   : > { %v891_v22 = vmax.f32 %v755_v13, 0.0  ;;  %v759_v23 = vadd.f32 %v758_v20, %v390_v7  ;;  %v893_v25 = vmax.f32 %v798_v17, 0.0  ;;  %v802_v27 = vadd.f32 %v801_v24, %v390_v7 }
 0x137   : > { %v898_v26 = vmax.f32 %v757_v18, 0.0  ;;  %v900_v29 = vmax.f32 %v800_v12, 0.0 }
 0x138   : > { %v1148_v28 = vpack.c.bf16 %v891_v22, %v890_v16  ;;  %v899_v30 = vmax.f32 %v759_v23, 0.0  ;;  %v1149_v31 = vpack.c.bf16 %v893_v25, %v892_v21  ;;  %v901_v32 = vmax.f32 %v802_v27, 0.0 }
 0x13a   : > { %954 = vst [vmem:[%s1494_s11] sm:$0xff] %v1148_v28  ;;  %v1152_v33 = vpack.c.bf16 %v899_v30, %v898_v26  ;;  %955 = vst [vmem:[%s1494_s11 + $0x8] sm:$0xff] %v1149_v31  ;;  %v1153_v34 = vpack.c.bf16 %v901_v32, %v900_v29 }
 0x13c   : > { %958 = vst [vmem:[%s1494_s11 + $0x20] sm:$0xff] %v1152_v33  ;;  %959 = vst [vmem:[%s1494_s11 + $0x28] sm:$0xff] %v1153_v34 }
 0x141   : > { %v984_v62 = vld [vmem:[%s1494_s11] sm:$0xff] (%p1259_p5)  ;;  %v986_v63 = vld [vmem:[%s1494_s11 + $0x8] sm:$0xff] (%p1259_p5) }
 0x142   : > { %985 = vst [vmem:[%s971_s21] sm:$0xff] (%p1259_p5), %v984_v62  ;;  %987 = vst [vmem:[%s971_s21 + $0x8] sm:$0xff] (%p1259_p5), %v986_v63 }
 0x143   : > { %v992_v3 = vld [vmem:[%s1494_s11 + $0x20] sm:$0xff] (%p1259_p5)  ;;  %v994_v4 = vld [vmem:[%s1494_s11 + $0x28] sm:$0xff] (%p1259_p5) }
 0x144   : > { %993 = vst [vmem:[%s971_s21 + $0x40] sm:$0xff] (%p1259_p5), %v992_v3  ;;  %995 = vst [vmem:[%s971_s21 + $0x48] sm:$0xff] (%p1259_p5), %v994_v4 }
 0x152   : > { %v838_v35 = vpop.f32.mrb[4].mxu0  ;;  %v881_v37 = vpop.f32.mrb[4].mxu1 }
 0x153   : > { %v839_v36 = vadd.f32 %v838_v35, %v385_v5  ;;  %v840_v38 = vpop.f32.mrb[5].mxu0  ;;  %v882_v39 = vadd.f32 %v881_v37, %v385_v5  ;;  %v883_v40 = vpop.f32.mrb[5].mxu1 }
 0x154   : > { %v841_v0 = vadd.f32 %v840_v38, %v385_v5  ;;  %v842_v41 = vpop.f32.mrb[6].mxu0  ;;  %v884_v43 = vadd.f32 %v883_v40, %v385_v5  ;;  %v885_v45 = vpop.f32.mrb[6].mxu1 }
 0x155   : > { %v894_v42 = vmax.f32 %v839_v36, 0.0  ;;  %v843_v44 = vadd.f32 %v842_v41, %v390_v7  ;;  %v844_v46 = vpop.f32.mrb[7].mxu0  ;;  %v896_v47 = vmax.f32 %v882_v39, 0.0  ;;  %v886_v49 = vadd.f32 %v885_v45, %v390_v7  ;;  %v887_v51 = vpop.f32.mrb[7].mxu1 }
 0x156   : > { %v895_v48 = vmax.f32 %v841_v0, 0.0  ;;  %v845_v50 = vadd.f32 %v844_v46, %v390_v7  ;;  %v897_v52 = vmax.f32 %v884_v43, 0.0  ;;  %v888_v54 = vadd.f32 %v887_v51, %v390_v7  ;;  %968 = sbr.rel (!%p1259_p5) target bundleno = 357 (0x165), region = 59 }
 0x157   : > { %v902_v53 = vmax.f32 %v843_v44, 0.0  ;;  %v904_v56 = vmax.f32 %v886_v49, 0.0 }
 0x158   : > { %v1150_v55 = vpack.c.bf16 %v895_v48, %v894_v42  ;;  %v903_v57 = vmax.f32 %v845_v50, 0.0  ;;  %v1151_v58 = vpack.c.bf16 %v897_v52, %v896_v47  ;;  %v905_v59 = vmax.f32 %v888_v54, 0.0 }
 0x15a   : > { %956 = vst [vmem:[%s1494_s11 + $0x10] sm:$0xff] %v1150_v55  ;;  %v1154_v60 = vpack.c.bf16 %v903_v57, %v902_v53  ;;  %957 = vst [vmem:[%s1494_s11 + $0x18] sm:$0xff] %v1151_v58  ;;  %v1155_v61 = vpack.c.bf16 %v905_v59, %v904_v56 }
 0x15c   : > { %960 = vst [vmem:[%s1494_s11 + $0x30] sm:$0xff] %v1154_v60  ;;  %961 = vst [vmem:[%s1494_s11 + $0x38] sm:$0xff] %v1155_v61 }
 0x161   : > { %v988_v1 = vld [vmem:[%s1494_s11 + $0x10] sm:$0xff]  ;;  %v990_v2 = vld [vmem:[%s1494_s11 + $0x18] sm:$0xff] }
 0x162   : > { %989 = vst [vmem:[%s971_s21 + $0x10] sm:$0xff] %v988_v1  ;;  %991 = vst [vmem:[%s971_s21 + $0x18] sm:$0xff] %v990_v2 }
 0x163   : > { %v996_v5 = vld [vmem:[%s1494_s11 + $0x30] sm:$0xff]  ;;  %v998_v6 = vld [vmem:[%s1494_s11 + $0x38] sm:$0xff] }
 0x164   : > { %997 = vst [vmem:[%s971_s21 + $0x50] sm:$0xff] %v996_v5  ;;  %999 = vst [vmem:[%s971_s21 + $0x58] sm:$0xff] %v998_v6 }
 0x165 PF: > { %p10_p10 = scmp.ge.s32.totalorder %s1246_s16, 4   ;;  %s1534_s12 = smov %s1202_s13 }
 0x166   : > { %s1535_s13 = smov %s1257_s19  ;;  %s1536_s14 = smov %s1246_s16 }
 0x167   :  { %12 = sbr.rel (!%p10_p10) target bundleno = 2 (0x2), region = 113 }

// kernel: dca_forward.25
= control target key start
LH: loop header
LB: loop body
LE: loop exit
PB: predicated region body
PF: predicated region fallthrough
CT: control target
= control target key end

     0   :  { %s984_s12 = smov 0   ;;  %s986_s13 = smov 0   ;;  %s1174_s0 = inlined_call_operand.vmem [shape: bf16[32,256], index: 0, kind: input, shape index: {}]   ;;  %s1175_s1 = inlined_call_operand.vmem [shape: bf16[256,512], index: 1, kind: input, shape index: {}]   ;;  %s1176_s2 = inlined_call_operand.vmem [shape: f32[32,1], index: 2, kind: input, shape index: {}]   ;;  %s1177_s3 = inlined_call_operand.vmem [shape: bf16[32,512], index: 3, kind: output, shape index: {}]  }
   0x1   :  { %s988_s14 = smov 0  }
   0x2 LB: > { %s765_s15 = sadd.s32 4294967295, %s961_s14   ;;  %s1001_s16 = sadd.s32 1, %s961_s14   ;;  %s961_s14 = sphi %s988_s14, %s1181_s14   ;;  %s957_s13 = sphi %s986_s13, %s1180_s13   ;;  %s953_s12 = sphi %s984_s12, %s1179_s12  }
   0x3   : > { %s38_s17 = ssub.s32 %s961_s14, %s1001_s16  ;;  %s41_s18 = sadd.s32 1, %s957_s13 }
   0x4   : > { %p39_p0 = scmp.eq.s32.totalorder %s38_s17, 0  ;;  %p48_p1 = scmp.ne.s32.totalorder %s957_s13, %s953_s12 }
   0x5   : > { %p49_p2 = scmp.eq.s32.totalorder %s961_s14, 0  ;;  %p99_p3 = scmp.eq.s32.totalorder %s765_s15, 1 }
   0x6   : > { %s1012_s19 = scalar_select %p39_p0, %s957_s13, %s41_s18  }
   0x7   : > { %p50_p4 = por %p49_p2, %p48_p1  ;;  %p1014_p5 = por %p99_p3, %p48_p1 }
   0x8   : > { %p768_p6 = scmp.ge.s32.totalorder %s961_s14, 2 }
   0xa   : > { %127 = sbr.rel (%p768_p6) target bundleno = 37 (0x25), region = 24 }
  0x11   : > { %130 = sbr.rel (!%p50_p4) target bundleno = 37 (0x25), region = 28  ;;  %s132_s21 = sand.u32 (%p50_p4), 1, %s957_s13  }
  0x12   : > { %s820_s22 = sshll.u32 (%p50_p4), %s961_s14, 3  ;;  %s769_s23 = sshll.u32 (%p50_p4), %s132_s21, 8 }
  0x13   : > { %s1024_s26 = scalar_lea.vmem (%p50_p4), %s1175_s1, %s820_s22  ;;  %s1029_s27 = scalar_lea.vmem (%p50_p4), [#allocation2], %s769_s23 }
  0x14   : > { %v227_v0 = vld [vmem:[%s1024_s26] sm:$0xff] (%p50_p4)  ;;  %v229_v1 = vld [vmem:[%s1024_s26 + $0x10] sm:$0xff] (%p50_p4) }
  0x15   : > { %v231_v2 = vld [vmem:[%s1024_s26 + $0x20] sm:$0xff] (%p50_p4)  ;;  %228 = vst [vmem:[%s1029_s27] sm:$0xff] (%p50_p4), %v227_v0  ;;  %230 = vst [vmem:[%s1029_s27 + $0x8] sm:$0xff] (%p50_p4), %v229_v1  ;;  %v233_v3 = vld [vmem:[%s1024_s26 + $0x30] sm:$0xff] (%p50_p4) }
  0x16   : > { %232 = vst [vmem:[%s1029_s27 + $0x10] sm:$0xff] (%p50_p4), %v231_v2  ;;  %v235_v4 = vld [vmem:[%s1024_s26 + $0x40] sm:$0xff] (%p50_p4)  ;;  %v237_v5 = vld [vmem:[%s1024_s26 + $0x50] sm:$0xff] (%p50_p4)  ;;  %234 = vst [vmem:[%s1029_s27 + $0x18] sm:$0xff] (%p50_p4), %v233_v3 }
  0x17   : > { %236 = vst [vmem:[%s1029_s27 + $0x20] sm:$0xff] (%p50_p4), %v235_v4  ;;  %238 = vst [vmem:[%s1029_s27 + $0x28] sm:$0xff] (%p50_p4), %v237_v5  ;;  %v239_v6 = vld [vmem:[%s1024_s26 + $0x60] sm:$0xff] (%p50_p4)  ;;  %v241_v7 = vld [vmem:[%s1024_s26 + $0x70] sm:$0xff] (%p50_p4) }
  0x18   : > { %v243_v8 = vld [vmem:[%s1024_s26 + $0x80] sm:$0xff]  ;;  %240 = vst [vmem:[%s1029_s27 + $0x30] sm:$0xff] %v239_v6  ;;  %242 = vst [vmem:[%s1029_s27 + $0x38] sm:$0xff] %v241_v7  ;;  %v245_v9 = vld [vmem:[%s1024_s26 + $0x90] sm:$0xff] }
  0x19   : > { %244 = vst [vmem:[%s1029_s27 + $0x40] sm:$0xff] %v243_v8  ;;  %v247_v10 = vld [vmem:[%s1024_s26 + $0xa0] sm:$0xff]  ;;  %v249_v11 = vld [vmem:[%s1024_s26 + $0xb0] sm:$0xff]  ;;  %246 = vst [vmem:[%s1029_s27 + $0x48] sm:$0xff] %v245_v9 }
  0x1a   : > { %248 = vst [vmem:[%s1029_s27 + $0x50] sm:$0xff] %v247_v10  ;;  %250 = vst [vmem:[%s1029_s27 + $0x58] sm:$0xff] %v249_v11  ;;  %v251_v12 = vld [vmem:[%s1024_s26 + $0xc0] sm:$0xff]  ;;  %v253_v13 = vld [vmem:[%s1024_s26 + $0xd0] sm:$0xff] }
  0x1b   : > { %v255_v14 = vld [vmem:[%s1024_s26 + $0xe0] sm:$0xff]  ;;  %252 = vst [vmem:[%s1029_s27 + $0x60] sm:$0xff] %v251_v12  ;;  %254 = vst [vmem:[%s1029_s27 + $0x68] sm:$0xff] %v253_v13  ;;  %v257_v15 = vld [vmem:[%s1024_s26 + $0xf0] sm:$0xff] }
  0x1c   : > { %256 = vst [vmem:[%s1029_s27 + $0x70] sm:$0xff] %v255_v14  ;;  %v259_v16 = vld [vmem:[%s1024_s26 + $0x100] sm:$0xff]  ;;  %v261_v17 = vld [vmem:[%s1024_s26 + $0x110] sm:$0xff]  ;;  %258 = vst [vmem:[%s1029_s27 + $0x78] sm:$0xff] %v257_v15 }
  0x1d   : > { %260 = vst [vmem:[%s1029_s27 + $0x80] sm:$0xff] %v259_v16  ;;  %262 = vst [vmem:[%s1029_s27 + $0x88] sm:$0xff] %v261_v17  ;;  %v263_v18 = vld [vmem:[%s1024_s26 + $0x120] sm:$0xff]  ;;  %v265_v19 = vld [vmem:[%s1024_s26 + $0x130] sm:$0xff] }
  0x1e   : > { %v267_v20 = vld [vmem:[%s1024_s26 + $0x140] sm:$0xff]  ;;  %264 = vst [vmem:[%s1029_s27 + $0x90] sm:$0xff] %v263_v18  ;;  %266 = vst [vmem:[%s1029_s27 + $0x98] sm:$0xff] %v265_v19  ;;  %v269_v21 = vld [vmem:[%s1024_s26 + $0x150] sm:$0xff] }
  0x1f   : > { %268 = vst [vmem:[%s1029_s27 + $0xa0] sm:$0xff] %v267_v20  ;;  %v271_v22 = vld [vmem:[%s1024_s26 + $0x160] sm:$0xff]  ;;  %v273_v23 = vld [vmem:[%s1024_s26 + $0x170] sm:$0xff]  ;;  %270 = vst [vmem:[%s1029_s27 + $0xa8] sm:$0xff] %v269_v21 }
  0x20   : > { %272 = vst [vmem:[%s1029_s27 + $0xb0] sm:$0xff] %v271_v22  ;;  %274 = vst [vmem:[%s1029_s27 + $0xb8] sm:$0xff] %v273_v23  ;;  %v275_v24 = vld [vmem:[%s1024_s26 + $0x180] sm:$0xff]  ;;  %v277_v25 = vld [vmem:[%s1024_s26 + $0x190] sm:$0xff] }
  0x21   : > { %v279_v26 = vld [vmem:[%s1024_s26 + $0x1a0] sm:$0xff]  ;;  %276 = vst [vmem:[%s1029_s27 + $0xc0] sm:$0xff] %v275_v24  ;;  %278 = vst [vmem:[%s1029_s27 + $0xc8] sm:$0xff] %v277_v25  ;;  %v281_v27 = vld [vmem:[%s1024_s26 + $0x1b0] sm:$0xff] }
  0x22   : > { %280 = vst [vmem:[%s1029_s27 + $0xd0] sm:$0xff] %v279_v26  ;;  %v283_v28 = vld [vmem:[%s1024_s26 + $0x1c0] sm:$0xff]  ;;  %v285_v29 = vld [vmem:[%s1024_s26 + $0x1d0] sm:$0xff]  ;;  %282 = vst [vmem:[%s1029_s27 + $0xd8] sm:$0xff] %v281_v27 }
  0x23   : > { %284 = vst [vmem:[%s1029_s27 + $0xe0] sm:$0xff] %v283_v28  ;;  %286 = vst [vmem:[%s1029_s27 + $0xe8] sm:$0xff] %v285_v29  ;;  %v287_v30 = vld [vmem:[%s1024_s26 + $0x1e0] sm:$0xff]  ;;  %v289_v31 = vld [vmem:[%s1024_s26 + $0x1f0] sm:$0xff] }
  0x24   : > { %288 = vst [vmem:[%s1029_s27 + $0xf0] sm:$0xff] %v287_v30  ;;  %290 = vst [vmem:[%s1029_s27 + $0xf8] sm:$0xff] %v289_v31 }
  0x25 PF: > { %p772_p7 = scmp.ge.s32.totalorder %s961_s14, 1  ;;  %p295_p8 = scmp.lt.s32.totalorder %s961_s14, 3 }
  0x27   : > { %p296_p9 = pnand %p772_p7, %p295_p8 }
  0x28   : > { %s302_s28 = sand.u32 (!%p296_p9), 1, %s953_s12   ;;  %v935_v32 = vld [vmem:[%s1174_s0 + $0x4] ss:$8 sps:$4 sm:$0xff] (!%p296_p9)   ;;  %v963_v33 = vmov (!%p296_p9), 0   ;;  %v938_v34 = vld [vmem:[%s1174_s0 + $0x14] ss:$8 sps:$4 sm:$0xff] (!%p296_p9)  }
  0x29   : > { %299 = sbr.rel (%p296_p9) target bundleno = 338 (0x152), region = 66  ;;  %s773_s29 = sshll.u32 (!%p296_p9), %s302_s28, 8  ;;  %884 = vset.pattern.permute.xlu1 (!%p296_p9), %v963_v33  ;;  %883 = vset.pattern.permute.xlu0 (!%p296_p9), %v963_v33  ;;  %v364_v35 = vld [vmem:[%s1176_s2 + $0x10] sm:$0xff] (!%p296_p9)  ;;  %v362_v49 = vld [vmem:[%s1176_s2] sm:$0xff] (!%p296_p9)  ;;  %v365_v50 = vld [vmem:[%s1176_s2 + $0x18] sm:$0xff] (!%p296_p9) }
  0x2a   : > { %s1106_s9 = scalar_lea.vmem (!%p296_p9), [#allocation2], %s773_s29  ;;  %598 = vmatprep.mubr.bf16.mxu0 (!%p296_p9), %v935_v32  ;;  %378 = vperm.xlu1 (!%p296_p9), %884, %v364_v35   ;;  %v363_v52 = vld [vmem:[%s1176_s2 + $0x8] sm:$0xff] (!%p296_p9)  ;;  %v936_v8 = vld [vmem:[%s1174_s0 + $0x10] ss:$8 sps:$4 sm:$0xff] (!%p296_p9)   ;;  %s774_s27 = sshll.u32 (!%p296_p9), %s302_s28, 5 }
  0x2b   : > { %v885_v36 = vld [vmem:[%s1106_s9 + $0x4] ss:$8 sps:$4 sm:$0xff] (!%p296_p9)   ;;  %v887_v37 = vld [vmem:[%s1106_s9] ss:$8 sps:$4 sm:$0xff] (!%p296_p9)   ;;  %608 = vmatprep.mubr.bf16.mxu1 (!%p296_p9), %v938_v34  ;;  %v888_v38 = vld [vmem:[%s1106_s9 + $0x14] ss:$8 sps:$4 sm:$0xff] (!%p296_p9)   ;;  %368 = vperm.xlu0 (!%p296_p9), %883, %v362_v49  }
  0x2c   : > { %566 = vmatprep.subr.bf16.mxu0 (!%p296_p9), %v885_v36  ;;  %826 = vmatprep.subr.bf16.mxu1 (!%p296_p9), %v885_v36  ;;  %v890_v39 = vld [vmem:[%s1106_s9 + $0x10] ss:$8 sps:$4 sm:$0xff] (!%p296_p9)   ;;  %v891_v40 = vld [vmem:[%s1106_s9 + $0x24] ss:$8 sps:$4 sm:$0xff] (!%p296_p9)   ;;  %v893_v41 = vld [vmem:[%s1106_s9 + $0x20] ss:$8 sps:$4 sm:$0xff] (!%p296_p9)  }
  0x2d   : > { %567 = vmatpush1.bf16.msra.mxu0 (!%p296_p9), %v887_v37  ;;  %842 = vmatpush1.bf16.msra.mxu1 (!%p296_p9), %v887_v37  ;;  %v894_v42 = vld [vmem:[%s1106_s9 + $0x34] ss:$8 sps:$4 sm:$0xff] (!%p296_p9)   ;;  %v896_v43 = vld [vmem:[%s1106_s9 + $0x30] ss:$8 sps:$4 sm:$0xff] (!%p296_p9)   ;;  %v897_v44 = vld [vmem:[%s1106_s9 + $0x44] ss:$8 sps:$4 sm:$0xff] (!%p296_p9)  }
  0x2e   : > { %568 = vmatprep.subr.bf16.mxu0 (!%p296_p9), %v888_v38  ;;  %827 = vmatprep.subr.bf16.mxu1 (!%p296_p9), %v888_v38  ;;  %v899_v45 = vld [vmem:[%s1106_s9 + $0x40] ss:$8 sps:$4 sm:$0xff] (!%p296_p9)   ;;  %v900_v46 = vld [vmem:[%s1106_s9 + $0x54] ss:$8 sps:$4 sm:$0xff] (!%p296_p9)   ;;  %v902_v47 = vld [vmem:[%s1106_s9 + $0x50] ss:$8 sps:$4 sm:$0xff] (!%p296_p9)  }
  0x2f   : > { %v903_v48 = vld [vmem:[%s1106_s9 + $0x64] ss:$8 sps:$4 sm:$0xff] (!%p296_p9)   ;;  %383 = vperm.xlu1 (!%p296_p9), %884, %v365_v50   ;;  %v905_v51 = vld [vmem:[%s1106_s9 + $0x60] ss:$8 sps:$4 sm:$0xff] (!%p296_p9)   ;;  %v906_v53 = vld [vmem:[%s1106_s9 + $0x74] ss:$8 sps:$4 sm:$0xff] (!%p296_p9)   ;;  %373 = vperm.xlu0 (!%p296_p9), %883, %v363_v52  }
  0x30   : > { %v908_v54 = vld [vmem:[%s1106_s9 + $0x70] ss:$8 sps:$4 sm:$0xff]   ;;  %v909_v55 = vld [vmem:[%s1106_s9 + $0x84] ss:$8 sps:$4 sm:$0xff]   ;;  %v911_v56 = vld [vmem:[%s1106_s9 + $0x80] ss:$8 sps:$4 sm:$0xff]  }
  0x31   : > { %569 = vmatpush1.bf16.msra.mxu0 %v890_v39  ;;  %843 = vmatpush1.bf16.msra.mxu1 %v890_v39  ;;  %v912_v57 = vld [vmem:[%s1106_s9 + $0x94] ss:$8 sps:$4 sm:$0xff]   ;;  %v914_v58 = vld [vmem:[%s1106_s9 + $0x90] ss:$8 sps:$4 sm:$0xff]   ;;  %v915_v59 = vld [vmem:[%s1106_s9 + $0xa4] ss:$8 sps:$4 sm:$0xff]  }
  0x32   : > { %570 = vmatprep.subr.bf16.mxu0 %v891_v40  ;;  %828 = vmatprep.subr.bf16.mxu1 %v891_v40  ;;  %v917_v60 = vld [vmem:[%s1106_s9 + $0xa0] ss:$8 sps:$4 sm:$0xff]   ;;  %v918_v61 = vld [vmem:[%s1106_s9 + $0xb4] ss:$8 sps:$4 sm:$0xff]   ;;  %v920_v62 = vld [vmem:[%s1106_s9 + $0xb0] ss:$8 sps:$4 sm:$0xff]  }
  0x33   : > { %v921_v63 = vld [vmem:[%s1106_s9 + $0xc4] ss:$8 sps:$4 sm:$0xff]   ;;  %v923_v0 = vld [vmem:[%s1106_s9 + $0xc0] ss:$8 sps:$4 sm:$0xff]   ;;  %v924_v1 = vld [vmem:[%s1106_s9 + $0xd4] ss:$8 sps:$4 sm:$0xff]  }
  0x34   : > { %v926_v2 = vld [vmem:[%s1106_s9 + $0xd0] ss:$8 sps:$4 sm:$0xff]   ;;  %v927_v3 = vld [vmem:[%s1106_s9 + $0xe4] ss:$8 sps:$4 sm:$0xff]   ;;  %v929_v4 = vld [vmem:[%s1106_s9 + $0xe0] ss:$8 sps:$4 sm:$0xff]  }
  0x35   : > { %571 = vmatpush1.bf16.msra.mxu0 %v893_v41  ;;  %844 = vmatpush1.bf16.msra.mxu1 %v893_v41  ;;  %v930_v5 = vld [vmem:[%s1106_s9 + $0xf4] ss:$8 sps:$4 sm:$0xff]   ;;  %v932_v6 = vld [vmem:[%s1106_s9 + $0xf0] ss:$8 sps:$4 sm:$0xff]   ;;  %v933_v7 = vld [vmem:[%s1174_s0] ss:$8 sps:$4 sm:$0xff]  }
  0x36   : > { %572 = vmatprep.subr.bf16.mxu0 %v894_v42  ;;  %829 = vmatprep.subr.bf16.mxu1 %v894_v42  ;;  %s323_s12 = scalar_lea.vmem [#allocation3], %s774_s27  ;;  %s825_s28 = sshll.u32 (%p1014_p5), %s765_s15, 3 }
  0x37   : > { %s664_s4 = scalar_lea.vmem (%p1014_p5), %s1177_s3, %s825_s28 }
  0x39   : > { %573 = vmatpush1.bf16.msra.mxu0 %v896_v43  ;;  %845 = vmatpush1.bf16.msra.mxu1 %v896_v43 }
  0x3a   : > { %574 = vmatprep.subr.bf16.mxu0 %v897_v44  ;;  %830 = vmatprep.subr.bf16.mxu1 %v897_v44 }
  0x3d   : > { %575 = vmatpush1.bf16.msra.mxu0 %v899_v45  ;;  %846 = vmatpush1.bf16.msra.mxu1 %v899_v45 }
  0x3e   : > { %576 = vmatprep.subr.bf16.mxu0 %v900_v46  ;;  %831 = vmatprep.subr.bf16.mxu1 %v900_v46 }
  0x41   : > { %577 = vmatpush1.bf16.msra.mxu0 %v902_v47  ;;  %847 = vmatpush1.bf16.msra.mxu1 %v902_v47 }
  0x42   : > { %578 = vmatprep.subr.bf16.mxu0 %v903_v48  ;;  %832 = vmatprep.subr.bf16.mxu1 %v903_v48 }
  0x45   : > { %579 = vmatpush1.bf16.msra.mxu0 %v905_v51  ;;  %848 = vmatpush1.bf16.msra.mxu1 %v905_v51 }
  0x46   : > { %580 = vmatprep.subr.bf16.mxu0 %v906_v53  ;;  %833 = vmatprep.subr.bf16.mxu1 %v906_v53 }
  0x49   : > { %581 = vmatpush1.bf16.msra.mxu0 %v908_v54  ;;  %849 = vmatpush1.bf16.msra.mxu1 %v908_v54 }
  0x4a   : > { %582 = vmatprep.subr.bf16.mxu0 %v909_v55  ;;  %834 = vmatprep.subr.bf16.mxu1 %v909_v55 }
  0x4d   : > { %583 = vmatpush1.bf16.msra.mxu0 %v911_v56  ;;  %850 = vmatpush1.bf16.msra.mxu1 %v911_v56 }
  0x4e   : > { %584 = vmatprep.subr.bf16.mxu0 %v912_v57  ;;  %835 = vmatprep.subr.bf16.mxu1 %v912_v57 }
  0x51   : > { %585 = vmatpush1.bf16.msra.mxu0 %v914_v58  ;;  %851 = vmatpush1.bf16.msra.mxu1 %v914_v58 }
  0x52   : > { %586 = vmatprep.subr.bf16.mxu0 %v915_v59  ;;  %836 = vmatprep.subr.bf16.mxu1 %v915_v59 }
  0x55   : > { %587 = vmatpush1.bf16.msra.mxu0 %v917_v60  ;;  %852 = vmatpush1.bf16.msra.mxu1 %v917_v60 }
  0x56   : > { %588 = vmatprep.subr.bf16.mxu0 %v918_v61  ;;  %837 = vmatprep.subr.bf16.mxu1 %v918_v61 }
  0x59   : > { %589 = vmatpush1.bf16.msra.mxu0 %v920_v62  ;;  %853 = vmatpush1.bf16.msra.mxu1 %v920_v62 }
  0x5a   : > { %590 = vmatprep.subr.bf16.mxu0 %v921_v63  ;;  %838 = vmatprep.subr.bf16.mxu1 %v921_v63 }
  0x5d   : > { %591 = vmatpush1.bf16.msra.mxu0 %v923_v0  ;;  %854 = vmatpush1.bf16.msra.mxu1 %v923_v0 }
  0x5e   : > { %592 = vmatprep.subr.bf16.mxu0 %v924_v1  ;;  %839 = vmatprep.subr.bf16.mxu1 %v924_v1 }
  0x61   : > { %593 = vmatpush1.bf16.msra.mxu0 %v926_v2  ;;  %855 = vmatpush1.bf16.msra.mxu1 %v926_v2 }
  0x62   : > { %594 = vmatprep.subr.bf16.mxu0 %v927_v3  ;;  %840 = vmatprep.subr.bf16.mxu1 %v927_v3 }
  0x65   : > { %595 = vmatpush1.bf16.msra.mxu0 %v929_v4  ;;  %856 = vmatpush1.bf16.msra.mxu1 %v929_v4 }
  0x66   : > { %596 = vmatprep.subr.bf16.mxu0 %v930_v5  ;;  %841 = vmatprep.subr.bf16.mxu1 %v930_v5 }
  0x69   : > { %597 = vmatpush1.bf16.msra.mxu0 %v932_v6  ;;  %857 = vmatpush1.bf16.msra.mxu1 %v932_v6 }
  0x6c   : > { %599 = vmatmul.mubr.bf16.vlgmr.msra.gmra.mrb[0].mxu0 %v933_v7  ;;  %609 = vmatmul.mubr.bf16.vlgmr.msra.gmra.mrb[0].mxu1 %v936_v8 }
  0xa9   : > { %v379_v9 = vpop.permute.xlu1 %378 }
  0xaa   : > { %v369_v10 = vpop.permute.xlu0 %368 }
  0xae   : > { %v384_v11 = vpop.permute.xlu1 %383  ;;  %v374_v12 = vpop.permute.xlu0 %373 }
 0x13f   : > { %v600_v13 = vpop.f32.mrb[0].mxu0  ;;  %v610_v14 = vpop.f32.mrb[0].mxu1 }
 0x140   : > { %v601_v15 = vadd.f32 %v600_v13, %v369_v10  ;;  %v611_v16 = vadd.f32 %v610_v14, %v379_v9  ;;  %v602_v17 = vpop.f32.mrb[1].mxu0  ;;  %v612_v18 = vpop.f32.mrb[1].mxu1 }
 0x141   : > { %v603_v19 = vadd.f32 %v602_v17, %v369_v10  ;;  %v613_v20 = vadd.f32 %v612_v18, %v379_v9  ;;  %v604_v21 = vpop.f32.mrb[2].mxu0  ;;  %v614_v22 = vpop.f32.mrb[2].mxu1 }
 0x142   : > { %v619_v23 = vmax.f32 %v601_v15, 0.0  ;;  %v623_v24 = vmax.f32 %v611_v16, 0.0  ;;  %v605_v25 = vadd.f32 %v604_v21, %v374_v12  ;;  %v615_v26 = vadd.f32 %v614_v22, %v384_v11  ;;  %v606_v27 = vpop.f32.mrb[3].mxu0  ;;  %v616_v28 = vpop.f32.mrb[3].mxu1 }
 0x143   : > { %v620_v29 = vmax.f32 %v603_v19, 0.0  ;;  %v624_v30 = vmax.f32 %v613_v20, 0.0  ;;  %v607_v31 = vadd.f32 %v606_v27, %v374_v12  ;;  %v617_v32 = vadd.f32 %v616_v28, %v384_v11  ;;  %661 = sbr.rel (!%p1014_p5) target bundleno = 338 (0x152), region = 74 }
 0x144   : > { %v621_v33 = vmax.f32 %v605_v25, 0.0  ;;  %v625_v34 = vmax.f32 %v615_v26, 0.0 }
 0x145   : > { %v821_v35 = vpack.c.bf16 %v620_v29, %v619_v23  ;;  %v823_v36 = vpack.c.bf16 %v624_v30, %v623_v24  ;;  %v622_v37 = vmax.f32 %v607_v31, 0.0  ;;  %v626_v38 = vmax.f32 %v617_v32, 0.0 }
 0x147   : > { %651 = vst [vmem:[%s323_s12] sm:$0xff] %v821_v35  ;;  %653 = vst [vmem:[%s323_s12 + $0x10] sm:$0xff] %v823_v36  ;;  %v822_v39 = vpack.c.bf16 %v622_v37, %v621_v33  ;;  %v824_v40 = vpack.c.bf16 %v626_v38, %v625_v34 }
 0x149   : > { %652 = vst [vmem:[%s323_s12 + $0x8] sm:$0xff] %v822_v39  ;;  %654 = vst [vmem:[%s323_s12 + $0x18] sm:$0xff] %v824_v40 }
 0x14e   : > { %v698_v41 = vld [vmem:[%s323_s12] sm:$0xff]  ;;  %v702_v43 = vld [vmem:[%s323_s12 + $0x10] sm:$0xff] }
 0x14f   : > { %699 = vst [vmem:[%s664_s4] sm:$0xff] %v698_v41  ;;  %703 = vst [vmem:[%s664_s4 + $0x20] sm:$0xff] %v702_v43 }
 0x150   : > { %v700_v42 = vld [vmem:[%s323_s12 + $0x8] sm:$0xff]  ;;  %v704_v44 = vld [vmem:[%s323_s12 + $0x18] sm:$0xff] }
 0x151   : > { %701 = vst [vmem:[%s664_s4 + $0x10] sm:$0xff] %v700_v42  ;;  %705 = vst [vmem:[%s664_s4 + $0x30] sm:$0xff] %v704_v44 }
 0x152 PF: > { %p10_p10 = scmp.ge.s32.totalorder %s1001_s16, 4   ;;  %s1179_s12 = smov %s957_s13 }
 0x153   : > { %s1180_s13 = smov %s1012_s19  ;;  %s1181_s14 = smov %s1001_s16 }
 0x154   :  { %12 = sbr.rel (!%p10_p10) target bundleno = 2 (0x2), region = 143 }

// kernel: dca_forward.26
= control target key start
LH: loop header
LB: loop body
LE: loop exit
PB: predicated region body
PF: predicated region fallthrough
CT: control target
= control target key end

     0   :  { %v631_v1 = vmov 0   ;;  %s790_s1 = inlined_call_operand.vmem [shape: bf16[512,128], index: 1, kind: input, shape index: {}]   ;;  %s791_s0 = inlined_call_operand.vmem [shape: bf16[32,512], index: 0, kind: input, shape index: {}]   ;;  %s792_s2 = inlined_call_operand.vmem [shape: f32[32,1], index: 2, kind: input, shape index: {}]   ;;  %s793_s3 = inlined_call_operand.vmem [shape: bf16[32,128], index: 3, kind: output, shape index: {}]  }
   0x1   :  { %v587_v0 = vld [vmem:[%s790_s1 + $0x40] sm:$0xff]   ;;  %585 = vset.pattern.permute.xlu0 %v631_v1  ;;  %586 = vset.pattern.permute.xlu1 %v631_v1  ;;  %v591_v5 = vld [vmem:[%s790_s1 + $0x48] sm:$0xff]   ;;  %v595_v9 = vld [vmem:[%s790_s1 + $0x50] sm:$0xff]  }
   0x2   :  { %v588_v2 = vld [vmem:[%s790_s1 + $0xc0] sm:$0xff]   ;;  %528 = vmatprep.subr.bf16.mxu0 %v587_v0  ;;  %v592_v6 = vld [vmem:[%s790_s1 + $0xc8] sm:$0xff]   ;;  %v596_v10 = vld [vmem:[%s790_s1 + $0xd0] sm:$0xff]  }
   0x3   :  { %v589_v3 = vld [vmem:[%s790_s1] sm:$0xff]   ;;  %556 = vmatprep.subr.bf16.mxu1 %v588_v2  ;;  %v593_v7 = vld [vmem:[%s790_s1 + $0x8] sm:$0xff]   ;;  %v597_v11 = vld [vmem:[%s790_s1 + $0x10] sm:$0xff]  }
   0x4   :  { %v590_v4 = vld [vmem:[%s790_s1 + $0x80] sm:$0xff]   ;;  %529 = vmatpush3.bf16.msra.mxu0 %v589_v3  ;;  %v594_v8 = vld [vmem:[%s790_s1 + $0x88] sm:$0xff]   ;;  %v598_v12 = vld [vmem:[%s790_s1 + $0x90] sm:$0xff]  }
   0x5   :  { %557 = vmatpush3.bf16.msra.mxu1 %v590_v4  ;;  %530 = vmatprep.subr.bf16.mxu0 %v591_v5  ;;  %v599_v13 = vld [vmem:[%s790_s1 + $0x58] sm:$0xff]   ;;  %v603_v17 = vld [vmem:[%s790_s1 + $0x60] sm:$0xff]   ;;  %v607_v21 = vld [vmem:[%s790_s1 + $0x68] sm:$0xff]  }
   0x6   :  { %558 = vmatprep.subr.bf16.mxu1 %v592_v6  ;;  %v600_v14 = vld [vmem:[%s790_s1 + $0xd8] sm:$0xff]   ;;  %v604_v18 = vld [vmem:[%s790_s1 + $0xe0] sm:$0xff]   ;;  %v608_v22 = vld [vmem:[%s790_s1 + $0xe8] sm:$0xff]  }
   0x7   :  { %v601_v15 = vld [vmem:[%s790_s1 + $0x18] sm:$0xff]   ;;  %v605_v19 = vld [vmem:[%s790_s1 + $0x20] sm:$0xff]   ;;  %v609_v23 = vld [vmem:[%s790_s1 + $0x28] sm:$0xff]  }
   0x8   :  { %531 = vmatpush3.bf16.msra.mxu0 %v593_v7  ;;  %v602_v16 = vld [vmem:[%s790_s1 + $0x98] sm:$0xff]   ;;  %v606_v20 = vld [vmem:[%s790_s1 + $0xa0] sm:$0xff]   ;;  %v610_v24 = vld [vmem:[%s790_s1 + $0xa8] sm:$0xff]  }
   0x9   :  { %559 = vmatpush3.bf16.msra.mxu1 %v594_v8  ;;  %532 = vmatprep.subr.bf16.mxu0 %v595_v9  ;;  %v611_v25 = vld [vmem:[%s790_s1 + $0x70] sm:$0xff]   ;;  %v615_v29 = vld [vmem:[%s790_s1 + $0x78] sm:$0xff]   ;;  %v87_v39 = vld [vmem:[%s792_s2] sm:$0xff] }
   0xa   :  { %560 = vmatprep.subr.bf16.mxu1 %v596_v10  ;;  %v612_v26 = vld [vmem:[%s790_s1 + $0xf0] sm:$0xff]   ;;  %v616_v30 = vld [vmem:[%s790_s1 + $0xf8] sm:$0xff]   ;;  %93 = vperm.xlu0 %585, %v87_v39   ;;  %v88_v41 = vld [vmem:[%s792_s2 + $0x8] sm:$0xff] }
   0xb   :  { %v613_v27 = vld [vmem:[%s790_s1 + $0x30] sm:$0xff]   ;;  %v617_v31 = vld [vmem:[%s790_s1 + $0x38] sm:$0xff]  }
   0xc   :  { %533 = vmatpush3.bf16.msra.mxu0 %v597_v11  ;;  %v614_v28 = vld [vmem:[%s790_s1 + $0xb0] sm:$0xff]   ;;  %v618_v32 = vld [vmem:[%s790_s1 + $0xb8] sm:$0xff]  }
   0xd   :  { %561 = vmatpush3.bf16.msra.mxu1 %v598_v12  ;;  %534 = vmatprep.subr.bf16.mxu0 %v599_v13  ;;  %v619_v33 = vld [vmem:[%s791_s0] ss:$16 sps:$4 sm:$0xff]   ;;  %v621_v34 = vld [vmem:[%s791_s0 + $0x4] ss:$16 sps:$4 sm:$0xff]   ;;  %v622_v35 = vld [vmem:[%s791_s0 + $0x8] ss:$16 sps:$4 sm:$0xff]  }
   0xe   :  { %562 = vmatprep.subr.bf16.mxu1 %v600_v14  ;;  %v624_v36 = vld [vmem:[%s791_s0 + $0xc] ss:$16 sps:$4 sm:$0xff]   ;;  %375 = vmatprep.mubr.bf16.mxu0 %v621_v34  ;;  %v625_v37 = vld [vmem:[%s791_s0 + $0x24] ss:$16 sps:$4 sm:$0xff]   ;;  %v629_v42 = vld [vmem:[%s791_s0 + $0x20] ss:$16 sps:$4 sm:$0xff]  }
   0xf   :  { %424 = vmatprep.mubr.bf16.mxu1 %v624_v36  ;;  %v627_v38 = vld [vmem:[%s791_s0 + $0x2c] ss:$16 sps:$4 sm:$0xff]   ;;  %v89_v40 = vld [vmem:[%s792_s2 + $0x10] sm:$0xff]  ;;  %v630_v44 = vld [vmem:[%s791_s0 + $0x28] ss:$16 sps:$4 sm:$0xff]   ;;  %98 = vperm.xlu0 %585, %v88_v41  }
  0x10   :  { %535 = vmatpush3.bf16.msra.mxu0 %v601_v15  ;;  %103 = vperm.xlu1 %586, %v89_v40   ;;  %v90_v43 = vld [vmem:[%s792_s2 + $0x18] sm:$0xff] }
  0x11   :  { %563 = vmatpush3.bf16.msra.mxu1 %v602_v16  ;;  %536 = vmatprep.subr.bf16.mxu0 %v603_v17 }
  0x12   :  { %564 = vmatprep.subr.bf16.mxu1 %v604_v18 }
  0x14   :  { %537 = vmatpush3.bf16.msra.mxu0 %v605_v19  ;;  %108 = vperm.xlu1 %586, %v90_v43  }
  0x15   :  { %565 = vmatpush3.bf16.msra.mxu1 %v606_v20  ;;  %538 = vmatprep.subr.bf16.mxu0 %v607_v21 }
  0x16   :  { %566 = vmatprep.subr.bf16.mxu1 %v608_v22 }
  0x18   :  { %539 = vmatpush3.bf16.msra.mxu0 %v609_v23 }
  0x19   :  { %567 = vmatpush3.bf16.msra.mxu1 %v610_v24  ;;  %540 = vmatprep.subr.bf16.mxu0 %v611_v25 }
  0x1a   :  { %568 = vmatprep.subr.bf16.mxu1 %v612_v26 }
  0x1c   :  { %541 = vmatpush3.bf16.msra.mxu0 %v613_v27 }
  0x1d   :  { %569 = vmatpush3.bf16.msra.mxu1 %v614_v28  ;;  %542 = vmatprep.subr.bf16.mxu0 %v615_v29 }
  0x1e   :  { %570 = vmatprep.subr.bf16.mxu1 %v616_v30 }
  0x20   :  { %543 = vmatpush3.bf16.msra.mxu0 %v617_v31 }
  0x21   :  { %571 = vmatpush3.bf16.msra.mxu1 %v618_v32 }
  0x23   :  { %376 = vmatmul.mubr.bf16.vlgmr.msra.gmra.mrb[0].mxu0 %v619_v33 }
  0x24   :  { %425 = vmatmul.mubr.bf16.vlgmr.msra.gmra.mrb[0].mxu1 %v622_v35  ;;  %383 = vmatprep.mubr.bf16.mxu0 %v625_v37 }
  0x25   :  { %432 = vmatprep.mubr.bf16.mxu1 %v627_v38 }
  0x2b   :  { %384 = vmatmul.mubr.bf16.gmra.mrb[4].mxu0 %v629_v42 }
  0x2c   :  { %433 = vmatmul.mubr.bf16.gmra.mrb[4].mxu1 %v630_v44 }
  0x89   :  { %v94_v45 = vpop.permute.xlu0 %93 }
  0x8e   :  { %v99_v47 = vpop.permute.xlu0 %98 }
  0x8f   :  { %v104_v62 = vpop.permute.xlu1 %103 }
  0x93   :  { %v109_v15 = vpop.permute.xlu1 %108 }
  0xf6   :  { %v544_v46 = vpop.f32.mrb[0].mxu0 }
  0xf7   :  { %v572_v48 = vpop.f32.mrb[0].mxu1  ;;  %v545_v49 = vpop.f32.mrb[1].mxu0 }
  0xf8   :  { %v546_v50 = vadd.f32 %v545_v49, %v544_v46  ;;  %v573_v51 = vpop.f32.mrb[1].mxu1  ;;  %v547_v52 = vpop.f32.mrb[2].mxu0 }
  0xf9   :  { %v574_v53 = vadd.f32 %v573_v51, %v572_v48  ;;  %v575_v54 = vpop.f32.mrb[2].mxu1  ;;  %v548_v55 = vpop.f32.mrb[3].mxu0 }
  0xfa   :  { %v378_v56 = vadd.f32 %v546_v50, %v94_v45  ;;  %v549_v57 = vadd.f32 %v548_v55, %v547_v52  ;;  %v576_v58 = vpop.f32.mrb[3].mxu1 }
  0xfb   :  { %v577_v59 = vadd.f32 %v576_v58, %v575_v54 }
  0xfc   :  { %v427_v60 = vadd.f32 %v574_v53, %v378_v56  ;;  %v381_v61 = vadd.f32 %v549_v57, %v99_v47 }
  0xfe   :  { %v430_v63 = vadd.f32 %v577_v59, %v381_v61  ;;  %v550_v0 = vpop.f32.mrb[4].mxu0  ;;  %v441_v3 = vmax.f32 %v427_v60, 0.0 }
  0xff   :  { %v578_v1 = vpop.f32.mrb[4].mxu1  ;;  %v551_v2 = vpop.f32.mrb[5].mxu0 }
 0x100   :  { %v442_v4 = vmax.f32 %v430_v63, 0.0  ;;  %v552_v5 = vadd.f32 %v551_v2, %v550_v0  ;;  %v579_v6 = vpop.f32.mrb[5].mxu1  ;;  %v553_v7 = vpop.f32.mrb[6].mxu0 }
 0x101   :  { %v580_v8 = vadd.f32 %v579_v6, %v578_v1  ;;  %v581_v9 = vpop.f32.mrb[6].mxu1  ;;  %v554_v10 = vpop.f32.mrb[7].mxu0 }
 0x102   :  { %v520_v11 = vpack.c.bf16 %v442_v4, %v441_v3  ;;  %v386_v12 = vadd.f32 %v552_v5, %v104_v62  ;;  %v555_v13 = vadd.f32 %v554_v10, %v553_v7  ;;  %v582_v14 = vpop.f32.mrb[7].mxu1 }
 0x103   :  { %v583_v16 = vadd.f32 %v582_v14, %v581_v9 }
 0x104   :  { %521 = vst [vmem:[%s793_s3] sm:$0xff] %v520_v11   ;;  %v435_v17 = vadd.f32 %v580_v8, %v386_v12  ;;  %v389_v18 = vadd.f32 %v555_v13, %v109_v15 }
 0x106   :  { %v438_v19 = vadd.f32 %v583_v16, %v389_v18  ;;  %v443_v20 = vmax.f32 %v435_v17, 0.0 }
 0x108   :  { %v444_v21 = vmax.f32 %v438_v19, 0.0 }
 0x10a   :  { %v525_v22 = vpack.c.bf16 %v444_v21, %v443_v20 }
 0x10c   :  { %527 = vst [vmem:[%s793_s3 + $0x8] sm:$0xff] %v525_v22  }

// kernel: dca_forward.27
= control target key start
LH: loop header
LB: loop body
LE: loop exit
PB: predicated region body
PF: predicated region fallthrough
CT: control target
= control target key end

     0   :  { %v793_v1 = vmov 0   ;;  %vm577_vm0 = vcmask 404480   ;;  %s1014_s1 = inlined_call_operand.vmem [shape: bf16[512,50], index: 1, kind: input, shape index: {}]   ;;  %s1015_s0 = inlined_call_operand.vmem [shape: bf16[64,512], index: 0, kind: input, shape index: {}]   ;;  %s1016_s2 = inlined_call_operand.vmem [shape: f32[64,1], index: 2, kind: input, shape index: {}]   ;;  %s1017_s3 = inlined_call_operand.vmem [shape: bf16[64,50], index: 3, kind: output, shape index: {}]  }
   0x1   :  { %v737_v0 = vld [vmem:[%s1014_s1 + $0x40] sm:$0xff]   ;;  %735 = vset.pattern.permute.xlu0 %v793_v1  ;;  %736 = vset.pattern.permute.xlu1 %v793_v1  ;;  %v741_v5 = vld [vmem:[%s1014_s1 + $0x48] sm:$0xff]   ;;  %v745_v9 = vld [vmem:[%s1014_s1 + $0x50] sm:$0xff]  }
   0x2   :  { %v738_v2 = vld [vmem:[%s1014_s1 + $0xc0] sm:$0xff]   ;;  %654 = vmatprep.subr.bf16.mxu0 %v737_v0  ;;  %v742_v6 = vld [vmem:[%s1014_s1 + $0xc8] sm:$0xff]   ;;  %v746_v10 = vld [vmem:[%s1014_s1 + $0xd0] sm:$0xff]  }
   0x3   :  { %v739_v3 = vld [vmem:[%s1014_s1] sm:$0xff]   ;;  %694 = vmatprep.subr.bf16.mxu1 %v738_v2  ;;  %v743_v7 = vld [vmem:[%s1014_s1 + $0x8] sm:$0xff]   ;;  %v747_v11 = vld [vmem:[%s1014_s1 + $0x10] sm:$0xff]  }
   0x4   :  { %v740_v4 = vld [vmem:[%s1014_s1 + $0x80] sm:$0xff]   ;;  %655 = vmatpush3.bf16.msra.mxu0 %v739_v3  ;;  %v744_v8 = vld [vmem:[%s1014_s1 + $0x88] sm:$0xff]   ;;  %v748_v12 = vld [vmem:[%s1014_s1 + $0x90] sm:$0xff]  }
   0x5   :  { %695 = vmatpush3.bf16.msra.mxu1 %v740_v4  ;;  %656 = vmatprep.subr.bf16.mxu0 %v741_v5  ;;  %v749_v13 = vld [vmem:[%s1014_s1 + $0x58] sm:$0xff]   ;;  %v753_v17 = vld [vmem:[%s1014_s1 + $0x60] sm:$0xff]   ;;  %v757_v21 = vld [vmem:[%s1014_s1 + $0x68] sm:$0xff]  }
   0x6   :  { %696 = vmatprep.subr.bf16.mxu1 %v742_v6  ;;  %v750_v14 = vld [vmem:[%s1014_s1 + $0xd8] sm:$0xff]   ;;  %v754_v18 = vld [vmem:[%s1014_s1 + $0xe0] sm:$0xff]   ;;  %v758_v22 = vld [vmem:[%s1014_s1 + $0xe8] sm:$0xff]  }
   0x7   :  { %v751_v15 = vld [vmem:[%s1014_s1 + $0x18] sm:$0xff]   ;;  %v755_v19 = vld [vmem:[%s1014_s1 + $0x20] sm:$0xff]   ;;  %v759_v23 = vld [vmem:[%s1014_s1 + $0x28] sm:$0xff]  }
   0x8   :  { %657 = vmatpush3.bf16.msra.mxu0 %v743_v7  ;;  %v752_v16 = vld [vmem:[%s1014_s1 + $0x98] sm:$0xff]   ;;  %v756_v20 = vld [vmem:[%s1014_s1 + $0xa0] sm:$0xff]   ;;  %v760_v24 = vld [vmem:[%s1014_s1 + $0xa8] sm:$0xff]  }
   0x9   :  { %697 = vmatpush3.bf16.msra.mxu1 %v744_v8  ;;  %658 = vmatprep.subr.bf16.mxu0 %v745_v9  ;;  %v761_v25 = vld [vmem:[%s1014_s1 + $0x70] sm:$0xff]   ;;  %v765_v29 = vld [vmem:[%s1014_s1 + $0x78] sm:$0xff]   ;;  %v95_v43 = vld [vmem:[%s1016_s2] sm:$0xff] }
   0xa   :  { %698 = vmatprep.subr.bf16.mxu1 %v746_v10  ;;  %v762_v26 = vld [vmem:[%s1014_s1 + $0xf0] sm:$0xff]   ;;  %v766_v30 = vld [vmem:[%s1014_s1 + $0xf8] sm:$0xff]   ;;  %105 = vperm.xlu0 %735, %v95_v43   ;;  %v96_v45 = vld [vmem:[%s1016_s2 + $0x8] sm:$0xff] }
   0xb   :  { %v763_v27 = vld [vmem:[%s1014_s1 + $0x30] sm:$0xff]   ;;  %v767_v31 = vld [vmem:[%s1014_s1 + $0x38] sm:$0xff]   ;;  %v99_v48 = vld [vmem:[%s1016_s2 + $0x20] sm:$0xff] }
   0xc   :  { %659 = vmatpush3.bf16.msra.mxu0 %v747_v11  ;;  %v764_v28 = vld [vmem:[%s1014_s1 + $0xb0] sm:$0xff]   ;;  %v768_v32 = vld [vmem:[%s1014_s1 + $0xb8] sm:$0xff]   ;;  %v100_v51 = vld [vmem:[%s1016_s2 + $0x28] sm:$0xff] }
   0xd   :  { %699 = vmatpush3.bf16.msra.mxu1 %v748_v12  ;;  %660 = vmatprep.subr.bf16.mxu0 %v749_v13  ;;  %v769_v33 = vld [vmem:[%s1015_s0] ss:$16 sps:$4 sm:$0xff]   ;;  %v771_v34 = vld [vmem:[%s1015_s0 + $0x4] ss:$16 sps:$4 sm:$0xff]   ;;  %v772_v35 = vld [vmem:[%s1015_s0 + $0x8] ss:$16 sps:$4 sm:$0xff]  }
   0xe   :  { %700 = vmatprep.subr.bf16.mxu1 %v750_v14  ;;  %v774_v36 = vld [vmem:[%s1015_s0 + $0xc] ss:$16 sps:$4 sm:$0xff]   ;;  %447 = vmatprep.mubr.bf16.mxu0 %v771_v34  ;;  %v775_v37 = vld [vmem:[%s1015_s0 + $0x24] ss:$16 sps:$4 sm:$0xff]   ;;  %v779_v39 = vld [vmem:[%s1015_s0 + $0x20] ss:$16 sps:$4 sm:$0xff]  }
   0xf   :  { %512 = vmatprep.mubr.bf16.mxu1 %v774_v36  ;;  %v777_v38 = vld [vmem:[%s1015_s0 + $0x2c] ss:$16 sps:$4 sm:$0xff]   ;;  %v780_v40 = vld [vmem:[%s1015_s0 + $0x28] ss:$16 sps:$4 sm:$0xff]   ;;  %v781_v41 = vld [vmem:[%s1015_s0 + $0x44] ss:$16 sps:$4 sm:$0xff]   ;;  %110 = vperm.xlu0 %735, %v96_v45  }
  0x10   :  { %661 = vmatpush3.bf16.msra.mxu0 %v751_v15  ;;  %v783_v42 = vld [vmem:[%s1015_s0 + $0x4c] ss:$16 sps:$4 sm:$0xff]   ;;  %v97_v44 = vld [vmem:[%s1016_s2 + $0x10] sm:$0xff]  ;;  %v786_v49 = vld [vmem:[%s1015_s0 + $0x48] ss:$16 sps:$4 sm:$0xff]  }
  0x11   :  { %701 = vmatpush3.bf16.msra.mxu1 %v752_v16  ;;  %662 = vmatprep.subr.bf16.mxu0 %v753_v17  ;;  %v98_v46 = vld [vmem:[%s1016_s2 + $0x18] sm:$0xff]  ;;  %v785_v47 = vld [vmem:[%s1015_s0 + $0x40] ss:$16 sps:$4 sm:$0xff]   ;;  %v787_v50 = vld [vmem:[%s1015_s0 + $0x64] ss:$16 sps:$4 sm:$0xff]  }
  0x12   :  { %702 = vmatprep.subr.bf16.mxu1 %v754_v18  ;;  %115 = vperm.xlu1 %736, %v97_v44   ;;  %v789_v52 = vld [vmem:[%s1015_s0 + $0x6c] ss:$16 sps:$4 sm:$0xff]   ;;  %v101_v53 = vld [vmem:[%s1016_s2 + $0x30] sm:$0xff]  ;;  %v792_v56 = vld [vmem:[%s1015_s0 + $0x68] ss:$16 sps:$4 sm:$0xff]  }
  0x13   :  { %125 = vperm.xlu0 %735, %v99_v48   ;;  %v102_v54 = vld [vmem:[%s1016_s2 + $0x38] sm:$0xff]  ;;  %v791_v55 = vld [vmem:[%s1015_s0 + $0x60] ss:$16 sps:$4 sm:$0xff]  }
  0x14   :  { %663 = vmatpush3.bf16.msra.mxu0 %v755_v19 }
  0x15   :  { %703 = vmatpush3.bf16.msra.mxu1 %v756_v20  ;;  %664 = vmatprep.subr.bf16.mxu0 %v757_v21 }
  0x16   :  { %704 = vmatprep.subr.bf16.mxu1 %v758_v22  ;;  %120 = vperm.xlu1 %736, %v98_v46  }
  0x17   :  { %135 = vperm.xlu0 %735, %v101_v53  }
  0x18   :  { %665 = vmatpush3.bf16.msra.mxu0 %v759_v23 }
  0x19   :  { %705 = vmatpush3.bf16.msra.mxu1 %v760_v24  ;;  %666 = vmatprep.subr.bf16.mxu0 %v761_v25 }
  0x1a   :  { %706 = vmatprep.subr.bf16.mxu1 %v762_v26  ;;  %130 = vperm.xlu1 %736, %v100_v51  }
  0x1c   :  { %667 = vmatpush3.bf16.msra.mxu0 %v763_v27 }
  0x1d   :  { %707 = vmatpush3.bf16.msra.mxu1 %v764_v28  ;;  %668 = vmatprep.subr.bf16.mxu0 %v765_v29 }
  0x1e   :  { %708 = vmatprep.subr.bf16.mxu1 %v766_v30  ;;  %140 = vperm.xlu1 %736, %v102_v54  }
  0x20   :  { %669 = vmatpush3.bf16.msra.mxu0 %v767_v31 }
  0x21   :  { %709 = vmatpush3.bf16.msra.mxu1 %v768_v32 }
  0x23   :  { %448 = vmatmul.mubr.bf16.vlgmr.msra.gmra.mrb[0].mxu0 %v769_v33 }
  0x24   :  { %513 = vmatmul.mubr.bf16.vlgmr.msra.gmra.mrb[0].mxu1 %v772_v35  ;;  %455 = vmatprep.mubr.bf16.mxu0 %v775_v37 }
  0x25   :  { %520 = vmatprep.mubr.bf16.mxu1 %v777_v38 }
  0x2b   :  { %456 = vmatmul.mubr.bf16.gmra.mrb[4].mxu0 %v779_v39 }
  0x2c   :  { %521 = vmatmul.mubr.bf16.gmra.mrb[4].mxu1 %v780_v40  ;;  %463 = vmatprep.mubr.bf16.mxu0 %v781_v41 }
  0x2d   :  { %528 = vmatprep.mubr.bf16.mxu1 %v783_v42 }
  0x33   :  { %464 = vmatmul.mubr.bf16.gmra.mrb[8].mxu0 %v785_v47 }
  0x34   :  { %529 = vmatmul.mubr.bf16.gmra.mrb[8].mxu1 %v786_v49  ;;  %471 = vmatprep.mubr.bf16.mxu0 %v787_v50 }
  0x35   :  { %536 = vmatprep.mubr.bf16.mxu1 %v789_v52 }
  0x3b   :  { %472 = vmatmul.mubr.bf16.gmra.mrb[12].mxu0 %v791_v55 }
  0x3c   :  { %537 = vmatmul.mubr.bf16.gmra.mrb[12].mxu1 %v792_v56 }
  0x89   :  { %v106_v57 = vpop.permute.xlu0 %105 }
  0x8e   :  { %v111_v59 = vpop.permute.xlu0 %110 }
  0x91   :  { %v116_v10 = vpop.permute.xlu1 %115 }
  0x92   :  { %v126_v32 = vpop.permute.xlu0 %125 }
  0x95   :  { %v121_v26 = vpop.permute.xlu1 %120 }
  0x96   :  { %v136_v50 = vpop.permute.xlu0 %135 }
  0x99   :  { %v131_v46 = vpop.permute.xlu1 %130 }
  0xf6   :  { %v670_v58 = vpop.f32.mrb[0].mxu0 }
  0xf7   :  { %v710_v60 = vpop.f32.mrb[0].mxu1  ;;  %v671_v61 = vpop.f32.mrb[1].mxu0 }
  0xf8   :  { %v672_v62 = vadd.f32 %v671_v61, %v670_v58  ;;  %v711_v63 = vpop.f32.mrb[1].mxu1  ;;  %v673_v0 = vpop.f32.mrb[2].mxu0 }
  0xf9   :  { %v712_v1 = vadd.f32 %v711_v63, %v710_v60  ;;  %v713_v2 = vpop.f32.mrb[2].mxu1  ;;  %v674_v3 = vpop.f32.mrb[3].mxu0 }
  0xfa   :  { %v450_v4 = vadd.f32 %v672_v62, %v106_v57  ;;  %v675_v5 = vadd.f32 %v674_v3, %v673_v0  ;;  %v714_v6 = vpop.f32.mrb[3].mxu1 }
  0xfb   :  { %v715_v7 = vadd.f32 %v714_v6, %v713_v2  ;;  %v141_v2 = vpop.permute.xlu1 %140 }
  0xfc   :  { %v515_v8 = vadd.f32 %v712_v1, %v450_v4  ;;  %v453_v9 = vadd.f32 %v675_v5, %v111_v59 }
  0xfe   :  { %v646_v11 = vpack.c.bf16 %v515_v8, %v515_v8  ;;  %v518_v12 = vadd.f32 %v715_v7, %v453_v9  ;;  %v676_v13 = vpop.f32.mrb[4].mxu0 }
  0xff   :  { %v716_v14 = vpop.f32.mrb[4].mxu1  ;;  %v677_v15 = vpop.f32.mrb[5].mxu0 }
 0x100   :  { %578 = vst.msk [vmem:[%s1017_s3] sm:$0xf] %vm577_vm0, %v646_v11  ;;  %v647_v16 = vpack.c.bf16 %v518_v12, %v518_v12  ;;  %v678_v17 = vadd.f32 %v677_v15, %v676_v13  ;;  %v717_v18 = vpop.f32.mrb[5].mxu1  ;;  %v679_v19 = vpop.f32.mrb[6].mxu0 }
 0x101   :  { %v718_v20 = vadd.f32 %v717_v18, %v716_v14  ;;  %v719_v21 = vpop.f32.mrb[6].mxu1  ;;  %v680_v22 = vpop.f32.mrb[7].mxu0 }
 0x102   :  { %579 = vst.msk [vmem:[%s1017_s3 + $0x4] sm:$0xf] %vm577_vm0, %v647_v16  ;;  %v458_v23 = vadd.f32 %v678_v17, %v116_v10  ;;  %v681_v24 = vadd.f32 %v680_v22, %v679_v19  ;;  %v720_v25 = vpop.f32.mrb[7].mxu1 }
 0x103   :  { %v721_v27 = vadd.f32 %v720_v25, %v719_v21 }
 0x104   :  { %v523_v28 = vadd.f32 %v718_v20, %v458_v23  ;;  %v461_v29 = vadd.f32 %v681_v24, %v121_v26 }
 0x106   :  { %v648_v30 = vpack.c.bf16 %v523_v28, %v523_v28  ;;  %v526_v31 = vadd.f32 %v721_v27, %v461_v29  ;;  %v682_v33 = vpop.f32.mrb[8].mxu0 }
 0x107   :  { %v722_v34 = vpop.f32.mrb[8].mxu1  ;;  %v683_v35 = vpop.f32.mrb[9].mxu0 }
 0x108   :  { %580 = vst.msk [vmem:[%s1017_s3 + $0x8] sm:$0xf] %vm577_vm0, %v648_v30  ;;  %v649_v36 = vpack.c.bf16 %v526_v31, %v526_v31  ;;  %v684_v37 = vadd.f32 %v683_v35, %v682_v33  ;;  %v723_v38 = vpop.f32.mrb[9].mxu1  ;;  %v685_v39 = vpop.f32.mrb[10].mxu0 }
 0x109   :  { %v724_v40 = vadd.f32 %v723_v38, %v722_v34  ;;  %v725_v41 = vpop.f32.mrb[10].mxu1  ;;  %v686_v42 = vpop.f32.mrb[11].mxu0 }
 0x10a   :  { %581 = vst.msk [vmem:[%s1017_s3 + $0xc] sm:$0xf] %vm577_vm0, %v649_v36  ;;  %v466_v43 = vadd.f32 %v684_v37, %v126_v32  ;;  %v687_v44 = vadd.f32 %v686_v42, %v685_v39  ;;  %v726_v45 = vpop.f32.mrb[11].mxu1 }
 0x10b   :  { %v727_v47 = vadd.f32 %v726_v45, %v725_v41 }
 0x10c   :  { %v531_v48 = vadd.f32 %v724_v40, %v466_v43  ;;  %v469_v49 = vadd.f32 %v687_v44, %v131_v46 }
 0x10e   :  { %v650_v51 = vpack.c.bf16 %v531_v48, %v531_v48  ;;  %v534_v52 = vadd.f32 %v727_v47, %v469_v49  ;;  %v688_v53 = vpop.f32.mrb[12].mxu0 }
 0x10f   :  { %v728_v54 = vpop.f32.mrb[12].mxu1  ;;  %v689_v55 = vpop.f32.mrb[13].mxu0 }
 0x110   :  { %582 = vst.msk [vmem:[%s1017_s3 + $0x10] sm:$0xf] %vm577_vm0, %v650_v51  ;;  %v651_v56 = vpack.c.bf16 %v534_v52, %v534_v52  ;;  %v690_v57 = vadd.f32 %v689_v55, %v688_v53  ;;  %v729_v58 = vpop.f32.mrb[13].mxu1  ;;  %v691_v59 = vpop.f32.mrb[14].mxu0 }
 0x111   :  { %v730_v60 = vadd.f32 %v729_v58, %v728_v54  ;;  %v731_v61 = vpop.f32.mrb[14].mxu1  ;;  %v692_v62 = vpop.f32.mrb[15].mxu0 }
 0x112   :  { %583 = vst.msk [vmem:[%s1017_s3 + $0x14] sm:$0xf] %vm577_vm0, %v651_v56  ;;  %v474_v63 = vadd.f32 %v690_v57, %v136_v50  ;;  %v693_v0 = vadd.f32 %v692_v62, %v691_v59  ;;  %v732_v1 = vpop.f32.mrb[15].mxu1 }
 0x113   :  { %v733_v3 = vadd.f32 %v732_v1, %v731_v61 }
 0x114   :  { %v539_v4 = vadd.f32 %v730_v60, %v474_v63  ;;  %v477_v5 = vadd.f32 %v693_v0, %v141_v2 }
 0x116   :  { %v652_v6 = vpack.c.bf16 %v539_v4, %v539_v4  ;;  %v542_v7 = vadd.f32 %v733_v3, %v477_v5 }
 0x118   :  { %584 = vst.msk [vmem:[%s1017_s3 + $0x18] sm:$0xf] %vm577_vm0, %v652_v6  ;;  %v653_v8 = vpack.c.bf16 %v542_v7, %v542_v7 }
 0x11a   :  { %585 = vst.msk [vmem:[%s1017_s3 + $0x1c] sm:$0xf] %vm577_vm0, %v653_v8 }

// kernel: dca_forward.28
= control target key start
LH: loop header
LB: loop body
LE: loop exit
PB: predicated region body
PF: predicated region fallthrough
CT: control target
= control target key end

     0   :  { %v425_v36 = vlaneseq  ;;  %v8631_v37 = vmov 1966171168   ;;  %vm2547_vm0 = vcmask 523264   ;;  %vm6447_vm1 = vcmask 1040384   ;;  %s11298_s1 = inlined_call_operand.vmem [shape: bf16[1600,512], index: 1, kind: input, shape index: {}]   ;;  %s11299_s0 = inlined_call_operand.vmem [shape: bf16[2,1600], index: 0, kind: input, shape index: {}]   ;;  %s11300_s3 = inlined_call_operand.vmem [shape: bf16[512,1600], index: 3, kind: input, shape index: {}]   ;;  %s11301_s2 = inlined_call_operand.vmem [shape: f32[1,512], index: 2, kind: input, shape index: {}]   ;;  %s11302_s4 = inlined_call_operand.vmem [shape: f32[1,1600], index: 4, kind: input, shape index: {}]   ;;  %s11303_s5 = inlined_call_operand.vmem [shape: bf16[2,1600], index: 5, kind: output, shape index: {}]  }
   0x1   :  { %v7419_v0 = vld [vmem:[%s11298_s1 + $0x4] ss:$16 sps:$4 sm:$0xff]   ;;  %v7421_v1 = vld [vmem:[%s11298_s1 + $0xc] ss:$16 sps:$4 sm:$0xff]   ;;  %v7423_v2 = vld [vmem:[%s11298_s1] ss:$16 sps:$4 sm:$0xff]   ;;  %v449_v38 = vunpack.c.l.s4 %v8631_v37 }
   0x2   :  { %2551 = vmatprep.subr.bf16.mxu0 %v7419_v0  ;;  %v7424_v3 = vld [vmem:[%s11298_s1 + $0x8] ss:$16 sps:$4 sm:$0xff]   ;;  %2838 = vmatprep.subr.bf16.mxu1 %v7421_v1  ;;  %v7425_v4 = vld [vmem:[%s11298_s1 + $0x24] ss:$16 sps:$4 sm:$0xff]   ;;  %v7427_v5 = vld [vmem:[%s11298_s1 + $0x2c] ss:$16 sps:$4 sm:$0xff]  }
   0x3   :  { %2552 = vmatpush1.bf16.msra.mxu0 %v7423_v2  ;;  %2839 = vmatpush1.bf16.msra.mxu1 %v7424_v3  ;;  %v7429_v6 = vld [vmem:[%s11298_s1 + $0x20] ss:$16 sps:$4 sm:$0xff]   ;;  %v7430_v7 = vld [vmem:[%s11298_s1 + $0x28] ss:$16 sps:$4 sm:$0xff]   ;;  %v7431_v8 = vld [vmem:[%s11298_s1 + $0x44] ss:$16 sps:$4 sm:$0xff]   ;;  %v450_v43 = vunpack.c.0.s8 %v449_v38 }
   0x4   :  { %2553 = vmatprep.subr.bf16.mxu0 %v7425_v4  ;;  %2840 = vmatprep.subr.bf16.mxu1 %v7427_v5  ;;  %v7433_v9 = vld [vmem:[%s11298_s1 + $0x4c] ss:$16 sps:$4 sm:$0xff]   ;;  %v7435_v10 = vld [vmem:[%s11298_s1 + $0x40] ss:$16 sps:$4 sm:$0xff]   ;;  %v7436_v11 = vld [vmem:[%s11298_s1 + $0x48] ss:$16 sps:$4 sm:$0xff]  }
   0x5   :  { %v7437_v12 = vld [vmem:[%s11298_s1 + $0x64] ss:$16 sps:$4 sm:$0xff]   ;;  %v7439_v13 = vld [vmem:[%s11298_s1 + $0x6c] ss:$16 sps:$4 sm:$0xff]   ;;  %v7441_v14 = vld [vmem:[%s11298_s1 + $0x60] ss:$16 sps:$4 sm:$0xff]  }
   0x6   :  { %v7442_v15 = vld [vmem:[%s11298_s1 + $0x68] ss:$16 sps:$4 sm:$0xff]   ;;  %v7443_v16 = vld [vmem:[%s11298_s1 + $0x84] ss:$16 sps:$4 sm:$0xff]   ;;  %v7445_v17 = vld [vmem:[%s11298_s1 + $0x8c] ss:$16 sps:$4 sm:$0xff]  }
   0x7   :  { %2554 = vmatpush1.bf16.msra.mxu0 %v7429_v6  ;;  %2841 = vmatpush1.bf16.msra.mxu1 %v7430_v7  ;;  %v7447_v18 = vld [vmem:[%s11298_s1 + $0x80] ss:$16 sps:$4 sm:$0xff]   ;;  %v7448_v19 = vld [vmem:[%s11298_s1 + $0x88] ss:$16 sps:$4 sm:$0xff]   ;;  %v7449_v20 = vld [vmem:[%s11298_s1 + $0xa4] ss:$16 sps:$4 sm:$0xff]  }
   0x8   :  { %2555 = vmatprep.subr.bf16.mxu0 %v7431_v8  ;;  %2842 = vmatprep.subr.bf16.mxu1 %v7433_v9  ;;  %v7451_v21 = vld [vmem:[%s11298_s1 + $0xac] ss:$16 sps:$4 sm:$0xff]   ;;  %v7453_v22 = vld [vmem:[%s11298_s1 + $0xa0] ss:$16 sps:$4 sm:$0xff]   ;;  %v7454_v23 = vld [vmem:[%s11298_s1 + $0xa8] ss:$16 sps:$4 sm:$0xff]  }
   0x9   :  { %v7455_v24 = vld [vmem:[%s11298_s1 + $0xc4] ss:$16 sps:$4 sm:$0xff]   ;;  %v7457_v25 = vld [vmem:[%s11298_s1 + $0xcc] ss:$16 sps:$4 sm:$0xff]   ;;  %v7459_v26 = vld [vmem:[%s11298_s1 + $0xc0] ss:$16 sps:$4 sm:$0xff]  }
   0xa   :  { %v7460_v27 = vld [vmem:[%s11298_s1 + $0xc8] ss:$16 sps:$4 sm:$0xff]   ;;  %v7461_v28 = vld [vmem:[%s11298_s1 + $0xe4] ss:$16 sps:$4 sm:$0xff]   ;;  %v7463_v29 = vld [vmem:[%s11298_s1 + $0xec] ss:$16 sps:$4 sm:$0xff]  }
   0xb   :  { %2556 = vmatpush1.bf16.msra.mxu0 %v7435_v10  ;;  %2843 = vmatpush1.bf16.msra.mxu1 %v7436_v11  ;;  %v7465_v30 = vld [vmem:[%s11298_s1 + $0xe0] ss:$16 sps:$4 sm:$0xff]   ;;  %v7466_v31 = vld [vmem:[%s11298_s1 + $0xe8] ss:$16 sps:$4 sm:$0xff]   ;;  %v7467_v32 = vld [vmem:[%s11298_s1 + $0x104] ss:$16 sps:$4 sm:$0xff]  }
   0xc   :  { %2557 = vmatprep.subr.bf16.mxu0 %v7437_v12  ;;  %2844 = vmatprep.subr.bf16.mxu1 %v7439_v13  ;;  %v7469_v33 = vld [vmem:[%s11298_s1 + $0x10c] ss:$16 sps:$4 sm:$0xff]   ;;  %v7471_v34 = vld [vmem:[%s11298_s1 + $0x100] ss:$16 sps:$4 sm:$0xff]   ;;  %v7472_v35 = vld [vmem:[%s11298_s1 + $0x108] ss:$16 sps:$4 sm:$0xff]  }
   0xd   :  { %v7473_v39 = vld [vmem:[%s11298_s1 + $0x124] ss:$16 sps:$4 sm:$0xff]   ;;  %v7475_v40 = vld [vmem:[%s11298_s1 + $0x12c] ss:$16 sps:$4 sm:$0xff]   ;;  %v7477_v41 = vld [vmem:[%s11298_s1 + $0x120] ss:$16 sps:$4 sm:$0xff]  }
   0xe   :  { %v8780_v42 = vshrl.u32 %v425_v36, 7  ;;  %v7478_v44 = vld [vmem:[%s11298_s1 + $0x128] ss:$16 sps:$4 sm:$0xff]   ;;  %v7479_v45 = vld [vmem:[%s11298_s1 + $0x144] ss:$16 sps:$4 sm:$0xff]   ;;  %vm6448_vm2 = vcmask 1041409  }
   0xf   :  { %2558 = vmatpush1.bf16.msra.mxu0 %v7441_v14  ;;  %2845 = vmatpush1.bf16.msra.mxu1 %v7442_v15  ;;  %v7481_v46 = vld [vmem:[%s11298_s1 + $0x14c] ss:$16 sps:$4 sm:$0xff]   ;;  %v7483_v47 = vld [vmem:[%s11298_s1 + $0x140] ss:$16 sps:$4 sm:$0xff]   ;;  %v7484_v48 = vld [vmem:[%s11298_s1 + $0x148] ss:$16 sps:$4 sm:$0xff]  }
  0x10   :  { %2559 = vmatprep.subr.bf16.mxu0 %v7443_v16  ;;  %2846 = vmatprep.subr.bf16.mxu1 %v7445_v17  ;;  %v8798_v49 = vsub.s32 %v450_v43, %v8780_v42  ;;  %v7485_v50 = vld [vmem:[%s11298_s1 + $0x164] ss:$16 sps:$4 sm:$0xff]   ;;  %v7487_v51 = vld [vmem:[%s11298_s1 + $0x16c] ss:$16 sps:$4 sm:$0xff]   ;;  %v7489_v53 = vld [vmem:[%s11298_s1 + $0x160] ss:$16 sps:$4 sm:$0xff]  }
  0x11   :  { %v8809_v52 = vld [vmem:[%s11299_s0] sm:$0xff]  ;;  %v7490_v55 = vld [vmem:[%s11298_s1 + $0x168] ss:$16 sps:$4 sm:$0xff]   ;;  %v7493_v57 = vld [vmem:[%s11298_s1 + $0x18c] ss:$16 sps:$4 sm:$0xff]   ;;  %vm6450_vm4 = vcmask 1042434  }
  0x12   :  { %v454_v54 = vrot.slane %v8809_v52, %v8798_v49  ;;  %v7491_v56 = vld [vmem:[%s11298_s1 + $0x184] ss:$16 sps:$4 sm:$0xff]   ;;  %v7495_v59 = vld [vmem:[%s11298_s1 + $0x180] ss:$16 sps:$4 sm:$0xff]   ;;  %v7496_v61 = vld [vmem:[%s11298_s1 + $0x188] ss:$16 sps:$4 sm:$0xff]  }
  0x13   :  { %2560 = vmatpush1.bf16.msra.mxu0 %v7447_v18  ;;  %2847 = vmatpush1.bf16.msra.mxu1 %v7448_v19  ;;  %v7497_v62 = vld [vmem:[%s11298_s1 + $0x1a4] ss:$16 sps:$4 sm:$0xff]   ;;  %v7499_v63 = vld [vmem:[%s11298_s1 + $0x1ac] ss:$16 sps:$4 sm:$0xff]   ;;  %v7501_v0 = vld [vmem:[%s11298_s1 + $0x1a0] ss:$16 sps:$4 sm:$0xff]  }
  0x14   :  { %2561 = vmatprep.subr.bf16.mxu0 %v7449_v20  ;;  %2848 = vmatprep.subr.bf16.mxu1 %v7451_v21  ;;  %v462_v58 = vcombine.high %v454_v54, %v454_v54  ;;  %v7502_v1 = vld [vmem:[%s11298_s1 + $0x1a8] ss:$16 sps:$4 sm:$0xff]   ;;  %v7503_v2 = vld [vmem:[%s11298_s1 + $0x1c4] ss:$16 sps:$4 sm:$0xff]   ;;  %v7505_v3 = vld [vmem:[%s11298_s1 + $0x1cc] ss:$16 sps:$4 sm:$0xff]   ;;  %v8878_v13 = vrot.slane %v454_v54, %v8798_v49 }
  0x15   :  { %v7507_v4 = vld [vmem:[%s11298_s1 + $0x1c0] ss:$16 sps:$4 sm:$0xff]   ;;  %v7508_v5 = vld [vmem:[%s11298_s1 + $0x1c8] ss:$16 sps:$4 sm:$0xff]   ;;  %v7509_v6 = vld [vmem:[%s11298_s1 + $0x1e4] ss:$16 sps:$4 sm:$0xff]  }
  0x16   :  { %v484_v60 = vrot.slane %v462_v58, %v8798_v49  ;;  %v7511_v7 = vld [vmem:[%s11298_s1 + $0x1ec] ss:$16 sps:$4 sm:$0xff]   ;;  %v7513_v8 = vld [vmem:[%s11298_s1 + $0x1e0] ss:$16 sps:$4 sm:$0xff]   ;;  %v7514_v9 = vld [vmem:[%s11298_s1 + $0x1e8] ss:$16 sps:$4 sm:$0xff]  }
  0x17   :  { %2562 = vmatpush1.bf16.msra.mxu0 %v7453_v22  ;;  %2849 = vmatpush1.bf16.msra.mxu1 %v7454_v23  ;;  %v7517_v10 = vld [vmem:[%s11298_s1 + $0x204] ss:$16 sps:$4 sm:$0xff]   ;;  %v7520_v11 = vld [vmem:[%s11298_s1 + $0x20c] ss:$16 sps:$4 sm:$0xff]   ;;  %v7515_v12 = vld [vmem:[%s11298_s1 + $0x200] ss:$16 sps:$4 sm:$0xff]  }
  0x18   :  { %2563 = vmatprep.subr.bf16.mxu0 %v7455_v24  ;;  %2850 = vmatprep.subr.bf16.mxu1 %v7457_v25  ;;  %v7518_v14 = vld [vmem:[%s11298_s1 + $0x208] ss:$16 sps:$4 sm:$0xff]   ;;  %v7523_v15 = vld [vmem:[%s11298_s1 + $0x224] ss:$16 sps:$4 sm:$0xff]   ;;  %v7526_v16 = vld [vmem:[%s11298_s1 + $0x22c] ss:$16 sps:$4 sm:$0xff]   ;;  %v494_v17 = vcombine.high %v484_v60, %v484_v60 }
  0x19   :  { %2583 = vmatprep.mubr.bf16.mxu0 %v484_v60  ;;  %2870 = vmatprep.mubr.bf16.mxu1 %v484_v60  ;;  %v7521_v18 = vld [vmem:[%s11298_s1 + $0x220] ss:$16 sps:$4 sm:$0xff]   ;;  %v7524_v19 = vld [vmem:[%s11298_s1 + $0x228] ss:$16 sps:$4 sm:$0xff]   ;;  %v7529_v20 = vld [vmem:[%s11298_s1 + $0x244] ss:$16 sps:$4 sm:$0xff]  }
  0x1a   :  { %v7532_v21 = vld [vmem:[%s11298_s1 + $0x24c] ss:$16 sps:$4 sm:$0xff]   ;;  %v7527_v22 = vld [vmem:[%s11298_s1 + $0x240] ss:$16 sps:$4 sm:$0xff]   ;;  %v7530_v23 = vld [vmem:[%s11298_s1 + $0x248] ss:$16 sps:$4 sm:$0xff]  }
  0x1b   :  { %2564 = vmatpush1.bf16.msra.mxu0 %v7459_v26  ;;  %2851 = vmatpush1.bf16.msra.mxu1 %v7460_v27  ;;  %v7535_v24 = vld [vmem:[%s11298_s1 + $0x264] ss:$16 sps:$4 sm:$0xff]   ;;  %v7538_v25 = vld [vmem:[%s11298_s1 + $0x26c] ss:$16 sps:$4 sm:$0xff]   ;;  %v7533_v26 = vld [vmem:[%s11298_s1 + $0x260] ss:$16 sps:$4 sm:$0xff]  }
  0x1c   :  { %2565 = vmatprep.subr.bf16.mxu0 %v7461_v28  ;;  %2852 = vmatprep.subr.bf16.mxu1 %v7463_v29  ;;  %v7536_v27 = vld [vmem:[%s11298_s1 + $0x268] ss:$16 sps:$4 sm:$0xff]   ;;  %v7541_v28 = vld [vmem:[%s11298_s1 + $0x284] ss:$16 sps:$4 sm:$0xff]   ;;  %v7544_v29 = vld [vmem:[%s11298_s1 + $0x28c] ss:$16 sps:$4 sm:$0xff]  }
  0x1d   :  { %v7553_v36 = vld [vmem:[%s11298_s1 + $0x2c4] ss:$16 sps:$4 sm:$0xff]   ;;  %v7556_v37 = vld [vmem:[%s11298_s1 + $0x2cc] ss:$16 sps:$4 sm:$0xff]   ;;  %v7551_v38 = vld [vmem:[%s11298_s1 + $0x2c0] ss:$16 sps:$4 sm:$0xff]  }
  0x1e   :  { %v7557_v43 = vld [vmem:[%s11298_s1 + $0x2e0] ss:$16 sps:$4 sm:$0xff]   ;;  %v7572_v54 = vld [vmem:[%s11298_s1 + $0x328] ss:$16 sps:$4 sm:$0xff]   ;;  %v7586_v60 = vld [vmem:[%s11298_s1 + $0x36c] ss:$16 sps:$4 sm:$0xff]  }
  0x1f   :  { %2566 = vmatpush1.bf16.msra.mxu0 %v7465_v30  ;;  %2853 = vmatpush1.bf16.msra.mxu1 %v7466_v31  ;;  %v7539_v30 = vld [vmem:[%s11298_s1 + $0x280] ss:$16 sps:$4 sm:$0xff]   ;;  %v7542_v31 = vld [vmem:[%s11298_s1 + $0x288] ss:$16 sps:$4 sm:$0xff]   ;;  %vm6449_vm3 = vmor %vm6448_vm2, %vm6447_vm1  ;;  %vm6452_vm6 = vcmask 1043459   ;;  %vm6454_vm8 = vcmask 520196  }
  0x20   :  { %2567 = vmatprep.subr.bf16.mxu0 %v7467_v32  ;;  %2854 = vmatprep.subr.bf16.mxu1 %v7469_v33  ;;  %v7547_v32 = vld [vmem:[%s11298_s1 + $0x2a4] ss:$16 sps:$4 sm:$0xff]   ;;  %v7550_v33 = vld [vmem:[%s11298_s1 + $0x2ac] ss:$16 sps:$4 sm:$0xff]   ;;  %v7578_v58 = vld [vmem:[%s11298_s1 + $0x348] ss:$16 sps:$4 sm:$0xff]  }
  0x21   :  { %vm6451_vm5 = vmor %vm6450_vm4, %vm6449_vm3 }
  0x22   :  { %vm6453_vm7 = vmor %vm6452_vm6, %vm6451_vm5 }
  0x23   :  { %2568 = vmatpush1.bf16.msra.mxu0 %v7471_v34  ;;  %2855 = vmatpush1.bf16.msra.mxu1 %v7472_v35  ;;  %v7545_v34 = vld [vmem:[%s11298_s1 + $0x2a0] ss:$16 sps:$4 sm:$0xff]   ;;  %v7548_v35 = vld [vmem:[%s11298_s1 + $0x2a8] ss:$16 sps:$4 sm:$0xff]   ;;  %vm6455_vm9 = vmor %vm6454_vm8, %vm6453_vm7 }
  0x24   :  { %2569 = vmatprep.subr.bf16.mxu0 %v7473_v39  ;;  %2856 = vmatprep.subr.bf16.mxu1 %v7475_v40  ;;  %v7554_v39 = vld [vmem:[%s11298_s1 + $0x2c8] ss:$16 sps:$4 sm:$0xff]   ;;  %v7559_v40 = vld [vmem:[%s11298_s1 + $0x2e4] ss:$16 sps:$4 sm:$0xff]  }
  0x27   :  { %2570 = vmatpush1.bf16.msra.mxu0 %v7477_v41  ;;  %2857 = vmatpush1.bf16.msra.mxu1 %v7478_v44  ;;  %v7562_v41 = vld [vmem:[%s11298_s1 + $0x2ec] ss:$16 sps:$4 sm:$0xff]   ;;  %v7560_v44 = vld [vmem:[%s11298_s1 + $0x2e8] ss:$16 sps:$4 sm:$0xff]  }
  0x28   :  { %2571 = vmatprep.subr.bf16.mxu0 %v7479_v45  ;;  %2858 = vmatprep.subr.bf16.mxu1 %v7481_v46  ;;  %v7565_v45 = vld [vmem:[%s11298_s1 + $0x304] ss:$16 sps:$4 sm:$0xff]   ;;  %v7568_v46 = vld [vmem:[%s11298_s1 + $0x30c] ss:$16 sps:$4 sm:$0xff]  }
  0x2b   :  { %2572 = vmatpush1.bf16.msra.mxu0 %v7483_v47  ;;  %2859 = vmatpush1.bf16.msra.mxu1 %v7484_v48  ;;  %v7563_v47 = vld [vmem:[%s11298_s1 + $0x300] ss:$16 sps:$4 sm:$0xff]   ;;  %v7566_v48 = vld [vmem:[%s11298_s1 + $0x308] ss:$16 sps:$4 sm:$0xff]  }
  0x2c   :  { %2573 = vmatprep.subr.bf16.mxu0 %v7485_v50  ;;  %2860 = vmatprep.subr.bf16.mxu1 %v7487_v51  ;;  %v7571_v50 = vld [vmem:[%s11298_s1 + $0x324] ss:$16 sps:$4 sm:$0xff]   ;;  %v7574_v51 = vld [vmem:[%s11298_s1 + $0x32c] ss:$16 sps:$4 sm:$0xff]  }
  0x2f   :  { %2574 = vmatpush1.bf16.msra.mxu0 %v7489_v53  ;;  %2861 = vmatpush1.bf16.msra.mxu1 %v7490_v55  ;;  %v7569_v53 = vld [vmem:[%s11298_s1 + $0x320] ss:$16 sps:$4 sm:$0xff]   ;;  %v7577_v55 = vld [vmem:[%s11298_s1 + $0x344] ss:$16 sps:$4 sm:$0xff]  }
  0x30   :  { %2575 = vmatprep.subr.bf16.mxu0 %v7491_v56  ;;  %2862 = vmatprep.subr.bf16.mxu1 %v7493_v57  ;;  %v7580_v56 = vld [vmem:[%s11298_s1 + $0x34c] ss:$16 sps:$4 sm:$0xff]   ;;  %v7575_v57 = vld [vmem:[%s11298_s1 + $0x340] ss:$16 sps:$4 sm:$0xff]  }
  0x33   :  { %2576 = vmatpush1.bf16.msra.mxu0 %v7495_v59  ;;  %2863 = vmatpush1.bf16.msra.mxu1 %v7496_v61  ;;  %v7583_v59 = vld [vmem:[%s11298_s1 + $0x364] ss:$16 sps:$4 sm:$0xff]   ;;  %v7581_v61 = vld [vmem:[%s11298_s1 + $0x360] ss:$16 sps:$4 sm:$0xff]  }
  0x34   :  { %2577 = vmatprep.subr.bf16.mxu0 %v7497_v62  ;;  %2864 = vmatprep.subr.bf16.mxu1 %v7499_v63  ;;  %v7584_v62 = vld [vmem:[%s11298_s1 + $0x368] ss:$16 sps:$4 sm:$0xff]   ;;  %v7589_v63 = vld [vmem:[%s11298_s1 + $0x384] ss:$16 sps:$4 sm:$0xff]  }
  0x37   :  { %2578 = vmatpush1.bf16.msra.mxu0 %v7501_v0  ;;  %2865 = vmatpush1.bf16.msra.mxu1 %v7502_v1  ;;  %v7592_v0 = vld [vmem:[%s11298_s1 + $0x38c] ss:$16 sps:$4 sm:$0xff]   ;;  %v7587_v1 = vld [vmem:[%s11298_s1 + $0x380] ss:$16 sps:$4 sm:$0xff]  }
  0x38   :  { %2579 = vmatprep.subr.bf16.mxu0 %v7503_v2  ;;  %2866 = vmatprep.subr.bf16.mxu1 %v7505_v3  ;;  %v7590_v2 = vld [vmem:[%s11298_s1 + $0x388] ss:$16 sps:$4 sm:$0xff]   ;;  %v7595_v3 = vld [vmem:[%s11298_s1 + $0x3a4] ss:$16 sps:$4 sm:$0xff]  }
  0x3b   :  { %2580 = vmatpush1.bf16.msra.mxu0 %v7507_v4  ;;  %2867 = vmatpush1.bf16.msra.mxu1 %v7508_v5  ;;  %v7598_v4 = vld [vmem:[%s11298_s1 + $0x3ac] ss:$16 sps:$4 sm:$0xff]   ;;  %v7593_v5 = vld [vmem:[%s11298_s1 + $0x3a0] ss:$16 sps:$4 sm:$0xff]  }
  0x3c   :  { %2581 = vmatprep.subr.bf16.mxu0 %v7509_v6  ;;  %2868 = vmatprep.subr.bf16.mxu1 %v7511_v7  ;;  %v7596_v6 = vld [vmem:[%s11298_s1 + $0x3a8] ss:$16 sps:$4 sm:$0xff]   ;;  %v7601_v7 = vld [vmem:[%s11298_s1 + $0x3c4] ss:$16 sps:$4 sm:$0xff]  }
  0x3f   :  { %2582 = vmatpush1.bf16.msra.mxu0 %v7513_v8  ;;  %2869 = vmatpush1.bf16.msra.mxu1 %v7514_v9  ;;  %v7604_v8 = vld [vmem:[%s11298_s1 + $0x3cc] ss:$16 sps:$4 sm:$0xff]   ;;  %v447_v9 = vcombine.high %v8809_v52, %v8809_v52 }
  0x40   :  { %2592 = vmatprep.subr.bf16.mxu0 %v7517_v10  ;;  %2879 = vmatprep.subr.bf16.mxu1 %v7520_v11  ;;  %v7599_v10 = vld [vmem:[%s11298_s1 + $0x3c0] ss:$16 sps:$4 sm:$0xff]   ;;  %v7602_v11 = vld [vmem:[%s11298_s1 + $0x3c8] ss:$16 sps:$4 sm:$0xff]   ;;  %v7610_v52 = vld [vmem:[%s11298_s1 + $0x3ec] ss:$16 sps:$4 sm:$0xff]  }
  0x42   :  { %2584 = vmatmul.mubr.bf16.vlgmr.msra.gmra.mrb[0].mxu0 %v8878_v13  ;;  %2871 = vmatmul.mubr.bf16.vlgmr.msra.gmra.mrb[0].mxu1 %v8878_v13 }
  0x43   :  { %2593 = vmatpush1.bf16.msra.mxu0 %v7515_v12  ;;  %2880 = vmatpush1.bf16.msra.mxu1 %v7518_v14  ;;  %v7607_v12 = vld [vmem:[%s11298_s1 + $0x3e4] ss:$16 sps:$4 sm:$0xff]   ;;  %v9062_v14 = vrot.slane %v447_v9, %v8798_v49  ;;  %v7686_v9 = vld [vmem:[%s11298_s1 + $0x588] ss:$16 sps:$4 sm:$0xff]  }
  0x44   :  { %2594 = vmatprep.subr.bf16.mxu0 %v7523_v15  ;;  %2881 = vmatprep.subr.bf16.mxu1 %v7526_v16  ;;  %v7605_v15 = vld [vmem:[%s11298_s1 + $0x3e0] ss:$16 sps:$4 sm:$0xff]   ;;  %v7608_v16 = vld [vmem:[%s11298_s1 + $0x3e8] ss:$16 sps:$4 sm:$0xff]  }
  0x45   :  { %2624 = vmatprep.mubr.bf16.mxu0 %v494_v17  ;;  %2911 = vmatprep.mubr.bf16.mxu1 %v494_v17  ;;  %v7613_v17 = vld [vmem:[%s11298_s1 + $0x404] ss:$16 sps:$4 sm:$0xff]  }
  0x47   :  { %2595 = vmatpush1.bf16.msra.mxu0 %v7521_v18  ;;  %2882 = vmatpush1.bf16.msra.mxu1 %v7524_v19  ;;  %v7616_v18 = vld [vmem:[%s11298_s1 + $0x40c] ss:$16 sps:$4 sm:$0xff]   ;;  %v463_v19 = vcombine.high %v9062_v14, %v9062_v14 }
  0x48   :  { %2596 = vmatprep.subr.bf16.mxu0 %v7529_v20  ;;  %2883 = vmatprep.subr.bf16.mxu1 %v7532_v21  ;;  %v7611_v20 = vld [vmem:[%s11298_s1 + $0x400] ss:$16 sps:$4 sm:$0xff]   ;;  %v492_v21 = vcombine.high %v8878_v13, %v8878_v13 }
  0x49   :  { %v7617_v13 = vld [vmem:[%s11298_s1 + $0x420] ss:$16 sps:$4 sm:$0xff]  }
  0x4b   :  { %2597 = vmatpush1.bf16.msra.mxu0 %v7527_v22  ;;  %2884 = vmatpush1.bf16.msra.mxu1 %v7530_v23  ;;  %v7614_v22 = vld [vmem:[%s11298_s1 + $0x408] ss:$16 sps:$4 sm:$0xff]   ;;  %v7619_v23 = vld [vmem:[%s11298_s1 + $0x424] ss:$16 sps:$4 sm:$0xff]  }
  0x4c   :  { %2598 = vmatprep.subr.bf16.mxu0 %v7535_v24  ;;  %2885 = vmatprep.subr.bf16.mxu1 %v7538_v25  ;;  %v7622_v24 = vld [vmem:[%s11298_s1 + $0x42c] ss:$16 sps:$4 sm:$0xff]   ;;  %v9093_v25 = vrot.slane %v463_v19, %v8798_v49  ;;  %v7703_v19 = vld [vmem:[%s11298_s1 + $0x5e4] ss:$16 sps:$4 sm:$0xff]  }
  0x4f   :  { %2599 = vmatpush1.bf16.msra.mxu0 %v7533_v26  ;;  %2886 = vmatpush1.bf16.msra.mxu1 %v7536_v27  ;;  %v7620_v26 = vld [vmem:[%s11298_s1 + $0x428] ss:$16 sps:$4 sm:$0xff]   ;;  %v7625_v27 = vld [vmem:[%s11298_s1 + $0x444] ss:$16 sps:$4 sm:$0xff]  }
  0x50   :  { %2600 = vmatprep.subr.bf16.mxu0 %v7541_v28  ;;  %2887 = vmatprep.subr.bf16.mxu1 %v7544_v29  ;;  %v7628_v28 = vld [vmem:[%s11298_s1 + $0x44c] ss:$16 sps:$4 sm:$0xff]   ;;  %v7623_v29 = vld [vmem:[%s11298_s1 + $0x440] ss:$16 sps:$4 sm:$0xff]  }
  0x53   :  { %2601 = vmatpush1.bf16.msra.mxu0 %v7539_v30  ;;  %2888 = vmatpush1.bf16.msra.mxu1 %v7542_v31  ;;  %v7626_v30 = vld [vmem:[%s11298_s1 + $0x448] ss:$16 sps:$4 sm:$0xff]   ;;  %v7631_v31 = vld [vmem:[%s11298_s1 + $0x464] ss:$16 sps:$4 sm:$0xff]  }
  0x54   :  { %2602 = vmatprep.subr.bf16.mxu0 %v7547_v32  ;;  %2889 = vmatprep.subr.bf16.mxu1 %v7550_v33  ;;  %v7634_v32 = vld [vmem:[%s11298_s1 + $0x46c] ss:$16 sps:$4 sm:$0xff]   ;;  %v7629_v33 = vld [vmem:[%s11298_s1 + $0x460] ss:$16 sps:$4 sm:$0xff]  }
  0x57   :  { %2603 = vmatpush1.bf16.msra.mxu0 %v7545_v34  ;;  %2890 = vmatpush1.bf16.msra.mxu1 %v7548_v35  ;;  %v7632_v34 = vld [vmem:[%s11298_s1 + $0x468] ss:$16 sps:$4 sm:$0xff]   ;;  %v7637_v35 = vld [vmem:[%s11298_s1 + $0x484] ss:$16 sps:$4 sm:$0xff]  }
  0x58   :  { %2604 = vmatprep.subr.bf16.mxu0 %v7553_v36  ;;  %2891 = vmatprep.subr.bf16.mxu1 %v7556_v37  ;;  %v7640_v36 = vld [vmem:[%s11298_s1 + $0x48c] ss:$16 sps:$4 sm:$0xff]   ;;  %v7635_v37 = vld [vmem:[%s11298_s1 + $0x480] ss:$16 sps:$4 sm:$0xff]  }
  0x5b   :  { %2605 = vmatpush1.bf16.msra.mxu0 %v7551_v38  ;;  %2892 = vmatpush1.bf16.msra.mxu1 %v7554_v39  ;;  %v7638_v38 = vld [vmem:[%s11298_s1 + $0x488] ss:$16 sps:$4 sm:$0xff]   ;;  %v7643_v39 = vld [vmem:[%s11298_s1 + $0x4a4] ss:$16 sps:$4 sm:$0xff]  }
  0x5c   :  { %2606 = vmatprep.subr.bf16.mxu0 %v7559_v40  ;;  %2893 = vmatprep.subr.bf16.mxu1 %v7562_v41  ;;  %v7646_v40 = vld [vmem:[%s11298_s1 + $0x4ac] ss:$16 sps:$4 sm:$0xff]   ;;  %v7641_v41 = vld [vmem:[%s11298_s1 + $0x4a0] ss:$16 sps:$4 sm:$0xff]  }
  0x5f   :  { %2607 = vmatpush1.bf16.msra.mxu0 %v7557_v43  ;;  %2894 = vmatpush1.bf16.msra.mxu1 %v7560_v44  ;;  %v7644_v43 = vld [vmem:[%s11298_s1 + $0x4a8] ss:$16 sps:$4 sm:$0xff]   ;;  %v7649_v44 = vld [vmem:[%s11298_s1 + $0x4c4] ss:$16 sps:$4 sm:$0xff]  }
  0x60   :  { %2608 = vmatprep.subr.bf16.mxu0 %v7565_v45  ;;  %2895 = vmatprep.subr.bf16.mxu1 %v7568_v46  ;;  %v7652_v45 = vld [vmem:[%s11298_s1 + $0x4cc] ss:$16 sps:$4 sm:$0xff]   ;;  %v7647_v46 = vld [vmem:[%s11298_s1 + $0x4c0] ss:$16 sps:$4 sm:$0xff]  }
  0x63   :  { %2609 = vmatpush1.bf16.msra.mxu0 %v7563_v47  ;;  %2896 = vmatpush1.bf16.msra.mxu1 %v7566_v48  ;;  %v7650_v47 = vld [vmem:[%s11298_s1 + $0x4c8] ss:$16 sps:$4 sm:$0xff]   ;;  %v7655_v48 = vld [vmem:[%s11298_s1 + $0x4e4] ss:$16 sps:$4 sm:$0xff]  }
  0x64   :  { %2610 = vmatprep.subr.bf16.mxu0 %v7571_v50  ;;  %2897 = vmatprep.subr.bf16.mxu1 %v7574_v51  ;;  %v7658_v50 = vld [vmem:[%s11298_s1 + $0x4ec] ss:$16 sps:$4 sm:$0xff]   ;;  %v7653_v51 = vld [vmem:[%s11298_s1 + $0x4e0] ss:$16 sps:$4 sm:$0xff]  }
  0x67   :  { %2611 = vmatpush1.bf16.msra.mxu0 %v7569_v53  ;;  %2898 = vmatpush1.bf16.msra.mxu1 %v7572_v54  ;;  %v7656_v53 = vld [vmem:[%s11298_s1 + $0x4e8] ss:$16 sps:$4 sm:$0xff]   ;;  %v7661_v54 = vld [vmem:[%s11298_s1 + $0x504] ss:$16 sps:$4 sm:$0xff]  }
  0x68   :  { %2612 = vmatprep.subr.bf16.mxu0 %v7577_v55  ;;  %2899 = vmatprep.subr.bf16.mxu1 %v7580_v56  ;;  %v7664_v55 = vld [vmem:[%s11298_s1 + $0x50c] ss:$16 sps:$4 sm:$0xff]   ;;  %v7659_v56 = vld [vmem:[%s11298_s1 + $0x500] ss:$16 sps:$4 sm:$0xff]  }
  0x6b   :  { %2613 = vmatpush1.bf16.msra.mxu0 %v7575_v57  ;;  %2900 = vmatpush1.bf16.msra.mxu1 %v7578_v58  ;;  %v7662_v57 = vld [vmem:[%s11298_s1 + $0x508] ss:$16 sps:$4 sm:$0xff]   ;;  %v7667_v58 = vld [vmem:[%s11298_s1 + $0x524] ss:$16 sps:$4 sm:$0xff]  }
  0x6c   :  { %2614 = vmatprep.subr.bf16.mxu0 %v7583_v59  ;;  %2901 = vmatprep.subr.bf16.mxu1 %v7586_v60  ;;  %v7670_v59 = vld [vmem:[%s11298_s1 + $0x52c] ss:$16 sps:$4 sm:$0xff]   ;;  %v7665_v60 = vld [vmem:[%s11298_s1 + $0x520] ss:$16 sps:$4 sm:$0xff]  }
  0x6f   :  { %2615 = vmatpush1.bf16.msra.mxu0 %v7581_v61  ;;  %2902 = vmatpush1.bf16.msra.mxu1 %v7584_v62  ;;  %v7668_v61 = vld [vmem:[%s11298_s1 + $0x528] ss:$16 sps:$4 sm:$0xff]   ;;  %v7673_v62 = vld [vmem:[%s11298_s1 + $0x544] ss:$16 sps:$4 sm:$0xff]  }
  0x70   :  { %2616 = vmatprep.subr.bf16.mxu0 %v7589_v63  ;;  %2903 = vmatprep.subr.bf16.mxu1 %v7592_v0  ;;  %v7676_v63 = vld [vmem:[%s11298_s1 + $0x54c] ss:$16 sps:$4 sm:$0xff]   ;;  %v7671_v0 = vld [vmem:[%s11298_s1 + $0x540] ss:$16 sps:$4 sm:$0xff]  }
  0x73   :  { %2617 = vmatpush1.bf16.msra.mxu0 %v7587_v1  ;;  %2904 = vmatpush1.bf16.msra.mxu1 %v7590_v2  ;;  %v7674_v1 = vld [vmem:[%s11298_s1 + $0x548] ss:$16 sps:$4 sm:$0xff]   ;;  %v7679_v2 = vld [vmem:[%s11298_s1 + $0x564] ss:$16 sps:$4 sm:$0xff]  }
  0x74   :  { %2618 = vmatprep.subr.bf16.mxu0 %v7595_v3  ;;  %2905 = vmatprep.subr.bf16.mxu1 %v7598_v4  ;;  %v7682_v3 = vld [vmem:[%s11298_s1 + $0x56c] ss:$16 sps:$4 sm:$0xff]   ;;  %v7677_v4 = vld [vmem:[%s11298_s1 + $0x560] ss:$16 sps:$4 sm:$0xff]  }
  0x77   :  { %2619 = vmatpush1.bf16.msra.mxu0 %v7593_v5  ;;  %2906 = vmatpush1.bf16.msra.mxu1 %v7596_v6  ;;  %v7680_v5 = vld [vmem:[%s11298_s1 + $0x568] ss:$16 sps:$4 sm:$0xff]   ;;  %v7685_v6 = vld [vmem:[%s11298_s1 + $0x584] ss:$16 sps:$4 sm:$0xff]  }
  0x78   :  { %2620 = vmatprep.subr.bf16.mxu0 %v7601_v7  ;;  %2907 = vmatprep.subr.bf16.mxu1 %v7604_v8  ;;  %v7688_v7 = vld [vmem:[%s11298_s1 + $0x58c] ss:$16 sps:$4 sm:$0xff]   ;;  %v7683_v8 = vld [vmem:[%s11298_s1 + $0x580] ss:$16 sps:$4 sm:$0xff]  }
  0x7b   :  { %2621 = vmatpush1.bf16.msra.mxu0 %v7599_v10  ;;  %2908 = vmatpush1.bf16.msra.mxu1 %v7602_v11  ;;  %v7691_v10 = vld [vmem:[%s11298_s1 + $0x5a4] ss:$16 sps:$4 sm:$0xff]   ;;  %v7694_v11 = vld [vmem:[%s11298_s1 + $0x5ac] ss:$16 sps:$4 sm:$0xff]  }
  0x7c   :  { %2622 = vmatprep.subr.bf16.mxu0 %v7607_v12  ;;  %2909 = vmatprep.subr.bf16.mxu1 %v7610_v52  ;;  %v7689_v12 = vld [vmem:[%s11298_s1 + $0x5a0] ss:$16 sps:$4 sm:$0xff]   ;;  %v7692_v52 = vld [vmem:[%s11298_s1 + $0x5a8] ss:$16 sps:$4 sm:$0xff]  }
  0x7f   :  { %2623 = vmatpush1.bf16.msra.mxu0 %v7605_v15  ;;  %2910 = vmatpush1.bf16.msra.mxu1 %v7608_v16  ;;  %v7697_v15 = vld [vmem:[%s11298_s1 + $0x5c4] ss:$16 sps:$4 sm:$0xff]   ;;  %v7700_v16 = vld [vmem:[%s11298_s1 + $0x5cc] ss:$16 sps:$4 sm:$0xff]  }
  0x80   :  { %2633 = vmatprep.subr.bf16.mxu0 %v7613_v17  ;;  %2920 = vmatprep.subr.bf16.mxu1 %v7616_v18  ;;  %v7695_v17 = vld [vmem:[%s11298_s1 + $0x5c0] ss:$16 sps:$4 sm:$0xff]   ;;  %v7698_v18 = vld [vmem:[%s11298_s1 + $0x5c8] ss:$16 sps:$4 sm:$0xff]  }
  0x82   :  { %2625 = vmatmul.mubr.bf16.vlgmr.msra.gmra.mrb[0].mxu0 %v492_v21  ;;  %2912 = vmatmul.mubr.bf16.vlgmr.msra.gmra.mrb[0].mxu1 %v492_v21  ;;  %v7701_v21 = vld [vmem:[%s11298_s1 + $0x5e0] ss:$16 sps:$4 sm:$0xff]  }
  0x83   :  { %2634 = vmatpush1.bf16.msra.mxu0 %v7611_v20  ;;  %2921 = vmatpush1.bf16.msra.mxu1 %v7614_v22  ;;  %v7706_v20 = vld [vmem:[%s11298_s1 + $0x5ec] ss:$16 sps:$4 sm:$0xff]   ;;  %v7704_v22 = vld [vmem:[%s11298_s1 + $0x5e8] ss:$16 sps:$4 sm:$0xff]  }
  0x84   :  { %2635 = vmatprep.subr.bf16.mxu0 %v7619_v23  ;;  %2922 = vmatprep.subr.bf16.mxu1 %v7622_v24  ;;  %v7710_v23 = vld [vmem:[%s11298_s1 + $0x604] ss:$16 sps:$4 sm:$0xff]   ;;  %v7713_v24 = vld [vmem:[%s11298_s1 + $0x60c] ss:$16 sps:$4 sm:$0xff]  }
  0x85   :  { %2665 = vmatprep.mubr.bf16.mxu0 %v9093_v25  ;;  %2952 = vmatprep.mubr.bf16.mxu1 %v9093_v25 }
  0x87   :  { %2636 = vmatpush1.bf16.msra.mxu0 %v7617_v13  ;;  %2923 = vmatpush1.bf16.msra.mxu1 %v7620_v26  ;;  %v7708_v13 = vld [vmem:[%s11298_s1 + $0x600] ss:$16 sps:$4 sm:$0xff]   ;;  %v9282_v26 = vrot.slane %v9062_v14, %v8798_v49  ;;  %v495_v14 = vcombine.high %v9093_v25, %v9093_v25  ;;  %v7722_v25 = vld [vmem:[%s11298_s1 + $0x644] ss:$16 sps:$4 sm:$0xff]  }
  0x88   :  { %2637 = vmatprep.subr.bf16.mxu0 %v7625_v27  ;;  %2924 = vmatprep.subr.bf16.mxu1 %v7628_v28  ;;  %v7711_v27 = vld [vmem:[%s11298_s1 + $0x608] ss:$16 sps:$4 sm:$0xff]   ;;  %v7716_v28 = vld [vmem:[%s11298_s1 + $0x624] ss:$16 sps:$4 sm:$0xff]  }
  0x8b   :  { %2638 = vmatpush1.bf16.msra.mxu0 %v7623_v29  ;;  %2925 = vmatpush1.bf16.msra.mxu1 %v7626_v30  ;;  %v7719_v29 = vld [vmem:[%s11298_s1 + $0x62c] ss:$16 sps:$4 sm:$0xff]   ;;  %v7714_v30 = vld [vmem:[%s11298_s1 + $0x620] ss:$16 sps:$4 sm:$0xff]  }
  0x8c   :  { %2639 = vmatprep.subr.bf16.mxu0 %v7631_v31  ;;  %2926 = vmatprep.subr.bf16.mxu1 %v7634_v32  ;;  %v7717_v31 = vld [vmem:[%s11298_s1 + $0x628] ss:$16 sps:$4 sm:$0xff]   ;;  %v7725_v32 = vld [vmem:[%s11298_s1 + $0x64c] ss:$16 sps:$4 sm:$0xff]  }
  0x8f   :  { %2640 = vmatpush1.bf16.msra.mxu0 %v7629_v33  ;;  %2927 = vmatpush1.bf16.msra.mxu1 %v7632_v34  ;;  %v7720_v33 = vld [vmem:[%s11298_s1 + $0x640] ss:$16 sps:$4 sm:$0xff]   ;;  %v7723_v34 = vld [vmem:[%s11298_s1 + $0x648] ss:$16 sps:$4 sm:$0xff]  }
  0x90   :  { %2641 = vmatprep.subr.bf16.mxu0 %v7637_v35  ;;  %2928 = vmatprep.subr.bf16.mxu1 %v7640_v36  ;;  %v7728_v35 = vld [vmem:[%s11298_s1 + $0x664] ss:$16 sps:$4 sm:$0xff]   ;;  %v7731_v36 = vld [vmem:[%s11298_s1 + $0x66c] ss:$16 sps:$4 sm:$0xff]  }
  0x93   :  { %2642 = vmatpush1.bf16.msra.mxu0 %v7635_v37  ;;  %2929 = vmatpush1.bf16.msra.mxu1 %v7638_v38  ;;  %v7726_v37 = vld [vmem:[%s11298_s1 + $0x660] ss:$16 sps:$4 sm:$0xff]   ;;  %v7729_v38 = vld [vmem:[%s11298_s1 + $0x668] ss:$16 sps:$4 sm:$0xff]  }
  0x94   :  { %2643 = vmatprep.subr.bf16.mxu0 %v7643_v39  ;;  %2930 = vmatprep.subr.bf16.mxu1 %v7646_v40  ;;  %v7734_v39 = vld [vmem:[%s11298_s1 + $0x684] ss:$16 sps:$4 sm:$0xff]   ;;  %v7737_v40 = vld [vmem:[%s11298_s1 + $0x68c] ss:$16 sps:$4 sm:$0xff]  }
  0x97   :  { %2644 = vmatpush1.bf16.msra.mxu0 %v7641_v41  ;;  %2931 = vmatpush1.bf16.msra.mxu1 %v7644_v43  ;;  %v7732_v41 = vld [vmem:[%s11298_s1 + $0x680] ss:$16 sps:$4 sm:$0xff]   ;;  %v7735_v43 = vld [vmem:[%s11298_s1 + $0x688] ss:$16 sps:$4 sm:$0xff]  }
  0x98   :  { %2645 = vmatprep.subr.bf16.mxu0 %v7649_v44  ;;  %2932 = vmatprep.subr.bf16.mxu1 %v7652_v45  ;;  %v7740_v44 = vld [vmem:[%s11298_s1 + $0x6a4] ss:$16 sps:$4 sm:$0xff]   ;;  %v7743_v45 = vld [vmem:[%s11298_s1 + $0x6ac] ss:$16 sps:$4 sm:$0xff]  }
  0x9b   :  { %2646 = vmatpush1.bf16.msra.mxu0 %v7647_v46  ;;  %2933 = vmatpush1.bf16.msra.mxu1 %v7650_v47  ;;  %v7738_v46 = vld [vmem:[%s11298_s1 + $0x6a0] ss:$16 sps:$4 sm:$0xff]   ;;  %v7741_v47 = vld [vmem:[%s11298_s1 + $0x6a8] ss:$16 sps:$4 sm:$0xff]  }
  0x9c   :  { %2647 = vmatprep.subr.bf16.mxu0 %v7655_v48  ;;  %2934 = vmatprep.subr.bf16.mxu1 %v7658_v50  ;;  %v7746_v48 = vld [vmem:[%s11298_s1 + $0x6c4] ss:$16 sps:$4 sm:$0xff]   ;;  %v7749_v50 = vld [vmem:[%s11298_s1 + $0x6cc] ss:$16 sps:$4 sm:$0xff]  }
  0x9f   :  { %2648 = vmatpush1.bf16.msra.mxu0 %v7653_v51  ;;  %2935 = vmatpush1.bf16.msra.mxu1 %v7656_v53  ;;  %v7744_v51 = vld [vmem:[%s11298_s1 + $0x6c0] ss:$16 sps:$4 sm:$0xff]   ;;  %v7747_v53 = vld [vmem:[%s11298_s1 + $0x6c8] ss:$16 sps:$4 sm:$0xff]  }
  0xa0   :  { %2649 = vmatprep.subr.bf16.mxu0 %v7661_v54  ;;  %2936 = vmatprep.subr.bf16.mxu1 %v7664_v55  ;;  %v7752_v54 = vld [vmem:[%s11298_s1 + $0x6e4] ss:$16 sps:$4 sm:$0xff]   ;;  %v7755_v55 = vld [vmem:[%s11298_s1 + $0x6ec] ss:$16 sps:$4 sm:$0xff]  }
  0xa3   :  { %2650 = vmatpush1.bf16.msra.mxu0 %v7659_v56  ;;  %2937 = vmatpush1.bf16.msra.mxu1 %v7662_v57  ;;  %v7750_v56 = vld [vmem:[%s11298_s1 + $0x6e0] ss:$16 sps:$4 sm:$0xff]   ;;  %v7753_v57 = vld [vmem:[%s11298_s1 + $0x6e8] ss:$16 sps:$4 sm:$0xff]  }
  0xa4   :  { %2651 = vmatprep.subr.bf16.mxu0 %v7667_v58  ;;  %2938 = vmatprep.subr.bf16.mxu1 %v7670_v59  ;;  %v7758_v58 = vld [vmem:[%s11298_s1 + $0x704] ss:$16 sps:$4 sm:$0xff]   ;;  %v7761_v59 = vld [vmem:[%s11298_s1 + $0x70c] ss:$16 sps:$4 sm:$0xff]  }
  0xa7   :  { %2652 = vmatpush1.bf16.msra.mxu0 %v7665_v60  ;;  %2939 = vmatpush1.bf16.msra.mxu1 %v7668_v61  ;;  %v7756_v60 = vld [vmem:[%s11298_s1 + $0x700] ss:$16 sps:$4 sm:$0xff]   ;;  %v7759_v61 = vld [vmem:[%s11298_s1 + $0x708] ss:$16 sps:$4 sm:$0xff]  }
  0xa8   :  { %2653 = vmatprep.subr.bf16.mxu0 %v7673_v62  ;;  %2940 = vmatprep.subr.bf16.mxu1 %v7676_v63  ;;  %v7764_v62 = vld [vmem:[%s11298_s1 + $0x724] ss:$16 sps:$4 sm:$0xff]   ;;  %v7767_v63 = vld [vmem:[%s11298_s1 + $0x72c] ss:$16 sps:$4 sm:$0xff]  }
  0xab   :  { %2654 = vmatpush1.bf16.msra.mxu0 %v7671_v0  ;;  %2941 = vmatpush1.bf16.msra.mxu1 %v7674_v1  ;;  %v7762_v0 = vld [vmem:[%s11298_s1 + $0x720] ss:$16 sps:$4 sm:$0xff]   ;;  %v7765_v1 = vld [vmem:[%s11298_s1 + $0x728] ss:$16 sps:$4 sm:$0xff]  }
  0xac   :  { %2655 = vmatprep.subr.bf16.mxu0 %v7679_v2  ;;  %2942 = vmatprep.subr.bf16.mxu1 %v7682_v3  ;;  %v7770_v2 = vld [vmem:[%s11298_s1 + $0x744] ss:$16 sps:$4 sm:$0xff]   ;;  %v7773_v3 = vld [vmem:[%s11298_s1 + $0x74c] ss:$16 sps:$4 sm:$0xff]  }
  0xaf   :  { %2656 = vmatpush1.bf16.msra.mxu0 %v7677_v4  ;;  %2943 = vmatpush1.bf16.msra.mxu1 %v7680_v5  ;;  %v7768_v4 = vld [vmem:[%s11298_s1 + $0x740] ss:$16 sps:$4 sm:$0xff]   ;;  %v7771_v5 = vld [vmem:[%s11298_s1 + $0x748] ss:$16 sps:$4 sm:$0xff]  }
  0xb0   :  { %2657 = vmatprep.subr.bf16.mxu0 %v7685_v6  ;;  %2944 = vmatprep.subr.bf16.mxu1 %v7688_v7  ;;  %v7776_v6 = vld [vmem:[%s11298_s1 + $0x764] ss:$16 sps:$4 sm:$0xff]   ;;  %v7779_v7 = vld [vmem:[%s11298_s1 + $0x76c] ss:$16 sps:$4 sm:$0xff]  }
  0xb3   :  { %2658 = vmatpush1.bf16.msra.mxu0 %v7683_v8  ;;  %2945 = vmatpush1.bf16.msra.mxu1 %v7686_v9  ;;  %v7774_v8 = vld [vmem:[%s11298_s1 + $0x760] ss:$16 sps:$4 sm:$0xff]   ;;  %v7777_v9 = vld [vmem:[%s11298_s1 + $0x768] ss:$16 sps:$4 sm:$0xff]  }
  0xb4   :  { %2659 = vmatprep.subr.bf16.mxu0 %v7691_v10  ;;  %2946 = vmatprep.subr.bf16.mxu1 %v7694_v11  ;;  %v7782_v10 = vld [vmem:[%s11298_s1 + $0x784] ss:$16 sps:$4 sm:$0xff]   ;;  %v7785_v11 = vld [vmem:[%s11298_s1 + $0x78c] ss:$16 sps:$4 sm:$0xff]  }
  0xb7   :  { %2660 = vmatpush1.bf16.msra.mxu0 %v7689_v12  ;;  %2947 = vmatpush1.bf16.msra.mxu1 %v7692_v52  ;;  %v7780_v12 = vld [vmem:[%s11298_s1 + $0x780] ss:$16 sps:$4 sm:$0xff]   ;;  %v7783_v52 = vld [vmem:[%s11298_s1 + $0x788] ss:$16 sps:$4 sm:$0xff]  }
  0xb8   :  { %2661 = vmatprep.subr.bf16.mxu0 %v7697_v15  ;;  %2948 = vmatprep.subr.bf16.mxu1 %v7700_v16  ;;  %v7788_v15 = vld [vmem:[%s11298_s1 + $0x7a4] ss:$16 sps:$4 sm:$0xff]   ;;  %v7791_v16 = vld [vmem:[%s11298_s1 + $0x7ac] ss:$16 sps:$4 sm:$0xff]  }
  0xbb   :  { %2662 = vmatpush1.bf16.msra.mxu0 %v7695_v17  ;;  %2949 = vmatpush1.bf16.msra.mxu1 %v7698_v18  ;;  %v7786_v17 = vld [vmem:[%s11298_s1 + $0x7a0] ss:$16 sps:$4 sm:$0xff]   ;;  %v7789_v18 = vld [vmem:[%s11298_s1 + $0x7a8] ss:$16 sps:$4 sm:$0xff]  }
  0xbc   :  { %2663 = vmatprep.subr.bf16.mxu0 %v7703_v19  ;;  %2950 = vmatprep.subr.bf16.mxu1 %v7706_v20  ;;  %v7794_v19 = vld [vmem:[%s11298_s1 + $0x7c4] ss:$16 sps:$4 sm:$0xff]   ;;  %v7797_v20 = vld [vmem:[%s11298_s1 + $0x7cc] ss:$16 sps:$4 sm:$0xff]  }
  0xbf   :  { %2664 = vmatpush1.bf16.msra.mxu0 %v7701_v21  ;;  %2951 = vmatpush1.bf16.msra.mxu1 %v7704_v22  ;;  %v9456_v21 = vld.sshfl [vmem:[%s11299_s0 + $0x8] sm:$0x37 pattern:$0x75316420]  ;;  %v7792_v22 = vld [vmem:[%s11298_s1 + $0x7c0] ss:$16 sps:$4 sm:$0xff]  }
  0xc0   :  { %2674 = vmatprep.subr.bf16.mxu0 %v7710_v23  ;;  %2961 = vmatprep.subr.bf16.mxu1 %v7713_v24  ;;  %v7795_v23 = vld [vmem:[%s11298_s1 + $0x7c8] ss:$16 sps:$4 sm:$0xff]   ;;  %v7800_v24 = vld [vmem:[%s11298_s1 + $0x7e4] ss:$16 sps:$4 sm:$0xff]  }
  0xc2   :  { %2666 = vmatmul.mubr.bf16.vlgmr.msra.gmra.mrb[0].mxu0 %v9282_v26  ;;  %2953 = vmatmul.mubr.bf16.vlgmr.msra.gmra.mrb[0].mxu1 %v9282_v26 }
  0xc3   :  { %2675 = vmatpush1.bf16.msra.mxu0 %v7708_v13  ;;  %2962 = vmatpush1.bf16.msra.mxu1 %v7711_v27  ;;  %v7803_v13 = vld [vmem:[%s11298_s1 + $0x7ec] ss:$16 sps:$4 sm:$0xff]   ;;  %v7798_v27 = vld [vmem:[%s11298_s1 + $0x7e0] ss:$16 sps:$4 sm:$0xff]  }
  0xc4   :  { %2676 = vmatprep.subr.bf16.mxu0 %v7716_v28  ;;  %2963 = vmatprep.subr.bf16.mxu1 %v7719_v29  ;;  %v7801_v28 = vld [vmem:[%s11298_s1 + $0x7e8] ss:$16 sps:$4 sm:$0xff]   ;;  %v7806_v29 = vld [vmem:[%s11298_s1 + $0x804] ss:$16 sps:$4 sm:$0xff]  }
  0xc5   :  { %2706 = vmatprep.mubr.bf16.mxu0 %v495_v14  ;;  %2993 = vmatprep.mubr.bf16.mxu1 %v495_v14  ;;  %v7809_v14 = vld [vmem:[%s11298_s1 + $0x80c] ss:$16 sps:$4 sm:$0xff]  }
  0xc7   :  { %2677 = vmatpush1.bf16.msra.mxu0 %v7714_v30  ;;  %2964 = vmatpush1.bf16.msra.mxu1 %v7717_v31  ;;  %v511_v30 = vcombine.high %v9456_v21, %v9456_v21  ;;  %v493_v31 = vcombine.high %v9282_v26, %v9282_v26  ;;  %v7815_v26 = vld [vmem:[%s11298_s1 + $0x82c] ss:$16 sps:$4 sm:$0xff]  }
  0xc8   :  { %2678 = vmatprep.subr.bf16.mxu0 %v7722_v25  ;;  %2965 = vmatprep.subr.bf16.mxu1 %v7725_v32  ;;  %v7804_v25 = vld [vmem:[%s11298_s1 + $0x800] ss:$16 sps:$4 sm:$0xff]   ;;  %v7807_v32 = vld [vmem:[%s11298_s1 + $0x808] ss:$16 sps:$4 sm:$0xff]  }
  0xcb   :  { %2679 = vmatpush1.bf16.msra.mxu0 %v7720_v33  ;;  %2966 = vmatpush1.bf16.msra.mxu1 %v7723_v34  ;;  %v7812_v33 = vld [vmem:[%s11298_s1 + $0x824] ss:$16 sps:$4 sm:$0xff]   ;;  %v9499_v34 = vrot.slane %v511_v30, %v8798_v49 }
  0xcc   :  { %2680 = vmatprep.subr.bf16.mxu0 %v7728_v35  ;;  %2967 = vmatprep.subr.bf16.mxu1 %v7731_v36  ;;  %v7810_v35 = vld [vmem:[%s11298_s1 + $0x820] ss:$16 sps:$4 sm:$0xff]   ;;  %v7813_v36 = vld [vmem:[%s11298_s1 + $0x828] ss:$16 sps:$4 sm:$0xff]   ;;  %v7896_v30 = vld [vmem:[%s11298_s1 + $0x9e4] ss:$16 sps:$4 sm:$0xff]  }
  0xcf   :  { %2681 = vmatpush1.bf16.msra.mxu0 %v7726_v37  ;;  %2968 = vmatpush1.bf16.msra.mxu1 %v7729_v38  ;;  %v7818_v37 = vld [vmem:[%s11298_s1 + $0x844] ss:$16 sps:$4 sm:$0xff]   ;;  %v7821_v38 = vld [vmem:[%s11298_s1 + $0x84c] ss:$16 sps:$4 sm:$0xff]  }
  0xd0   :  { %2682 = vmatprep.subr.bf16.mxu0 %v7734_v39  ;;  %2969 = vmatprep.subr.bf16.mxu1 %v7737_v40  ;;  %v7816_v39 = vld [vmem:[%s11298_s1 + $0x840] ss:$16 sps:$4 sm:$0xff]   ;;  %v7819_v40 = vld [vmem:[%s11298_s1 + $0x848] ss:$16 sps:$4 sm:$0xff]  }
  0xd3   :  { %2683 = vmatpush1.bf16.msra.mxu0 %v7732_v41  ;;  %2970 = vmatpush1.bf16.msra.mxu1 %v7735_v43  ;;  %v7824_v41 = vld [vmem:[%s11298_s1 + $0x864] ss:$16 sps:$4 sm:$0xff]   ;;  %v7827_v43 = vld [vmem:[%s11298_s1 + $0x86c] ss:$16 sps:$4 sm:$0xff]  }
  0xd4   :  { %2684 = vmatprep.subr.bf16.mxu0 %v7740_v44  ;;  %2971 = vmatprep.subr.bf16.mxu1 %v7743_v45  ;;  %v7822_v44 = vld [vmem:[%s11298_s1 + $0x860] ss:$16 sps:$4 sm:$0xff]   ;;  %v7825_v45 = vld [vmem:[%s11298_s1 + $0x868] ss:$16 sps:$4 sm:$0xff]  }
  0xd7   :  { %2685 = vmatpush1.bf16.msra.mxu0 %v7738_v46  ;;  %2972 = vmatpush1.bf16.msra.mxu1 %v7741_v47  ;;  %v7830_v46 = vld [vmem:[%s11298_s1 + $0x884] ss:$16 sps:$4 sm:$0xff]   ;;  %v7833_v47 = vld [vmem:[%s11298_s1 + $0x88c] ss:$16 sps:$4 sm:$0xff]  }
  0xd8   :  { %2686 = vmatprep.subr.bf16.mxu0 %v7746_v48  ;;  %2973 = vmatprep.subr.bf16.mxu1 %v7749_v50  ;;  %v7828_v48 = vld [vmem:[%s11298_s1 + $0x880] ss:$16 sps:$4 sm:$0xff]   ;;  %v7831_v50 = vld [vmem:[%s11298_s1 + $0x888] ss:$16 sps:$4 sm:$0xff]  }
  0xdb   :  { %2687 = vmatpush1.bf16.msra.mxu0 %v7744_v51  ;;  %2974 = vmatpush1.bf16.msra.mxu1 %v7747_v53  ;;  %v7836_v51 = vld [vmem:[%s11298_s1 + $0x8a4] ss:$16 sps:$4 sm:$0xff]   ;;  %v7839_v53 = vld [vmem:[%s11298_s1 + $0x8ac] ss:$16 sps:$4 sm:$0xff]  }
  0xdc   :  { %2688 = vmatprep.subr.bf16.mxu0 %v7752_v54  ;;  %2975 = vmatprep.subr.bf16.mxu1 %v7755_v55  ;;  %v7834_v54 = vld [vmem:[%s11298_s1 + $0x8a0] ss:$16 sps:$4 sm:$0xff]   ;;  %v7837_v55 = vld [vmem:[%s11298_s1 + $0x8a8] ss:$16 sps:$4 sm:$0xff]  }
  0xdf   :  { %2689 = vmatpush1.bf16.msra.mxu0 %v7750_v56  ;;  %2976 = vmatpush1.bf16.msra.mxu1 %v7753_v57  ;;  %v7842_v56 = vld [vmem:[%s11298_s1 + $0x8c4] ss:$16 sps:$4 sm:$0xff]   ;;  %v7845_v57 = vld [vmem:[%s11298_s1 + $0x8cc] ss:$16 sps:$4 sm:$0xff]  }
  0xe0   :  { %2690 = vmatprep.subr.bf16.mxu0 %v7758_v58  ;;  %2977 = vmatprep.subr.bf16.mxu1 %v7761_v59  ;;  %v7840_v58 = vld [vmem:[%s11298_s1 + $0x8c0] ss:$16 sps:$4 sm:$0xff]   ;;  %v7843_v59 = vld [vmem:[%s11298_s1 + $0x8c8] ss:$16 sps:$4 sm:$0xff]  }
  0xe3   :  { %2691 = vmatpush1.bf16.msra.mxu0 %v7756_v60  ;;  %2978 = vmatpush1.bf16.msra.mxu1 %v7759_v61  ;;  %v7848_v60 = vld [vmem:[%s11298_s1 + $0x8e4] ss:$16 sps:$4 sm:$0xff]   ;;  %v7851_v61 = vld [vmem:[%s11298_s1 + $0x8ec] ss:$16 sps:$4 sm:$0xff]  }
  0xe4   :  { %2692 = vmatprep.subr.bf16.mxu0 %v7764_v62  ;;  %2979 = vmatprep.subr.bf16.mxu1 %v7767_v63  ;;  %v7846_v62 = vld [vmem:[%s11298_s1 + $0x8e0] ss:$16 sps:$4 sm:$0xff]   ;;  %v7849_v63 = vld [vmem:[%s11298_s1 + $0x8e8] ss:$16 sps:$4 sm:$0xff]  }
  0xe7   :  { %2693 = vmatpush1.bf16.msra.mxu0 %v7762_v0  ;;  %2980 = vmatpush1.bf16.msra.mxu1 %v7765_v1  ;;  %v7854_v0 = vld [vmem:[%s11298_s1 + $0x904] ss:$16 sps:$4 sm:$0xff]   ;;  %v7857_v1 = vld [vmem:[%s11298_s1 + $0x90c] ss:$16 sps:$4 sm:$0xff]  }
  0xe8   :  { %2694 = vmatprep.subr.bf16.mxu0 %v7770_v2  ;;  %2981 = vmatprep.subr.bf16.mxu1 %v7773_v3  ;;  %v7852_v2 = vld [vmem:[%s11298_s1 + $0x900] ss:$16 sps:$4 sm:$0xff]   ;;  %v7855_v3 = vld [vmem:[%s11298_s1 + $0x908] ss:$16 sps:$4 sm:$0xff]  }
  0xeb   :  { %2695 = vmatpush1.bf16.msra.mxu0 %v7768_v4  ;;  %2982 = vmatpush1.bf16.msra.mxu1 %v7771_v5  ;;  %v7860_v4 = vld [vmem:[%s11298_s1 + $0x924] ss:$16 sps:$4 sm:$0xff]   ;;  %v7863_v5 = vld [vmem:[%s11298_s1 + $0x92c] ss:$16 sps:$4 sm:$0xff]  }
  0xec   :  { %2696 = vmatprep.subr.bf16.mxu0 %v7776_v6  ;;  %2983 = vmatprep.subr.bf16.mxu1 %v7779_v7  ;;  %v7858_v6 = vld [vmem:[%s11298_s1 + $0x920] ss:$16 sps:$4 sm:$0xff]   ;;  %v7861_v7 = vld [vmem:[%s11298_s1 + $0x928] ss:$16 sps:$4 sm:$0xff]  }
  0xef   :  { %2697 = vmatpush1.bf16.msra.mxu0 %v7774_v8  ;;  %2984 = vmatpush1.bf16.msra.mxu1 %v7777_v9  ;;  %v7866_v8 = vld [vmem:[%s11298_s1 + $0x944] ss:$16 sps:$4 sm:$0xff]   ;;  %v7869_v9 = vld [vmem:[%s11298_s1 + $0x94c] ss:$16 sps:$4 sm:$0xff]  }
  0xf0   :  { %2698 = vmatprep.subr.bf16.mxu0 %v7782_v10  ;;  %2985 = vmatprep.subr.bf16.mxu1 %v7785_v11  ;;  %v7864_v10 = vld [vmem:[%s11298_s1 + $0x940] ss:$16 sps:$4 sm:$0xff]   ;;  %v7867_v11 = vld [vmem:[%s11298_s1 + $0x948] ss:$16 sps:$4 sm:$0xff]  }
  0xf3   :  { %2699 = vmatpush1.bf16.msra.mxu0 %v7780_v12  ;;  %2986 = vmatpush1.bf16.msra.mxu1 %v7783_v52  ;;  %v7872_v12 = vld [vmem:[%s11298_s1 + $0x964] ss:$16 sps:$4 sm:$0xff]   ;;  %v7875_v52 = vld [vmem:[%s11298_s1 + $0x96c] ss:$16 sps:$4 sm:$0xff]  }
  0xf4   :  { %2700 = vmatprep.subr.bf16.mxu0 %v7788_v15  ;;  %2987 = vmatprep.subr.bf16.mxu1 %v7791_v16  ;;  %v7870_v15 = vld [vmem:[%s11298_s1 + $0x960] ss:$16 sps:$4 sm:$0xff]   ;;  %v7873_v16 = vld [vmem:[%s11298_s1 + $0x968] ss:$16 sps:$4 sm:$0xff]  }
  0xf7   :  { %2701 = vmatpush1.bf16.msra.mxu0 %v7786_v17  ;;  %2988 = vmatpush1.bf16.msra.mxu1 %v7789_v18  ;;  %v7878_v17 = vld [vmem:[%s11298_s1 + $0x984] ss:$16 sps:$4 sm:$0xff]   ;;  %v7881_v18 = vld [vmem:[%s11298_s1 + $0x98c] ss:$16 sps:$4 sm:$0xff]  }
  0xf8   :  { %2702 = vmatprep.subr.bf16.mxu0 %v7794_v19  ;;  %2989 = vmatprep.subr.bf16.mxu1 %v7797_v20  ;;  %v7876_v19 = vld [vmem:[%s11298_s1 + $0x980] ss:$16 sps:$4 sm:$0xff]   ;;  %v7879_v20 = vld [vmem:[%s11298_s1 + $0x988] ss:$16 sps:$4 sm:$0xff]  }
  0xfb   :  { %2703 = vmatpush1.bf16.msra.mxu0 %v7792_v22  ;;  %2990 = vmatpush1.bf16.msra.mxu1 %v7795_v23  ;;  %v7884_v22 = vld [vmem:[%s11298_s1 + $0x9a4] ss:$16 sps:$4 sm:$0xff]   ;;  %v7887_v23 = vld [vmem:[%s11298_s1 + $0x9ac] ss:$16 sps:$4 sm:$0xff]  }
  0xfc   :  { %2704 = vmatprep.subr.bf16.mxu0 %v7800_v24  ;;  %2991 = vmatprep.subr.bf16.mxu1 %v7803_v13  ;;  %v7882_v24 = vld [vmem:[%s11298_s1 + $0x9a0] ss:$16 sps:$4 sm:$0xff]   ;;  %v7885_v13 = vld [vmem:[%s11298_s1 + $0x9a8] ss:$16 sps:$4 sm:$0xff]  }
  0xff   :  { %2705 = vmatpush1.bf16.msra.mxu0 %v7798_v27  ;;  %2992 = vmatpush1.bf16.msra.mxu1 %v7801_v28  ;;  %v7890_v27 = vld [vmem:[%s11298_s1 + $0x9c4] ss:$16 sps:$4 sm:$0xff]   ;;  %v7893_v28 = vld [vmem:[%s11298_s1 + $0x9cc] ss:$16 sps:$4 sm:$0xff]  }
 0x100   :  { %2715 = vmatprep.subr.bf16.mxu0 %v7806_v29  ;;  %3002 = vmatprep.subr.bf16.mxu1 %v7809_v14  ;;  %v7888_v29 = vld [vmem:[%s11298_s1 + $0x9c0] ss:$16 sps:$4 sm:$0xff]   ;;  %v7891_v14 = vld [vmem:[%s11298_s1 + $0x9c8] ss:$16 sps:$4 sm:$0xff]  }
 0x102   :  { %2707 = vmatmul.mubr.bf16.vlgmr.msra.gmra.mrb[0].mxu0 %v493_v31  ;;  %2994 = vmatmul.mubr.bf16.vlgmr.msra.gmra.mrb[0].mxu1 %v493_v31  ;;  %v7899_v31 = vld [vmem:[%s11298_s1 + $0x9ec] ss:$16 sps:$4 sm:$0xff]  }
 0x103   :  { %2716 = vmatpush1.bf16.msra.mxu0 %v7804_v25  ;;  %3003 = vmatpush1.bf16.msra.mxu1 %v7807_v32  ;;  %v7894_v25 = vld [vmem:[%s11298_s1 + $0x9e0] ss:$16 sps:$4 sm:$0xff]   ;;  %v7897_v32 = vld [vmem:[%s11298_s1 + $0x9e8] ss:$16 sps:$4 sm:$0xff]  }
 0x104   :  { %2717 = vmatprep.subr.bf16.mxu0 %v7812_v33  ;;  %3004 = vmatprep.subr.bf16.mxu1 %v7815_v26  ;;  %v7903_v33 = vld [vmem:[%s11298_s1 + $0xa04] ss:$16 sps:$4 sm:$0xff]   ;;  %v7906_v26 = vld [vmem:[%s11298_s1 + $0xa0c] ss:$16 sps:$4 sm:$0xff]  }
 0x105   :  { %2747 = vmatprep.mubr.bf16.mxu0 %v9499_v34  ;;  %3034 = vmatprep.mubr.bf16.mxu1 %v9499_v34 }
 0x107   :  { %2718 = vmatpush1.bf16.msra.mxu0 %v7810_v35  ;;  %3005 = vmatpush1.bf16.msra.mxu1 %v7813_v36  ;;  %v9685_v35 = vrot.slane %v9456_v21, %v8798_v49  ;;  %v7901_v36 = vld [vmem:[%s11298_s1 + $0xa00] ss:$16 sps:$4 sm:$0xff]   ;;  %v7912_v21 = vld [vmem:[%s11298_s1 + $0xa2c] ss:$16 sps:$4 sm:$0xff]  }
 0x108   :  { %2719 = vmatprep.subr.bf16.mxu0 %v7818_v37  ;;  %3006 = vmatprep.subr.bf16.mxu1 %v7821_v38  ;;  %v7904_v37 = vld [vmem:[%s11298_s1 + $0xa08] ss:$16 sps:$4 sm:$0xff]   ;;  %v7909_v38 = vld [vmem:[%s11298_s1 + $0xa24] ss:$16 sps:$4 sm:$0xff]  }
 0x10b   :  { %2720 = vmatpush1.bf16.msra.mxu0 %v7816_v39  ;;  %3007 = vmatpush1.bf16.msra.mxu1 %v7819_v40  ;;  %v534_v39 = vcombine.high %v9499_v34, %v9499_v34  ;;  %v7907_v40 = vld [vmem:[%s11298_s1 + $0xa20] ss:$16 sps:$4 sm:$0xff]   ;;  %v7915_v34 = vld [vmem:[%s11298_s1 + $0xa44] ss:$16 sps:$4 sm:$0xff]  }
 0x10c   :  { %2721 = vmatprep.subr.bf16.mxu0 %v7824_v41  ;;  %3008 = vmatprep.subr.bf16.mxu1 %v7827_v43  ;;  %v7910_v41 = vld [vmem:[%s11298_s1 + $0xa28] ss:$16 sps:$4 sm:$0xff]   ;;  %v7918_v43 = vld [vmem:[%s11298_s1 + $0xa4c] ss:$16 sps:$4 sm:$0xff]  }
 0x10f   :  { %2722 = vmatpush1.bf16.msra.mxu0 %v7822_v44  ;;  %3009 = vmatpush1.bf16.msra.mxu1 %v7825_v45  ;;  %v7913_v44 = vld [vmem:[%s11298_s1 + $0xa40] ss:$16 sps:$4 sm:$0xff]   ;;  %v7916_v45 = vld [vmem:[%s11298_s1 + $0xa48] ss:$16 sps:$4 sm:$0xff]  }
 0x110   :  { %2723 = vmatprep.subr.bf16.mxu0 %v7830_v46  ;;  %3010 = vmatprep.subr.bf16.mxu1 %v7833_v47  ;;  %v7921_v46 = vld [vmem:[%s11298_s1 + $0xa64] ss:$16 sps:$4 sm:$0xff]   ;;  %v7924_v47 = vld [vmem:[%s11298_s1 + $0xa6c] ss:$16 sps:$4 sm:$0xff]  }
 0x113   :  { %2724 = vmatpush1.bf16.msra.mxu0 %v7828_v48  ;;  %3011 = vmatpush1.bf16.msra.mxu1 %v7831_v50  ;;  %v7919_v48 = vld [vmem:[%s11298_s1 + $0xa60] ss:$16 sps:$4 sm:$0xff]   ;;  %v7922_v50 = vld [vmem:[%s11298_s1 + $0xa68] ss:$16 sps:$4 sm:$0xff]  }
 0x114   :  { %2725 = vmatprep.subr.bf16.mxu0 %v7836_v51  ;;  %3012 = vmatprep.subr.bf16.mxu1 %v7839_v53  ;;  %v7927_v51 = vld [vmem:[%s11298_s1 + $0xa84] ss:$16 sps:$4 sm:$0xff]   ;;  %v7930_v53 = vld [vmem:[%s11298_s1 + $0xa8c] ss:$16 sps:$4 sm:$0xff]  }
 0x117   :  { %2726 = vmatpush1.bf16.msra.mxu0 %v7834_v54  ;;  %3013 = vmatpush1.bf16.msra.mxu1 %v7837_v55  ;;  %v7925_v54 = vld [vmem:[%s11298_s1 + $0xa80] ss:$16 sps:$4 sm:$0xff]   ;;  %v7928_v55 = vld [vmem:[%s11298_s1 + $0xa88] ss:$16 sps:$4 sm:$0xff]  }
 0x118   :  { %2727 = vmatprep.subr.bf16.mxu0 %v7842_v56  ;;  %3014 = vmatprep.subr.bf16.mxu1 %v7845_v57  ;;  %v7933_v56 = vld [vmem:[%s11298_s1 + $0xaa4] ss:$16 sps:$4 sm:$0xff]   ;;  %v7936_v57 = vld [vmem:[%s11298_s1 + $0xaac] ss:$16 sps:$4 sm:$0xff]  }
 0x11b   :  { %2728 = vmatpush1.bf16.msra.mxu0 %v7840_v58  ;;  %3015 = vmatpush1.bf16.msra.mxu1 %v7843_v59  ;;  %v7931_v58 = vld [vmem:[%s11298_s1 + $0xaa0] ss:$16 sps:$4 sm:$0xff]   ;;  %v7934_v59 = vld [vmem:[%s11298_s1 + $0xaa8] ss:$16 sps:$4 sm:$0xff]  }
 0x11c   :  { %2729 = vmatprep.subr.bf16.mxu0 %v7848_v60  ;;  %3016 = vmatprep.subr.bf16.mxu1 %v7851_v61  ;;  %v7939_v60 = vld [vmem:[%s11298_s1 + $0xac4] ss:$16 sps:$4 sm:$0xff]   ;;  %v7942_v61 = vld [vmem:[%s11298_s1 + $0xacc] ss:$16 sps:$4 sm:$0xff]  }
 0x11f   :  { %2730 = vmatpush1.bf16.msra.mxu0 %v7846_v62  ;;  %3017 = vmatpush1.bf16.msra.mxu1 %v7849_v63  ;;  %v7937_v62 = vld [vmem:[%s11298_s1 + $0xac0] ss:$16 sps:$4 sm:$0xff]   ;;  %v7940_v63 = vld [vmem:[%s11298_s1 + $0xac8] ss:$16 sps:$4 sm:$0xff]  }
 0x120   :  { %2731 = vmatprep.subr.bf16.mxu0 %v7854_v0  ;;  %3018 = vmatprep.subr.bf16.mxu1 %v7857_v1  ;;  %v7945_v0 = vld [vmem:[%s11298_s1 + $0xae4] ss:$16 sps:$4 sm:$0xff]   ;;  %v7948_v1 = vld [vmem:[%s11298_s1 + $0xaec] ss:$16 sps:$4 sm:$0xff]  }
 0x123   :  { %2732 = vmatpush1.bf16.msra.mxu0 %v7852_v2  ;;  %3019 = vmatpush1.bf16.msra.mxu1 %v7855_v3  ;;  %v7943_v2 = vld [vmem:[%s11298_s1 + $0xae0] ss:$16 sps:$4 sm:$0xff]   ;;  %v7946_v3 = vld [vmem:[%s11298_s1 + $0xae8] ss:$16 sps:$4 sm:$0xff]  }
 0x124   :  { %2733 = vmatprep.subr.bf16.mxu0 %v7860_v4  ;;  %3020 = vmatprep.subr.bf16.mxu1 %v7863_v5  ;;  %v7951_v4 = vld [vmem:[%s11298_s1 + $0xb04] ss:$16 sps:$4 sm:$0xff]   ;;  %v7954_v5 = vld [vmem:[%s11298_s1 + $0xb0c] ss:$16 sps:$4 sm:$0xff]  }
 0x127   :  { %2734 = vmatpush1.bf16.msra.mxu0 %v7858_v6  ;;  %3021 = vmatpush1.bf16.msra.mxu1 %v7861_v7  ;;  %v7949_v6 = vld [vmem:[%s11298_s1 + $0xb00] ss:$16 sps:$4 sm:$0xff]   ;;  %v7952_v7 = vld [vmem:[%s11298_s1 + $0xb08] ss:$16 sps:$4 sm:$0xff]  }
 0x128   :  { %2735 = vmatprep.subr.bf16.mxu0 %v7866_v8  ;;  %3022 = vmatprep.subr.bf16.mxu1 %v7869_v9  ;;  %v7957_v8 = vld [vmem:[%s11298_s1 + $0xb24] ss:$16 sps:$4 sm:$0xff]   ;;  %v7960_v9 = vld [vmem:[%s11298_s1 + $0xb2c] ss:$16 sps:$4 sm:$0xff]  }
 0x12b   :  { %2736 = vmatpush1.bf16.msra.mxu0 %v7864_v10  ;;  %3023 = vmatpush1.bf16.msra.mxu1 %v7867_v11  ;;  %v7955_v10 = vld [vmem:[%s11298_s1 + $0xb20] ss:$16 sps:$4 sm:$0xff]   ;;  %v7958_v11 = vld [vmem:[%s11298_s1 + $0xb28] ss:$16 sps:$4 sm:$0xff]  }
 0x12c   :  { %2737 = vmatprep.subr.bf16.mxu0 %v7872_v12  ;;  %3024 = vmatprep.subr.bf16.mxu1 %v7875_v52  ;;  %v7963_v12 = vld [vmem:[%s11298_s1 + $0xb44] ss:$16 sps:$4 sm:$0xff]   ;;  %v7966_v52 = vld [vmem:[%s11298_s1 + $0xb4c] ss:$16 sps:$4 sm:$0xff]  }
 0x12f   :  { %2738 = vmatpush1.bf16.msra.mxu0 %v7870_v15  ;;  %3025 = vmatpush1.bf16.msra.mxu1 %v7873_v16  ;;  %v7961_v15 = vld [vmem:[%s11298_s1 + $0xb40] ss:$16 sps:$4 sm:$0xff]   ;;  %v7964_v16 = vld [vmem:[%s11298_s1 + $0xb48] ss:$16 sps:$4 sm:$0xff]  }
 0x130   :  { %2739 = vmatprep.subr.bf16.mxu0 %v7878_v17  ;;  %3026 = vmatprep.subr.bf16.mxu1 %v7881_v18  ;;  %v7969_v17 = vld [vmem:[%s11298_s1 + $0xb64] ss:$16 sps:$4 sm:$0xff]   ;;  %v7972_v18 = vld [vmem:[%s11298_s1 + $0xb6c] ss:$16 sps:$4 sm:$0xff]  }
 0x133   :  { %2740 = vmatpush1.bf16.msra.mxu0 %v7876_v19  ;;  %3027 = vmatpush1.bf16.msra.mxu1 %v7879_v20  ;;  %v7967_v19 = vld [vmem:[%s11298_s1 + $0xb60] ss:$16 sps:$4 sm:$0xff]   ;;  %v7970_v20 = vld [vmem:[%s11298_s1 + $0xb68] ss:$16 sps:$4 sm:$0xff]  }
 0x134   :  { %2741 = vmatprep.subr.bf16.mxu0 %v7884_v22  ;;  %3028 = vmatprep.subr.bf16.mxu1 %v7887_v23  ;;  %v7975_v22 = vld [vmem:[%s11298_s1 + $0xb84] ss:$16 sps:$4 sm:$0xff]   ;;  %v7978_v23 = vld [vmem:[%s11298_s1 + $0xb8c] ss:$16 sps:$4 sm:$0xff]  }
 0x137   :  { %2742 = vmatpush1.bf16.msra.mxu0 %v7882_v24  ;;  %3029 = vmatpush1.bf16.msra.mxu1 %v7885_v13  ;;  %v7973_v24 = vld [vmem:[%s11298_s1 + $0xb80] ss:$16 sps:$4 sm:$0xff]   ;;  %v7976_v13 = vld [vmem:[%s11298_s1 + $0xb88] ss:$16 sps:$4 sm:$0xff]  }
 0x138   :  { %2743 = vmatprep.subr.bf16.mxu0 %v7890_v27  ;;  %3030 = vmatprep.subr.bf16.mxu1 %v7893_v28  ;;  %v7981_v27 = vld [vmem:[%s11298_s1 + $0xba4] ss:$16 sps:$4 sm:$0xff]   ;;  %v7984_v28 = vld [vmem:[%s11298_s1 + $0xbac] ss:$16 sps:$4 sm:$0xff]  }
 0x13b   :  { %2744 = vmatpush1.bf16.msra.mxu0 %v7888_v29  ;;  %3031 = vmatpush1.bf16.msra.mxu1 %v7891_v14  ;;  %v7979_v29 = vld [vmem:[%s11298_s1 + $0xba0] ss:$16 sps:$4 sm:$0xff]   ;;  %v7982_v14 = vld [vmem:[%s11298_s1 + $0xba8] ss:$16 sps:$4 sm:$0xff]  }
 0x13c   :  { %2745 = vmatprep.subr.bf16.mxu0 %v7896_v30  ;;  %3032 = vmatprep.subr.bf16.mxu1 %v7899_v31  ;;  %v7987_v30 = vld [vmem:[%s11298_s1 + $0xbc4] ss:$16 sps:$4 sm:$0xff]   ;;  %v7990_v31 = vld [vmem:[%s11298_s1 + $0xbcc] ss:$16 sps:$4 sm:$0xff]  }
 0x13f   :  { %2746 = vmatpush1.bf16.msra.mxu0 %v7894_v25  ;;  %3033 = vmatpush1.bf16.msra.mxu1 %v7897_v32  ;;  %v7985_v25 = vld [vmem:[%s11298_s1 + $0xbc0] ss:$16 sps:$4 sm:$0xff]   ;;  %v7988_v32 = vld [vmem:[%s11298_s1 + $0xbc8] ss:$16 sps:$4 sm:$0xff]  }
 0x140   :  { %2756 = vmatprep.subr.bf16.mxu0 %v7903_v33  ;;  %3043 = vmatprep.subr.bf16.mxu1 %v7906_v26  ;;  %v7993_v33 = vld [vmem:[%s11298_s1 + $0xbe4] ss:$16 sps:$4 sm:$0xff]   ;;  %v7996_v26 = vld [vmem:[%s11298_s1 + $0xbec] ss:$16 sps:$4 sm:$0xff]  }
 0x142   :  { %2748 = vmatmul.mubr.bf16.vlgmr.msra.gmra.mrb[0].mxu0 %v9685_v35  ;;  %3035 = vmatmul.mubr.bf16.vlgmr.msra.gmra.mrb[0].mxu1 %v9685_v35 }
 0x143   :  { %2757 = vmatpush1.bf16.msra.mxu0 %v7901_v36  ;;  %3044 = vmatpush1.bf16.msra.mxu1 %v7904_v37  ;;  %v7991_v36 = vld [vmem:[%s11298_s1 + $0xbe0] ss:$16 sps:$4 sm:$0xff]   ;;  %v7994_v37 = vld [vmem:[%s11298_s1 + $0xbe8] ss:$16 sps:$4 sm:$0xff]  }
 0x144   :  { %2758 = vmatprep.subr.bf16.mxu0 %v7909_v38  ;;  %3045 = vmatprep.subr.bf16.mxu1 %v7912_v21  ;;  %v7999_v38 = vld [vmem:[%s11298_s1 + $0xc04] ss:$16 sps:$4 sm:$0xff]   ;;  %v8002_v21 = vld [vmem:[%s11298_s1 + $0xc0c] ss:$16 sps:$4 sm:$0xff]  }
 0x145   :  { %2788 = vmatprep.mubr.bf16.mxu0 %v534_v39  ;;  %3075 = vmatprep.mubr.bf16.mxu1 %v534_v39  ;;  %v7997_v39 = vld [vmem:[%s11298_s1 + $0xc00] ss:$16 sps:$4 sm:$0xff]  }
 0x147   :  { %2759 = vmatpush1.bf16.msra.mxu0 %v7907_v40  ;;  %3046 = vmatpush1.bf16.msra.mxu1 %v7910_v41  ;;  %v8000_v40 = vld [vmem:[%s11298_s1 + $0xc08] ss:$16 sps:$4 sm:$0xff]   ;;  %v533_v41 = vcombine.high %v9685_v35, %v9685_v35 }
 0x148   :  { %2760 = vmatprep.subr.bf16.mxu0 %v7915_v34  ;;  %3047 = vmatprep.subr.bf16.mxu1 %v7918_v43  ;;  %v8005_v34 = vld [vmem:[%s11298_s1 + $0xc24] ss:$16 sps:$4 sm:$0xff]   ;;  %v8008_v43 = vld [vmem:[%s11298_s1 + $0xc2c] ss:$16 sps:$4 sm:$0xff]   ;;  %v8006_v35 = vld [vmem:[%s11298_s1 + $0xc28] ss:$16 sps:$4 sm:$0xff]  }
 0x14b   :  { %2761 = vmatpush1.bf16.msra.mxu0 %v7913_v44  ;;  %3048 = vmatpush1.bf16.msra.mxu1 %v7916_v45  ;;  %v8003_v44 = vld [vmem:[%s11298_s1 + $0xc20] ss:$16 sps:$4 sm:$0xff]   ;;  %v8011_v45 = vld [vmem:[%s11298_s1 + $0xc44] ss:$16 sps:$4 sm:$0xff]  }
 0x14c   :  { %2762 = vmatprep.subr.bf16.mxu0 %v7921_v46  ;;  %3049 = vmatprep.subr.bf16.mxu1 %v7924_v47  ;;  %v8014_v46 = vld [vmem:[%s11298_s1 + $0xc4c] ss:$16 sps:$4 sm:$0xff]   ;;  %v8009_v47 = vld [vmem:[%s11298_s1 + $0xc40] ss:$16 sps:$4 sm:$0xff]  }
 0x14f   :  { %2763 = vmatpush1.bf16.msra.mxu0 %v7919_v48  ;;  %3050 = vmatpush1.bf16.msra.mxu1 %v7922_v50  ;;  %v8012_v48 = vld [vmem:[%s11298_s1 + $0xc48] ss:$16 sps:$4 sm:$0xff]   ;;  %v8632_v50 = vmov 0  }
 0x150   :  { %2764 = vmatprep.subr.bf16.mxu0 %v7927_v51  ;;  %3051 = vmatprep.subr.bf16.mxu1 %v7930_v53  ;;  %v8629_v51 = vld [vmem:[%s11299_s0 + $0x8] sm:$0x1f] }
 0x151   :  { %v496_v53 = vcombine.high %v8629_v51, %v8629_v51  ;;  %v8099_v51 = vld [vmem:[%s11300_s3 + $0x548] ss:$52 sps:$4 sm:$0xff]  }
 0x153   :  { %2765 = vmatpush1.bf16.msra.mxu0 %v7925_v54  ;;  %3052 = vmatpush1.bf16.msra.mxu1 %v7928_v55  ;;  %v8017_v54 = vld [vmem:[%s11298_s1 + $0xc64] ss:$16 sps:$4 sm:$0xff]   ;;  %v8020_v55 = vld [vmem:[%s11298_s1 + $0xc6c] ss:$16 sps:$4 sm:$0xff]  }
 0x154   :  { %2766 = vmatprep.subr.bf16.mxu0 %v7933_v56  ;;  %3053 = vmatprep.subr.bf16.mxu1 %v7936_v57  ;;  %v8015_v56 = vld [vmem:[%s11298_s1 + $0xc60] ss:$16 sps:$4 sm:$0xff]   ;;  %v8018_v57 = vld [vmem:[%s11298_s1 + $0xc68] ss:$16 sps:$4 sm:$0xff]  }
 0x157   :  { %2767 = vmatpush1.bf16.msra.mxu0 %v7931_v58  ;;  %3054 = vmatpush1.bf16.msra.mxu1 %v7934_v59  ;;  %v510_v58 = vrot.slane %v496_v53, %v8798_v49  ;;  %v8023_v59 = vld [vmem:[%s11300_s3 + $0x4] ss:$52 sps:$4 sm:$0xff]  }
 0x158   :  { %2768 = vmatprep.subr.bf16.mxu0 %v7939_v60  ;;  %3055 = vmatprep.subr.bf16.mxu1 %v7942_v61  ;;  %v8026_v60 = vld [vmem:[%s11300_s3 + $0xc] ss:$52 sps:$4 sm:$0xff]   ;;  %v8102_v53 = vld [vmem:[%s11300_s3 + $0x550] ss:$52 sps:$4 sm:$0xff]  }
 0x159   :  { %v8021_v61 = vld [vmem:[%s11300_s3] ss:$52 sps:$4 sm:$0xff]  }
 0x15b   :  { %2769 = vmatpush1.bf16.msra.mxu0 %v7937_v62  ;;  %3056 = vmatpush1.bf16.msra.mxu1 %v7940_v63  ;;  %v8024_v62 = vld [vmem:[%s11300_s3 + $0x8] ss:$52 sps:$4 sm:$0xff]   ;;  %v525_v63 = vrot.slane %v510_v58, %v8798_v49 }
 0x15c   :  { %2770 = vmatprep.subr.bf16.mxu0 %v7945_v0  ;;  %3057 = vmatprep.subr.bf16.mxu1 %v7948_v1  ;;  %v8029_v0 = vld [vmem:[%s11300_s3 + $0x6c] ss:$52 sps:$4 sm:$0xff]   ;;  %v8032_v1 = vld [vmem:[%s11300_s3 + $0x74] ss:$52 sps:$4 sm:$0xff]   ;;  %v8113_v58 = vld [vmem:[%s11300_s3 + $0x61c] ss:$52 sps:$4 sm:$0xff]  }
 0x15f   :  { %2771 = vmatpush1.bf16.msra.mxu0 %v7943_v2  ;;  %3058 = vmatpush1.bf16.msra.mxu1 %v7946_v3  ;;  %v8027_v2 = vld [vmem:[%s11300_s3 + $0x68] ss:$52 sps:$4 sm:$0xff]   ;;  %v8030_v3 = vld [vmem:[%s11300_s3 + $0x70] ss:$52 sps:$4 sm:$0xff]  }
 0x160   :  { %2772 = vmatprep.subr.bf16.mxu0 %v7951_v4  ;;  %3059 = vmatprep.subr.bf16.mxu1 %v7954_v5  ;;  %v8035_v4 = vld [vmem:[%s11300_s3 + $0xd4] ss:$52 sps:$4 sm:$0xff]   ;;  %v8038_v5 = vld [vmem:[%s11300_s3 + $0xdc] ss:$52 sps:$4 sm:$0xff]  }
 0x163   :  { %2773 = vmatpush1.bf16.msra.mxu0 %v7949_v6  ;;  %3060 = vmatpush1.bf16.msra.mxu1 %v7952_v7  ;;  %v8033_v6 = vld [vmem:[%s11300_s3 + $0xd0] ss:$52 sps:$4 sm:$0xff]   ;;  %v8036_v7 = vld [vmem:[%s11300_s3 + $0xd8] ss:$52 sps:$4 sm:$0xff]  }
 0x164   :  { %2774 = vmatprep.subr.bf16.mxu0 %v7957_v8  ;;  %3061 = vmatprep.subr.bf16.mxu1 %v7960_v9  ;;  %v8041_v8 = vld [vmem:[%s11300_s3 + $0x13c] ss:$52 sps:$4 sm:$0xff]   ;;  %v8044_v9 = vld [vmem:[%s11300_s3 + $0x144] ss:$52 sps:$4 sm:$0xff]  }
 0x167   :  { %2775 = vmatpush1.bf16.msra.mxu0 %v7955_v10  ;;  %3062 = vmatpush1.bf16.msra.mxu1 %v7958_v11  ;;  %v8039_v10 = vld [vmem:[%s11300_s3 + $0x138] ss:$52 sps:$4 sm:$0xff]   ;;  %v8042_v11 = vld [vmem:[%s11300_s3 + $0x140] ss:$52 sps:$4 sm:$0xff]  }
 0x168   :  { %2776 = vmatprep.subr.bf16.mxu0 %v7963_v12  ;;  %3063 = vmatprep.subr.bf16.mxu1 %v7966_v52  ;;  %v8047_v12 = vld [vmem:[%s11300_s3 + $0x1a4] ss:$52 sps:$4 sm:$0xff]   ;;  %v8050_v52 = vld [vmem:[%s11300_s3 + $0x1ac] ss:$52 sps:$4 sm:$0xff]  }
 0x16b   :  { %2777 = vmatpush1.bf16.msra.mxu0 %v7961_v15  ;;  %3064 = vmatpush1.bf16.msra.mxu1 %v7964_v16  ;;  %v8045_v15 = vld [vmem:[%s11300_s3 + $0x1a0] ss:$52 sps:$4 sm:$0xff]   ;;  %v8048_v16 = vld [vmem:[%s11300_s3 + $0x1a8] ss:$52 sps:$4 sm:$0xff]  }
 0x16c   :  { %2778 = vmatprep.subr.bf16.mxu0 %v7969_v17  ;;  %3065 = vmatprep.subr.bf16.mxu1 %v7972_v18  ;;  %v8053_v17 = vld [vmem:[%s11300_s3 + $0x20c] ss:$52 sps:$4 sm:$0xff]   ;;  %v8056_v18 = vld [vmem:[%s11300_s3 + $0x214] ss:$52 sps:$4 sm:$0xff]  }
 0x16f   :  { %2779 = vmatpush1.bf16.msra.mxu0 %v7967_v19  ;;  %3066 = vmatpush1.bf16.msra.mxu1 %v7970_v20  ;;  %v8051_v19 = vld [vmem:[%s11300_s3 + $0x208] ss:$52 sps:$4 sm:$0xff]   ;;  %v8054_v20 = vld [vmem:[%s11300_s3 + $0x210] ss:$52 sps:$4 sm:$0xff]  }
 0x170   :  { %2780 = vmatprep.subr.bf16.mxu0 %v7975_v22  ;;  %3067 = vmatprep.subr.bf16.mxu1 %v7978_v23  ;;  %v8059_v22 = vld [vmem:[%s11300_s3 + $0x274] ss:$52 sps:$4 sm:$0xff]   ;;  %v8062_v23 = vld [vmem:[%s11300_s3 + $0x27c] ss:$52 sps:$4 sm:$0xff]  }
 0x173   :  { %2781 = vmatpush1.bf16.msra.mxu0 %v7973_v24  ;;  %3068 = vmatpush1.bf16.msra.mxu1 %v7976_v13  ;;  %v8057_v24 = vld [vmem:[%s11300_s3 + $0x270] ss:$52 sps:$4 sm:$0xff]   ;;  %v8060_v13 = vld [vmem:[%s11300_s3 + $0x278] ss:$52 sps:$4 sm:$0xff]  }
 0x174   :  { %2782 = vmatprep.subr.bf16.mxu0 %v7981_v27  ;;  %3069 = vmatprep.subr.bf16.mxu1 %v7984_v28  ;;  %v8065_v27 = vld [vmem:[%s11300_s3 + $0x2dc] ss:$52 sps:$4 sm:$0xff]   ;;  %v8068_v28 = vld [vmem:[%s11300_s3 + $0x2e4] ss:$52 sps:$4 sm:$0xff]  }
 0x177   :  { %2783 = vmatpush1.bf16.msra.mxu0 %v7979_v29  ;;  %3070 = vmatpush1.bf16.msra.mxu1 %v7982_v14  ;;  %v8063_v29 = vld [vmem:[%s11300_s3 + $0x2d8] ss:$52 sps:$4 sm:$0xff]   ;;  %v8066_v14 = vld [vmem:[%s11300_s3 + $0x2e0] ss:$52 sps:$4 sm:$0xff]  }
 0x178   :  { %2784 = vmatprep.subr.bf16.mxu0 %v7987_v30  ;;  %3071 = vmatprep.subr.bf16.mxu1 %v7990_v31  ;;  %v8071_v30 = vld [vmem:[%s11300_s3 + $0x344] ss:$52 sps:$4 sm:$0xff]   ;;  %v8074_v31 = vld [vmem:[%s11300_s3 + $0x34c] ss:$52 sps:$4 sm:$0xff]  }
 0x17b   :  { %2785 = vmatpush1.bf16.msra.mxu0 %v7985_v25  ;;  %3072 = vmatpush1.bf16.msra.mxu1 %v7988_v32  ;;  %v8069_v25 = vld [vmem:[%s11300_s3 + $0x340] ss:$52 sps:$4 sm:$0xff]   ;;  %v8072_v32 = vld [vmem:[%s11300_s3 + $0x348] ss:$52 sps:$4 sm:$0xff]  }
 0x17c   :  { %2786 = vmatprep.subr.bf16.mxu0 %v7993_v33  ;;  %3073 = vmatprep.subr.bf16.mxu1 %v7996_v26  ;;  %v8077_v33 = vld [vmem:[%s11300_s3 + $0x3ac] ss:$52 sps:$4 sm:$0xff]   ;;  %v8080_v26 = vld [vmem:[%s11300_s3 + $0x3b4] ss:$52 sps:$4 sm:$0xff]  }
 0x17f   :  { %2787 = vmatpush1.bf16.msra.mxu0 %v7991_v36  ;;  %3074 = vmatpush1.bf16.msra.mxu1 %v7994_v37  ;;  %v8075_v36 = vld [vmem:[%s11300_s3 + $0x3a8] ss:$52 sps:$4 sm:$0xff]   ;;  %v8078_v37 = vld [vmem:[%s11300_s3 + $0x3b0] ss:$52 sps:$4 sm:$0xff]  }
 0x180   :  { %2797 = vmatprep.subr.bf16.mxu0 %v7999_v38  ;;  %3084 = vmatprep.subr.bf16.mxu1 %v8002_v21  ;;  %v8083_v38 = vld [vmem:[%s11300_s3 + $0x414] ss:$52 sps:$4 sm:$0xff]   ;;  %v8086_v21 = vld [vmem:[%s11300_s3 + $0x41c] ss:$52 sps:$4 sm:$0xff]  }
 0x182   :  { %2789 = vmatmul.mubr.bf16.vlgmr.msra.gmra.mrb[0].mxu0 %v533_v41  ;;  %3076 = vmatmul.mubr.bf16.vlgmr.msra.gmra.mrb[0].mxu1 %v533_v41  ;;  %v8089_v41 = vld [vmem:[%s11300_s3 + $0x47c] ss:$52 sps:$4 sm:$0xff]  }
 0x183   :  { %2798 = vmatpush1.bf16.msra.mxu0 %v7997_v39  ;;  %3085 = vmatpush1.bf16.msra.mxu1 %v8000_v40  ;;  %v8081_v39 = vld [vmem:[%s11300_s3 + $0x410] ss:$52 sps:$4 sm:$0xff]   ;;  %v8084_v40 = vld [vmem:[%s11300_s3 + $0x418] ss:$52 sps:$4 sm:$0xff]  }
 0x184   :  { %2799 = vmatprep.subr.bf16.mxu0 %v8005_v34  ;;  %3086 = vmatprep.subr.bf16.mxu1 %v8008_v43  ;;  %v8092_v34 = vld [vmem:[%s11300_s3 + $0x484] ss:$52 sps:$4 sm:$0xff]  }
 0x185   :  { %2829 = vmatprep.mubr.bf16.mxu0 %v8632_v50  ;;  %3116 = vmatprep.mubr.bf16.mxu1 %v8632_v50  ;;  %v8087_v43 = vld [vmem:[%s11300_s3 + $0x478] ss:$52 sps:$4 sm:$0xff]   ;;  %v8104_v50 = vld [vmem:[%s11300_s3 + $0x554] ss:$52 sps:$4 sm:$0xff]  }
 0x187   :  { %2800 = vmatpush1.bf16.msra.mxu0 %v8003_v44  ;;  %3087 = vmatpush1.bf16.msra.mxu1 %v8006_v35  ;;  %v8090_v44 = vld [vmem:[%s11300_s3 + $0x480] ss:$52 sps:$4 sm:$0xff]   ;;  %v8095_v35 = vld [vmem:[%s11300_s3 + $0x4e4] ss:$52 sps:$4 sm:$0xff]  }
 0x188   :  { %2801 = vmatprep.subr.bf16.mxu0 %v8011_v45  ;;  %3088 = vmatprep.subr.bf16.mxu1 %v8014_v46  ;;  %v8098_v45 = vld [vmem:[%s11300_s3 + $0x4ec] ss:$52 sps:$4 sm:$0xff]  }
 0x189   :  { %v8093_v46 = vld [vmem:[%s11300_s3 + $0x4e0] ss:$52 sps:$4 sm:$0xff]  }
 0x18b   :  { %2802 = vmatpush1.bf16.msra.mxu0 %v8009_v47  ;;  %3089 = vmatpush1.bf16.msra.mxu1 %v8012_v48  ;;  %v8096_v47 = vld [vmem:[%s11300_s3 + $0x4e8] ss:$52 sps:$4 sm:$0xff]   ;;  %v8101_v48 = vld [vmem:[%s11300_s3 + $0x54c] ss:$52 sps:$4 sm:$0xff]  }
 0x18c   :  { %2803 = vmatprep.subr.bf16.mxu0 %v8017_v54  ;;  %3090 = vmatprep.subr.bf16.mxu1 %v8020_v55  ;;  %v8107_v54 = vld [vmem:[%s11300_s3 + $0x5b4] ss:$52 sps:$4 sm:$0xff]   ;;  %v8110_v55 = vld [vmem:[%s11300_s3 + $0x5bc] ss:$52 sps:$4 sm:$0xff]  }
 0x18f   :  { %2804 = vmatpush1.bf16.msra.mxu0 %v8015_v56  ;;  %3091 = vmatpush1.bf16.msra.mxu1 %v8018_v57  ;;  %v8105_v56 = vld [vmem:[%s11300_s3 + $0x5b0] ss:$52 sps:$4 sm:$0xff]   ;;  %v8108_v57 = vld [vmem:[%s11300_s3 + $0x5b8] ss:$52 sps:$4 sm:$0xff]  }
 0x190   :  { %5758 = vmatprep.subr.bf16.mxu0 %v8023_v59  ;;  %5840 = vmatprep.subr.bf16.mxu1 %v8026_v60  ;;  %v8116_v59 = vld [vmem:[%s11300_s3 + $0x624] ss:$52 sps:$4 sm:$0xff]  }
 0x191   :  { %v8111_v60 = vld [vmem:[%s11300_s3 + $0x618] ss:$52 sps:$4 sm:$0xff]  }
 0x192   :  { %6861 = vmatmul.mubr.msk.bf16.vlgmr.msra.gmra.mrb[0].mxu0 %vm2547_vm0, %v525_v63  ;;  %6862 = vmatmul.mubr.msk.bf16.vlgmr.msra.gmra.mrb[0].mxu1 %vm2547_vm0, %v525_v63  ;;  %v8122_v63 = vld [vmem:[%s11300_s3 + $0x68c] ss:$52 sps:$4 sm:$0xff]  }
 0x193   :  { %5759 = vmatpush1.bf16.msra.mxu0 %v8021_v61  ;;  %5841 = vmatpush1.bf16.msra.mxu1 %v8024_v62  ;;  %v8114_v61 = vld [vmem:[%s11300_s3 + $0x620] ss:$52 sps:$4 sm:$0xff]   ;;  %v8119_v62 = vld [vmem:[%s11300_s3 + $0x684] ss:$52 sps:$4 sm:$0xff]  }
 0x194   :  { %5760 = vmatprep.subr.bf16.mxu0 %v8029_v0  ;;  %5842 = vmatprep.subr.bf16.mxu1 %v8032_v1  ;;  %v10131_v0 = vsub.s32 0, %v8780_v42  ;;  %v10136_v1 = vld [vmem:[%s11301_s2] sm:$0xf] }
 0x197   :  { %5761 = vmatpush1.bf16.msra.mxu0 %v8027_v2  ;;  %5843 = vmatpush1.bf16.msra.mxu1 %v8030_v3  ;;  %v10139_v2 = vsub.s32 1, %v8780_v42  ;;  %v10142_v3 = vsub.s32 3, %v8780_v42 }
 0x198   :  { %5762 = vmatprep.subr.bf16.mxu0 %v8035_v4  ;;  %5844 = vmatprep.subr.bf16.mxu1 %v8038_v5  ;;  %v428_v4 = vrot.slane %v10136_v1, %v10131_v0 }
 0x199   :  { %v432_v5 = vrot.slane %v10136_v1, %v10139_v2 }
 0x19b   :  { %5763 = vmatpush1.bf16.msra.mxu0 %v8033_v6  ;;  %5845 = vmatpush1.bf16.msra.mxu1 %v8036_v7  ;;  %v440_v6 = vrot.slane %v10136_v1, %v10142_v3 }
 0x19c   :  { %5764 = vmatprep.subr.bf16.mxu0 %v8041_v8  ;;  %5846 = vmatprep.subr.bf16.mxu1 %v8044_v9 }
 0x19f   :  { %5765 = vmatpush1.bf16.msra.mxu0 %v8039_v10  ;;  %5847 = vmatpush1.bf16.msra.mxu1 %v8042_v11 }
 0x1a0   :  { %5766 = vmatprep.subr.bf16.mxu0 %v8047_v12  ;;  %5848 = vmatprep.subr.bf16.mxu1 %v8050_v52 }
 0x1a3   :  { %5767 = vmatpush1.bf16.msra.mxu0 %v8045_v15  ;;  %5849 = vmatpush1.bf16.msra.mxu1 %v8048_v16 }
 0x1a4   :  { %5768 = vmatprep.subr.bf16.mxu0 %v8053_v17  ;;  %5850 = vmatprep.subr.bf16.mxu1 %v8056_v18 }
 0x1a7   :  { %5769 = vmatpush1.bf16.msra.mxu0 %v8051_v19  ;;  %5851 = vmatpush1.bf16.msra.mxu1 %v8054_v20  ;;  %v8117_v20 = vld [vmem:[%s11300_s3 + $0x680] ss:$52 sps:$4 sm:$0xff]  }
 0x1a8   :  { %5770 = vmatprep.subr.bf16.mxu0 %v8059_v22  ;;  %5852 = vmatprep.subr.bf16.mxu1 %v8062_v23  ;;  %v8120_v22 = vld [vmem:[%s11300_s3 + $0x688] ss:$52 sps:$4 sm:$0xff]  }
 0x1ab   :  { %5771 = vmatpush1.bf16.msra.mxu0 %v8057_v24  ;;  %5853 = vmatpush1.bf16.msra.mxu1 %v8060_v13  ;;  %v8125_v24 = vld [vmem:[%s11300_s3 + $0x6ec] ss:$52 sps:$4 sm:$0xff]   ;;  %v8128_v13 = vld [vmem:[%s11300_s3 + $0x6f4] ss:$52 sps:$4 sm:$0xff]  }
 0x1ac   :  { %5772 = vmatprep.subr.bf16.mxu0 %v8065_v27  ;;  %5854 = vmatprep.subr.bf16.mxu1 %v8068_v28  ;;  %v8123_v28 = vld [vmem:[%s11300_s3 + $0x6e8] ss:$52 sps:$4 sm:$0xff]  }
 0x1af   :  { %5773 = vmatpush1.bf16.msra.mxu0 %v8063_v29  ;;  %5855 = vmatpush1.bf16.msra.mxu1 %v8066_v14  ;;  %v8126_v29 = vld [vmem:[%s11300_s3 + $0x6f0] ss:$52 sps:$4 sm:$0xff]   ;;  %v8131_v14 = vld [vmem:[%s11300_s3 + $0x754] ss:$52 sps:$4 sm:$0xff]  }
 0x1b0   :  { %5774 = vmatprep.subr.bf16.mxu0 %v8071_v30  ;;  %5856 = vmatprep.subr.bf16.mxu1 %v8074_v31  ;;  %v8134_v30 = vld [vmem:[%s11300_s3 + $0x75c] ss:$52 sps:$4 sm:$0xff]  }
 0x1b1   :  { %v8129_v31 = vld [vmem:[%s11300_s3 + $0x750] ss:$52 sps:$4 sm:$0xff]  }
 0x1b3   :  { %5775 = vmatpush1.bf16.msra.mxu0 %v8069_v25  ;;  %5857 = vmatpush1.bf16.msra.mxu1 %v8072_v32  ;;  %v8132_v25 = vld [vmem:[%s11300_s3 + $0x758] ss:$52 sps:$4 sm:$0xff]   ;;  %v8137_v32 = vld [vmem:[%s11300_s3 + $0x7bc] ss:$52 sps:$4 sm:$0xff]  }
 0x1b4   :  { %5776 = vmatprep.subr.bf16.mxu0 %v8077_v33  ;;  %5858 = vmatprep.subr.bf16.mxu1 %v8080_v26  ;;  %v8140_v33 = vld [vmem:[%s11300_s3 + $0x7c4] ss:$52 sps:$4 sm:$0xff]  }
 0x1b5   :  { %v8135_v26 = vld [vmem:[%s11300_s3 + $0x7b8] ss:$52 sps:$4 sm:$0xff]  }
 0x1b7   :  { %5777 = vmatpush1.bf16.msra.mxu0 %v8075_v36  ;;  %5859 = vmatpush1.bf16.msra.mxu1 %v8078_v37  ;;  %v8138_v36 = vld [vmem:[%s11300_s3 + $0x7c0] ss:$52 sps:$4 sm:$0xff]   ;;  %v8143_v37 = vld [vmem:[%s11300_s3 + $0x824] ss:$52 sps:$4 sm:$0xff]  }
 0x1b8   :  { %5778 = vmatprep.subr.bf16.mxu0 %v8083_v38  ;;  %5860 = vmatprep.subr.bf16.mxu1 %v8086_v21  ;;  %v8146_v38 = vld [vmem:[%s11300_s3 + $0x82c] ss:$52 sps:$4 sm:$0xff]  }
 0x1b9   :  { %v8141_v21 = vld [vmem:[%s11300_s3 + $0x820] ss:$52 sps:$4 sm:$0xff]  }
 0x1bb   :  { %5779 = vmatpush1.bf16.msra.mxu0 %v8081_v39  ;;  %5861 = vmatpush1.bf16.msra.mxu1 %v8084_v40  ;;  %v8144_v39 = vld [vmem:[%s11300_s3 + $0x828] ss:$52 sps:$4 sm:$0xff]   ;;  %v8149_v40 = vld [vmem:[%s11300_s3 + $0x88c] ss:$52 sps:$4 sm:$0xff]  }
 0x1bc   :  { %5780 = vmatprep.subr.bf16.mxu0 %v8089_v41  ;;  %5862 = vmatprep.subr.bf16.mxu1 %v8092_v34  ;;  %v8152_v41 = vld [vmem:[%s11300_s3 + $0x894] ss:$52 sps:$4 sm:$0xff]  }
 0x1bd   :  { %v8147_v34 = vld [vmem:[%s11300_s3 + $0x888] ss:$52 sps:$4 sm:$0xff]  }
 0x1bf   :  { %5781 = vmatpush1.bf16.msra.mxu0 %v8087_v43  ;;  %5863 = vmatpush1.bf16.msra.mxu1 %v8090_v44  ;;  %v8150_v43 = vld [vmem:[%s11300_s3 + $0x890] ss:$52 sps:$4 sm:$0xff]   ;;  %v8155_v44 = vld [vmem:[%s11300_s3 + $0x8f4] ss:$52 sps:$4 sm:$0xff]  }
 0x1c0   :  { %5782 = vmatprep.subr.bf16.mxu0 %v8095_v35  ;;  %5864 = vmatprep.subr.bf16.mxu1 %v8098_v45  ;;  %v8158_v35 = vld [vmem:[%s11300_s3 + $0x8fc] ss:$52 sps:$4 sm:$0xff]  }
 0x1c1   :  { %v8153_v45 = vld [vmem:[%s11300_s3 + $0x8f0] ss:$52 sps:$4 sm:$0xff]  }
 0x1c3   :  { %5783 = vmatpush1.bf16.msra.mxu0 %v8093_v46  ;;  %5865 = vmatpush1.bf16.msra.mxu1 %v8096_v47  ;;  %v8156_v46 = vld [vmem:[%s11300_s3 + $0x8f8] ss:$52 sps:$4 sm:$0xff]   ;;  %v8161_v47 = vld [vmem:[%s11300_s3 + $0x95c] ss:$52 sps:$4 sm:$0xff]  }
 0x1c4   :  { %5784 = vmatprep.subr.bf16.mxu0 %v8101_v48  ;;  %5866 = vmatprep.subr.bf16.mxu1 %v8104_v50  ;;  %v8164_v48 = vld [vmem:[%s11300_s3 + $0x964] ss:$52 sps:$4 sm:$0xff]  }
 0x1c5   :  { %v8159_v50 = vld [vmem:[%s11300_s3 + $0x958] ss:$52 sps:$4 sm:$0xff]  }
 0x1c7   :  { %5785 = vmatpush1.bf16.msra.mxu0 %v8099_v51  ;;  %5867 = vmatpush1.bf16.msra.mxu1 %v8102_v53  ;;  %v8162_v51 = vld [vmem:[%s11300_s3 + $0x960] ss:$52 sps:$4 sm:$0xff]   ;;  %v8167_v53 = vld [vmem:[%s11300_s3 + $0x9c4] ss:$52 sps:$4 sm:$0xff]  }
 0x1c8   :  { %5786 = vmatprep.subr.bf16.mxu0 %v8107_v54  ;;  %5868 = vmatprep.subr.bf16.mxu1 %v8110_v55  ;;  %v8170_v54 = vld [vmem:[%s11300_s3 + $0x9cc] ss:$52 sps:$4 sm:$0xff]  }
 0x1c9   :  { %v8165_v55 = vld [vmem:[%s11300_s3 + $0x9c0] ss:$52 sps:$4 sm:$0xff]  }
 0x1cb   :  { %5787 = vmatpush1.bf16.msra.mxu0 %v8105_v56  ;;  %5869 = vmatpush1.bf16.msra.mxu1 %v8108_v57  ;;  %v8168_v56 = vld [vmem:[%s11300_s3 + $0x9c8] ss:$52 sps:$4 sm:$0xff]   ;;  %v8173_v57 = vld [vmem:[%s11300_s3 + $0xa2c] ss:$52 sps:$4 sm:$0xff]  }
 0x1cc   :  { %5788 = vmatprep.subr.bf16.mxu0 %v8113_v58  ;;  %5870 = vmatprep.subr.bf16.mxu1 %v8116_v59  ;;  %v8176_v58 = vld [vmem:[%s11300_s3 + $0xa34] ss:$52 sps:$4 sm:$0xff]  }
 0x1cd   :  { %v8171_v59 = vld [vmem:[%s11300_s3 + $0xa28] ss:$52 sps:$4 sm:$0xff]  }
 0x1cf   :  { %5789 = vmatpush1.bf16.msra.mxu0 %v8111_v60  ;;  %5871 = vmatpush1.bf16.msra.mxu1 %v8114_v61  ;;  %v8174_v60 = vld [vmem:[%s11300_s3 + $0xa30] ss:$52 sps:$4 sm:$0xff]   ;;  %v8179_v61 = vld [vmem:[%s11300_s3 + $0xa94] ss:$52 sps:$4 sm:$0xff]  }
 0x1d0   :  { %5799 = vmatprep.subr.bf16.mxu0 %v8119_v62  ;;  %5881 = vmatprep.subr.bf16.mxu1 %v8122_v63  ;;  %v8182_v62 = vld [vmem:[%s11300_s3 + $0xa9c] ss:$52 sps:$4 sm:$0xff]  }
 0x1d1   :  { %v8177_v63 = vld [vmem:[%s11300_s3 + $0xa90] ss:$52 sps:$4 sm:$0xff]  }
 0x265   :  { %v2831_v7 = vpop.f32.mrb[0].mxu0  ;;  %v10150_v8 = vpop.f32.mrb[0].mxu1 }
 0x266   :  { %v7329_v9 = vadd.f32 %v2831_v7, %v428_v4  ;;  %v2833_v10 = vpop.f32.mrb[1].mxu0  ;;  %v3120_v11 = vpop.f32.mrb[1].mxu1  ;;  %v8180_v4 = vld [vmem:[%s11300_s3 + $0xa98] ss:$52 sps:$4 sm:$0xff]  }
 0x267   :  { %v7330_v12 = vadd.f32 %v2833_v10, %v432_v5  ;;  %v2835_v52 = vpop.f32.mrb[2].mxu0  ;;  %v3122_v15 = vpop.f32.mrb[2].mxu1  ;;  %v7332_v16 = vadd.f32 %v3120_v11, %v440_v6  ;;  %v8185_v5 = vld [vmem:[%s11300_s3 + $0xafc] ss:$52 sps:$4 sm:$0xff]   ;;  %v8188_v6 = vld [vmem:[%s11300_s3 + $0xb04] ss:$52 sps:$4 sm:$0xff]  }
 0x268   :  { %v2836_v17 = vpop.f32.mrb[3].mxu0  ;;  %v3123_v18 = vpop.f32.mrb[3].mxu1  ;;  %v10160_v23 = vpack.c.bf16 %v7329_v9, %v7329_v9  ;;  %v8183_v7 = vld [vmem:[%s11300_s3 + $0xaf8] ss:$52 sps:$4 sm:$0xff]   ;;  %v8186_v9 = vld [vmem:[%s11300_s3 + $0xb00] ss:$52 sps:$4 sm:$0xff]  }
 0x269   :  { %v10152_v19 = vpack.c.bf16 %v7330_v12, %v7330_v12  ;;  %v10170_v27 = vpack.c.bf16 %v7332_v16, %v7332_v16  ;;  %v8191_v10 = vld [vmem:[%s11300_s3 + $0xb64] ss:$52 sps:$4 sm:$0xff]   ;;  %v8194_v11 = vld [vmem:[%s11300_s3 + $0xb6c] ss:$52 sps:$4 sm:$0xff]   ;;  %v8192_v52 = vld [vmem:[%s11300_s3 + $0xb68] ss:$52 sps:$4 sm:$0xff]  }
 0x26a   :  { %v8189_v12 = vld [vmem:[%s11300_s3 + $0xb60] ss:$52 sps:$4 sm:$0xff]   ;;  %v8195_v17 = vld [vmem:[%s11300_s3 + $0xbc8] ss:$52 sps:$4 sm:$0xff]   ;;  %v8198_v18 = vld [vmem:[%s11300_s3 + $0xbd0] ss:$52 sps:$4 sm:$0xff]  }
 0x26b   :  { %5790 = vmatprep.mubr.bf16.mxu0 %v10152_v19  ;;  %5872 = vmatprep.mubr.bf16.mxu1 %v10152_v19  ;;  %v8197_v15 = vld [vmem:[%s11300_s3 + $0xbcc] ss:$52 sps:$4 sm:$0xff]   ;;  %v8200_v16 = vld [vmem:[%s11300_s3 + $0xbd4] ss:$52 sps:$4 sm:$0xff]  }
 0x26c   :  { %5791 = vmatmul.mubr.bf16.vlgmr.msra.gmra.mrb[4].mxu0 %v10160_v23  ;;  %5873 = vmatmul.mubr.bf16.vlgmr.msra.gmra.mrb[4].mxu1 %v10160_v23 }
 0x26d   :  { %5800 = vmatpush1.bf16.msra.mxu0 %v8117_v20  ;;  %5882 = vmatpush1.bf16.msra.mxu1 %v8120_v22  ;;  %v10327_v20 = vsub.s32 2, %v8780_v42  ;;  %v8203_v22 = vld [vmem:[%s11300_s3 + $0xc34] ss:$52 sps:$4 sm:$0xff]  }
 0x26e   :  { %5831 = vmatprep.mubr.bf16.mxu0 %v10170_v27  ;;  %5913 = vmatprep.mubr.bf16.mxu1 %v10170_v27 }
 0x26f   :  { %5801 = vmatprep.subr.bf16.mxu0 %v8125_v24  ;;  %5883 = vmatprep.subr.bf16.mxu1 %v8128_v13  ;;  %v8206_v24 = vld [vmem:[%s11300_s3 + $0xc3c] ss:$52 sps:$4 sm:$0xff]  }
 0x270   :  { %v8201_v13 = vld [vmem:[%s11300_s3 + $0xc30] ss:$52 sps:$4 sm:$0xff]  }
 0x271   :  { %5802 = vmatpush1.bf16.msra.mxu0 %v8123_v28  ;;  %5884 = vmatpush1.bf16.msra.mxu1 %v8126_v29  ;;  %v8204_v28 = vld [vmem:[%s11300_s3 + $0xc38] ss:$52 sps:$4 sm:$0xff]   ;;  %v436_v29 = vrot.slane %v10136_v1, %v10327_v20  ;;  %v8210_v1 = vld [vmem:[%s11300_s3 + $0xca0] ss:$52 sps:$4 sm:$0xff]  }
 0x272   :  { %5803 = vmatprep.subr.bf16.mxu0 %v8131_v14  ;;  %5885 = vmatprep.subr.bf16.mxu1 %v8134_v30  ;;  %v8209_v14 = vld [vmem:[%s11300_s3 + $0xc9c] ss:$52 sps:$4 sm:$0xff]   ;;  %v8212_v30 = vld [vmem:[%s11300_s3 + $0xca4] ss:$52 sps:$4 sm:$0xff]  }
 0x275   :  { %5804 = vmatpush1.bf16.msra.mxu0 %v8129_v31  ;;  %5886 = vmatpush1.bf16.msra.mxu1 %v8132_v25  ;;  %v8207_v31 = vld [vmem:[%s11300_s3 + $0xc98] ss:$52 sps:$4 sm:$0xff]   ;;  %v7331_v25 = vadd.f32 %v10150_v8, %v436_v29  ;;  %v8287_v29 = vld [vmem:[%s11300_s3 + $0x4f4] ss:$52 sps:$4 sm:$0xff]  }
 0x276   :  { %5805 = vmatprep.subr.bf16.mxu0 %v8137_v32  ;;  %5887 = vmatprep.subr.bf16.mxu1 %v8140_v33  ;;  %v8215_v32 = vld [vmem:[%s11300_s3 + $0x14] ss:$52 sps:$4 sm:$0xff]   ;;  %v8218_v33 = vld [vmem:[%s11300_s3 + $0x1c] ss:$52 sps:$4 sm:$0xff]   ;;  %v8216_v8 = vld [vmem:[%s11300_s3 + $0x18] ss:$52 sps:$4 sm:$0xff]  }
 0x279   :  { %5806 = vmatpush1.bf16.msra.mxu0 %v8135_v26  ;;  %5888 = vmatpush1.bf16.msra.mxu1 %v8138_v36  ;;  %v8213_v26 = vld [vmem:[%s11300_s3 + $0x10] ss:$52 sps:$4 sm:$0xff]   ;;  %v10365_v36 = vpack.c.bf16 %v7331_v25, %v7331_v25 }
 0x27a   :  { %5807 = vmatprep.subr.bf16.mxu0 %v8143_v37  ;;  %5889 = vmatprep.subr.bf16.mxu1 %v8146_v38  ;;  %v8221_v37 = vld [vmem:[%s11300_s3 + $0x7c] ss:$52 sps:$4 sm:$0xff]   ;;  %v8224_v38 = vld [vmem:[%s11300_s3 + $0x84] ss:$52 sps:$4 sm:$0xff]  }
 0x27b   :  { %v8296_v25 = vld [vmem:[%s11300_s3 + $0x564] ss:$52 sps:$4 sm:$0xff]  }
 0x27d   :  { %5808 = vmatpush1.bf16.msra.mxu0 %v8141_v21  ;;  %5890 = vmatpush1.bf16.msra.mxu1 %v8144_v39  ;;  %v8219_v21 = vld [vmem:[%s11300_s3 + $0x78] ss:$52 sps:$4 sm:$0xff]   ;;  %v8222_v39 = vld [vmem:[%s11300_s3 + $0x80] ss:$52 sps:$4 sm:$0xff]  }
 0x27e   :  { %5809 = vmatprep.subr.bf16.mxu0 %v8149_v40  ;;  %5891 = vmatprep.subr.bf16.mxu1 %v8152_v41  ;;  %v8227_v40 = vld [vmem:[%s11300_s3 + $0xe4] ss:$52 sps:$4 sm:$0xff]   ;;  %v8230_v41 = vld [vmem:[%s11300_s3 + $0xec] ss:$52 sps:$4 sm:$0xff]  }
 0x281   :  { %5810 = vmatpush1.bf16.msra.mxu0 %v8147_v34  ;;  %5892 = vmatpush1.bf16.msra.mxu1 %v8150_v43  ;;  %v8225_v34 = vld [vmem:[%s11300_s3 + $0xe0] ss:$52 sps:$4 sm:$0xff]   ;;  %v8228_v43 = vld [vmem:[%s11300_s3 + $0xe8] ss:$52 sps:$4 sm:$0xff]  }
 0x282   :  { %5811 = vmatprep.subr.bf16.mxu0 %v8155_v44  ;;  %5893 = vmatprep.subr.bf16.mxu1 %v8158_v35  ;;  %v8233_v44 = vld [vmem:[%s11300_s3 + $0x14c] ss:$52 sps:$4 sm:$0xff]   ;;  %v8236_v35 = vld [vmem:[%s11300_s3 + $0x154] ss:$52 sps:$4 sm:$0xff]  }
 0x285   :  { %5812 = vmatpush1.bf16.msra.mxu0 %v8153_v45  ;;  %5894 = vmatpush1.bf16.msra.mxu1 %v8156_v46  ;;  %v8231_v45 = vld [vmem:[%s11300_s3 + $0x148] ss:$52 sps:$4 sm:$0xff]   ;;  %v8234_v46 = vld [vmem:[%s11300_s3 + $0x150] ss:$52 sps:$4 sm:$0xff]  }
 0x286   :  { %5813 = vmatprep.subr.bf16.mxu0 %v8161_v47  ;;  %5895 = vmatprep.subr.bf16.mxu1 %v8164_v48  ;;  %v8239_v47 = vld [vmem:[%s11300_s3 + $0x1b4] ss:$52 sps:$4 sm:$0xff]   ;;  %v8242_v48 = vld [vmem:[%s11300_s3 + $0x1bc] ss:$52 sps:$4 sm:$0xff]  }
 0x289   :  { %5814 = vmatpush1.bf16.msra.mxu0 %v8159_v50  ;;  %5896 = vmatpush1.bf16.msra.mxu1 %v8162_v51  ;;  %v8237_v50 = vld [vmem:[%s11300_s3 + $0x1b0] ss:$52 sps:$4 sm:$0xff]   ;;  %v8240_v51 = vld [vmem:[%s11300_s3 + $0x1b8] ss:$52 sps:$4 sm:$0xff]  }
 0x28a   :  { %5815 = vmatprep.subr.bf16.mxu0 %v8167_v53  ;;  %5897 = vmatprep.subr.bf16.mxu1 %v8170_v54  ;;  %v8245_v53 = vld [vmem:[%s11300_s3 + $0x21c] ss:$52 sps:$4 sm:$0xff]   ;;  %v8248_v54 = vld [vmem:[%s11300_s3 + $0x224] ss:$52 sps:$4 sm:$0xff]  }
 0x28d   :  { %5816 = vmatpush1.bf16.msra.mxu0 %v8165_v55  ;;  %5898 = vmatpush1.bf16.msra.mxu1 %v8168_v56  ;;  %v8243_v55 = vld [vmem:[%s11300_s3 + $0x218] ss:$52 sps:$4 sm:$0xff]   ;;  %v8246_v56 = vld [vmem:[%s11300_s3 + $0x220] ss:$52 sps:$4 sm:$0xff]  }
 0x28e   :  { %5817 = vmatprep.subr.bf16.mxu0 %v8173_v57  ;;  %5899 = vmatprep.subr.bf16.mxu1 %v8176_v58  ;;  %v8251_v57 = vld [vmem:[%s11300_s3 + $0x284] ss:$52 sps:$4 sm:$0xff]   ;;  %v8254_v58 = vld [vmem:[%s11300_s3 + $0x28c] ss:$52 sps:$4 sm:$0xff]  }
 0x291   :  { %5818 = vmatpush1.bf16.msra.mxu0 %v8171_v59  ;;  %5900 = vmatpush1.bf16.msra.mxu1 %v8174_v60  ;;  %v8249_v59 = vld [vmem:[%s11300_s3 + $0x280] ss:$52 sps:$4 sm:$0xff]   ;;  %v8252_v60 = vld [vmem:[%s11300_s3 + $0x288] ss:$52 sps:$4 sm:$0xff]  }
 0x292   :  { %5819 = vmatprep.subr.bf16.mxu0 %v8179_v61  ;;  %5901 = vmatprep.subr.bf16.mxu1 %v8182_v62  ;;  %v8257_v61 = vld [vmem:[%s11300_s3 + $0x2ec] ss:$52 sps:$4 sm:$0xff]   ;;  %v8260_v62 = vld [vmem:[%s11300_s3 + $0x2f4] ss:$52 sps:$4 sm:$0xff]  }
 0x295   :  { %5820 = vmatpush1.bf16.msra.mxu0 %v8177_v63  ;;  %5902 = vmatpush1.bf16.msra.mxu1 %v8180_v4  ;;  %v8255_v63 = vld [vmem:[%s11300_s3 + $0x2e8] ss:$52 sps:$4 sm:$0xff]   ;;  %v8258_v4 = vld [vmem:[%s11300_s3 + $0x2f0] ss:$52 sps:$4 sm:$0xff]  }
 0x296   :  { %5821 = vmatprep.subr.bf16.mxu0 %v8185_v5  ;;  %5903 = vmatprep.subr.bf16.mxu1 %v8188_v6  ;;  %v8263_v5 = vld [vmem:[%s11300_s3 + $0x354] ss:$52 sps:$4 sm:$0xff]   ;;  %v8266_v6 = vld [vmem:[%s11300_s3 + $0x35c] ss:$52 sps:$4 sm:$0xff]  }
 0x299   :  { %5822 = vmatpush1.bf16.msra.mxu0 %v8183_v7  ;;  %5904 = vmatpush1.bf16.msra.mxu1 %v8186_v9  ;;  %v8261_v7 = vld [vmem:[%s11300_s3 + $0x350] ss:$52 sps:$4 sm:$0xff]   ;;  %v8264_v9 = vld [vmem:[%s11300_s3 + $0x358] ss:$52 sps:$4 sm:$0xff]  }
 0x29a   :  { %5823 = vmatprep.subr.bf16.mxu0 %v8191_v10  ;;  %5905 = vmatprep.subr.bf16.mxu1 %v8194_v11  ;;  %v8269_v10 = vld [vmem:[%s11300_s3 + $0x3bc] ss:$52 sps:$4 sm:$0xff]   ;;  %v8272_v11 = vld [vmem:[%s11300_s3 + $0x3c4] ss:$52 sps:$4 sm:$0xff]  }
 0x29d   :  { %5824 = vmatpush1.bf16.msra.mxu0 %v8189_v12  ;;  %5906 = vmatpush1.bf16.msra.mxu1 %v8192_v52  ;;  %v8267_v12 = vld [vmem:[%s11300_s3 + $0x3b8] ss:$52 sps:$4 sm:$0xff]   ;;  %v8270_v52 = vld [vmem:[%s11300_s3 + $0x3c0] ss:$52 sps:$4 sm:$0xff]  }
 0x29e   :  { %5825 = vmatprep.subr.bf16.mxu0 %v8197_v15  ;;  %5907 = vmatprep.subr.bf16.mxu1 %v8200_v16  ;;  %v8275_v15 = vld [vmem:[%s11300_s3 + $0x424] ss:$52 sps:$4 sm:$0xff]   ;;  %v8278_v16 = vld [vmem:[%s11300_s3 + $0x42c] ss:$52 sps:$4 sm:$0xff]  }
 0x2a1   :  { %5826 = vmatpush1.bf16.msra.mxu0 %v8195_v17  ;;  %5908 = vmatpush1.bf16.msra.mxu1 %v8198_v18  ;;  %v8273_v17 = vld [vmem:[%s11300_s3 + $0x420] ss:$52 sps:$4 sm:$0xff]   ;;  %v8276_v18 = vld [vmem:[%s11300_s3 + $0x428] ss:$52 sps:$4 sm:$0xff]  }
 0x2a2   :  { %5827 = vmatprep.subr.bf16.mxu0 %v8203_v22  ;;  %5909 = vmatprep.subr.bf16.mxu1 %v8206_v24  ;;  %v8281_v22 = vld [vmem:[%s11300_s3 + $0x48c] ss:$52 sps:$4 sm:$0xff]   ;;  %v8284_v24 = vld [vmem:[%s11300_s3 + $0x494] ss:$52 sps:$4 sm:$0xff]  }
 0x2a5   :  { %5828 = vmatpush1.bf16.msra.mxu0 %v8201_v13  ;;  %5910 = vmatpush1.bf16.msra.mxu1 %v8204_v28  ;;  %v8279_v13 = vld [vmem:[%s11300_s3 + $0x488] ss:$52 sps:$4 sm:$0xff]   ;;  %v8282_v28 = vld [vmem:[%s11300_s3 + $0x490] ss:$52 sps:$4 sm:$0xff]  }
 0x2a6   :  { %5829 = vmatprep.subr.bf16.mxu0 %v8209_v14  ;;  %5911 = vmatprep.subr.bf16.mxu1 %v8212_v30  ;;  %v8290_v14 = vld [vmem:[%s11300_s3 + $0x4fc] ss:$52 sps:$4 sm:$0xff]  }
 0x2a7   :  { %v8285_v30 = vld [vmem:[%s11300_s3 + $0x4f0] ss:$52 sps:$4 sm:$0xff]  }
 0x2a9   :  { %5830 = vmatpush1.bf16.msra.mxu0 %v8207_v31  ;;  %5912 = vmatpush1.bf16.msra.mxu1 %v8210_v1  ;;  %v8288_v31 = vld [vmem:[%s11300_s3 + $0x4f8] ss:$52 sps:$4 sm:$0xff]   ;;  %v8293_v1 = vld [vmem:[%s11300_s3 + $0x55c] ss:$52 sps:$4 sm:$0xff]  }
 0x2aa   :  { %5922 = vmatprep.subr.bf16.mxu0 %v8215_v32  ;;  %6004 = vmatprep.subr.bf16.mxu1 %v8218_v33  ;;  %v8291_v32 = vld [vmem:[%s11300_s3 + $0x558] ss:$52 sps:$4 sm:$0xff]   ;;  %v8294_v33 = vld [vmem:[%s11300_s3 + $0x560] ss:$52 sps:$4 sm:$0xff]  }
 0x2ac   :  { %5832 = vmatmul.mubr.bf16.vlgmr.msra.gmra.mrb[4].mxu0 %v10365_v36  ;;  %5914 = vmatmul.mubr.bf16.vlgmr.msra.gmra.mrb[4].mxu1 %v10365_v36 }
 0x2ad   :  { %5923 = vmatpush1.bf16.msra.mxu0 %v8213_v26  ;;  %5954 = vmatprep.mubr.bf16.mxu0 %v10152_v19  ;;  %v8299_v26 = vld [vmem:[%s11300_s3 + $0x5c4] ss:$52 sps:$4 sm:$0xff]  }
 0x2ae   :  { %6005 = vmatpush1.bf16.msra.mxu1 %v8216_v8  ;;  %6036 = vmatprep.mubr.bf16.mxu1 %v10152_v19  ;;  %v8302_v8 = vld [vmem:[%s11300_s3 + $0x5cc] ss:$52 sps:$4 sm:$0xff]  }
 0x2af   :  { %5924 = vmatprep.subr.bf16.mxu0 %v8221_v37  ;;  %6006 = vmatprep.subr.bf16.mxu1 %v8224_v38  ;;  %v8297_v37 = vld [vmem:[%s11300_s3 + $0x5c0] ss:$52 sps:$4 sm:$0xff]   ;;  %v8300_v38 = vld [vmem:[%s11300_s3 + $0x5c8] ss:$52 sps:$4 sm:$0xff]  }
 0x2b1   :  { %5925 = vmatpush1.bf16.msra.mxu0 %v8219_v21  ;;  %v8305_v21 = vld [vmem:[%s11300_s3 + $0x62c] ss:$52 sps:$4 sm:$0xff]  }
 0x2b2   :  { %6007 = vmatpush1.bf16.msra.mxu1 %v8222_v39  ;;  %5926 = vmatprep.subr.bf16.mxu0 %v8227_v40  ;;  %v8308_v39 = vld [vmem:[%s11300_s3 + $0x634] ss:$52 sps:$4 sm:$0xff]  }
 0x2b3   :  { %6008 = vmatprep.subr.bf16.mxu1 %v8230_v41  ;;  %v8303_v40 = vld [vmem:[%s11300_s3 + $0x628] ss:$52 sps:$4 sm:$0xff]   ;;  %v8306_v41 = vld [vmem:[%s11300_s3 + $0x630] ss:$52 sps:$4 sm:$0xff]  }
 0x2b5   :  { %5927 = vmatpush1.bf16.msra.mxu0 %v8225_v34  ;;  %v8311_v34 = vld [vmem:[%s11300_s3 + $0x694] ss:$52 sps:$4 sm:$0xff]  }
 0x2b6   :  { %6009 = vmatpush1.bf16.msra.mxu1 %v8228_v43  ;;  %5928 = vmatprep.subr.bf16.mxu0 %v8233_v44  ;;  %v8314_v43 = vld [vmem:[%s11300_s3 + $0x69c] ss:$52 sps:$4 sm:$0xff]  }
 0x2b7   :  { %6010 = vmatprep.subr.bf16.mxu1 %v8236_v35  ;;  %v8309_v44 = vld [vmem:[%s11300_s3 + $0x690] ss:$52 sps:$4 sm:$0xff]   ;;  %v8312_v35 = vld [vmem:[%s11300_s3 + $0x698] ss:$52 sps:$4 sm:$0xff]  }
 0x2b9   :  { %5929 = vmatpush1.bf16.msra.mxu0 %v8231_v45  ;;  %v8317_v45 = vld [vmem:[%s11300_s3 + $0x6fc] ss:$52 sps:$4 sm:$0xff]  }
 0x2ba   :  { %6011 = vmatpush1.bf16.msra.mxu1 %v8234_v46  ;;  %5930 = vmatprep.subr.bf16.mxu0 %v8239_v47  ;;  %v8320_v46 = vld [vmem:[%s11300_s3 + $0x704] ss:$52 sps:$4 sm:$0xff]  }
 0x2bb   :  { %6012 = vmatprep.subr.bf16.mxu1 %v8242_v48  ;;  %v8315_v47 = vld [vmem:[%s11300_s3 + $0x6f8] ss:$52 sps:$4 sm:$0xff]   ;;  %v8318_v48 = vld [vmem:[%s11300_s3 + $0x700] ss:$52 sps:$4 sm:$0xff]  }
 0x2bd   :  { %5931 = vmatpush1.bf16.msra.mxu0 %v8237_v50  ;;  %v8323_v50 = vld [vmem:[%s11300_s3 + $0x764] ss:$52 sps:$4 sm:$0xff]  }
 0x2be   :  { %6013 = vmatpush1.bf16.msra.mxu1 %v8240_v51  ;;  %5932 = vmatprep.subr.bf16.mxu0 %v8245_v53  ;;  %v8326_v51 = vld [vmem:[%s11300_s3 + $0x76c] ss:$52 sps:$4 sm:$0xff]  }
 0x2bf   :  { %6014 = vmatprep.subr.bf16.mxu1 %v8248_v54  ;;  %v8321_v53 = vld [vmem:[%s11300_s3 + $0x760] ss:$52 sps:$4 sm:$0xff]   ;;  %v8324_v54 = vld [vmem:[%s11300_s3 + $0x768] ss:$52 sps:$4 sm:$0xff]  }
 0x2c1   :  { %5933 = vmatpush1.bf16.msra.mxu0 %v8243_v55  ;;  %v8329_v55 = vld [vmem:[%s11300_s3 + $0x7cc] ss:$52 sps:$4 sm:$0xff]  }
 0x2c2   :  { %6015 = vmatpush1.bf16.msra.mxu1 %v8246_v56  ;;  %5934 = vmatprep.subr.bf16.mxu0 %v8251_v57  ;;  %v8332_v56 = vld [vmem:[%s11300_s3 + $0x7d4] ss:$52 sps:$4 sm:$0xff]  }
 0x2c3   :  { %6016 = vmatprep.subr.bf16.mxu1 %v8254_v58  ;;  %v8327_v57 = vld [vmem:[%s11300_s3 + $0x7c8] ss:$52 sps:$4 sm:$0xff]   ;;  %v8330_v58 = vld [vmem:[%s11300_s3 + $0x7d0] ss:$52 sps:$4 sm:$0xff]  }
 0x2c5   :  { %5935 = vmatpush1.bf16.msra.mxu0 %v8249_v59  ;;  %v8335_v59 = vld [vmem:[%s11300_s3 + $0x834] ss:$52 sps:$4 sm:$0xff]  }
 0x2c6   :  { %6017 = vmatpush1.bf16.msra.mxu1 %v8252_v60  ;;  %5936 = vmatprep.subr.bf16.mxu0 %v8257_v61  ;;  %v8338_v60 = vld [vmem:[%s11300_s3 + $0x83c] ss:$52 sps:$4 sm:$0xff]  }
 0x2c7   :  { %6018 = vmatprep.subr.bf16.mxu1 %v8260_v62  ;;  %v8333_v61 = vld [vmem:[%s11300_s3 + $0x830] ss:$52 sps:$4 sm:$0xff]   ;;  %v8336_v62 = vld [vmem:[%s11300_s3 + $0x838] ss:$52 sps:$4 sm:$0xff]  }
 0x2c9   :  { %5937 = vmatpush1.bf16.msra.mxu0 %v8255_v63  ;;  %v8341_v63 = vld [vmem:[%s11300_s3 + $0x89c] ss:$52 sps:$4 sm:$0xff]  }
 0x2ca   :  { %6019 = vmatpush1.bf16.msra.mxu1 %v8258_v4  ;;  %5938 = vmatprep.subr.bf16.mxu0 %v8263_v5  ;;  %v8344_v4 = vld [vmem:[%s11300_s3 + $0x8a4] ss:$52 sps:$4 sm:$0xff]  }
 0x2cb   :  { %6020 = vmatprep.subr.bf16.mxu1 %v8266_v6  ;;  %v8339_v5 = vld [vmem:[%s11300_s3 + $0x898] ss:$52 sps:$4 sm:$0xff]   ;;  %v8342_v6 = vld [vmem:[%s11300_s3 + $0x8a0] ss:$52 sps:$4 sm:$0xff]  }
 0x2cd   :  { %5939 = vmatpush1.bf16.msra.mxu0 %v8261_v7  ;;  %v8347_v7 = vld [vmem:[%s11300_s3 + $0x904] ss:$52 sps:$4 sm:$0xff]  }
 0x2ce   :  { %6021 = vmatpush1.bf16.msra.mxu1 %v8264_v9  ;;  %5940 = vmatprep.subr.bf16.mxu0 %v8269_v10  ;;  %v8350_v9 = vld [vmem:[%s11300_s3 + $0x90c] ss:$52 sps:$4 sm:$0xff]  }
 0x2cf   :  { %6022 = vmatprep.subr.bf16.mxu1 %v8272_v11  ;;  %v8345_v10 = vld [vmem:[%s11300_s3 + $0x900] ss:$52 sps:$4 sm:$0xff]   ;;  %v8348_v11 = vld [vmem:[%s11300_s3 + $0x908] ss:$52 sps:$4 sm:$0xff]  }
 0x2d1   :  { %5941 = vmatpush1.bf16.msra.mxu0 %v8267_v12  ;;  %v8353_v12 = vld [vmem:[%s11300_s3 + $0x96c] ss:$52 sps:$4 sm:$0xff]  }
 0x2d2   :  { %6023 = vmatpush1.bf16.msra.mxu1 %v8270_v52  ;;  %5942 = vmatprep.subr.bf16.mxu0 %v8275_v15  ;;  %v8356_v52 = vld [vmem:[%s11300_s3 + $0x974] ss:$52 sps:$4 sm:$0xff]  }
 0x2d3   :  { %6024 = vmatprep.subr.bf16.mxu1 %v8278_v16  ;;  %v8351_v15 = vld [vmem:[%s11300_s3 + $0x968] ss:$52 sps:$4 sm:$0xff]   ;;  %v8354_v16 = vld [vmem:[%s11300_s3 + $0x970] ss:$52 sps:$4 sm:$0xff]  }
 0x2d5   :  { %5943 = vmatpush1.bf16.msra.mxu0 %v8273_v17  ;;  %v8359_v17 = vld [vmem:[%s11300_s3 + $0x9d4] ss:$52 sps:$4 sm:$0xff]  }
 0x2d6   :  { %6025 = vmatpush1.bf16.msra.mxu1 %v8276_v18  ;;  %5944 = vmatprep.subr.bf16.mxu0 %v8281_v22  ;;  %v8362_v18 = vld [vmem:[%s11300_s3 + $0x9dc] ss:$52 sps:$4 sm:$0xff]  }
 0x2d7   :  { %6026 = vmatprep.subr.bf16.mxu1 %v8284_v24  ;;  %v8357_v22 = vld [vmem:[%s11300_s3 + $0x9d0] ss:$52 sps:$4 sm:$0xff]   ;;  %v8360_v24 = vld [vmem:[%s11300_s3 + $0x9d8] ss:$52 sps:$4 sm:$0xff]  }
 0x2d9   :  { %5945 = vmatpush1.bf16.msra.mxu0 %v8279_v13  ;;  %v8365_v13 = vld [vmem:[%s11300_s3 + $0xa3c] ss:$52 sps:$4 sm:$0xff]  }
 0x2da   :  { %6027 = vmatpush1.bf16.msra.mxu1 %v8282_v28  ;;  %5946 = vmatprep.subr.bf16.mxu0 %v8287_v29  ;;  %v8368_v28 = vld [vmem:[%s11300_s3 + $0xa44] ss:$52 sps:$4 sm:$0xff]  }
 0x2db   :  { %6028 = vmatprep.subr.bf16.mxu1 %v8290_v14  ;;  %v8363_v29 = vld [vmem:[%s11300_s3 + $0xa38] ss:$52 sps:$4 sm:$0xff]   ;;  %v8366_v14 = vld [vmem:[%s11300_s3 + $0xa40] ss:$52 sps:$4 sm:$0xff]  }
 0x2dd   :  { %5947 = vmatpush1.bf16.msra.mxu0 %v8285_v30  ;;  %v8371_v30 = vld [vmem:[%s11300_s3 + $0xaa4] ss:$52 sps:$4 sm:$0xff]  }
 0x2de   :  { %6029 = vmatpush1.bf16.msra.mxu1 %v8288_v31  ;;  %5948 = vmatprep.subr.bf16.mxu0 %v8293_v1  ;;  %v8374_v31 = vld [vmem:[%s11300_s3 + $0xaac] ss:$52 sps:$4 sm:$0xff]  }
 0x2df   :  { %6030 = vmatprep.subr.bf16.mxu1 %v8296_v25  ;;  %v8369_v1 = vld [vmem:[%s11300_s3 + $0xaa0] ss:$52 sps:$4 sm:$0xff]   ;;  %v8372_v25 = vld [vmem:[%s11300_s3 + $0xaa8] ss:$52 sps:$4 sm:$0xff]  }
 0x2e1   :  { %5949 = vmatpush1.bf16.msra.mxu0 %v8291_v32  ;;  %v8377_v32 = vld [vmem:[%s11300_s3 + $0xb0c] ss:$52 sps:$4 sm:$0xff]  }
 0x2e2   :  { %6031 = vmatpush1.bf16.msra.mxu1 %v8294_v33  ;;  %5950 = vmatprep.subr.bf16.mxu0 %v8299_v26  ;;  %v8380_v33 = vld [vmem:[%s11300_s3 + $0xb14] ss:$52 sps:$4 sm:$0xff]  }
 0x2e3   :  { %6032 = vmatprep.subr.bf16.mxu1 %v8302_v8  ;;  %v8375_v26 = vld [vmem:[%s11300_s3 + $0xb08] ss:$52 sps:$4 sm:$0xff]   ;;  %v8378_v8 = vld [vmem:[%s11300_s3 + $0xb10] ss:$52 sps:$4 sm:$0xff]  }
 0x2e5   :  { %5951 = vmatpush1.bf16.msra.mxu0 %v8297_v37  ;;  %v8383_v37 = vld [vmem:[%s11300_s3 + $0xb74] ss:$52 sps:$4 sm:$0xff]  }
 0x2e6   :  { %6033 = vmatpush1.bf16.msra.mxu1 %v8300_v38  ;;  %5952 = vmatprep.subr.bf16.mxu0 %v8305_v21  ;;  %v8386_v38 = vld [vmem:[%s11300_s3 + $0xb7c] ss:$52 sps:$4 sm:$0xff]  }
 0x2e7   :  { %6034 = vmatprep.subr.bf16.mxu1 %v8308_v39  ;;  %v8381_v21 = vld [vmem:[%s11300_s3 + $0xb70] ss:$52 sps:$4 sm:$0xff]   ;;  %v8384_v39 = vld [vmem:[%s11300_s3 + $0xb78] ss:$52 sps:$4 sm:$0xff]  }
 0x2e9   :  { %5953 = vmatpush1.bf16.msra.mxu0 %v8303_v40  ;;  %v8389_v40 = vld [vmem:[%s11300_s3 + $0xbdc] ss:$52 sps:$4 sm:$0xff]  }
 0x2ea   :  { %6035 = vmatpush1.bf16.msra.mxu1 %v8306_v41  ;;  %5963 = vmatprep.subr.bf16.mxu0 %v8311_v34  ;;  %v8392_v41 = vld [vmem:[%s11300_s3 + $0xbe4] ss:$52 sps:$4 sm:$0xff]  }
 0x2eb   :  { %6045 = vmatprep.subr.bf16.mxu1 %v8314_v43  ;;  %v8387_v34 = vld [vmem:[%s11300_s3 + $0xbd8] ss:$52 sps:$4 sm:$0xff]   ;;  %v8390_v43 = vld [vmem:[%s11300_s3 + $0xbe0] ss:$52 sps:$4 sm:$0xff]  }
 0x2ec   :  { %5955 = vmatmul.mubr.bf16.vlgmr.msra.gmra.mrb[8].mxu0 %v10160_v23 }
 0x2ed   :  { %6037 = vmatmul.mubr.bf16.vlgmr.msra.gmra.mrb[8].mxu1 %v10160_v23  ;;  %5964 = vmatpush1.bf16.msra.mxu0 %v8309_v44  ;;  %v8395_v44 = vld [vmem:[%s11300_s3 + $0xc44] ss:$52 sps:$4 sm:$0xff]  }
 0x2ee   :  { %5995 = vmatprep.mubr.bf16.mxu0 %v10170_v27  ;;  %6046 = vmatpush1.bf16.msra.mxu1 %v8312_v35  ;;  %v8398_v35 = vld [vmem:[%s11300_s3 + $0xc4c] ss:$52 sps:$4 sm:$0xff]  }
 0x2ef   :  { %6077 = vmatprep.mubr.bf16.mxu1 %v10170_v27  ;;  %5965 = vmatprep.subr.bf16.mxu0 %v8317_v45  ;;  %v8393_v45 = vld [vmem:[%s11300_s3 + $0xc40] ss:$52 sps:$4 sm:$0xff]  }
 0x2f0   :  { %6047 = vmatprep.subr.bf16.mxu1 %v8320_v46  ;;  %v8396_v46 = vld [vmem:[%s11300_s3 + $0xc48] ss:$52 sps:$4 sm:$0xff]  }
 0x2f1   :  { %5966 = vmatpush1.bf16.msra.mxu0 %v8315_v47  ;;  %v8401_v47 = vld [vmem:[%s11300_s3 + $0xcac] ss:$52 sps:$4 sm:$0xff]  }
 0x2f2   :  { %6048 = vmatpush1.bf16.msra.mxu1 %v8318_v48  ;;  %5967 = vmatprep.subr.bf16.mxu0 %v8323_v50  ;;  %v8404_v48 = vld [vmem:[%s11300_s3 + $0xcb4] ss:$52 sps:$4 sm:$0xff]  }
 0x2f3   :  { %6049 = vmatprep.subr.bf16.mxu1 %v8326_v51  ;;  %v8399_v50 = vld [vmem:[%s11300_s3 + $0xca8] ss:$52 sps:$4 sm:$0xff]   ;;  %v8402_v51 = vld [vmem:[%s11300_s3 + $0xcb0] ss:$52 sps:$4 sm:$0xff]  }
 0x2f5   :  { %5968 = vmatpush1.bf16.msra.mxu0 %v8321_v53  ;;  %v8407_v53 = vld [vmem:[%s11300_s3 + $0x24] ss:$52 sps:$4 sm:$0xff]  }
 0x2f6   :  { %6050 = vmatpush1.bf16.msra.mxu1 %v8324_v54  ;;  %5969 = vmatprep.subr.bf16.mxu0 %v8329_v55  ;;  %v8410_v54 = vld [vmem:[%s11300_s3 + $0x2c] ss:$52 sps:$4 sm:$0xff]  }
 0x2f7   :  { %6051 = vmatprep.subr.bf16.mxu1 %v8332_v56  ;;  %v8405_v55 = vld [vmem:[%s11300_s3 + $0x20] ss:$52 sps:$4 sm:$0xff]   ;;  %v8408_v56 = vld [vmem:[%s11300_s3 + $0x28] ss:$52 sps:$4 sm:$0xff]  }
 0x2f9   :  { %5970 = vmatpush1.bf16.msra.mxu0 %v8327_v57  ;;  %v8413_v57 = vld [vmem:[%s11300_s3 + $0x8c] ss:$52 sps:$4 sm:$0xff]  }
 0x2fa   :  { %6052 = vmatpush1.bf16.msra.mxu1 %v8330_v58  ;;  %5971 = vmatprep.subr.bf16.mxu0 %v8335_v59  ;;  %v8416_v58 = vld [vmem:[%s11300_s3 + $0x94] ss:$52 sps:$4 sm:$0xff]  }
 0x2fb   :  { %6053 = vmatprep.subr.bf16.mxu1 %v8338_v60  ;;  %v8411_v59 = vld [vmem:[%s11300_s3 + $0x88] ss:$52 sps:$4 sm:$0xff]   ;;  %v8414_v60 = vld [vmem:[%s11300_s3 + $0x90] ss:$52 sps:$4 sm:$0xff]  }
 0x2fd   :  { %5972 = vmatpush1.bf16.msra.mxu0 %v8333_v61  ;;  %v8419_v61 = vld [vmem:[%s11300_s3 + $0xf4] ss:$52 sps:$4 sm:$0xff]  }
 0x2fe   :  { %6054 = vmatpush1.bf16.msra.mxu1 %v8336_v62  ;;  %5973 = vmatprep.subr.bf16.mxu0 %v8341_v63  ;;  %v8422_v62 = vld [vmem:[%s11300_s3 + $0xfc] ss:$52 sps:$4 sm:$0xff]  }
 0x2ff   :  { %6055 = vmatprep.subr.bf16.mxu1 %v8344_v4  ;;  %v8417_v63 = vld [vmem:[%s11300_s3 + $0xf0] ss:$52 sps:$4 sm:$0xff]   ;;  %v8420_v4 = vld [vmem:[%s11300_s3 + $0xf8] ss:$52 sps:$4 sm:$0xff]  }
 0x301   :  { %5974 = vmatpush1.bf16.msra.mxu0 %v8339_v5  ;;  %v8425_v5 = vld [vmem:[%s11300_s3 + $0x15c] ss:$52 sps:$4 sm:$0xff]  }
 0x302   :  { %6056 = vmatpush1.bf16.msra.mxu1 %v8342_v6  ;;  %5975 = vmatprep.subr.bf16.mxu0 %v8347_v7  ;;  %v8428_v6 = vld [vmem:[%s11300_s3 + $0x164] ss:$52 sps:$4 sm:$0xff]  }
 0x303   :  { %6057 = vmatprep.subr.bf16.mxu1 %v8350_v9  ;;  %v8423_v7 = vld [vmem:[%s11300_s3 + $0x158] ss:$52 sps:$4 sm:$0xff]   ;;  %v8426_v9 = vld [vmem:[%s11300_s3 + $0x160] ss:$52 sps:$4 sm:$0xff]  }
 0x305   :  { %5976 = vmatpush1.bf16.msra.mxu0 %v8345_v10  ;;  %v8431_v10 = vld [vmem:[%s11300_s3 + $0x1c4] ss:$52 sps:$4 sm:$0xff]  }
 0x306   :  { %6058 = vmatpush1.bf16.msra.mxu1 %v8348_v11  ;;  %5977 = vmatprep.subr.bf16.mxu0 %v8353_v12  ;;  %v8434_v11 = vld [vmem:[%s11300_s3 + $0x1cc] ss:$52 sps:$4 sm:$0xff]  }
 0x307   :  { %6059 = vmatprep.subr.bf16.mxu1 %v8356_v52  ;;  %v8429_v12 = vld [vmem:[%s11300_s3 + $0x1c0] ss:$52 sps:$4 sm:$0xff]   ;;  %v8432_v52 = vld [vmem:[%s11300_s3 + $0x1c8] ss:$52 sps:$4 sm:$0xff]  }
 0x309   :  { %5978 = vmatpush1.bf16.msra.mxu0 %v8351_v15  ;;  %v8437_v15 = vld [vmem:[%s11300_s3 + $0x22c] ss:$52 sps:$4 sm:$0xff]  }
 0x30a   :  { %6060 = vmatpush1.bf16.msra.mxu1 %v8354_v16  ;;  %5979 = vmatprep.subr.bf16.mxu0 %v8359_v17  ;;  %v8440_v16 = vld [vmem:[%s11300_s3 + $0x234] ss:$52 sps:$4 sm:$0xff]  }
 0x30b   :  { %6061 = vmatprep.subr.bf16.mxu1 %v8362_v18  ;;  %v8435_v17 = vld [vmem:[%s11300_s3 + $0x228] ss:$52 sps:$4 sm:$0xff]   ;;  %v8438_v18 = vld [vmem:[%s11300_s3 + $0x230] ss:$52 sps:$4 sm:$0xff]  }
 0x30d   :  { %5980 = vmatpush1.bf16.msra.mxu0 %v8357_v22  ;;  %v8443_v22 = vld [vmem:[%s11300_s3 + $0x294] ss:$52 sps:$4 sm:$0xff]  }
 0x30e   :  { %6062 = vmatpush1.bf16.msra.mxu1 %v8360_v24  ;;  %5981 = vmatprep.subr.bf16.mxu0 %v8365_v13  ;;  %v8446_v24 = vld [vmem:[%s11300_s3 + $0x29c] ss:$52 sps:$4 sm:$0xff]  }
 0x30f   :  { %6063 = vmatprep.subr.bf16.mxu1 %v8368_v28  ;;  %v8441_v13 = vld [vmem:[%s11300_s3 + $0x290] ss:$52 sps:$4 sm:$0xff]   ;;  %v8444_v28 = vld [vmem:[%s11300_s3 + $0x298] ss:$52 sps:$4 sm:$0xff]  }
 0x311   :  { %5982 = vmatpush1.bf16.msra.mxu0 %v8363_v29  ;;  %v8449_v29 = vld [vmem:[%s11300_s3 + $0x2fc] ss:$52 sps:$4 sm:$0xff]  }
 0x312   :  { %6064 = vmatpush1.bf16.msra.mxu1 %v8366_v14  ;;  %5983 = vmatprep.subr.bf16.mxu0 %v8371_v30  ;;  %v8452_v14 = vld [vmem:[%s11300_s3 + $0x304] ss:$52 sps:$4 sm:$0xff]  }
 0x313   :  { %6065 = vmatprep.subr.bf16.mxu1 %v8374_v31  ;;  %v8447_v30 = vld [vmem:[%s11300_s3 + $0x2f8] ss:$52 sps:$4 sm:$0xff]   ;;  %v8450_v31 = vld [vmem:[%s11300_s3 + $0x300] ss:$52 sps:$4 sm:$0xff]  }
 0x315   :  { %5984 = vmatpush1.bf16.msra.mxu0 %v8369_v1  ;;  %v8455_v1 = vld [vmem:[%s11300_s3 + $0x364] ss:$52 sps:$4 sm:$0xff]  }
 0x316   :  { %6066 = vmatpush1.bf16.msra.mxu1 %v8372_v25  ;;  %5985 = vmatprep.subr.bf16.mxu0 %v8377_v32  ;;  %v8458_v25 = vld [vmem:[%s11300_s3 + $0x36c] ss:$52 sps:$4 sm:$0xff]  }
 0x317   :  { %6067 = vmatprep.subr.bf16.mxu1 %v8380_v33  ;;  %v8453_v32 = vld [vmem:[%s11300_s3 + $0x360] ss:$52 sps:$4 sm:$0xff]   ;;  %v8456_v33 = vld [vmem:[%s11300_s3 + $0x368] ss:$52 sps:$4 sm:$0xff]  }
 0x319   :  { %5986 = vmatpush1.bf16.msra.mxu0 %v8375_v26  ;;  %v8461_v26 = vld [vmem:[%s11300_s3 + $0x3cc] ss:$52 sps:$4 sm:$0xff]  }
 0x31a   :  { %6068 = vmatpush1.bf16.msra.mxu1 %v8378_v8  ;;  %5987 = vmatprep.subr.bf16.mxu0 %v8383_v37  ;;  %v8464_v8 = vld [vmem:[%s11300_s3 + $0x3d4] ss:$52 sps:$4 sm:$0xff]  }
 0x31b   :  { %6069 = vmatprep.subr.bf16.mxu1 %v8386_v38  ;;  %v8459_v37 = vld [vmem:[%s11300_s3 + $0x3c8] ss:$52 sps:$4 sm:$0xff]   ;;  %v8462_v38 = vld [vmem:[%s11300_s3 + $0x3d0] ss:$52 sps:$4 sm:$0xff]  }
 0x31d   :  { %5988 = vmatpush1.bf16.msra.mxu0 %v8381_v21  ;;  %v8467_v21 = vld [vmem:[%s11300_s3 + $0x434] ss:$52 sps:$4 sm:$0xff]  }
 0x31e   :  { %6070 = vmatpush1.bf16.msra.mxu1 %v8384_v39  ;;  %5989 = vmatprep.subr.bf16.mxu0 %v8389_v40  ;;  %v8470_v39 = vld [vmem:[%s11300_s3 + $0x43c] ss:$52 sps:$4 sm:$0xff]  }
 0x31f   :  { %6071 = vmatprep.subr.bf16.mxu1 %v8392_v41  ;;  %v8465_v40 = vld [vmem:[%s11300_s3 + $0x430] ss:$52 sps:$4 sm:$0xff]   ;;  %v8468_v41 = vld [vmem:[%s11300_s3 + $0x438] ss:$52 sps:$4 sm:$0xff]  }
 0x321   :  { %5990 = vmatpush1.bf16.msra.mxu0 %v8387_v34  ;;  %v8473_v34 = vld [vmem:[%s11300_s3 + $0x49c] ss:$52 sps:$4 sm:$0xff]  }
 0x322   :  { %6072 = vmatpush1.bf16.msra.mxu1 %v8390_v43  ;;  %5991 = vmatprep.subr.bf16.mxu0 %v8395_v44  ;;  %v8476_v43 = vld [vmem:[%s11300_s3 + $0x4a4] ss:$52 sps:$4 sm:$0xff]  }
 0x323   :  { %6073 = vmatprep.subr.bf16.mxu1 %v8398_v35  ;;  %v8471_v44 = vld [vmem:[%s11300_s3 + $0x498] ss:$52 sps:$4 sm:$0xff]   ;;  %v8474_v35 = vld [vmem:[%s11300_s3 + $0x4a0] ss:$52 sps:$4 sm:$0xff]  }
 0x325   :  { %5992 = vmatpush1.bf16.msra.mxu0 %v8393_v45  ;;  %v8479_v45 = vld [vmem:[%s11300_s3 + $0x504] ss:$52 sps:$4 sm:$0xff]  }
 0x326   :  { %6074 = vmatpush1.bf16.msra.mxu1 %v8396_v46  ;;  %5993 = vmatprep.subr.bf16.mxu0 %v8401_v47  ;;  %v8482_v46 = vld [vmem:[%s11300_s3 + $0x50c] ss:$52 sps:$4 sm:$0xff]  }
 0x327   :  { %6075 = vmatprep.subr.bf16.mxu1 %v8404_v48  ;;  %v8477_v47 = vld [vmem:[%s11300_s3 + $0x500] ss:$52 sps:$4 sm:$0xff]   ;;  %v8480_v48 = vld [vmem:[%s11300_s3 + $0x508] ss:$52 sps:$4 sm:$0xff]  }
 0x329   :  { %5994 = vmatpush1.bf16.msra.mxu0 %v8399_v50  ;;  %v8485_v50 = vld [vmem:[%s11300_s3 + $0x56c] ss:$52 sps:$4 sm:$0xff]  }
 0x32a   :  { %6076 = vmatpush1.bf16.msra.mxu1 %v8402_v51  ;;  %6086 = vmatprep.subr.bf16.mxu0 %v8407_v53  ;;  %v8488_v51 = vld [vmem:[%s11300_s3 + $0x574] ss:$52 sps:$4 sm:$0xff]  }
 0x32b   :  { %6168 = vmatprep.subr.bf16.mxu1 %v8410_v54  ;;  %v8483_v53 = vld [vmem:[%s11300_s3 + $0x568] ss:$52 sps:$4 sm:$0xff]   ;;  %v8486_v54 = vld [vmem:[%s11300_s3 + $0x570] ss:$52 sps:$4 sm:$0xff]  }
 0x32c   :  { %5996 = vmatmul.mubr.bf16.vlgmr.msra.gmra.mrb[8].mxu0 %v10365_v36 }
 0x32d   :  { %6078 = vmatmul.mubr.bf16.vlgmr.msra.gmra.mrb[8].mxu1 %v10365_v36  ;;  %6087 = vmatpush1.bf16.msra.mxu0 %v8405_v55  ;;  %v8491_v55 = vld [vmem:[%s11300_s3 + $0x5d4] ss:$52 sps:$4 sm:$0xff]  }
 0x32e   :  { %6118 = vmatprep.mubr.bf16.mxu0 %v10152_v19  ;;  %6169 = vmatpush1.bf16.msra.mxu1 %v8408_v56  ;;  %v8494_v56 = vld [vmem:[%s11300_s3 + $0x5dc] ss:$52 sps:$4 sm:$0xff]  }
 0x32f   :  { %6200 = vmatprep.mubr.bf16.mxu1 %v10152_v19  ;;  %6088 = vmatprep.subr.bf16.mxu0 %v8413_v57  ;;  %v8489_v57 = vld [vmem:[%s11300_s3 + $0x5d0] ss:$52 sps:$4 sm:$0xff]  }
 0x330   :  { %6170 = vmatprep.subr.bf16.mxu1 %v8416_v58  ;;  %v8492_v58 = vld [vmem:[%s11300_s3 + $0x5d8] ss:$52 sps:$4 sm:$0xff]  }
 0x331   :  { %6089 = vmatpush1.bf16.msra.mxu0 %v8411_v59  ;;  %v8497_v59 = vld [vmem:[%s11300_s3 + $0x63c] ss:$52 sps:$4 sm:$0xff]  }
 0x332   :  { %6171 = vmatpush1.bf16.msra.mxu1 %v8414_v60  ;;  %6090 = vmatprep.subr.bf16.mxu0 %v8419_v61  ;;  %v8500_v60 = vld [vmem:[%s11300_s3 + $0x644] ss:$52 sps:$4 sm:$0xff]  }
 0x333   :  { %6172 = vmatprep.subr.bf16.mxu1 %v8422_v62  ;;  %v8495_v61 = vld [vmem:[%s11300_s3 + $0x638] ss:$52 sps:$4 sm:$0xff]   ;;  %v8498_v62 = vld [vmem:[%s11300_s3 + $0x640] ss:$52 sps:$4 sm:$0xff]  }
 0x335   :  { %6091 = vmatpush1.bf16.msra.mxu0 %v8417_v63  ;;  %v8503_v63 = vld [vmem:[%s11300_s3 + $0x6a4] ss:$52 sps:$4 sm:$0xff]  }
 0x336   :  { %6173 = vmatpush1.bf16.msra.mxu1 %v8420_v4  ;;  %6092 = vmatprep.subr.bf16.mxu0 %v8425_v5  ;;  %v8506_v4 = vld [vmem:[%s11300_s3 + $0x6ac] ss:$52 sps:$4 sm:$0xff]  }
 0x337   :  { %6174 = vmatprep.subr.bf16.mxu1 %v8428_v6  ;;  %v8501_v5 = vld [vmem:[%s11300_s3 + $0x6a0] ss:$52 sps:$4 sm:$0xff]   ;;  %v8504_v6 = vld [vmem:[%s11300_s3 + $0x6a8] ss:$52 sps:$4 sm:$0xff]  }
 0x339   :  { %6093 = vmatpush1.bf16.msra.mxu0 %v8423_v7  ;;  %v8509_v7 = vld [vmem:[%s11300_s3 + $0x70c] ss:$52 sps:$4 sm:$0xff]  }
 0x33a   :  { %6175 = vmatpush1.bf16.msra.mxu1 %v8426_v9  ;;  %6094 = vmatprep.subr.bf16.mxu0 %v8431_v10  ;;  %v8512_v9 = vld [vmem:[%s11300_s3 + $0x714] ss:$52 sps:$4 sm:$0xff]  }
 0x33b   :  { %6176 = vmatprep.subr.bf16.mxu1 %v8434_v11  ;;  %v8507_v10 = vld [vmem:[%s11300_s3 + $0x708] ss:$52 sps:$4 sm:$0xff]   ;;  %v8510_v11 = vld [vmem:[%s11300_s3 + $0x710] ss:$52 sps:$4 sm:$0xff]  }
 0x33d   :  { %6095 = vmatpush1.bf16.msra.mxu0 %v8429_v12  ;;  %v8515_v12 = vld [vmem:[%s11300_s3 + $0x774] ss:$52 sps:$4 sm:$0xff]  }
 0x33e   :  { %6177 = vmatpush1.bf16.msra.mxu1 %v8432_v52  ;;  %6096 = vmatprep.subr.bf16.mxu0 %v8437_v15  ;;  %v8518_v52 = vld [vmem:[%s11300_s3 + $0x77c] ss:$52 sps:$4 sm:$0xff]  }
 0x33f   :  { %6178 = vmatprep.subr.bf16.mxu1 %v8440_v16  ;;  %v8513_v15 = vld [vmem:[%s11300_s3 + $0x770] ss:$52 sps:$4 sm:$0xff]   ;;  %v8516_v16 = vld [vmem:[%s11300_s3 + $0x778] ss:$52 sps:$4 sm:$0xff]  }
 0x341   :  { %6097 = vmatpush1.bf16.msra.mxu0 %v8435_v17  ;;  %v8521_v17 = vld [vmem:[%s11300_s3 + $0x7dc] ss:$52 sps:$4 sm:$0xff]  }
 0x342   :  { %6179 = vmatpush1.bf16.msra.mxu1 %v8438_v18  ;;  %6098 = vmatprep.subr.bf16.mxu0 %v8443_v22  ;;  %v8524_v18 = vld [vmem:[%s11300_s3 + $0x7e4] ss:$52 sps:$4 sm:$0xff]  }
 0x343   :  { %6180 = vmatprep.subr.bf16.mxu1 %v8446_v24  ;;  %v8519_v22 = vld [vmem:[%s11300_s3 + $0x7d8] ss:$52 sps:$4 sm:$0xff]   ;;  %v8522_v24 = vld [vmem:[%s11300_s3 + $0x7e0] ss:$52 sps:$4 sm:$0xff]  }
 0x345   :  { %6099 = vmatpush1.bf16.msra.mxu0 %v8441_v13  ;;  %v8527_v13 = vld [vmem:[%s11300_s3 + $0x844] ss:$52 sps:$4 sm:$0xff]  }
 0x346   :  { %6181 = vmatpush1.bf16.msra.mxu1 %v8444_v28  ;;  %6100 = vmatprep.subr.bf16.mxu0 %v8449_v29  ;;  %v8530_v28 = vld [vmem:[%s11300_s3 + $0x84c] ss:$52 sps:$4 sm:$0xff]  }
 0x347   :  { %6182 = vmatprep.subr.bf16.mxu1 %v8452_v14  ;;  %v8525_v29 = vld [vmem:[%s11300_s3 + $0x840] ss:$52 sps:$4 sm:$0xff]  }
 0x348   :  { %v11010_v14 = vld [vmem:[%s11302_s4] sm:$0xff] }
 0x349   :  { %6101 = vmatpush1.bf16.msra.mxu0 %v8447_v30  ;;  %v8528_v30 = vld [vmem:[%s11300_s3 + $0x848] ss:$52 sps:$4 sm:$0xff]  }
 0x34a   :  { %6183 = vmatpush1.bf16.msra.mxu1 %v8450_v31  ;;  %6102 = vmatprep.subr.bf16.mxu0 %v8455_v1  ;;  %v8533_v31 = vld [vmem:[%s11300_s3 + $0x8ac] ss:$52 sps:$4 sm:$0xff]   ;;  %v8536_v1 = vld [vmem:[%s11300_s3 + $0x8b4] ss:$52 sps:$4 sm:$0xff]  }
 0x34b   :  { %6184 = vmatprep.subr.bf16.mxu1 %v8458_v25  ;;  %v3584_v25 = vrot.slane %v11010_v14, %v10131_v0 }
 0x34d   :  { %6103 = vmatpush1.bf16.msra.mxu0 %v8453_v32  ;;  %v3592_v32 = vrot.slane %v11010_v14, %v10327_v20 }
 0x34e   :  { %6185 = vmatpush1.bf16.msra.mxu1 %v8456_v33  ;;  %6104 = vmatprep.subr.bf16.mxu0 %v8461_v26  ;;  %v3588_v33 = vrot.slane %v11010_v14, %v10139_v2  ;;  %v3596_v26 = vrot.slane %v11010_v14, %v10142_v3 }
 0x34f   :  { %6186 = vmatprep.subr.bf16.mxu1 %v8464_v8  ;;  %v8531_v8 = vld [vmem:[%s11300_s3 + $0x8a8] ss:$52 sps:$4 sm:$0xff]  }
 0x351   :  { %6105 = vmatpush1.bf16.msra.mxu0 %v8459_v37  ;;  %v8534_v37 = vld [vmem:[%s11300_s3 + $0x8b0] ss:$52 sps:$4 sm:$0xff]  }
 0x352   :  { %6187 = vmatpush1.bf16.msra.mxu1 %v8462_v38  ;;  %6106 = vmatprep.subr.bf16.mxu0 %v8467_v21  ;;  %v8539_v38 = vld [vmem:[%s11300_s3 + $0x914] ss:$52 sps:$4 sm:$0xff]  }
 0x353   :  { %6188 = vmatprep.subr.bf16.mxu1 %v8470_v39 }
 0x355   :  { %6107 = vmatpush1.bf16.msra.mxu0 %v8465_v40  ;;  %v8542_v40 = vld [vmem:[%s11300_s3 + $0x91c] ss:$52 sps:$4 sm:$0xff]  }
 0x356   :  { %6189 = vmatpush1.bf16.msra.mxu1 %v8468_v41  ;;  %6108 = vmatprep.subr.bf16.mxu0 %v8473_v34 }
 0x357   :  { %6190 = vmatprep.subr.bf16.mxu1 %v8476_v43 }
 0x359   :  { %6109 = vmatpush1.bf16.msra.mxu0 %v8471_v44 }
 0x35a   :  { %6191 = vmatpush1.bf16.msra.mxu1 %v8474_v35  ;;  %6110 = vmatprep.subr.bf16.mxu0 %v8479_v45 }
 0x35b   :  { %6192 = vmatprep.subr.bf16.mxu1 %v8482_v46 }
 0x35d   :  { %6111 = vmatpush1.bf16.msra.mxu0 %v8477_v47 }
 0x35e   :  { %6193 = vmatpush1.bf16.msra.mxu1 %v8480_v48  ;;  %6112 = vmatprep.subr.bf16.mxu0 %v8485_v50  ;;  %v8537_v48 = vld [vmem:[%s11300_s3 + $0x910] ss:$52 sps:$4 sm:$0xff]  }
 0x35f   :  { %6194 = vmatprep.subr.bf16.mxu1 %v8488_v51 }
 0x361   :  { %6113 = vmatpush1.bf16.msra.mxu0 %v8483_v53  ;;  %v8540_v53 = vld [vmem:[%s11300_s3 + $0x918] ss:$52 sps:$4 sm:$0xff]  }
 0x362   :  { %6195 = vmatpush1.bf16.msra.mxu1 %v8486_v54  ;;  %6114 = vmatprep.subr.bf16.mxu0 %v8491_v55  ;;  %v8545_v54 = vld [vmem:[%s11300_s3 + $0x97c] ss:$52 sps:$4 sm:$0xff]  }
 0x363   :  { %6196 = vmatprep.subr.bf16.mxu1 %v8494_v56 }
 0x365   :  { %6115 = vmatpush1.bf16.msra.mxu0 %v8489_v57  ;;  %v8548_v57 = vld [vmem:[%s11300_s3 + $0x984] ss:$52 sps:$4 sm:$0xff]  }
 0x366   :  { %6197 = vmatpush1.bf16.msra.mxu1 %v8492_v58  ;;  %6116 = vmatprep.subr.bf16.mxu0 %v8497_v59 }
 0x367   :  { %6198 = vmatprep.subr.bf16.mxu1 %v8500_v60  ;;  %v8543_v60 = vld [vmem:[%s11300_s3 + $0x978] ss:$52 sps:$4 sm:$0xff]  }
 0x369   :  { %6117 = vmatpush1.bf16.msra.mxu0 %v8495_v61  ;;  %v8546_v61 = vld [vmem:[%s11300_s3 + $0x980] ss:$52 sps:$4 sm:$0xff]  }
 0x36a   :  { %6199 = vmatpush1.bf16.msra.mxu1 %v8498_v62  ;;  %6127 = vmatprep.subr.bf16.mxu0 %v8503_v63  ;;  %v8551_v62 = vld [vmem:[%s11300_s3 + $0x9e4] ss:$52 sps:$4 sm:$0xff]  }
 0x36b   :  { %6209 = vmatprep.subr.bf16.mxu1 %v8506_v4  ;;  %v8554_v4 = vld [vmem:[%s11300_s3 + $0x9ec] ss:$52 sps:$4 sm:$0xff]  }
 0x36c   :  { %6119 = vmatmul.mubr.bf16.vlgmr.msra.gmra.mrb[12].mxu0 %v10160_v23 }
 0x36d   :  { %6201 = vmatmul.mubr.bf16.vlgmr.msra.gmra.mrb[12].mxu1 %v10160_v23  ;;  %6128 = vmatpush1.bf16.msra.mxu0 %v8501_v5  ;;  %v8549_v5 = vld [vmem:[%s11300_s3 + $0x9e0] ss:$52 sps:$4 sm:$0xff]  }
 0x36e   :  { %6159 = vmatprep.mubr.bf16.mxu0 %v10170_v27  ;;  %6210 = vmatpush1.bf16.msra.mxu1 %v8504_v6  ;;  %v8552_v6 = vld [vmem:[%s11300_s3 + $0x9e8] ss:$52 sps:$4 sm:$0xff]  }
 0x36f   :  { %6241 = vmatprep.mubr.bf16.mxu1 %v10170_v27  ;;  %6129 = vmatprep.subr.bf16.mxu0 %v8509_v7  ;;  %v8557_v7 = vld [vmem:[%s11300_s3 + $0xa4c] ss:$52 sps:$4 sm:$0xff]  }
 0x370   :  { %6211 = vmatprep.subr.bf16.mxu1 %v8512_v9  ;;  %v8560_v9 = vld [vmem:[%s11300_s3 + $0xa54] ss:$52 sps:$4 sm:$0xff]  }
 0x371   :  { %6130 = vmatpush1.bf16.msra.mxu0 %v8507_v10  ;;  %v8555_v10 = vld [vmem:[%s11300_s3 + $0xa48] ss:$52 sps:$4 sm:$0xff]  }
 0x372   :  { %6212 = vmatpush1.bf16.msra.mxu1 %v8510_v11  ;;  %6131 = vmatprep.subr.bf16.mxu0 %v8515_v12  ;;  %v8558_v11 = vld [vmem:[%s11300_s3 + $0xa50] ss:$52 sps:$4 sm:$0xff]   ;;  %v8563_v12 = vld [vmem:[%s11300_s3 + $0xab4] ss:$52 sps:$4 sm:$0xff]  }
 0x373   :  { %6213 = vmatprep.subr.bf16.mxu1 %v8518_v52  ;;  %v8566_v52 = vld [vmem:[%s11300_s3 + $0xabc] ss:$52 sps:$4 sm:$0xff]  }
 0x375   :  { %6132 = vmatpush1.bf16.msra.mxu0 %v8513_v15  ;;  %v8561_v15 = vld [vmem:[%s11300_s3 + $0xab0] ss:$52 sps:$4 sm:$0xff]  }
 0x376   :  { %6214 = vmatpush1.bf16.msra.mxu1 %v8516_v16  ;;  %6133 = vmatprep.subr.bf16.mxu0 %v8521_v17  ;;  %v8564_v16 = vld [vmem:[%s11300_s3 + $0xab8] ss:$52 sps:$4 sm:$0xff]   ;;  %v8569_v17 = vld [vmem:[%s11300_s3 + $0xb1c] ss:$52 sps:$4 sm:$0xff]  }
 0x377   :  { %6215 = vmatprep.subr.bf16.mxu1 %v8524_v18  ;;  %v8572_v18 = vld [vmem:[%s11300_s3 + $0xb24] ss:$52 sps:$4 sm:$0xff]  }
 0x379   :  { %6134 = vmatpush1.bf16.msra.mxu0 %v8519_v22  ;;  %v8567_v22 = vld [vmem:[%s11300_s3 + $0xb18] ss:$52 sps:$4 sm:$0xff]  }
 0x37a   :  { %6216 = vmatpush1.bf16.msra.mxu1 %v8522_v24  ;;  %6135 = vmatprep.subr.bf16.mxu0 %v8527_v13  ;;  %v8570_v24 = vld [vmem:[%s11300_s3 + $0xb20] ss:$52 sps:$4 sm:$0xff]   ;;  %v8575_v13 = vld [vmem:[%s11300_s3 + $0xb84] ss:$52 sps:$4 sm:$0xff]  }
 0x37b   :  { %6217 = vmatprep.subr.bf16.mxu1 %v8530_v28  ;;  %v8578_v28 = vld [vmem:[%s11300_s3 + $0xb8c] ss:$52 sps:$4 sm:$0xff]  }
 0x37d   :  { %6136 = vmatpush1.bf16.msra.mxu0 %v8525_v29  ;;  %v8573_v29 = vld [vmem:[%s11300_s3 + $0xb80] ss:$52 sps:$4 sm:$0xff]  }
 0x37e   :  { %6218 = vmatpush1.bf16.msra.mxu1 %v8528_v30  ;;  %6137 = vmatprep.subr.bf16.mxu0 %v8533_v31  ;;  %v8576_v30 = vld [vmem:[%s11300_s3 + $0xb88] ss:$52 sps:$4 sm:$0xff]   ;;  %v8581_v31 = vld [vmem:[%s11300_s3 + $0xbec] ss:$52 sps:$4 sm:$0xff]  }
 0x37f   :  { %v5833_v21 = vpop.f32.mrb[4].mxu0  ;;  %v5915_v39 = vpop.f32.mrb[4].mxu1  ;;  %6219 = vmatprep.subr.bf16.mxu1 %v8536_v1  ;;  %v8584_v1 = vld [vmem:[%s11300_s3 + $0xbf4] ss:$52 sps:$4 sm:$0xff]  }
 0x380   :  { %v7333_v41 = vadd.f32 %v5833_v21, %v3584_v25  ;;  %v7335_v34 = vadd.f32 %v5915_v39, %v3592_v32  ;;  %v5835_v43 = vpop.f32.mrb[5].mxu0  ;;  %v5917_v44 = vpop.f32.mrb[5].mxu1  ;;  %v8579_v25 = vld [vmem:[%s11300_s3 + $0xbe8] ss:$52 sps:$4 sm:$0xff]   ;;  %v8582_v32 = vld [vmem:[%s11300_s3 + $0xbf0] ss:$52 sps:$4 sm:$0xff]  }
 0x381   :  { %v7334_v35 = vadd.f32 %v5835_v43, %v3588_v33  ;;  %v7336_v45 = vadd.f32 %v5917_v44, %v3596_v26  ;;  %v5837_v46 = vpop.f32.mrb[6].mxu0  ;;  %v5919_v47 = vpop.f32.mrb[6].mxu1  ;;  %6138 = vmatpush1.bf16.msra.mxu0 %v8531_v8  ;;  %v8587_v33 = vld [vmem:[%s11300_s3 + $0xc54] ss:$52 sps:$4 sm:$0xff]   ;;  %v8590_v26 = vld [vmem:[%s11300_s3 + $0xc5c] ss:$52 sps:$4 sm:$0xff]  }
 0x382   :  { %6220 = vmatpush1.bf16.msra.mxu1 %v8534_v37  ;;  %v5838_v50 = vpop.f32.mrb[7].mxu0  ;;  %v5920_v51 = vpop.f32.mrb[7].mxu1  ;;  %6139 = vmatprep.subr.bf16.mxu0 %v8539_v38  ;;  %v8585_v8 = vld [vmem:[%s11300_s3 + $0xc50] ss:$52 sps:$4 sm:$0xff]   ;;  %v8588_v37 = vld [vmem:[%s11300_s3 + $0xc58] ss:$52 sps:$4 sm:$0xff]  }
 0x383   :  { %v7279_v55 = vpack.c.bf16 %v7334_v35, %v7333_v41  ;;  %v7280_v56 = vpack.c.bf16 %v7336_v45, %v7335_v34  ;;  %6221 = vmatprep.subr.bf16.mxu1 %v8542_v40  ;;  %v8593_v38 = vld [vmem:[%s11300_s3 + $0xcbc] ss:$52 sps:$4 sm:$0xff]   ;;  %v8596_v21 = vld [vmem:[%s11300_s3 + $0xcc4] ss:$52 sps:$4 sm:$0xff]   ;;  %v8594_v40 = vld [vmem:[%s11300_s3 + $0xcc0] ss:$52 sps:$4 sm:$0xff]  }
 0x384   :  { %v8591_v39 = vld [vmem:[%s11300_s3 + $0xcb8] ss:$52 sps:$4 sm:$0xff]   ;;  %v8597_v41 = vld [vmem:[%s11300_s3 + $0x370] ss:$52 sps:$4 sm:$0xff]   ;;  %v8606_v50 = vld [vmem:[%s11300_s3 + $0xac0] ss:$52 sps:$4 sm:$0xff]  }
 0x385   :  { %v11054_v58 = vrot.slane %v7279_v55, %v8798_v49  ;;  %v11057_v59 = vrot.slane %v7280_v56, %v8798_v49  ;;  %6140 = vmatpush1.bf16.msra.mxu0 %v8537_v48  ;;  %v8598_v34 = vld [vmem:[%s11300_s3 + $0x9f0] ss:$52 sps:$4 sm:$0xff]   ;;  %v8601_v35 = vld [vmem:[%s11300_s3 + $0x3d8] ss:$52 sps:$4 sm:$0xff]   ;;  %v8605_v48 = vld [vmem:[%s11300_s3 + $0x440] ss:$52 sps:$4 sm:$0xff]  }
 0x386   :  { %6222 = vmatpush1.bf16.msra.mxu1 %v8540_v53  ;;  %6141 = vmatprep.subr.bf16.mxu0 %v8545_v54  ;;  %v8599_v43 = vld [vmem:[%s11300_s3 + $0x30] ss:$52 sps:$4 sm:$0xff]   ;;  %v8602_v45 = vld [vmem:[%s11300_s3 + $0xa58] ss:$52 sps:$4 sm:$0xff]   ;;  %v8608_v51 = vld [vmem:[%s11300_s3 + $0x780] ss:$52 sps:$4 sm:$0xff]  }
 0x387   :  { %v6388_v63 = vcombine.low %v11054_v58, %v11057_v59  ;;  %6223 = vmatprep.subr.bf16.mxu1 %v8548_v57  ;;  %v8600_v44 = vld [vmem:[%s11300_s3 + $0x6b0] ss:$52 sps:$4 sm:$0xff]   ;;  %v8603_v46 = vld [vmem:[%s11300_s3 + $0x98] ss:$52 sps:$4 sm:$0xff]   ;;  %v8610_v53 = vld [vmem:[%s11300_s3 + $0xb28] ss:$52 sps:$4 sm:$0xff]  }
 0x388   :  { %v8604_v47 = vld [vmem:[%s11300_s3 + $0x718] ss:$52 sps:$4 sm:$0xff]   ;;  %v8611_v54 = vld [vmem:[%s11300_s3 + $0x168] ss:$52 sps:$4 sm:$0xff]   ;;  %v8613_v56 = vld [vmem:[%s11300_s3 + $0x510] ss:$52 sps:$4 sm:$0xff]  }
 0x389   :  { %6142 = vmatpush1.bf16.msra.mxu0 %v8543_v60  ;;  %v8612_v55 = vld [vmem:[%s11300_s3 + $0x7e8] ss:$52 sps:$4 sm:$0xff]   ;;  %v8614_v57 = vld [vmem:[%s11300_s3 + $0xb90] ss:$52 sps:$4 sm:$0xff]  }
 0x38a   :  { %6224 = vmatpush1.bf16.msra.mxu1 %v8546_v61  ;;  %6143 = vmatprep.subr.bf16.mxu0 %v8551_v62  ;;  %v8615_v60 = vld [vmem:[%s11300_s3 + $0x1d0] ss:$52 sps:$4 sm:$0xff]   ;;  %v8617_v62 = vld [vmem:[%s11300_s3 + $0x578] ss:$52 sps:$4 sm:$0xff]  }
 0x38b   :  { %6225 = vmatprep.subr.bf16.mxu1 %v8554_v4  ;;  %v8616_v61 = vld [vmem:[%s11300_s3 + $0x850] ss:$52 sps:$4 sm:$0xff]   ;;  %v8618_v4 = vld [vmem:[%s11300_s3 + $0xbf8] ss:$52 sps:$4 sm:$0xff]  }
 0x38d   :  { %6144 = vmatpush1.bf16.msra.mxu0 %v8549_v5  ;;  %v8619_v5 = vld [vmem:[%s11300_s3 + $0x238] ss:$52 sps:$4 sm:$0xff]  }
 0x38e   :  { %6226 = vmatpush1.bf16.msra.mxu1 %v8552_v6  ;;  %6145 = vmatprep.subr.bf16.mxu0 %v8557_v7  ;;  %v8620_v6 = vld [vmem:[%s11300_s3 + $0x8b8] ss:$52 sps:$4 sm:$0xff]   ;;  %v8621_v7 = vld [vmem:[%s11300_s3 + $0x5e0] ss:$52 sps:$4 sm:$0xff]  }
 0x38f   :  { %6227 = vmatprep.subr.bf16.mxu1 %v8560_v9  ;;  %v8622_v9 = vld [vmem:[%s11300_s3 + $0xc60] ss:$52 sps:$4 sm:$0xff]  }
 0x391   :  { %6146 = vmatpush1.bf16.msra.mxu0 %v8555_v10  ;;  %v8623_v10 = vld [vmem:[%s11300_s3 + $0x2a0] ss:$52 sps:$4 sm:$0xff]  }
 0x392   :  { %6228 = vmatpush1.bf16.msra.mxu1 %v8558_v11  ;;  %6147 = vmatprep.subr.bf16.mxu0 %v8563_v12  ;;  %v8624_v11 = vld [vmem:[%s11300_s3 + $0x920] ss:$52 sps:$4 sm:$0xff]   ;;  %v8625_v12 = vld [vmem:[%s11300_s3 + $0x648] ss:$52 sps:$4 sm:$0xff]  }
 0x393   :  { %6229 = vmatprep.subr.bf16.mxu1 %v8566_v52  ;;  %v8626_v52 = vld [vmem:[%s11300_s3 + $0xcc8] ss:$52 sps:$4 sm:$0xff]  }
 0x395   :  { %6148 = vmatpush1.bf16.msra.mxu0 %v8561_v15  ;;  %v8627_v15 = vld [vmem:[%s11300_s3 + $0x308] ss:$52 sps:$4 sm:$0xff]  }
 0x396   :  { %6230 = vmatpush1.bf16.msra.mxu1 %v8564_v16  ;;  %6149 = vmatprep.subr.bf16.mxu0 %v8569_v17  ;;  %v8628_v16 = vld [vmem:[%s11300_s3 + $0x988] ss:$52 sps:$4 sm:$0xff]   ;;  %v3599_v17 = vsub.s32 4, %v8780_v42 }
 0x397   :  { %6231 = vmatprep.subr.bf16.mxu1 %v8572_v18  ;;  %v3607_v18 = vsub.s32 6, %v8780_v42 }
 0x399   :  { %6150 = vmatpush1.bf16.msra.mxu0 %v8567_v22  ;;  %v3603_v22 = vsub.s32 5, %v8780_v42 }
 0x39a   :  { %6232 = vmatpush1.bf16.msra.mxu1 %v8570_v24  ;;  %6151 = vmatprep.subr.bf16.mxu0 %v8575_v13  ;;  %v3611_v24 = vsub.s32 7, %v8780_v42  ;;  %v3600_v13 = vrot.slane %v11010_v14, %v3599_v17 }
 0x39b   :  { %6233 = vmatprep.subr.bf16.mxu1 %v8578_v28  ;;  %v3608_v28 = vrot.slane %v11010_v14, %v3607_v18 }
 0x39d   :  { %6152 = vmatpush1.bf16.msra.mxu0 %v8573_v29  ;;  %v3604_v29 = vrot.slane %v11010_v14, %v3603_v22 }
 0x39e   :  { %6234 = vmatpush1.bf16.msra.mxu1 %v8576_v30  ;;  %6153 = vmatprep.subr.bf16.mxu0 %v8581_v31  ;;  %v3612_v30 = vrot.slane %v11010_v14, %v3611_v24  ;;  %v6396_v14 = vrot.slane %v6388_v63, %v8798_v49 }
 0x39f   :  { %6235 = vmatprep.subr.bf16.mxu1 %v8584_v1 }
 0x3a1   :  { %6154 = vmatpush1.bf16.msra.mxu0 %v8579_v25 }
 0x3a2   :  { %6236 = vmatpush1.bf16.msra.mxu1 %v8582_v32  ;;  %6155 = vmatprep.subr.bf16.mxu0 %v8587_v33 }
 0x3a3   :  { %6237 = vmatprep.subr.bf16.mxu1 %v8590_v26 }
 0x3a5   :  { %6156 = vmatpush1.bf16.msra.mxu0 %v8585_v8 }
 0x3a6   :  { %6238 = vmatpush1.bf16.msra.mxu1 %v8588_v37  ;;  %6157 = vmatprep.subr.bf16.mxu0 %v8593_v38 }
 0x3a7   :  { %6239 = vmatprep.subr.bf16.mxu1 %v8596_v21 }
 0x3a9   :  { %6158 = vmatpush1.bf16.msra.mxu0 %v8591_v39 }
 0x3aa   :  { %6240 = vmatpush1.bf16.msra.mxu1 %v8594_v40  ;;  %7285 = vmatprep.subr.bf16.mxu0 %v8597_v41 }
 0x3ab   :  { %7307 = vmatprep.subr.bf16.mxu1 %v8598_v34 }
 0x3ac   :  { %6160 = vmatmul.mubr.bf16.vlgmr.msra.gmra.mrb[12].mxu0 %v10365_v36 }
 0x3ad   :  { %6242 = vmatmul.mubr.bf16.vlgmr.msra.gmra.mrb[12].mxu1 %v10365_v36  ;;  %7286 = vmatpush3.bf16.msra.mxu0 %v8599_v43 }
 0x3ae   :  { %6282 = vmatprep.mubr.bf16.mxu0 %v10152_v19  ;;  %7308 = vmatpush3.bf16.msra.mxu1 %v8600_v44  ;;  %v8607_v19 = vld [vmem:[%s11300_s3 + $0x100] ss:$52 sps:$4 sm:$0xff]  }
 0x3af   :  { %6322 = vmatprep.mubr.bf16.mxu1 %v10170_v27  ;;  %7287 = vmatprep.subr.bf16.mxu0 %v8601_v35  ;;  %v8609_v27 = vld [vmem:[%s11300_s3 + $0x4a8] ss:$52 sps:$4 sm:$0xff]  }
 0x3b0   :  { %7309 = vmatprep.subr.bf16.mxu1 %v8602_v45  ;;  %v3578_v35 = vld [vmem:[%s11302_s4 + $0x8] sm:$0x1f] }
 0x3b1   :  { %7288 = vmatpush3.bf16.msra.mxu0 %v8603_v46  ;;  %v3616_v45 = vrot.slane %v3578_v35, %v10131_v0  ;;  %v3624_v46 = vrot.slane %v3578_v35, %v10327_v20  ;;  %v3628_v58 = vrot.slane %v3578_v35, %v10142_v3 }
 0x3b2   :  { %7310 = vmatpush3.bf16.msra.mxu1 %v8604_v47  ;;  %7289 = vmatprep.subr.bf16.mxu0 %v8605_v48  ;;  %v3620_v47 = vrot.slane %v3578_v35, %v10139_v2 }
 0x3b3   :  { %7311 = vmatprep.subr.bf16.mxu1 %v8606_v50 }
 0x3b5   :  { %7290 = vmatpush3.bf16.msra.mxu0 %v8607_v19 }
 0x3b6   :  { %7312 = vmatpush3.bf16.msra.mxu1 %v8608_v51  ;;  %7291 = vmatprep.subr.bf16.mxu0 %v8609_v27 }
 0x3b7   :  { %7313 = vmatprep.subr.bf16.mxu1 %v8610_v53 }
 0x3b9   :  { %7292 = vmatpush3.bf16.msra.mxu0 %v8611_v54 }
 0x3ba   :  { %7314 = vmatpush3.bf16.msra.mxu1 %v8612_v55  ;;  %7293 = vmatprep.subr.bf16.mxu0 %v8613_v56 }
 0x3bb   :  { %7315 = vmatprep.subr.bf16.mxu1 %v8614_v57 }
 0x3bd   :  { %7294 = vmatpush3.bf16.msra.mxu0 %v8615_v60 }
 0x3be   :  { %7316 = vmatpush3.bf16.msra.mxu1 %v8616_v61  ;;  %7295 = vmatprep.subr.bf16.mxu0 %v8617_v62  ;;  %v3632_v62 = vrot.slane %v3578_v35, %v3599_v17 }
 0x3bf   :  { %7317 = vmatprep.subr.bf16.mxu1 %v8618_v4 }
 0x3c1   :  { %7296 = vmatpush3.bf16.msra.mxu0 %v8619_v5 }
 0x3c2   :  { %7318 = vmatpush3.bf16.msra.mxu1 %v8620_v6  ;;  %7297 = vmatprep.subr.bf16.mxu0 %v8621_v7 }
 0x3c3   :  { %7319 = vmatprep.subr.bf16.mxu1 %v8622_v9 }
 0x3c5   :  { %7298 = vmatpush3.bf16.msra.mxu0 %v8623_v10 }
 0x3c6   :  { %7320 = vmatpush3.bf16.msra.mxu1 %v8624_v11  ;;  %7299 = vmatprep.subr.bf16.mxu0 %v8625_v12 }
 0x3c7   :  { %7321 = vmatprep.subr.bf16.mxu1 %v8626_v52 }
 0x3c9   :  { %7300 = vmatpush3.bf16.msra.mxu0 %v8627_v15 }
 0x3ca   :  { %7322 = vmatpush3.bf16.msra.mxu1 %v8628_v16 }
 0x3cc   :  { %6283 = vmatmul.mubr.bf16.vlgmr.msra.gmra.mrb[16].mxu0 %v10160_v23 }
 0x3cd   :  { %6323 = vmatmul.mubr.bf16.vlgmr.msra.gmra.mrb[16].mxu1 %v10365_v36 }
 0x3ff   :  { %v5997_v31 = vpop.f32.mrb[8].mxu0 }
 0x400   :  { %v7337_v23 = vadd.f32 %v5997_v31, %v3600_v13  ;;  %v6079_v1 = vpop.f32.mrb[8].mxu1  ;;  %v5999_v36 = vpop.f32.mrb[9].mxu0 }
 0x401   :  { %v7339_v25 = vadd.f32 %v6079_v1, %v3608_v28  ;;  %v7338_v32 = vadd.f32 %v5999_v36, %v3604_v29  ;;  %v6081_v33 = vpop.f32.mrb[9].mxu1  ;;  %v6001_v26 = vpop.f32.mrb[10].mxu0 }
 0x402   :  { %v7340_v8 = vadd.f32 %v6081_v33, %v3612_v30  ;;  %v6083_v37 = vpop.f32.mrb[10].mxu1  ;;  %v6002_v38 = vpop.f32.mrb[11].mxu0 }
 0x403   :  { %v7281_v42 = vpack.c.bf16 %v7338_v32, %v7337_v23  ;;  %v6084_v21 = vpop.f32.mrb[11].mxu1 }
 0x404   :  { %v7282_v39 = vpack.c.bf16 %v7340_v8, %v7339_v25 }
 0x405   :  { %v6380_v40 = vrot.slane %v7281_v42, %v8798_v49 }
 0x406   :  { %v6387_v41 = vrot.slane %v7282_v39, %v8798_v49 }
 0x408   :  { %v6389_v34 = vcombine.low %v6380_v40, %v6387_v41 }
 0x40a   :  { %v6403_v43 = vrot.slane %v6389_v34, %v8798_v49 }
 0x40c   :  { %v6404_v44 = vcombine.low %v6396_v14, %v6403_v43 }
 0x40e   :  { %6446 = vst [vmem:[%s11303_s5] sm:$0xff] %v6404_v44 }
 0x47f   :  { %v6161_v59 = vpop.f32.mrb[12].mxu0 }
 0x480   :  { %v7341_v63 = vadd.f32 %v6161_v59, %v3616_v45  ;;  %v6243_v48 = vpop.f32.mrb[12].mxu1  ;;  %v6163_v50 = vpop.f32.mrb[13].mxu0 }
 0x481   :  { %v7343_v19 = vadd.f32 %v6243_v48, %v3624_v46  ;;  %v7342_v51 = vadd.f32 %v6163_v50, %v3620_v47  ;;  %v6245_v27 = vpop.f32.mrb[13].mxu1  ;;  %v6165_v53 = vpop.f32.mrb[14].mxu0 }
 0x482   :  { %v7344_v54 = vadd.f32 %v6245_v27, %v3628_v58  ;;  %v6247_v55 = vpop.f32.mrb[14].mxu1  ;;  %v6166_v56 = vpop.f32.mrb[15].mxu0 }
 0x483   :  { %v7283_v57 = vpack.c.bf16 %v7342_v51, %v7341_v63  ;;  %v6248_v60 = vpop.f32.mrb[15].mxu1 }
 0x484   :  { %v7284_v0 = vpack.c.bf16 %v7344_v54, %v7343_v19 }
 0x485   :  { %v6413_v20 = vrot.slane %v7283_v57, %v8798_v49 }
 0x486   :  { %v6420_v2 = vrot.slane %v7284_v0, %v8798_v49 }
 0x488   :  { %v6428_v61 = vcombine.low %v6413_v20, %v6420_v2 }
 0x48a   :  { %v6435_v22 = vrot.slane %v6428_v61, %v8798_v49 }
 0x49f   :  { %v7301_v3 = vpop.f32.mrb[16].mxu0 }
 0x4a0   :  { %v7323_v4 = vpop.f32.mrb[16].mxu1  ;;  %v7302_v5 = vpop.f32.mrb[17].mxu0 }
 0x4a1   :  { %v7303_v6 = vadd.f32 %v7302_v5, %v7301_v3  ;;  %v7324_v7 = vpop.f32.mrb[17].mxu1  ;;  %v7304_v9 = vpop.f32.mrb[18].mxu0 }
 0x4a2   :  { %v7325_v10 = vadd.f32 %v7324_v7, %v7323_v4  ;;  %v7326_v11 = vpop.f32.mrb[18].mxu1  ;;  %v7305_v12 = vpop.f32.mrb[19].mxu0 }
 0x4a3   :  { %v6285_v52 = vadd.f32 %v7303_v6, %v3632_v62  ;;  %v7327_v15 = vpop.f32.mrb[19].mxu1 }
 0x4a5   :  { %v6325_v16 = vadd.f32 %v7325_v10, %v6285_v52 }
 0x4a7   :  { %v6342_v18 = vpack.c.bf16 %v6325_v16, %v6325_v16 }
 0x4a9   :  { %v6427_v17 = vrot.slane %v6342_v18, %v8798_v49 }
 0x4ab   :  { %v6442_v24 = vrot.slane %v6427_v17, %v8798_v49 }
 0x4ad   :  { %v6443_v13 = vcombine.low %v6435_v22, %v6442_v24 }
 0x4af   :  { %6456 = vst.msk [vmem:[%s11303_s5 + $0x8] sm:$0x1f] %vm6455_vm9, %v6443_v13 }

// kernel: dca_forward.29
= control target key start
LH: loop header
LB: loop body
LE: loop exit
PB: predicated region body
PF: predicated region fallthrough
CT: control target
= control target key end

     0   :  { %v1149_v1 = vmov 0   ;;  %s1428_s1 = inlined_call_operand.vmem [shape: bf16[1024,128], index: 1, kind: input, shape index: {}]   ;;  %s1429_s0 = inlined_call_operand.vmem [shape: bf16[32,1024], index: 0, kind: input, shape index: {}]   ;;  %s1430_s2 = inlined_call_operand.vmem [shape: f32[32,1], index: 2, kind: input, shape index: {}]   ;;  %s1431_s3 = inlined_call_operand.vmem [shape: bf16[32,128], index: 3, kind: output, shape index: {}]  }
   0x1   :  { %v1085_v0 = vld [vmem:[%s1428_s1 + $0x40] sm:$0xff]   ;;  %1083 = vset.pattern.permute.xlu0 %v1149_v1  ;;  %1084 = vset.pattern.permute.xlu1 %v1149_v1  ;;  %v1089_v5 = vld [vmem:[%s1428_s1 + $0x48] sm:$0xff]   ;;  %v1093_v9 = vld [vmem:[%s1428_s1 + $0x50] sm:$0xff]  }
   0x2   :  { %v1086_v2 = vld [vmem:[%s1428_s1 + $0xc0] sm:$0xff]   ;;  %970 = vmatprep.subr.bf16.mxu0 %v1085_v0  ;;  %v1090_v6 = vld [vmem:[%s1428_s1 + $0xc8] sm:$0xff]   ;;  %v1094_v10 = vld [vmem:[%s1428_s1 + $0xd0] sm:$0xff]  }
   0x3   :  { %v1087_v3 = vld [vmem:[%s1428_s1] sm:$0xff]   ;;  %998 = vmatprep.subr.bf16.mxu1 %v1086_v2  ;;  %v1091_v7 = vld [vmem:[%s1428_s1 + $0x8] sm:$0xff]   ;;  %v1095_v11 = vld [vmem:[%s1428_s1 + $0x10] sm:$0xff]  }
   0x4   :  { %v1088_v4 = vld [vmem:[%s1428_s1 + $0x80] sm:$0xff]   ;;  %971 = vmatpush3.bf16.msra.mxu0 %v1087_v3  ;;  %v1092_v8 = vld [vmem:[%s1428_s1 + $0x88] sm:$0xff]   ;;  %v1096_v12 = vld [vmem:[%s1428_s1 + $0x90] sm:$0xff]  }
   0x5   :  { %999 = vmatpush3.bf16.msra.mxu1 %v1088_v4  ;;  %972 = vmatprep.subr.bf16.mxu0 %v1089_v5  ;;  %v1097_v13 = vld [vmem:[%s1428_s1 + $0x58] sm:$0xff]   ;;  %v1101_v17 = vld [vmem:[%s1428_s1 + $0x60] sm:$0xff]   ;;  %v1105_v21 = vld [vmem:[%s1428_s1 + $0x68] sm:$0xff]  }
   0x6   :  { %1000 = vmatprep.subr.bf16.mxu1 %v1090_v6  ;;  %v1098_v14 = vld [vmem:[%s1428_s1 + $0xd8] sm:$0xff]   ;;  %v1102_v18 = vld [vmem:[%s1428_s1 + $0xe0] sm:$0xff]   ;;  %v1106_v22 = vld [vmem:[%s1428_s1 + $0xe8] sm:$0xff]  }
   0x7   :  { %v1099_v15 = vld [vmem:[%s1428_s1 + $0x18] sm:$0xff]   ;;  %v1103_v19 = vld [vmem:[%s1428_s1 + $0x20] sm:$0xff]   ;;  %v1107_v23 = vld [vmem:[%s1428_s1 + $0x28] sm:$0xff]  }
   0x8   :  { %973 = vmatpush3.bf16.msra.mxu0 %v1091_v7  ;;  %v1100_v16 = vld [vmem:[%s1428_s1 + $0x98] sm:$0xff]   ;;  %v1104_v20 = vld [vmem:[%s1428_s1 + $0xa0] sm:$0xff]   ;;  %v1108_v24 = vld [vmem:[%s1428_s1 + $0xa8] sm:$0xff]  }
   0x9   :  { %1001 = vmatpush3.bf16.msra.mxu1 %v1092_v8  ;;  %974 = vmatprep.subr.bf16.mxu0 %v1093_v9  ;;  %v1109_v25 = vld [vmem:[%s1428_s1 + $0x70] sm:$0xff]   ;;  %v1113_v29 = vld [vmem:[%s1428_s1 + $0x78] sm:$0xff]   ;;  %v15_v33 = vld [vmem:[%s1429_s0] sm:$0xff] }
   0xa   :  { %1002 = vmatprep.subr.bf16.mxu1 %v1094_v10  ;;  %v1110_v26 = vld [vmem:[%s1428_s1 + $0xf0] sm:$0xff]   ;;  %v1114_v30 = vld [vmem:[%s1428_s1 + $0xf8] sm:$0xff]   ;;  %v19_v34 = vld [vmem:[%s1429_s0 + $0x20] sm:$0xff] }
   0xb   :  { %v1111_v27 = vld [vmem:[%s1428_s1 + $0x30] sm:$0xff]   ;;  %v1115_v31 = vld [vmem:[%s1428_s1 + $0x38] sm:$0xff]   ;;  %v16_v35 = vld [vmem:[%s1429_s0 + $0x8] sm:$0xff]  ;;  %v871_v36 = vcombine.low %v15_v33, %v19_v34  ;;  %v872_v37 = vcombine.high %v15_v33, %v19_v34 }
   0xc   :  { %975 = vmatpush3.bf16.msra.mxu0 %v1095_v11  ;;  %v1112_v28 = vld [vmem:[%s1428_s1 + $0xb0] sm:$0xff]   ;;  %v1116_v32 = vld [vmem:[%s1428_s1 + $0xb8] sm:$0xff]   ;;  %v20_v38 = vld [vmem:[%s1429_s0 + $0x28] sm:$0xff] }
   0xd   :  { %1003 = vmatpush3.bf16.msra.mxu1 %v1096_v12  ;;  %976 = vmatprep.subr.bf16.mxu0 %v1097_v13  ;;  %v873_v39 = vcombine.low %v16_v35, %v20_v38  ;;  %v874_v40 = vcombine.high %v16_v35, %v20_v38  ;;  %v1117_v41 = vld [vmem:[%s1428_s1 + $0x140] sm:$0xff]   ;;  %v1121_v45 = vld [vmem:[%s1428_s1 + $0x148] sm:$0xff]   ;;  %v1125_v49 = vld [vmem:[%s1428_s1 + $0x150] sm:$0xff]  }
   0xe   :  { %1004 = vmatprep.subr.bf16.mxu1 %v1098_v14  ;;  %679 = vmatprep.mubr.bf16.mxu0 %v872_v37  ;;  %v1118_v42 = vld [vmem:[%s1428_s1 + $0x1c0] sm:$0xff]   ;;  %v1122_v46 = vld [vmem:[%s1428_s1 + $0x1c8] sm:$0xff]   ;;  %v1126_v50 = vld [vmem:[%s1428_s1 + $0x1d0] sm:$0xff]  }
   0xf   :  { %728 = vmatprep.mubr.bf16.mxu1 %v874_v40  ;;  %v1119_v43 = vld [vmem:[%s1428_s1 + $0x100] sm:$0xff]   ;;  %v1123_v47 = vld [vmem:[%s1428_s1 + $0x108] sm:$0xff]   ;;  %v1127_v51 = vld [vmem:[%s1428_s1 + $0x110] sm:$0xff]  }
  0x10   :  { %977 = vmatpush3.bf16.msra.mxu0 %v1099_v15  ;;  %v1120_v44 = vld [vmem:[%s1428_s1 + $0x180] sm:$0xff]   ;;  %v1124_v48 = vld [vmem:[%s1428_s1 + $0x188] sm:$0xff]   ;;  %v1128_v52 = vld [vmem:[%s1428_s1 + $0x190] sm:$0xff]  }
  0x11   :  { %1005 = vmatpush3.bf16.msra.mxu1 %v1100_v16  ;;  %978 = vmatprep.subr.bf16.mxu0 %v1101_v17  ;;  %v1129_v53 = vld [vmem:[%s1428_s1 + $0x158] sm:$0xff]   ;;  %v1133_v57 = vld [vmem:[%s1428_s1 + $0x160] sm:$0xff]   ;;  %v1137_v0 = vld [vmem:[%s1428_s1 + $0x168] sm:$0xff]  }
  0x12   :  { %1006 = vmatprep.subr.bf16.mxu1 %v1102_v18  ;;  %v1130_v54 = vld [vmem:[%s1428_s1 + $0x1d8] sm:$0xff]   ;;  %v1134_v58 = vld [vmem:[%s1428_s1 + $0x1e0] sm:$0xff]   ;;  %v1138_v2 = vld [vmem:[%s1428_s1 + $0x1e8] sm:$0xff]  }
  0x13   :  { %v1131_v55 = vld [vmem:[%s1428_s1 + $0x118] sm:$0xff]   ;;  %v1135_v59 = vld [vmem:[%s1428_s1 + $0x120] sm:$0xff]   ;;  %v1139_v3 = vld [vmem:[%s1428_s1 + $0x128] sm:$0xff]  }
  0x14   :  { %979 = vmatpush3.bf16.msra.mxu0 %v1103_v19  ;;  %v1132_v56 = vld [vmem:[%s1428_s1 + $0x198] sm:$0xff]   ;;  %v1136_v60 = vld [vmem:[%s1428_s1 + $0x1a0] sm:$0xff]   ;;  %v1140_v4 = vld [vmem:[%s1428_s1 + $0x1a8] sm:$0xff]  }
  0x15   :  { %1007 = vmatpush3.bf16.msra.mxu1 %v1104_v20  ;;  %980 = vmatprep.subr.bf16.mxu0 %v1105_v21  ;;  %v23_v61 = vld [vmem:[%s1429_s0 + $0x40] sm:$0xff]  ;;  %v24_v5 = vld [vmem:[%s1429_s0 + $0x48] sm:$0xff]  ;;  %v1141_v9 = vld [vmem:[%s1428_s1 + $0x170] sm:$0xff]  }
  0x16   :  { %1008 = vmatprep.subr.bf16.mxu1 %v1106_v22  ;;  %v27_v62 = vld [vmem:[%s1429_s0 + $0x60] sm:$0xff]  ;;  %v28_v6 = vld [vmem:[%s1429_s0 + $0x68] sm:$0xff]  ;;  %v1142_v10 = vld [vmem:[%s1428_s1 + $0x1f0] sm:$0xff]  }
  0x17   :  { %v880_v63 = vcombine.high %v23_v61, %v27_v62  ;;  %v879_v1 = vcombine.low %v23_v61, %v27_v62  ;;  %v882_v7 = vcombine.high %v24_v5, %v28_v6  ;;  %v881_v8 = vcombine.low %v24_v5, %v28_v6  ;;  %v1143_v11 = vld [vmem:[%s1428_s1 + $0x130] sm:$0xff]   ;;  %v1145_v13 = vld [vmem:[%s1428_s1 + $0x178] sm:$0xff]   ;;  %v160_v33 = vld [vmem:[%s1430_s2 + $0x8] sm:$0xff] }
  0x18   :  { %981 = vmatpush3.bf16.msra.mxu0 %v1107_v23  ;;  %v1144_v12 = vld [vmem:[%s1428_s1 + $0x1b0] sm:$0xff]   ;;  %v1146_v14 = vld [vmem:[%s1428_s1 + $0x1f8] sm:$0xff]  }
  0x19   :  { %1009 = vmatpush3.bf16.msra.mxu1 %v1108_v24  ;;  %982 = vmatprep.subr.bf16.mxu0 %v1109_v25  ;;  %v1147_v15 = vld [vmem:[%s1428_s1 + $0x138] sm:$0xff]   ;;  %v17_v17 = vld [vmem:[%s1429_s0 + $0x10] sm:$0xff] }
  0x1a   :  { %1010 = vmatprep.subr.bf16.mxu1 %v1110_v26  ;;  %v1148_v16 = vld [vmem:[%s1428_s1 + $0x1b8] sm:$0xff]   ;;  %v21_v18 = vld [vmem:[%s1429_s0 + $0x30] sm:$0xff] }
  0x1b   :  { %v18_v19 = vld [vmem:[%s1429_s0 + $0x18] sm:$0xff]  ;;  %v875_v21 = vcombine.low %v17_v17, %v21_v18  ;;  %v876_v22 = vcombine.high %v17_v17, %v21_v18  ;;  %v25_v25 = vld [vmem:[%s1429_s0 + $0x50] sm:$0xff] }
  0x1c   :  { %983 = vmatpush3.bf16.msra.mxu0 %v1111_v27  ;;  %v22_v20 = vld [vmem:[%s1429_s0 + $0x38] sm:$0xff]  ;;  %v29_v26 = vld [vmem:[%s1429_s0 + $0x70] sm:$0xff] }
  0x1d   :  { %1011 = vmatpush3.bf16.msra.mxu1 %v1112_v28  ;;  %984 = vmatprep.subr.bf16.mxu0 %v1113_v29  ;;  %v877_v23 = vcombine.low %v18_v19, %v22_v20  ;;  %v878_v24 = vcombine.high %v18_v19, %v22_v20  ;;  %v26_v27 = vld [vmem:[%s1429_s0 + $0x58] sm:$0xff]  ;;  %v884_v28 = vcombine.high %v25_v25, %v29_v26 }
  0x1e   :  { %1012 = vmatprep.subr.bf16.mxu1 %v1114_v30  ;;  %v30_v29 = vld [vmem:[%s1429_s0 + $0x78] sm:$0xff]  ;;  %v883_v35 = vcombine.low %v25_v25, %v29_v26 }
  0x1f   :  { %v886_v30 = vcombine.high %v26_v27, %v30_v29  ;;  %v162_v34 = vld [vmem:[%s1430_s2 + $0x18] sm:$0xff] }
  0x20   :  { %985 = vmatpush3.bf16.msra.mxu0 %v1115_v31  ;;  %v159_v31 = vld [vmem:[%s1430_s2] sm:$0xff] }
  0x21   :  { %1013 = vmatpush3.bf16.msra.mxu1 %v1116_v32  ;;  %1026 = vmatprep.subr.bf16.mxu0 %v1117_v41  ;;  %v161_v32 = vld [vmem:[%s1430_s2 + $0x10] sm:$0xff] }
  0x22   :  { %1054 = vmatprep.subr.bf16.mxu1 %v1118_v42  ;;  %165 = vperm.xlu0 %1083, %v159_v31  }
  0x23   :  { %680 = vmatmul.mubr.bf16.vlgmr.msra.gmra.mrb[0].mxu0 %v871_v36  ;;  %175 = vperm.xlu1 %1084, %v161_v32   ;;  %v885_v36 = vcombine.low %v26_v27, %v30_v29 }
  0x24   :  { %729 = vmatmul.mubr.bf16.vlgmr.msra.gmra.mrb[0].mxu1 %v873_v39  ;;  %1027 = vmatpush3.bf16.msra.mxu0 %v1119_v43 }
  0x25   :  { %1055 = vmatpush3.bf16.msra.mxu1 %v1120_v44  ;;  %1028 = vmatprep.subr.bf16.mxu0 %v1121_v45 }
  0x26   :  { %1056 = vmatprep.subr.bf16.mxu1 %v1122_v46  ;;  %687 = vmatprep.mubr.bf16.mxu0 %v880_v63 }
  0x27   :  { %736 = vmatprep.mubr.bf16.mxu1 %v882_v7  ;;  %170 = vperm.xlu0 %1083, %v160_v33  }
  0x28   :  { %1029 = vmatpush3.bf16.msra.mxu0 %v1123_v47  ;;  %180 = vperm.xlu1 %1084, %v162_v34  }
  0x29   :  { %1057 = vmatpush3.bf16.msra.mxu1 %v1124_v48  ;;  %1030 = vmatprep.subr.bf16.mxu0 %v1125_v49 }
  0x2a   :  { %1058 = vmatprep.subr.bf16.mxu1 %v1126_v50 }
  0x2b   :  { %688 = vmatmul.mubr.bf16.gmra.mrb[4].mxu0 %v879_v1 }
  0x2c   :  { %1031 = vmatpush3.bf16.msra.mxu0 %v1127_v51  ;;  %737 = vmatmul.mubr.bf16.gmra.mrb[4].mxu1 %v881_v8 }
  0x2d   :  { %1059 = vmatpush3.bf16.msra.mxu1 %v1128_v52  ;;  %1032 = vmatprep.subr.bf16.mxu0 %v1129_v53 }
  0x2e   :  { %1060 = vmatprep.subr.bf16.mxu1 %v1130_v54  ;;  %777 = vmatprep.mubr.bf16.mxu0 %v876_v22 }
  0x2f   :  { %826 = vmatprep.mubr.bf16.mxu1 %v878_v24 }
  0x30   :  { %1033 = vmatpush3.bf16.msra.mxu0 %v1131_v55 }
  0x31   :  { %1061 = vmatpush3.bf16.msra.mxu1 %v1132_v56  ;;  %1034 = vmatprep.subr.bf16.mxu0 %v1133_v57 }
  0x32   :  { %1062 = vmatprep.subr.bf16.mxu1 %v1134_v58 }
  0x34   :  { %1035 = vmatpush3.bf16.msra.mxu0 %v1135_v59 }
  0x35   :  { %1063 = vmatpush3.bf16.msra.mxu1 %v1136_v60  ;;  %1036 = vmatprep.subr.bf16.mxu0 %v1137_v0 }
  0x36   :  { %1064 = vmatprep.subr.bf16.mxu1 %v1138_v2 }
  0x38   :  { %1037 = vmatpush3.bf16.msra.mxu0 %v1139_v3 }
  0x39   :  { %1065 = vmatpush3.bf16.msra.mxu1 %v1140_v4  ;;  %1038 = vmatprep.subr.bf16.mxu0 %v1141_v9 }
  0x3a   :  { %1066 = vmatprep.subr.bf16.mxu1 %v1142_v10 }
  0x3c   :  { %1039 = vmatpush3.bf16.msra.mxu0 %v1143_v11 }
  0x3d   :  { %1067 = vmatpush3.bf16.msra.mxu1 %v1144_v12  ;;  %1040 = vmatprep.subr.bf16.mxu0 %v1145_v13 }
  0x3e   :  { %1068 = vmatprep.subr.bf16.mxu1 %v1146_v14 }
  0x40   :  { %1041 = vmatpush3.bf16.msra.mxu0 %v1147_v15 }
  0x41   :  { %1069 = vmatpush3.bf16.msra.mxu1 %v1148_v16 }
  0x43   :  { %778 = vmatmul.mubr.bf16.vlgmr.msra.gmra.mrb[8].mxu0 %v875_v21 }
  0x44   :  { %827 = vmatmul.mubr.bf16.vlgmr.msra.gmra.mrb[8].mxu1 %v877_v23  ;;  %785 = vmatprep.mubr.bf16.mxu0 %v884_v28 }
  0x45   :  { %834 = vmatprep.mubr.bf16.mxu1 %v886_v30 }
  0x4b   :  { %786 = vmatmul.mubr.bf16.gmra.mrb[12].mxu0 %v883_v35 }
  0x4c   :  { %835 = vmatmul.mubr.bf16.gmra.mrb[12].mxu1 %v885_v36 }
  0xa1   :  { %v166_v37 = vpop.permute.xlu0 %165 }
  0xa2   :  { %v176_v55 = vpop.permute.xlu1 %175 }
  0xa6   :  { %v171_v39 = vpop.permute.xlu0 %170 }
  0xa7   :  { %v181_v62 = vpop.permute.xlu1 %180 }
  0xf6   :  { %v986_v38 = vpop.f32.mrb[0].mxu0 }
  0xf7   :  { %v1014_v40 = vpop.f32.mrb[0].mxu1  ;;  %v987_v41 = vpop.f32.mrb[1].mxu0 }
  0xf8   :  { %v988_v42 = vadd.f32 %v987_v41, %v986_v38  ;;  %v1015_v43 = vpop.f32.mrb[1].mxu1  ;;  %v989_v44 = vpop.f32.mrb[2].mxu0 }
  0xf9   :  { %v1016_v45 = vadd.f32 %v1015_v43, %v1014_v40  ;;  %v1017_v46 = vpop.f32.mrb[2].mxu1  ;;  %v990_v47 = vpop.f32.mrb[3].mxu0 }
  0xfa   :  { %v682_v48 = vadd.f32 %v988_v42, %v166_v37  ;;  %v991_v49 = vadd.f32 %v990_v47, %v989_v44  ;;  %v1018_v50 = vpop.f32.mrb[3].mxu1 }
  0xfb   :  { %v1019_v51 = vadd.f32 %v1018_v50, %v1017_v46 }
  0xfc   :  { %v731_v52 = vadd.f32 %v1016_v45, %v682_v48  ;;  %v685_v53 = vadd.f32 %v991_v49, %v171_v39 }
  0xfe   :  { %v734_v54 = vadd.f32 %v1019_v51, %v685_v53  ;;  %v992_v56 = vpop.f32.mrb[4].mxu0 }
  0xff   :  { %v993_v57 = vpop.f32.mrb[5].mxu0  ;;  %v1020_v0 = vpop.f32.mrb[4].mxu1 }
 0x100   :  { %v994_v58 = vadd.f32 %v993_v57, %v992_v56  ;;  %v995_v59 = vpop.f32.mrb[6].mxu0  ;;  %v1021_v1 = vpop.f32.mrb[5].mxu1 }
 0x101   :  { %v996_v60 = vpop.f32.mrb[7].mxu0  ;;  %v1022_v2 = vadd.f32 %v1021_v1, %v1020_v0  ;;  %v1023_v3 = vpop.f32.mrb[6].mxu1 }
 0x102   :  { %v997_v61 = vadd.f32 %v996_v60, %v995_v59  ;;  %v690_v63 = vadd.f32 %v994_v58, %v176_v55  ;;  %v1024_v5 = vpop.f32.mrb[7].mxu1 }
 0x103   :  { %v1025_v7 = vadd.f32 %v1024_v5, %v1023_v3 }
 0x104   :  { %v693_v4 = vadd.f32 %v997_v61, %v181_v62  ;;  %v739_v6 = vadd.f32 %v1022_v2, %v690_v63 }
 0x106   :  { %v742_v8 = vadd.f32 %v1025_v7, %v693_v4 }
 0x116   :  { %v1042_v9 = vpop.f32.mrb[8].mxu0 }
 0x117   :  { %v1070_v10 = vpop.f32.mrb[8].mxu1  ;;  %v1043_v11 = vpop.f32.mrb[9].mxu0 }
 0x118   :  { %v1071_v12 = vpop.f32.mrb[9].mxu1  ;;  %v1044_v13 = vadd.f32 %v1043_v11, %v1042_v9  ;;  %v1045_v15 = vpop.f32.mrb[10].mxu0 }
 0x119   :  { %v1072_v14 = vadd.f32 %v1071_v12, %v1070_v10  ;;  %v1073_v16 = vpop.f32.mrb[10].mxu1  ;;  %v1046_v17 = vpop.f32.mrb[11].mxu0 }
 0x11a   :  { %v1074_v18 = vpop.f32.mrb[11].mxu1  ;;  %v780_v19 = vadd.f32 %v1044_v13, %v731_v52  ;;  %v1047_v20 = vadd.f32 %v1046_v17, %v1045_v15 }
 0x11b   :  { %v1075_v21 = vadd.f32 %v1074_v18, %v1073_v16 }
 0x11c   :  { %v829_v22 = vadd.f32 %v1072_v14, %v780_v19  ;;  %v783_v23 = vadd.f32 %v1047_v20, %v734_v54 }
 0x11e   :  { %v832_v24 = vadd.f32 %v1075_v21, %v783_v23  ;;  %v1048_v25 = vpop.f32.mrb[12].mxu0  ;;  %v843_v29 = vmax.f32 %v829_v22, 0.0 }
 0x11f   :  { %v1076_v26 = vpop.f32.mrb[12].mxu1  ;;  %v1049_v27 = vpop.f32.mrb[13].mxu0 }
 0x120   :  { %v1077_v28 = vpop.f32.mrb[13].mxu1  ;;  %v844_v30 = vmax.f32 %v832_v24, 0.0  ;;  %v1050_v31 = vadd.f32 %v1049_v27, %v1048_v25  ;;  %v1051_v33 = vpop.f32.mrb[14].mxu0 }
 0x121   :  { %v1078_v32 = vadd.f32 %v1077_v28, %v1076_v26  ;;  %v1079_v34 = vpop.f32.mrb[14].mxu1  ;;  %v1052_v35 = vpop.f32.mrb[15].mxu0 }
 0x122   :  { %v1080_v36 = vpop.f32.mrb[15].mxu1  ;;  %v962_v37 = vpack.c.bf16 %v844_v30, %v843_v29  ;;  %v788_v38 = vadd.f32 %v1050_v31, %v739_v6  ;;  %v1053_v39 = vadd.f32 %v1052_v35, %v1051_v33 }
 0x123   :  { %v1081_v40 = vadd.f32 %v1080_v36, %v1079_v34 }
 0x124   :  { %963 = vst [vmem:[%s1431_s3] sm:$0xff] %v962_v37   ;;  %v837_v41 = vadd.f32 %v1078_v32, %v788_v38  ;;  %v791_v42 = vadd.f32 %v1053_v39, %v742_v8 }
 0x126   :  { %v840_v43 = vadd.f32 %v1081_v40, %v791_v42  ;;  %v845_v44 = vmax.f32 %v837_v41, 0.0 }
 0x128   :  { %v846_v45 = vmax.f32 %v840_v43, 0.0 }
 0x12a   :  { %v967_v46 = vpack.c.bf16 %v846_v45, %v845_v44 }
 0x12c   :  { %969 = vst [vmem:[%s1431_s3 + $0x8] sm:$0xff] %v967_v46  }

// kernel: dca_forward.30
= control target key start
LH: loop header
LB: loop body
LE: loop exit
PB: predicated region body
PF: predicated region fallthrough
CT: control target
= control target key end

     0   :  { %v268_v1 = vmov 0   ;;  %s337_s1 = inlined_call_operand.vmem [shape: bf16[128,128], index: 1, kind: input, shape index: {}]   ;;  %s338_s0 = inlined_call_operand.vmem [shape: bf16[32,128], index: 0, kind: input, shape index: {}]   ;;  %s339_s2 = inlined_call_operand.vmem [shape: f32[32,1], index: 2, kind: input, shape index: {}]   ;;  %s340_s3 = inlined_call_operand.vmem [shape: bf16[32,128], index: 3, kind: output, shape index: {}]  }
   0x1   :  { %v258_v0 = vld [vmem:[%s337_s1] sm:$0xff]   ;;  %257 = vset.pattern.permute.xlu1 %v268_v1  ;;  %256 = vset.pattern.permute.xlu0 %v268_v1  ;;  %v259_v2 = vld [vmem:[%s337_s1 + $0x8] sm:$0xff]   ;;  %v260_v3 = vld [vmem:[%s337_s1 + $0x10] sm:$0xff]  }
   0x2   :  { %235 = vmatprep.subr.bf16.mxu0 %v258_v0  ;;  %v261_v4 = vld [vmem:[%s337_s1 + $0x18] sm:$0xff]   ;;  %v266_v5 = vld [vmem:[%s338_s0] sm:$0xff]   ;;  %v37_v6 = vld [vmem:[%s339_s2 + $0x10] sm:$0xff] }
   0x3   :  { %236 = vmatpush3.bf16.msra.mxu0 %v258_v0  ;;  %251 = vmatprep.mubr.bf16.mxu0 %v266_v5  ;;  %v35_v7 = vld [vmem:[%s339_s2] sm:$0xff]  ;;  %v38_v9 = vld [vmem:[%s339_s2 + $0x18] sm:$0xff]  ;;  %v36_v10 = vld [vmem:[%s339_s2 + $0x8] sm:$0xff] }
   0x4   :  { %237 = vmatprep.subr.bf16.mxu0 %v259_v2  ;;  %51 = vperm.xlu1 %257, %v37_v6   ;;  %v262_v8 = vld [vmem:[%s337_s1 + $0x20] sm:$0xff]   ;;  %v263_v11 = vld [vmem:[%s337_s1 + $0x28] sm:$0xff]   ;;  %v264_v12 = vld [vmem:[%s337_s1 + $0x30] sm:$0xff]  }
   0x5   :  { %41 = vperm.xlu0 %256, %v35_v7   ;;  %v265_v13 = vld [vmem:[%s337_s1 + $0x38] sm:$0xff]   ;;  %v267_v14 = vld [vmem:[%s338_s0 + $0x8] sm:$0xff]  }
   0x7   :  { %238 = vmatpush3.bf16.msra.mxu0 %v259_v2 }
   0x8   :  { %239 = vmatprep.subr.bf16.mxu0 %v260_v3  ;;  %56 = vperm.xlu1 %257, %v38_v9  }
   0x9   :  { %46 = vperm.xlu0 %256, %v36_v10  }
   0xb   :  { %240 = vmatpush3.bf16.msra.mxu0 %v260_v3 }
   0xc   :  { %241 = vmatprep.subr.bf16.mxu0 %v261_v4 }
   0xf   :  { %242 = vmatpush3.bf16.msra.mxu0 %v261_v4 }
  0x10   :  { %243 = vmatprep.subr.bf16.mxu0 %v262_v8 }
  0x13   :  { %244 = vmatpush3.bf16.msra.mxu0 %v262_v8 }
  0x14   :  { %245 = vmatprep.subr.bf16.mxu0 %v263_v11 }
  0x17   :  { %246 = vmatpush3.bf16.msra.mxu0 %v263_v11 }
  0x18   :  { %247 = vmatprep.subr.bf16.mxu0 %v264_v12 }
  0x1b   :  { %248 = vmatpush3.bf16.msra.mxu0 %v264_v12 }
  0x1c   :  { %249 = vmatprep.subr.bf16.mxu0 %v265_v13 }
  0x1f   :  { %250 = vmatpush3.bf16.msra.mxu0 %v265_v13 }
  0x22   :  { %252 = vmatmul.mubr.bf16.vlgmr.msra.gmra.mrb[0].mxu0 %v267_v14 }
  0x83   :  { %v52_v15 = vpop.permute.xlu1 %51 }
  0x84   :  { %v42_v16 = vpop.permute.xlu0 %41 }
  0x87   :  { %v57_v20 = vpop.permute.xlu1 %56 }
  0x88   :  { %v47_v23 = vpop.permute.xlu0 %46 }
  0xf5   :  { %v253_v17 = vpop.f32.mrb[0].mxu0 }
  0xf6   :  { %v162_v18 = vadd.f32 %v253_v17, %v52_v15  ;;  %v153_v19 = vpop.f32.mrb[1].mxu0 }
  0xf7   :  { %v154_v21 = vadd.f32 %v153_v19, %v42_v16  ;;  %v254_v22 = vpop.f32.mrb[2].mxu0 }
  0xf8   :  { %v165_v24 = vadd.f32 %v254_v22, %v57_v20  ;;  %v156_v25 = vpop.f32.mrb[3].mxu0  ;;  %v170_v27 = vmax.f32 %v162_v18, 0.0 }
  0xf9   :  { %v157_v26 = vadd.f32 %v156_v25, %v47_v23  ;;  %v168_v29 = vmax.f32 %v154_v21, 0.0 }
  0xfa   :  { %v171_v28 = vmax.f32 %v165_v24, 0.0 }
  0xfb   :  { %v169_v30 = vmax.f32 %v157_v26, 0.0 }
  0xfc   :  { %v222_v31 = vpack.c.bf16 %v171_v28, %v170_v27 }
  0xfd   :  { %v217_v32 = vpack.c.bf16 %v169_v30, %v168_v29 }
  0xfe   :  { %224 = vst [vmem:[%s340_s3 + $0x8] sm:$0xff] %v222_v31  }
  0xff   :  { %218 = vst [vmem:[%s340_s3] sm:$0xff] %v217_v32  }

// kernel: dca_forward.34
= control target key start
LH: loop header
LB: loop body
LE: loop exit
PB: predicated region body
PF: predicated region fallthrough
CT: control target
= control target key end

     0   :  { %s676_s12 = smov 0   ;;  %s678_s13 = smov 0   ;;  %s785_s0 = inlined_call_operand.vmem [shape: bf16[16,128], index: 0, kind: input, shape index: {}]   ;;  %s786_s1 = inlined_call_operand.vmem [shape: bf16[128,512], index: 1, kind: input, shape index: {}]   ;;  %s787_s2 = inlined_call_operand.vmem [shape: f32[16,1], index: 2, kind: input, shape index: {}]   ;;  %s788_s3 = inlined_call_operand.vmem [shape: bf16[16,512], index: 3, kind: output, shape index: {}]  }
   0x1   :  { %s680_s14 = smov 0  }
   0x2 LB: > { %s542_s15 = sadd.s32 4294967295, %s653_s14   ;;  %s693_s16 = sadd.s32 1, %s653_s14   ;;  %s653_s14 = sphi %s680_s14, %s792_s14   ;;  %s649_s13 = sphi %s678_s13, %s791_s13   ;;  %s645_s12 = sphi %s676_s12, %s790_s12  }
   0x3   : > { %s38_s17 = ssub.s32 %s653_s14, %s693_s16  ;;  %s41_s18 = sadd.s32 1, %s649_s13 }
   0x4   : > { %p39_p0 = scmp.eq.s32.totalorder %s38_s17, 0  ;;  %p48_p1 = scmp.ne.s32.totalorder %s649_s13, %s645_s12 }
   0x5   : > { %p49_p2 = scmp.eq.s32.totalorder %s653_s14, 0  ;;  %p99_p3 = scmp.eq.s32.totalorder %s542_s15, 1 }
   0x6   : > { %s704_s19 = scalar_select %p39_p0, %s649_s13, %s41_s18  }
   0x7   : > { %p50_p4 = por %p49_p2, %p48_p1  ;;  %p706_p5 = por %p99_p3, %p48_p1 }
   0x8   : > { %p545_p6 = scmp.ge.s32.totalorder %s653_s14, 2 }
   0xa   : > { %127 = sbr.rel (%p545_p6) target bundleno = 29 (0x1d), region = 24 }
  0x11   : > { %130 = sbr.rel (!%p50_p4) target bundleno = 29 (0x1d), region = 28  ;;  %s132_s21 = sand.u32 (%p50_p4), 1, %s649_s13  }
  0x12   : > { %s576_s22 = sshll.u32 (%p50_p4), %s653_s14, 3  ;;  %s546_s23 = sshll.u32 (%p50_p4), %s132_s21, 7 }
  0x13   : > { %s716_s26 = scalar_lea.vmem (%p50_p4), %s786_s1, %s576_s22  ;;  %s134_s27 = scalar_lea.vmem (%p50_p4), [#allocation2], %s546_s23 }
  0x14   : > { %v195_v0 = vld [vmem:[%s716_s26] sm:$0xff] (%p50_p4)  ;;  %v197_v1 = vld [vmem:[%s716_s26 + $0x10] sm:$0xff] (%p50_p4) }
  0x15   : > { %v199_v2 = vld [vmem:[%s716_s26 + $0x20] sm:$0xff] (%p50_p4)  ;;  %196 = vst [vmem:[%s134_s27] sm:$0xff] (%p50_p4), %v195_v0  ;;  %198 = vst [vmem:[%s134_s27 + $0x8] sm:$0xff] (%p50_p4), %v197_v1  ;;  %v201_v3 = vld [vmem:[%s716_s26 + $0x30] sm:$0xff] (%p50_p4) }
  0x16   : > { %200 = vst [vmem:[%s134_s27 + $0x10] sm:$0xff] (%p50_p4), %v199_v2  ;;  %v203_v4 = vld [vmem:[%s716_s26 + $0x40] sm:$0xff] (%p50_p4)  ;;  %v205_v5 = vld [vmem:[%s716_s26 + $0x50] sm:$0xff] (%p50_p4)  ;;  %202 = vst [vmem:[%s134_s27 + $0x18] sm:$0xff] (%p50_p4), %v201_v3 }
  0x17   : > { %204 = vst [vmem:[%s134_s27 + $0x20] sm:$0xff] (%p50_p4), %v203_v4  ;;  %206 = vst [vmem:[%s134_s27 + $0x28] sm:$0xff] (%p50_p4), %v205_v5  ;;  %v207_v6 = vld [vmem:[%s716_s26 + $0x60] sm:$0xff] (%p50_p4)  ;;  %v209_v7 = vld [vmem:[%s716_s26 + $0x70] sm:$0xff] (%p50_p4) }
  0x18   : > { %v211_v8 = vld [vmem:[%s716_s26 + $0x80] sm:$0xff]  ;;  %208 = vst [vmem:[%s134_s27 + $0x30] sm:$0xff] %v207_v6  ;;  %210 = vst [vmem:[%s134_s27 + $0x38] sm:$0xff] %v209_v7  ;;  %v213_v9 = vld [vmem:[%s716_s26 + $0x90] sm:$0xff] }
  0x19   : > { %212 = vst [vmem:[%s134_s27 + $0x40] sm:$0xff] %v211_v8  ;;  %v215_v10 = vld [vmem:[%s716_s26 + $0xa0] sm:$0xff]  ;;  %v217_v11 = vld [vmem:[%s716_s26 + $0xb0] sm:$0xff]  ;;  %214 = vst [vmem:[%s134_s27 + $0x48] sm:$0xff] %v213_v9 }
  0x1a   : > { %216 = vst [vmem:[%s134_s27 + $0x50] sm:$0xff] %v215_v10  ;;  %218 = vst [vmem:[%s134_s27 + $0x58] sm:$0xff] %v217_v11  ;;  %v219_v12 = vld [vmem:[%s716_s26 + $0xc0] sm:$0xff]  ;;  %v221_v13 = vld [vmem:[%s716_s26 + $0xd0] sm:$0xff] }
  0x1b   : > { %v223_v14 = vld [vmem:[%s716_s26 + $0xe0] sm:$0xff]  ;;  %220 = vst [vmem:[%s134_s27 + $0x60] sm:$0xff] %v219_v12  ;;  %222 = vst [vmem:[%s134_s27 + $0x68] sm:$0xff] %v221_v13  ;;  %v225_v15 = vld [vmem:[%s716_s26 + $0xf0] sm:$0xff] }
  0x1c   : > { %224 = vst [vmem:[%s134_s27 + $0x70] sm:$0xff] %v223_v14  ;;  %226 = vst [vmem:[%s134_s27 + $0x78] sm:$0xff] %v225_v15 }
  0x1d PF: > { %p549_p7 = scmp.ge.s32.totalorder %s653_s14, 1  ;;  %p231_p8 = scmp.lt.s32.totalorder %s653_s14, 3 }
  0x1f   : > { %p232_p9 = pnand %p549_p7, %p231_p8 }
  0x20   : > { %s238_s28 = sand.u32 (!%p232_p9), 1, %s645_s12   ;;  %v655_v16 = vmov (!%p232_p9), 0   ;;  %v281_v17 = vld [vmem:[%s787_s2] sm:$0xff] (!%p232_p9)  ;;  %v282_v18 = vld [vmem:[%s787_s2 + $0x8] sm:$0xff] (!%p232_p9) }
  0x21   : > { %235 = sbr.rel (%p232_p9) target bundleno = 298 (0x12a), region = 66  ;;  %s550_s29 = sshll.u32 (!%p232_p9), %s238_s28, 7  ;;  %411 = vmatprep.mubr.bf16.mxu0 (!%p232_p9), %v655_v16  ;;  %605 = vset.pattern.permute.xlu0 (!%p232_p9), %v655_v16  ;;  %v630_v35 = vld [vmem:[%s785_s0] sm:$0xff] (!%p232_p9)  }
  0x22   : > { %285 = vperm.xlu0 (!%p232_p9), %605, %v281_v17   ;;  %s745_s7 = scalar_lea.vmem (!%p232_p9), [#allocation2], %s550_s29  ;;  %s551_s10 = sshll.u32 (!%p232_p9), %s238_s28, 4 }
  0x23   : > { %v606_v19 = vld [vmem:[%s745_s7 + $0x4] ss:$8 sps:$4 sm:$0xff] (!%p232_p9)   ;;  %v608_v20 = vld [vmem:[%s745_s7] ss:$8 sps:$4 sm:$0xff] (!%p232_p9)   ;;  %v609_v21 = vld [vmem:[%s745_s7 + $0x14] ss:$8 sps:$4 sm:$0xff] (!%p232_p9)  }
  0x24   : > { %379 = vmatprep.subr.bf16.mxu0 (!%p232_p9), %v606_v19  ;;  %v611_v22 = vld [vmem:[%s745_s7 + $0x10] ss:$8 sps:$4 sm:$0xff] (!%p232_p9)   ;;  %v612_v23 = vld [vmem:[%s745_s7 + $0x24] ss:$8 sps:$4 sm:$0xff] (!%p232_p9)   ;;  %v614_v24 = vld [vmem:[%s745_s7 + $0x20] ss:$8 sps:$4 sm:$0xff] (!%p232_p9)  }
  0x25   : > { %380 = vmatpush1.bf16.msra.mxu0 (!%p232_p9), %v608_v20  ;;  %v615_v25 = vld [vmem:[%s745_s7 + $0x34] ss:$8 sps:$4 sm:$0xff] (!%p232_p9)   ;;  %v617_v26 = vld [vmem:[%s745_s7 + $0x30] ss:$8 sps:$4 sm:$0xff] (!%p232_p9)   ;;  %v618_v27 = vld [vmem:[%s745_s7 + $0x44] ss:$8 sps:$4 sm:$0xff] (!%p232_p9)  }
  0x26   : > { %290 = vperm.xlu0 (!%p232_p9), %605, %v282_v18   ;;  %381 = vmatprep.subr.bf16.mxu0 (!%p232_p9), %v609_v21  ;;  %v620_v28 = vld [vmem:[%s745_s7 + $0x40] ss:$8 sps:$4 sm:$0xff] (!%p232_p9)   ;;  %v621_v29 = vld [vmem:[%s745_s7 + $0x54] ss:$8 sps:$4 sm:$0xff] (!%p232_p9)   ;;  %v623_v30 = vld [vmem:[%s745_s7 + $0x50] ss:$8 sps:$4 sm:$0xff] (!%p232_p9)  }
  0x27   : > { %v624_v31 = vld [vmem:[%s745_s7 + $0x64] ss:$8 sps:$4 sm:$0xff] (!%p232_p9)   ;;  %v626_v32 = vld [vmem:[%s745_s7 + $0x60] ss:$8 sps:$4 sm:$0xff] (!%p232_p9)   ;;  %v627_v33 = vld [vmem:[%s745_s7 + $0x74] ss:$8 sps:$4 sm:$0xff] (!%p232_p9)  }
  0x28   : > { %v629_v34 = vld [vmem:[%s745_s7 + $0x70] ss:$8 sps:$4 sm:$0xff]   ;;  %s259_s11 = scalar_lea.vmem [#allocation3], %s551_s10  ;;  %s579_s12 = sshll.u32 (%p706_p5), %s542_s15, 3 }
  0x29   : > { %382 = vmatpush1.bf16.msra.mxu0 %v611_v22  ;;  %s449_s21 = scalar_lea.vmem (%p706_p5), %s788_s3, %s579_s12 }
  0x2a   : > { %383 = vmatprep.subr.bf16.mxu0 %v612_v23 }
  0x2d   : > { %384 = vmatpush1.bf16.msra.mxu0 %v614_v24 }
  0x2e   : > { %385 = vmatprep.subr.bf16.mxu0 %v615_v25 }
  0x31   : > { %386 = vmatpush1.bf16.msra.mxu0 %v617_v26 }
  0x32   : > { %387 = vmatprep.subr.bf16.mxu0 %v618_v27 }
  0x35   : > { %388 = vmatpush1.bf16.msra.mxu0 %v620_v28 }
  0x36   : > { %389 = vmatprep.subr.bf16.mxu0 %v621_v29 }
  0x39   : > { %390 = vmatpush1.bf16.msra.mxu0 %v623_v30 }
  0x3a   : > { %391 = vmatprep.subr.bf16.mxu0 %v624_v31 }
  0x3d   : > { %392 = vmatpush1.bf16.msra.mxu0 %v626_v32 }
  0x3e   : > { %393 = vmatprep.subr.bf16.mxu0 %v627_v33 }
  0x41   : > { %394 = vmatpush1.bf16.msra.mxu0 %v629_v34 }
  0x44   : > { %412 = vmatmul.mubr.bf16.vlgmr.msra.gmra.mrb[0].mxu0 %v630_v35 }
  0xa1   : > { %v286_v36 = vpop.permute.xlu0 %285 }
  0xa5   : > { %v291_v40 = vpop.permute.xlu0 %290 }
 0x117   : > { %v413_v37 = vpop.f32.mrb[0].mxu0 }
 0x118   : > { %v414_v38 = vadd.f32 %v413_v37, %v286_v36  ;;  %v415_v39 = vpop.f32.mrb[1].mxu0 }
 0x119   : > { %v416_v41 = vadd.f32 %v415_v39, %v286_v36  ;;  %v417_v42 = vpop.f32.mrb[2].mxu0 }
 0x11a   : > { %v422_v43 = vmax.f32 %v414_v38, 0.0  ;;  %v418_v44 = vadd.f32 %v417_v42, %v291_v40  ;;  %v419_v45 = vpop.f32.mrb[3].mxu0 }
 0x11b   : > { %v423_v46 = vmax.f32 %v416_v41, 0.0  ;;  %v420_v47 = vadd.f32 %v419_v45, %v291_v40  ;;  %446 = sbr.rel (!%p706_p5) target bundleno = 298 (0x12a), region = 74 }
 0x11c   : > { %v424_v48 = vmax.f32 %v418_v44, 0.0 }
 0x11d   : > { %v577_v49 = vpack.c.bf16 %v423_v46, %v422_v43  ;;  %v425_v50 = vmax.f32 %v420_v47, 0.0 }
 0x11f   : > { %438 = vst [vmem:[%s259_s11] sm:$0xff] %v577_v49  ;;  %v578_v51 = vpack.c.bf16 %v425_v50, %v424_v48 }
 0x121   : > { %439 = vst [vmem:[%s259_s11 + $0x8] sm:$0xff] %v578_v51 }
 0x126   : > { %v479_v52 = vld [vmem:[%s259_s11] sm:$0xff] }
 0x127   : > { %480 = vst [vmem:[%s449_s21] sm:$0xff] %v479_v52 }
 0x128   : > { %v481_v53 = vld [vmem:[%s259_s11 + $0x8] sm:$0xff] }
 0x129   : > { %482 = vst [vmem:[%s449_s21 + $0x10] sm:$0xff] %v481_v53 }
 0x12a PF: > { %p10_p10 = scmp.ge.s32.totalorder %s693_s16, 4   ;;  %s790_s12 = smov %s649_s13 }
 0x12b   : > { %s791_s13 = smov %s704_s19  ;;  %s792_s14 = smov %s693_s16 }
 0x12c   :  { %12 = sbr.rel (!%p10_p10) target bundleno = 2 (0x2), region = 143 }

// kernel: dca_forward.38
= control target key start
LH: loop header
LB: loop body
LE: loop exit
PB: predicated region body
PF: predicated region fallthrough
CT: control target
= control target key end

     0   :  { %s858_s12 = smov 0   ;;  %s860_s13 = smov 0   ;;  %s1027_s0 = inlined_call_operand.vmem [shape: bf16[8,64], index: 0, kind: input, shape index: {}]   ;;  %s1028_s1 = inlined_call_operand.vmem [shape: bf16[64,2048], index: 1, kind: input, shape index: {}]   ;;  %s1029_s2 = inlined_call_operand.vmem [shape: f32[8,1], index: 2, kind: input, shape index: {}]   ;;  %s1030_s3 = inlined_call_operand.vmem [shape: bf16[8,2048], index: 3, kind: output, shape index: {}]  }
   0x1   :  { %s862_s14 = smov 0  }
   0x2 LB: > { %s729_s15 = sadd.s32 4294967295, %s835_s14   ;;  %s875_s16 = sadd.s32 1, %s835_s14   ;;  %s835_s14 = sphi %s862_s14, %s1033_s14   ;;  %s831_s13 = sphi %s860_s13, %s1032_s13   ;;  %s827_s12 = sphi %s858_s12, %s1031_s12  }
   0x3   : > { %s38_s17 = ssub.s32 %s835_s14, %s875_s16  ;;  %s41_s18 = sadd.s32 1, %s831_s13 }
   0x4   : > { %p39_p0 = scmp.eq.s32.totalorder %s38_s17, 0  ;;  %p48_p1 = scmp.ne.s32.totalorder %s831_s13, %s827_s12 }
   0x5   : > { %p49_p2 = scmp.eq.s32.totalorder %s835_s14, 0  ;;  %p732_p4 = scmp.ge.s32.totalorder %s835_s14, 2 }
   0x6   : > { %s884_s19 = scalar_select %p39_p0, %s831_s13, %s41_s18  }
   0x7   : > { %p50_p3 = por %p49_p2, %p48_p1  ;;  %127 = sbr.rel (%p732_p4) target bundleno = 34 (0x22), region = 24 }
   0xe   : > { %130 = sbr.rel (!%p50_p3) target bundleno = 34 (0x22), region = 28  ;;  %s132_s20 = sand.u32 (%p50_p3), 1, %s831_s13  }
   0xf   : > { %s782_s21 = sshll.u32 (%p50_p3), %s835_s14, 5  ;;  %s733_s22 = sshll.u32 (%p50_p3), %s132_s20, 8 }
  0x10   : > { %s892_s25 = scalar_lea.vmem (%p50_p3), %s1028_s1, %s782_s21  ;;  %s897_s26 = scalar_lea.vmem (%p50_p3), [#allocation2], %s733_s22 }
  0x11   : > { %v150_v0 = vld [vmem:[%s892_s25] sm:$0xff] (%p50_p3)  ;;  %v152_v1 = vld [vmem:[%s892_s25 + $0x8] sm:$0xff] (%p50_p3)  ;;  %v154_v2 = vld [vmem:[%s892_s25 + $0x10] sm:$0xff] (%p50_p3) }
  0x12   : > { %151 = vst [vmem:[%s897_s26] sm:$0xff] (%p50_p3), %v150_v0  ;;  %153 = vst [vmem:[%s897_s26 + $0x8] sm:$0xff] (%p50_p3), %v152_v1  ;;  %v156_v3 = vld [vmem:[%s892_s25 + $0x18] sm:$0xff] (%p50_p3)  ;;  %v158_v4 = vld [vmem:[%s892_s25 + $0x40] sm:$0xff] (%p50_p3) }
  0x13   : > { %155 = vst [vmem:[%s897_s26 + $0x10] sm:$0xff] (%p50_p3), %v154_v2  ;;  %v160_v5 = vld [vmem:[%s892_s25 + $0x48] sm:$0xff] (%p50_p3)  ;;  %157 = vst [vmem:[%s897_s26 + $0x18] sm:$0xff] (%p50_p3), %v156_v3  ;;  %v162_v6 = vld [vmem:[%s892_s25 + $0x50] sm:$0xff] (%p50_p3) }
  0x14   : > { %159 = vst [vmem:[%s897_s26 + $0x20] sm:$0xff] (%p50_p3), %v158_v4  ;;  %161 = vst [vmem:[%s897_s26 + $0x28] sm:$0xff] (%p50_p3), %v160_v5  ;;  %v164_v7 = vld [vmem:[%s892_s25 + $0x58] sm:$0xff] (%p50_p3)  ;;  %v166_v8 = vld [vmem:[%s892_s25 + $0x80] sm:$0xff] (%p50_p3) }
  0x15   : > { %163 = vst [vmem:[%s897_s26 + $0x30] sm:$0xff] %v162_v6  ;;  %165 = vst [vmem:[%s897_s26 + $0x38] sm:$0xff] %v164_v7  ;;  %v168_v9 = vld [vmem:[%s892_s25 + $0x88] sm:$0xff]  ;;  %v170_v10 = vld [vmem:[%s892_s25 + $0x90] sm:$0xff] }
  0x16   : > { %167 = vst [vmem:[%s897_s26 + $0x40] sm:$0xff] %v166_v8  ;;  %v172_v11 = vld [vmem:[%s892_s25 + $0x98] sm:$0xff]  ;;  %169 = vst [vmem:[%s897_s26 + $0x48] sm:$0xff] %v168_v9  ;;  %v174_v12 = vld [vmem:[%s892_s25 + $0xc0] sm:$0xff] }
  0x17   : > { %171 = vst [vmem:[%s897_s26 + $0x50] sm:$0xff] %v170_v10  ;;  %173 = vst [vmem:[%s897_s26 + $0x58] sm:$0xff] %v172_v11  ;;  %v176_v13 = vld [vmem:[%s892_s25 + $0xc8] sm:$0xff]  ;;  %v178_v14 = vld [vmem:[%s892_s25 + $0xd0] sm:$0xff] }
  0x18   : > { %175 = vst [vmem:[%s897_s26 + $0x60] sm:$0xff] %v174_v12  ;;  %177 = vst [vmem:[%s897_s26 + $0x68] sm:$0xff] %v176_v13  ;;  %v180_v15 = vld [vmem:[%s892_s25 + $0xd8] sm:$0xff]  ;;  %v182_v16 = vld [vmem:[%s892_s25 + $0x100] sm:$0xff] }
  0x19   : > { %179 = vst [vmem:[%s897_s26 + $0x70] sm:$0xff] %v178_v14  ;;  %v184_v17 = vld [vmem:[%s892_s25 + $0x108] sm:$0xff]  ;;  %181 = vst [vmem:[%s897_s26 + $0x78] sm:$0xff] %v180_v15  ;;  %v186_v18 = vld [vmem:[%s892_s25 + $0x110] sm:$0xff] }
  0x1a   : > { %183 = vst [vmem:[%s897_s26 + $0x80] sm:$0xff] %v182_v16  ;;  %185 = vst [vmem:[%s897_s26 + $0x88] sm:$0xff] %v184_v17  ;;  %v188_v19 = vld [vmem:[%s892_s25 + $0x118] sm:$0xff]  ;;  %v190_v20 = vld [vmem:[%s892_s25 + $0x140] sm:$0xff] }
  0x1b   : > { %187 = vst [vmem:[%s897_s26 + $0x90] sm:$0xff] %v186_v18  ;;  %189 = vst [vmem:[%s897_s26 + $0x98] sm:$0xff] %v188_v19  ;;  %v192_v21 = vld [vmem:[%s892_s25 + $0x148] sm:$0xff]  ;;  %v194_v22 = vld [vmem:[%s892_s25 + $0x150] sm:$0xff] }
  0x1c   : > { %191 = vst [vmem:[%s897_s26 + $0xa0] sm:$0xff] %v190_v20  ;;  %v196_v23 = vld [vmem:[%s892_s25 + $0x158] sm:$0xff]  ;;  %193 = vst [vmem:[%s897_s26 + $0xa8] sm:$0xff] %v192_v21  ;;  %v198_v24 = vld [vmem:[%s892_s25 + $0x180] sm:$0xff] }
  0x1d   : > { %195 = vst [vmem:[%s897_s26 + $0xb0] sm:$0xff] %v194_v22  ;;  %197 = vst [vmem:[%s897_s26 + $0xb8] sm:$0xff] %v196_v23  ;;  %v200_v25 = vld [vmem:[%s892_s25 + $0x188] sm:$0xff]  ;;  %v202_v26 = vld [vmem:[%s892_s25 + $0x190] sm:$0xff] }
  0x1e   : > { %199 = vst [vmem:[%s897_s26 + $0xc0] sm:$0xff] %v198_v24  ;;  %201 = vst [vmem:[%s897_s26 + $0xc8] sm:$0xff] %v200_v25  ;;  %v204_v27 = vld [vmem:[%s892_s25 + $0x198] sm:$0xff]  ;;  %v206_v28 = vld [vmem:[%s892_s25 + $0x1c0] sm:$0xff] }
  0x1f   : > { %203 = vst [vmem:[%s897_s26 + $0xd0] sm:$0xff] %v202_v26  ;;  %v208_v29 = vld [vmem:[%s892_s25 + $0x1c8] sm:$0xff]  ;;  %205 = vst [vmem:[%s897_s26 + $0xd8] sm:$0xff] %v204_v27  ;;  %v210_v30 = vld [vmem:[%s892_s25 + $0x1d0] sm:$0xff] }
  0x20   : > { %207 = vst [vmem:[%s897_s26 + $0xe0] sm:$0xff] %v206_v28  ;;  %209 = vst [vmem:[%s897_s26 + $0xe8] sm:$0xff] %v208_v29  ;;  %v212_v31 = vld [vmem:[%s892_s25 + $0x1d8] sm:$0xff] }
  0x21   : > { %211 = vst [vmem:[%s897_s26 + $0xf0] sm:$0xff] %v210_v30  ;;  %213 = vst [vmem:[%s897_s26 + $0xf8] sm:$0xff] %v212_v31 }
  0x22 PF: > { %p736_p5 = scmp.ge.s32.totalorder %s835_s14, 1  ;;  %p218_p6 = scmp.lt.s32.totalorder %s835_s14, 3 }
  0x24   : > { %p219_p7 = pnand %p736_p5, %p218_p6 }
  0x25   : > { %s225_s27 = sand.u32 (!%p219_p7), 1, %s827_s12   ;;  %v289_v32 = vld [vmem:[%s1029_s2] sm:$0xff] (!%p219_p7)  ;;  %v837_v33 = vmov (!%p219_p7), 0   ;;  %vm455_vm0 = vcmask (!%p219_p7), 523264   ;;  %s738_s7 = sshll.u32 (!%p219_p7), %s729_s15, 3 }
  0x26   : > { %222 = sbr.rel (%p219_p7) target bundleno = 296 (0x128), region = 51  ;;  %s737_s30 = sshll.u32 (!%p219_p7), %s225_s27, 8  ;;  %491 = vmatprep.mubr.bf16.mxu0 (!%p219_p7), %v837_v33  ;;  %532 = vmatprep.mubr.bf16.mxu1 (!%p219_p7), %v837_v33  ;;  %v256_v12 = vld [vmem:[%s1027_s0] sm:$0xf] (!%p219_p7) }
  0x27   : > { %812 = vset.pattern.permute.xlu0 (!%p219_p7), %v837_v33  ;;  %s969_s4 = scalar_lea.vmem (!%p219_p7), [#allocation2], %s737_s30  ;;  %p250_p8 = scmp.lt.s32.totalorder (!%p219_p7), %s738_s7, 15 }
  0x28   : > { %v257_v34 = vld [vmem:[%s969_s4] sm:$0xff] (!%p219_p7)  ;;  %v258_v36 = vld [vmem:[%s969_s4 + $0x8] sm:$0xff] (!%p219_p7)  ;;  %292 = vperm.xlu0 (!%p219_p7), %812, %v289_v32   ;;  %v259_v0 = vld [vmem:[%s969_s4 + $0x10] sm:$0xff] (!%p219_p7) }
  0x29   : > { %v261_v35 = vld [vmem:[%s969_s4 + $0x20] sm:$0xff] (!%p219_p7)  ;;  %v262_v38 = vld [vmem:[%s969_s4 + $0x28] sm:$0xff] (!%p219_p7)  ;;  %v263_v1 = vld [vmem:[%s969_s4 + $0x30] sm:$0xff] (!%p219_p7) }
  0x2a   : > { %v741_v37 = vcombine.high (!%p219_p7), %v257_v34, %v261_v35  ;;  %v740_v39 = vcombine.low (!%p219_p7), %v257_v34, %v261_v35  ;;  %v265_v40 = vld [vmem:[%s969_s4 + $0x40] sm:$0xff] (!%p219_p7)  ;;  %v743_v42 = vcombine.high (!%p219_p7), %v258_v36, %v262_v38  ;;  %v742_v43 = vcombine.low (!%p219_p7), %v258_v36, %v262_v38  ;;  %v266_v45 = vld [vmem:[%s969_s4 + $0x48] sm:$0xff] (!%p219_p7)  ;;  %v260_v2 = vld [vmem:[%s969_s4 + $0x18] sm:$0xff] (!%p219_p7) }
  0x2b   : > { %v269_v41 = vld [vmem:[%s969_s4 + $0x60] sm:$0xff] (!%p219_p7)  ;;  %v270_v46 = vld [vmem:[%s969_s4 + $0x68] sm:$0xff] (!%p219_p7)  ;;  %v264_v3 = vld [vmem:[%s969_s4 + $0x38] sm:$0xff] (!%p219_p7)  ;;  %v745_v6 = vcombine.high (!%p219_p7), %v259_v0, %v263_v1  ;;  %v744_v13 = vcombine.low (!%p219_p7), %v259_v0, %v263_v1 }
  0x2c   : > { %v749_v44 = vcombine.high (!%p219_p7), %v265_v40, %v269_v41  ;;  %v273_v47 = vld [vmem:[%s969_s4 + $0x80] sm:$0xff] (!%p219_p7)  ;;  %459 = vmatprep.subr.bf16.mxu0 (!%p219_p7), %v741_v37  ;;  %v751_v48 = vcombine.high (!%p219_p7), %v266_v45, %v270_v46  ;;  %v274_v50 = vld [vmem:[%s969_s4 + $0x88] sm:$0xff] (!%p219_p7)  ;;  %500 = vmatprep.subr.bf16.mxu1 (!%p219_p7), %v743_v42  ;;  %v748_v52 = vcombine.low (!%p219_p7), %v265_v40, %v269_v41  ;;  %v267_v8 = vld [vmem:[%s969_s4 + $0x50] sm:$0xff] (!%p219_p7) }
  0x2d   : > { %v277_v49 = vld [vmem:[%s969_s4 + $0xa0] sm:$0xff]  ;;  %v278_v51 = vld [vmem:[%s969_s4 + $0xa8] sm:$0xff]  ;;  %460 = vmatpush1.bf16.msra.mxu0 %v740_v39  ;;  %501 = vmatpush1.bf16.msra.mxu1 %v742_v43  ;;  %v750_v53 = vcombine.low %v266_v45, %v270_v46  ;;  %v747_v7 = vcombine.high %v260_v2, %v264_v3  ;;  %v271_v9 = vld [vmem:[%s969_s4 + $0x70] sm:$0xff]  ;;  %v746_v14 = vcombine.low %v260_v2, %v264_v3  ;;  %s1035_s7 = smov (!%p250_p8, %s738_s7), 15 }
  0x2e   : > { %461 = vmatprep.subr.bf16.mxu0 %v749_v44  ;;  %v757_v54 = vcombine.high %v273_v47, %v277_v49  ;;  %502 = vmatprep.subr.bf16.mxu1 %v751_v48  ;;  %v759_v55 = vcombine.high %v274_v50, %v278_v51  ;;  %v281_v56 = vld [vmem:[%s969_s4 + $0xc0] sm:$0xff]  ;;  %v282_v58 = vld [vmem:[%s969_s4 + $0xc8] sm:$0xff]  ;;  %v756_v60 = vcombine.low %v273_v47, %v277_v49  ;;  %v268_v10 = vld [vmem:[%s969_s4 + $0x58] sm:$0xff]  ;;  %s739_s8 = sshll.u32 %s1035_s7, 2 }
  0x2f   : > { %v285_v57 = vld [vmem:[%s969_s4 + $0xe0] sm:$0xff]  ;;  %v286_v59 = vld [vmem:[%s969_s4 + $0xe8] sm:$0xff]  ;;  %v758_v61 = vcombine.low %v274_v50, %v278_v51  ;;  %v272_v11 = vld [vmem:[%s969_s4 + $0x78] sm:$0xff]  ;;  %v753_v15 = vcombine.high %v267_v8, %v271_v9  ;;  %v752_v21 = vcombine.low %v267_v8, %v271_v9  ;;  %s253_s11 = scalar_lea.vmem %s1030_s3, %s739_s8 }
  0x30   : > { %v765_v62 = vcombine.high %v281_v56, %v285_v57  ;;  %v767_v63 = vcombine.high %v282_v58, %v286_v59  ;;  %v764_v4 = vcombine.low %v281_v56, %v285_v57  ;;  %v766_v5 = vcombine.low %v282_v58, %v286_v59  ;;  %v275_v17 = vld [vmem:[%s969_s4 + $0x90] sm:$0xff]  ;;  %v276_v19 = vld [vmem:[%s969_s4 + $0x98] sm:$0xff] }
  0x31   : > { %462 = vmatpush1.bf16.msra.mxu0 %v748_v52  ;;  %503 = vmatpush1.bf16.msra.mxu1 %v750_v53  ;;  %v755_v16 = vcombine.high %v268_v10, %v272_v11  ;;  %v279_v18 = vld [vmem:[%s969_s4 + $0xb0] sm:$0xff]  ;;  %v280_v20 = vld [vmem:[%s969_s4 + $0xb8] sm:$0xff]  ;;  %v754_v22 = vcombine.low %v268_v10, %v272_v11 }
  0x32   : > { %463 = vmatprep.subr.bf16.mxu0 %v757_v54  ;;  %504 = vmatprep.subr.bf16.mxu1 %v759_v55  ;;  %v761_v23 = vcombine.high %v275_v17, %v279_v18  ;;  %v763_v24 = vcombine.high %v276_v19, %v280_v20  ;;  %v283_v25 = vld [vmem:[%s969_s4 + $0xd0] sm:$0xff]  ;;  %v284_v27 = vld [vmem:[%s969_s4 + $0xd8] sm:$0xff]  ;;  %v760_v29 = vcombine.low %v275_v17, %v279_v18 }
  0x33   : > { %v287_v26 = vld [vmem:[%s969_s4 + $0xf0] sm:$0xff]  ;;  %v288_v28 = vld [vmem:[%s969_s4 + $0xf8] sm:$0xff]  ;;  %v762_v30 = vcombine.low %v276_v19, %v280_v20 }
  0x34   : > { %v769_v31 = vcombine.high %v283_v25, %v287_v26  ;;  %v771_v32 = vcombine.high %v284_v27, %v288_v28  ;;  %v768_v34 = vcombine.low %v283_v25, %v287_v26  ;;  %v770_v35 = vcombine.low %v284_v27, %v288_v28 }
  0x35   : > { %464 = vmatpush1.bf16.msra.mxu0 %v756_v60  ;;  %505 = vmatpush1.bf16.msra.mxu1 %v758_v61 }
  0x36   : > { %465 = vmatprep.subr.bf16.mxu0 %v765_v62  ;;  %506 = vmatprep.subr.bf16.mxu1 %v767_v63 }
  0x39   : > { %466 = vmatpush1.bf16.msra.mxu0 %v764_v4  ;;  %507 = vmatpush1.bf16.msra.mxu1 %v766_v5 }
  0x3a   : > { %541 = vmatprep.subr.bf16.mxu0 %v745_v6  ;;  %582 = vmatprep.subr.bf16.mxu1 %v747_v7 }
  0x3c   : > { %772 = vmatmul.mubr.msk.bf16.vlgmr.msra.gmra.mrb[0].mxu0 %vm455_vm0, %v256_v12  ;;  %773 = vmatmul.mubr.msk.bf16.vlgmr.msra.gmra.mrb[0].mxu1 %vm455_vm0, %v256_v12 }
  0x3d   : > { %542 = vmatpush1.bf16.msra.mxu0 %v744_v13  ;;  %583 = vmatpush1.bf16.msra.mxu1 %v746_v14 }
  0x3e   : > { %543 = vmatprep.subr.bf16.mxu0 %v753_v15  ;;  %584 = vmatprep.subr.bf16.mxu1 %v755_v16 }
  0x3f   : > { %573 = vmatprep.mubr.bf16.mxu0 %v837_v33  ;;  %614 = vmatprep.mubr.bf16.mxu1 %v837_v33 }
  0x41   : > { %544 = vmatpush1.bf16.msra.mxu0 %v752_v21  ;;  %585 = vmatpush1.bf16.msra.mxu1 %v754_v22 }
  0x42   : > { %545 = vmatprep.subr.bf16.mxu0 %v761_v23  ;;  %586 = vmatprep.subr.bf16.mxu1 %v763_v24 }
  0x45   : > { %546 = vmatpush1.bf16.msra.mxu0 %v760_v29  ;;  %587 = vmatpush1.bf16.msra.mxu1 %v762_v30 }
  0x46   : > { %547 = vmatprep.subr.bf16.mxu0 %v769_v31  ;;  %588 = vmatprep.subr.bf16.mxu1 %v771_v32 }
  0x49   : > { %548 = vmatpush1.bf16.msra.mxu0 %v768_v34  ;;  %589 = vmatpush1.bf16.msra.mxu1 %v770_v35 }
  0x4c   : > { %774 = vmatmul.mubr.msk.bf16.vlgmr.msra.gmra.mrb[4].mxu0 %vm455_vm0, %v256_v12  ;;  %775 = vmatmul.mubr.msk.bf16.vlgmr.msra.gmra.mrb[4].mxu1 %vm455_vm0, %v256_v12 }
  0xa7   : > { %v293_v33 = vpop.permute.xlu0 %292 }
 0x10f   : > { %v493_v36 = vpop.f32.mrb[0].mxu0  ;;  %v534_v37 = vpop.f32.mrb[0].mxu1 }
 0x110   : > { %v494_v38 = vadd.f32 %v493_v36, %v293_v33  ;;  %v495_v39 = vpop.f32.mrb[1].mxu0  ;;  %v535_v41 = vadd.f32 %v534_v37, %v293_v33  ;;  %v536_v42 = vpop.f32.mrb[1].mxu1 }
 0x111   : > { %v496_v40 = vadd.f32 %v495_v39, %v293_v33  ;;  %v497_v43 = vpop.f32.mrb[2].mxu0  ;;  %v537_v45 = vadd.f32 %v536_v42, %v293_v33  ;;  %v538_v46 = vpop.f32.mrb[2].mxu1 }
 0x112   : > { %v623_v44 = vmax.f32 %v494_v38, 0.0  ;;  %v498_v47 = vpop.f32.mrb[3].mxu0  ;;  %v625_v49 = vmax.f32 %v535_v41, 0.0  ;;  %v539_v50 = vpop.f32.mrb[3].mxu1 }
 0x113   : > { %v624_v48 = vmax.f32 %v496_v40, 0.0  ;;  %v626_v51 = vmax.f32 %v537_v45, 0.0 }
 0x115   : > { %v783_v52 = vpack.c.bf16 %v624_v48, %v623_v44  ;;  %v784_v53 = vpack.c.bf16 %v626_v51, %v625_v49 }
 0x117   : > { %663 = vst [vmem:[%s253_s11] sm:$0xff] %v783_v52  ;;  %664 = vst [vmem:[%s253_s11 + $0x8] sm:$0xff] %v784_v53 }
 0x11f   : > { %v575_v54 = vpop.f32.mrb[4].mxu0  ;;  %v616_v56 = vpop.f32.mrb[4].mxu1 }
 0x120   : > { %v576_v55 = vadd.f32 %v575_v54, %v293_v33  ;;  %v577_v57 = vpop.f32.mrb[5].mxu0  ;;  %v617_v58 = vadd.f32 %v616_v56, %v293_v33  ;;  %v618_v60 = vpop.f32.mrb[5].mxu1 }
 0x121   : > { %v578_v59 = vadd.f32 %v577_v57, %v293_v33  ;;  %v579_v61 = vpop.f32.mrb[6].mxu0  ;;  %v619_v63 = vadd.f32 %v618_v60, %v293_v33  ;;  %v620_v0 = vpop.f32.mrb[6].mxu1 }
 0x122   : > { %v627_v62 = vmax.f32 %v576_v55, 0.0  ;;  %v580_v1 = vpop.f32.mrb[7].mxu0  ;;  %v629_v2 = vmax.f32 %v617_v58, 0.0  ;;  %v621_v4 = vpop.f32.mrb[7].mxu1 }
 0x123   : > { %v628_v3 = vmax.f32 %v578_v59, 0.0  ;;  %v630_v5 = vmax.f32 %v619_v63, 0.0 }
 0x125   : > { %v785_v6 = vpack.c.bf16 %v628_v3, %v627_v62  ;;  %v786_v7 = vpack.c.bf16 %v630_v5, %v629_v2 }
 0x127   : > { %665 = vst [vmem:[%s253_s11 + $0x10] sm:$0xff] %v785_v6  ;;  %666 = vst [vmem:[%s253_s11 + $0x18] sm:$0xff] %v786_v7 }
 0x128 PF: > { %p10_p9 = scmp.ge.s32.totalorder %s875_s16, 4   ;;  %s1031_s12 = smov %s831_s13 }
 0x129   : > { %s1032_s13 = smov %s884_s19  ;;  %s1033_s14 = smov %s875_s16 }
 0x12a   :  { %12 = sbr.rel (!%p10_p9) target bundleno = 2 (0x2), region = 90 }

// kernel: dca_forward.42
= control target key start
LH: loop header
LB: loop body
LE: loop exit
PB: predicated region body
PF: predicated region fallthrough
CT: control target
= control target key end

     0   :  { %s1116_s12 = smov 0   ;;  %s1118_s13 = smov 0   ;;  %s1338_s0 = inlined_call_operand.vmem [shape: bf16[2,32], index: 0, kind: input, shape index: {}]   ;;  %s1339_s1 = inlined_call_operand.vmem [shape: bf16[32,8192], index: 1, kind: input, shape index: {}]   ;;  %s1340_s2 = inlined_call_operand.vmem [shape: f32[2,1], index: 2, kind: input, shape index: {}]   ;;  %s1341_s3 = inlined_call_operand.vmem [shape: f32[2,8192], index: 3, kind: output, shape index: {}]  }
   0x1   :  { %s1120_s14 = smov 0  }
   0x2 LB: > { %s957_s15 = sadd.s32 4294967295, %s1092_s14   ;;  %s1133_s16 = sadd.s32 1, %s1092_s14   ;;  %s1092_s14 = sphi %s1120_s14, %s1344_s14   ;;  %s1088_s13 = sphi %s1118_s13, %s1343_s13   ;;  %s1084_s12 = sphi %s1116_s12, %s1342_s12  }
   0x3   : > { %s38_s17 = ssub.s32 %s1092_s14, %s1133_s16  ;;  %s41_s18 = sadd.s32 1, %s1088_s13 }
   0x4   : > { %p39_p0 = scmp.eq.s32.totalorder %s38_s17, 0  ;;  %p48_p1 = scmp.ne.s32.totalorder %s1088_s13, %s1084_s12 }
   0x5   : > { %p49_p2 = scmp.eq.s32.totalorder %s1092_s14, 0  ;;  %p960_p4 = scmp.ge.s32.totalorder %s1092_s14, 4 }
   0x6   : > { %s1142_s19 = scalar_select %p39_p0, %s1088_s13, %s41_s18  }
   0x7   : > { %p50_p3 = por %p49_p2, %p48_p1  ;;  %127 = sbr.rel (%p960_p4) target bundleno = 34 (0x22), region = 24 }
   0xe   : > { %130 = sbr.rel (!%p50_p3) target bundleno = 34 (0x22), region = 28  ;;  %s132_s20 = sand.u32 (%p50_p3), 1, %s1088_s13  }
   0xf   : > { %s1010_s21 = sshll.u32 (%p50_p3), %s1092_s14, 6  ;;  %s961_s22 = sshll.u32 (%p50_p3), %s132_s20, 8 }
  0x10   : > { %s1150_s25 = scalar_lea.vmem (%p50_p3), %s1339_s1, %s1010_s21  ;;  %s1155_s26 = scalar_lea.vmem (%p50_p3), [#allocation2], %s961_s22 }
  0x11   : > { %v150_v0 = vld [vmem:[%s1150_s25] sm:$0xff] (%p50_p3)  ;;  %v152_v1 = vld [vmem:[%s1150_s25 + $0x8] sm:$0xff] (%p50_p3)  ;;  %v154_v2 = vld [vmem:[%s1150_s25 + $0x10] sm:$0xff] (%p50_p3) }
  0x12   : > { %151 = vst [vmem:[%s1155_s26] sm:$0xff] (%p50_p3), %v150_v0  ;;  %153 = vst [vmem:[%s1155_s26 + $0x8] sm:$0xff] (%p50_p3), %v152_v1  ;;  %v156_v3 = vld [vmem:[%s1150_s25 + $0x18] sm:$0xff] (%p50_p3)  ;;  %v158_v4 = vld [vmem:[%s1150_s25 + $0x20] sm:$0xff] (%p50_p3) }
  0x13   : > { %155 = vst [vmem:[%s1155_s26 + $0x10] sm:$0xff] (%p50_p3), %v154_v2  ;;  %v160_v5 = vld [vmem:[%s1150_s25 + $0x28] sm:$0xff] (%p50_p3)  ;;  %157 = vst [vmem:[%s1155_s26 + $0x18] sm:$0xff] (%p50_p3), %v156_v3  ;;  %v162_v6 = vld [vmem:[%s1150_s25 + $0x30] sm:$0xff] (%p50_p3) }
  0x14   : > { %159 = vst [vmem:[%s1155_s26 + $0x20] sm:$0xff] (%p50_p3), %v158_v4  ;;  %161 = vst [vmem:[%s1155_s26 + $0x28] sm:$0xff] (%p50_p3), %v160_v5  ;;  %v164_v7 = vld [vmem:[%s1150_s25 + $0x38] sm:$0xff] (%p50_p3)  ;;  %v166_v8 = vld [vmem:[%s1150_s25 + $0x100] sm:$0xff] (%p50_p3) }
  0x15   : > { %163 = vst [vmem:[%s1155_s26 + $0x30] sm:$0xff] %v162_v6  ;;  %165 = vst [vmem:[%s1155_s26 + $0x38] sm:$0xff] %v164_v7  ;;  %v168_v9 = vld [vmem:[%s1150_s25 + $0x108] sm:$0xff]  ;;  %v170_v10 = vld [vmem:[%s1150_s25 + $0x110] sm:$0xff] }
  0x16   : > { %167 = vst [vmem:[%s1155_s26 + $0x40] sm:$0xff] %v166_v8  ;;  %v172_v11 = vld [vmem:[%s1150_s25 + $0x118] sm:$0xff]  ;;  %169 = vst [vmem:[%s1155_s26 + $0x48] sm:$0xff] %v168_v9  ;;  %v174_v12 = vld [vmem:[%s1150_s25 + $0x120] sm:$0xff] }
  0x17   : > { %171 = vst [vmem:[%s1155_s26 + $0x50] sm:$0xff] %v170_v10  ;;  %173 = vst [vmem:[%s1155_s26 + $0x58] sm:$0xff] %v172_v11  ;;  %v176_v13 = vld [vmem:[%s1150_s25 + $0x128] sm:$0xff]  ;;  %v178_v14 = vld [vmem:[%s1150_s25 + $0x130] sm:$0xff] }
  0x18   : > { %175 = vst [vmem:[%s1155_s26 + $0x60] sm:$0xff] %v174_v12  ;;  %177 = vst [vmem:[%s1155_s26 + $0x68] sm:$0xff] %v176_v13  ;;  %v180_v15 = vld [vmem:[%s1150_s25 + $0x138] sm:$0xff]  ;;  %v182_v16 = vld [vmem:[%s1150_s25 + $0x200] sm:$0xff] }
  0x19   : > { %179 = vst [vmem:[%s1155_s26 + $0x70] sm:$0xff] %v178_v14  ;;  %v184_v17 = vld [vmem:[%s1150_s25 + $0x208] sm:$0xff]  ;;  %181 = vst [vmem:[%s1155_s26 + $0x78] sm:$0xff] %v180_v15  ;;  %v186_v18 = vld [vmem:[%s1150_s25 + $0x210] sm:$0xff] }
  0x1a   : > { %183 = vst [vmem:[%s1155_s26 + $0x80] sm:$0xff] %v182_v16  ;;  %185 = vst [vmem:[%s1155_s26 + $0x88] sm:$0xff] %v184_v17  ;;  %v188_v19 = vld [vmem:[%s1150_s25 + $0x218] sm:$0xff]  ;;  %v190_v20 = vld [vmem:[%s1150_s25 + $0x220] sm:$0xff] }
  0x1b   : > { %187 = vst [vmem:[%s1155_s26 + $0x90] sm:$0xff] %v186_v18  ;;  %189 = vst [vmem:[%s1155_s26 + $0x98] sm:$0xff] %v188_v19  ;;  %v192_v21 = vld [vmem:[%s1150_s25 + $0x228] sm:$0xff]  ;;  %v194_v22 = vld [vmem:[%s1150_s25 + $0x230] sm:$0xff] }
  0x1c   : > { %191 = vst [vmem:[%s1155_s26 + $0xa0] sm:$0xff] %v190_v20  ;;  %v196_v23 = vld [vmem:[%s1150_s25 + $0x238] sm:$0xff]  ;;  %193 = vst [vmem:[%s1155_s26 + $0xa8] sm:$0xff] %v192_v21  ;;  %v198_v24 = vld [vmem:[%s1150_s25 + $0x300] sm:$0xff] }
  0x1d   : > { %195 = vst [vmem:[%s1155_s26 + $0xb0] sm:$0xff] %v194_v22  ;;  %197 = vst [vmem:[%s1155_s26 + $0xb8] sm:$0xff] %v196_v23  ;;  %v200_v25 = vld [vmem:[%s1150_s25 + $0x308] sm:$0xff]  ;;  %v202_v26 = vld [vmem:[%s1150_s25 + $0x310] sm:$0xff] }
  0x1e   : > { %199 = vst [vmem:[%s1155_s26 + $0xc0] sm:$0xff] %v198_v24  ;;  %201 = vst [vmem:[%s1155_s26 + $0xc8] sm:$0xff] %v200_v25  ;;  %v204_v27 = vld [vmem:[%s1150_s25 + $0x318] sm:$0xff]  ;;  %v206_v28 = vld [vmem:[%s1150_s25 + $0x320] sm:$0xff] }
  0x1f   : > { %203 = vst [vmem:[%s1155_s26 + $0xd0] sm:$0xff] %v202_v26  ;;  %v208_v29 = vld [vmem:[%s1150_s25 + $0x328] sm:$0xff]  ;;  %205 = vst [vmem:[%s1155_s26 + $0xd8] sm:$0xff] %v204_v27  ;;  %v210_v30 = vld [vmem:[%s1150_s25 + $0x330] sm:$0xff] }
  0x20   : > { %207 = vst [vmem:[%s1155_s26 + $0xe0] sm:$0xff] %v206_v28  ;;  %209 = vst [vmem:[%s1155_s26 + $0xe8] sm:$0xff] %v208_v29  ;;  %v212_v31 = vld [vmem:[%s1150_s25 + $0x338] sm:$0xff] }
  0x21   : > { %211 = vst [vmem:[%s1155_s26 + $0xf0] sm:$0xff] %v210_v30  ;;  %213 = vst [vmem:[%s1155_s26 + $0xf8] sm:$0xff] %v212_v31 }
  0x22 PF: > { %p964_p5 = scmp.ge.s32.totalorder %s1092_s14, 1  ;;  %p218_p6 = scmp.lt.s32.totalorder %s1092_s14, 5 }
  0x24   : > { %p219_p7 = pnand %p964_p5, %p218_p6 }
  0x25   : > { %s225_s27 = sand.u32 (!%p219_p7), 1, %s1084_s12   ;;  %v1094_v32 = vmov (!%p219_p7), 0   ;;  %v289_v33 = vld [vmem:[%s1340_s2] sm:$0x3] (!%p219_p7)  ;;  %vm455_vm0 = vcmask (!%p219_p7), 261120   ;;  %s966_s7 = sshll.u32 (!%p219_p7), %s957_s15, 4 }
  0x26   : > { %222 = sbr.rel (%p219_p7) target bundleno = 311 (0x137), region = 51  ;;  %s965_s28 = sshll.u32 (!%p219_p7), %s225_s27, 8  ;;  %491 = vmatprep.mubr.bf16.mxu0 (!%p219_p7), %v1094_v32  ;;  %532 = vmatprep.mubr.bf16.mxu1 (!%p219_p7), %v1094_v32  ;;  %v1248_v60 = vld [vmem:[%s1338_s0] sm:$0x1] (!%p219_p7) }
  0x27   : > { %1037 = vset.pattern.permute.xlu0 (!%p219_p7), %v1094_v32  ;;  %s1227_s4 = scalar_lea.vmem (!%p219_p7), [#allocation2], %s965_s28  ;;  %p250_p8 = scmp.lt.s32.totalorder (!%p219_p7), %s966_s7, 63 }
  0x28   : > { %v257_v34 = vld [vmem:[%s1227_s4] sm:$0xff] (!%p219_p7)  ;;  %v258_v36 = vld [vmem:[%s1227_s4 + $0x8] sm:$0xff] (!%p219_p7)  ;;  %292 = vperm.xlu0 (!%p219_p7), %1037, %v289_v33   ;;  %v259_v47 = vld [vmem:[%s1227_s4 + $0x10] sm:$0xff] (!%p219_p7) }
  0x29   : > { %v265_v35 = vld [vmem:[%s1227_s4 + $0x40] sm:$0xff] (!%p219_p7)  ;;  %v266_v38 = vld [vmem:[%s1227_s4 + $0x48] sm:$0xff] (!%p219_p7)  ;;  %v267_v49 = vld [vmem:[%s1227_s4 + $0x50] sm:$0xff] (!%p219_p7) }
  0x2a   : > { %v969_v37 = vcombine.high (!%p219_p7), %v257_v34, %v265_v35  ;;  %v968_v39 = vcombine.low (!%p219_p7), %v257_v34, %v265_v35  ;;  %v273_v40 = vld [vmem:[%s1227_s4 + $0x80] sm:$0xff] (!%p219_p7)  ;;  %v971_v42 = vcombine.high (!%p219_p7), %v258_v36, %v266_v38  ;;  %v970_v43 = vcombine.low (!%p219_p7), %v258_v36, %v266_v38  ;;  %v274_v45 = vld [vmem:[%s1227_s4 + $0x88] sm:$0xff] (!%p219_p7)  ;;  %v260_v50 = vld [vmem:[%s1227_s4 + $0x18] sm:$0xff] (!%p219_p7) }
  0x2b   : > { %v281_v41 = vld [vmem:[%s1227_s4 + $0xc0] sm:$0xff] (!%p219_p7)  ;;  %v282_v46 = vld [vmem:[%s1227_s4 + $0xc8] sm:$0xff] (!%p219_p7)  ;;  %v268_v51 = vld [vmem:[%s1227_s4 + $0x58] sm:$0xff] (!%p219_p7)  ;;  %v973_v54 = vcombine.high (!%p219_p7), %v259_v47, %v267_v49  ;;  %v972_v61 = vcombine.low (!%p219_p7), %v259_v47, %v267_v49 }
  0x2c   : > { %v985_v44 = vcombine.high (!%p219_p7), %v273_v40, %v281_v41  ;;  %459 = vmatprep.subr.bf16.mxu0 (!%p219_p7), %v969_v37  ;;  %v987_v48 = vcombine.high (!%p219_p7), %v274_v45, %v282_v46  ;;  %500 = vmatprep.subr.bf16.mxu1 (!%p219_p7), %v971_v42  ;;  %v984_v52 = vcombine.low (!%p219_p7), %v273_v40, %v281_v41  ;;  %v275_v56 = vld [vmem:[%s1227_s4 + $0x90] sm:$0xff] (!%p219_p7)  ;;  %v276_v58 = vld [vmem:[%s1227_s4 + $0x98] sm:$0xff] (!%p219_p7)  ;;  %v261_v1 = vld [vmem:[%s1227_s4 + $0x20] sm:$0xff] (!%p219_p7) }
  0x2d   : > { %460 = vmatpush1.bf16.msra.mxu0 %v968_v39  ;;  %501 = vmatpush1.bf16.msra.mxu1 %v970_v43  ;;  %v986_v53 = vcombine.low %v274_v45, %v282_v46  ;;  %v975_v55 = vcombine.high %v260_v50, %v268_v51  ;;  %v283_v57 = vld [vmem:[%s1227_s4 + $0xd0] sm:$0xff]  ;;  %v284_v59 = vld [vmem:[%s1227_s4 + $0xd8] sm:$0xff]  ;;  %v974_v62 = vcombine.low %v260_v50, %v268_v51  ;;  %v269_v2 = vld [vmem:[%s1227_s4 + $0x60] sm:$0xff]  ;;  %v824_v50 = vlaneseq  ;;  %s1346_s7 = smov (!%p250_p8, %s966_s7), 63 }
  0x2e   : > { %461 = vmatprep.subr.bf16.mxu0 %v985_v44  ;;  %502 = vmatprep.subr.bf16.mxu1 %v987_v48  ;;  %v989_v63 = vcombine.high %v275_v56, %v283_v57  ;;  %v991_v0 = vcombine.high %v276_v58, %v284_v59  ;;  %v262_v3 = vld [vmem:[%s1227_s4 + $0x28] sm:$0xff]  ;;  %v988_v5 = vcombine.low %v275_v56, %v283_v57  ;;  %v277_v9 = vld [vmem:[%s1227_s4 + $0xa0] sm:$0xff]  ;;  %v263_v17 = vld [vmem:[%s1227_s4 + $0x30] sm:$0xff]  ;;  %v1095_v48 = vmov 1983009808   ;;  %s967_s8 = sshll.u32 %s1346_s7, 1 }
  0x2f   : > { %v270_v4 = vld [vmem:[%s1227_s4 + $0x68] sm:$0xff]  ;;  %v990_v6 = vcombine.low %v276_v58, %v284_v59  ;;  %v977_v7 = vcombine.high %v261_v1, %v269_v2  ;;  %v285_v10 = vld [vmem:[%s1227_s4 + $0xe0] sm:$0xff]  ;;  %v976_v13 = vcombine.low %v261_v1, %v269_v2  ;;  %v271_v18 = vld [vmem:[%s1227_s4 + $0x70] sm:$0xff]  ;;  %v822_v49 = vunpack.c.l.s4 %v1095_v48  ;;  %s1312_s11 = scalar_lea.vmem %s1341_s3, %s967_s8 }
  0x30   : > { %v979_v8 = vcombine.high %v262_v3, %v270_v4  ;;  %v278_v11 = vld [vmem:[%s1227_s4 + $0xa8] sm:$0xff]  ;;  %v978_v14 = vcombine.low %v262_v3, %v270_v4  ;;  %v993_v15 = vcombine.high %v277_v9, %v285_v10  ;;  %v264_v19 = vld [vmem:[%s1227_s4 + $0x38] sm:$0xff]  ;;  %v992_v21 = vcombine.low %v277_v9, %v285_v10  ;;  %v279_v25 = vld [vmem:[%s1227_s4 + $0xb0] sm:$0xff] }
  0x31   : > { %462 = vmatpush1.bf16.msra.mxu0 %v984_v52  ;;  %503 = vmatpush1.bf16.msra.mxu1 %v986_v53  ;;  %v286_v12 = vld [vmem:[%s1227_s4 + $0xe8] sm:$0xff]  ;;  %v272_v20 = vld [vmem:[%s1227_s4 + $0x78] sm:$0xff]  ;;  %v981_v23 = vcombine.high %v263_v17, %v271_v18  ;;  %v287_v26 = vld [vmem:[%s1227_s4 + $0xf0] sm:$0xff]  ;;  %v980_v29 = vcombine.low %v263_v17, %v271_v18  ;;  %v823_v52 = vunpack.c.0.s8 %v822_v49  ;;  %v825_v53 = vshrl.u32 %v824_v50, 7 }
  0x32   : > { %541 = vmatprep.subr.bf16.mxu0 %v973_v54  ;;  %582 = vmatprep.subr.bf16.mxu1 %v975_v55  ;;  %v995_v16 = vcombine.high %v278_v11, %v286_v12  ;;  %v994_v22 = vcombine.low %v278_v11, %v286_v12  ;;  %v983_v24 = vcombine.high %v264_v19, %v272_v20  ;;  %v280_v27 = vld [vmem:[%s1227_s4 + $0xb8] sm:$0xff] }
  0x33   : > { %v288_v28 = vld [vmem:[%s1227_s4 + $0xf8] sm:$0xff]  ;;  %v982_v30 = vcombine.low %v264_v19, %v272_v20  ;;  %v997_v31 = vcombine.high %v279_v25, %v287_v26  ;;  %v996_v34 = vcombine.low %v279_v25, %v287_v26  ;;  %v1300_v2 = vsub.s32 %v823_v52, %v825_v53 }
  0x34   : > { %1000 = vmatmul.mubr.msk.bf16.vlgmr.msra.gmra.mrb[0].mxu0 %vm455_vm0, %v1248_v60  ;;  %1001 = vmatmul.mubr.msk.bf16.vlgmr.msra.gmra.mrb[0].mxu1 %vm455_vm0, %v1248_v60  ;;  %v999_v33 = vcombine.high %v280_v27, %v288_v28  ;;  %v998_v35 = vcombine.low %v280_v27, %v288_v28 }
  0x35   : > { %542 = vmatpush1.bf16.msra.mxu0 %v972_v61  ;;  %583 = vmatpush1.bf16.msra.mxu1 %v974_v62 }
  0x36   : > { %543 = vmatprep.subr.bf16.mxu0 %v989_v63  ;;  %584 = vmatprep.subr.bf16.mxu1 %v991_v0 }
  0x37   : > { %573 = vmatprep.mubr.bf16.mxu0 %v1094_v32  ;;  %614 = vmatprep.mubr.bf16.mxu1 %v1094_v32 }
  0x39   : > { %544 = vmatpush1.bf16.msra.mxu0 %v988_v5  ;;  %585 = vmatpush1.bf16.msra.mxu1 %v990_v6 }
  0x3a   : > { %623 = vmatprep.subr.bf16.mxu0 %v977_v7  ;;  %664 = vmatprep.subr.bf16.mxu1 %v979_v8 }
  0x3c   : > { %1002 = vmatmul.mubr.msk.bf16.vlgmr.msra.gmra.mrb[4].mxu0 %vm455_vm0, %v1248_v60  ;;  %1003 = vmatmul.mubr.msk.bf16.vlgmr.msra.gmra.mrb[4].mxu1 %vm455_vm0, %v1248_v60 }
  0x3d   : > { %624 = vmatpush1.bf16.msra.mxu0 %v976_v13  ;;  %665 = vmatpush1.bf16.msra.mxu1 %v978_v14 }
  0x3e   : > { %625 = vmatprep.subr.bf16.mxu0 %v993_v15  ;;  %666 = vmatprep.subr.bf16.mxu1 %v995_v16 }
  0x3f   : > { %655 = vmatprep.mubr.bf16.mxu0 %v1094_v32  ;;  %696 = vmatprep.mubr.bf16.mxu1 %v1094_v32 }
  0x41   : > { %626 = vmatpush1.bf16.msra.mxu0 %v992_v21  ;;  %667 = vmatpush1.bf16.msra.mxu1 %v994_v22 }
  0x42   : > { %705 = vmatprep.subr.bf16.mxu0 %v981_v23  ;;  %746 = vmatprep.subr.bf16.mxu1 %v983_v24 }
  0x44   : > { %1004 = vmatmul.mubr.msk.bf16.vlgmr.msra.gmra.mrb[8].mxu0 %vm455_vm0, %v1248_v60  ;;  %1005 = vmatmul.mubr.msk.bf16.vlgmr.msra.gmra.mrb[8].mxu1 %vm455_vm0, %v1248_v60 }
  0x45   : > { %706 = vmatpush1.bf16.msra.mxu0 %v980_v29  ;;  %747 = vmatpush1.bf16.msra.mxu1 %v982_v30 }
  0x46   : > { %707 = vmatprep.subr.bf16.mxu0 %v997_v31  ;;  %748 = vmatprep.subr.bf16.mxu1 %v999_v33 }
  0x47   : > { %737 = vmatprep.mubr.bf16.mxu0 %v1094_v32  ;;  %778 = vmatprep.mubr.bf16.mxu1 %v1094_v32 }
  0x49   : > { %708 = vmatpush1.bf16.msra.mxu0 %v996_v34  ;;  %749 = vmatpush1.bf16.msra.mxu1 %v998_v35 }
  0x4c   : > { %1006 = vmatmul.mubr.msk.bf16.vlgmr.msra.gmra.mrb[12].mxu0 %vm455_vm0, %v1248_v60  ;;  %1007 = vmatmul.mubr.msk.bf16.vlgmr.msra.gmra.mrb[12].mxu1 %vm455_vm0, %v1248_v60 }
  0xa7   : > { %v1288_v36 = vpop.permute.xlu0 %292 }
 0x107   : > { %v493_v37 = vpop.f32.mrb[0].mxu0  ;;  %v534_v38 = vpop.f32.mrb[0].mxu1 }
 0x108   : > { %v494_v39 = vadd.f32 %v493_v37, %v1288_v36  ;;  %v495_v40 = vpop.f32.mrb[1].mxu0  ;;  %v535_v32 = vadd.f32 %v534_v38, %v1288_v36  ;;  %v536_v42 = vpop.f32.mrb[1].mxu1 }
 0x109   : > { %v496_v41 = vadd.f32 %v495_v40, %v1288_v36  ;;  %v497_v43 = vpop.f32.mrb[2].mxu0  ;;  %v537_v44 = vadd.f32 %v536_v42, %v1288_v36  ;;  %v538_v45 = vpop.f32.mrb[2].mxu1 }
 0x10a   : > { %1038 = vtanh.f32 %v494_v39  ;;  %v498_v46 = vpop.f32.mrb[3].mxu0  ;;  %v539_v47 = vpop.f32.mrb[3].mxu1 }
 0x10b   : > { %1040 = vtanh.f32 %v496_v41 }
 0x10c   : > { %1042 = vtanh.f32 %v535_v32 }
 0x10d   : > { %1044 = vtanh.f32 %v537_v44 }
 0x10f   : > { %v575_v51 = vpop.f32.mrb[4].mxu0  ;;  %v616_v55 = vpop.f32.mrb[4].mxu1 }
 0x110   : > { %v576_v54 = vadd.f32 %v575_v51, %v1288_v36  ;;  %v577_v56 = vpop.f32.mrb[5].mxu0  ;;  %v617_v57 = vadd.f32 %v616_v55, %v1288_v36  ;;  %v618_v59 = vpop.f32.mrb[5].mxu1 }
 0x111   : > { %v578_v58 = vadd.f32 %v577_v56, %v1288_v36  ;;  %v579_v60 = vpop.f32.mrb[6].mxu0  ;;  %v619_v61 = vadd.f32 %v618_v59, %v1288_v36  ;;  %v620_v62 = vpop.f32.mrb[6].mxu1 }
 0x112   : > { %1046 = vtanh.f32 %v576_v54  ;;  %v580_v63 = vpop.f32.mrb[7].mxu0  ;;  %v621_v0 = vpop.f32.mrb[7].mxu1 }
 0x113   : > { %1048 = vtanh.f32 %v617_v57 }
 0x114   : > { %v1039_v1 = vpop.eup %1038  ;;  %1050 = vtanh.f32 %v578_v58 }
 0x115   : > { %v1041_v3 = vpop.eup %1040  ;;  %1052 = vtanh.f32 %v619_v61 }
 0x116   : > { %v1043_v4 = vpop.eup %1042  ;;  %v819_v5 = vcombine.low %v1039_v1, %v1041_v3 }
 0x117   : > { %v1045_v6 = vpop.eup %1044  ;;  %v657_v7 = vpop.f32.mrb[8].mxu0 }
 0x118   : > { %v827_v8 = vrot.slane %v819_v5, %v1300_v2  ;;  %v820_v9 = vcombine.low %v1043_v4, %v1045_v6  ;;  %v658_v10 = vadd.f32 %v657_v7, %v1288_v36  ;;  %v698_v11 = vpop.f32.mrb[8].mxu1  ;;  %v659_v12 = vpop.f32.mrb[9].mxu0 }
 0x119   : > { %v699_v13 = vadd.f32 %v698_v11, %v1288_v36  ;;  %v660_v14 = vadd.f32 %v659_v12, %v1288_v36  ;;  %v700_v15 = vpop.f32.mrb[9].mxu1  ;;  %v661_v16 = vpop.f32.mrb[10].mxu0 }
 0x11a   : > { %v834_v17 = vrot.slane %v820_v9, %v1300_v2  ;;  %1054 = vtanh.f32 %v658_v10  ;;  %v701_v18 = vadd.f32 %v700_v15, %v1288_v36  ;;  %v702_v19 = vpop.f32.mrb[10].mxu1  ;;  %v662_v20 = vpop.f32.mrb[11].mxu0 }
 0x11b   : > { %1056 = vtanh.f32 %v699_v13  ;;  %v703_v21 = vpop.f32.mrb[11].mxu1 }
 0x11c   : > { %v1047_v22 = vpop.eup %1046  ;;  %v835_v23 = vcombine.low %v827_v8, %v834_v17  ;;  %1058 = vtanh.f32 %v660_v14 }
 0x11d   : > { %v1049_v24 = vpop.eup %1048  ;;  %1060 = vtanh.f32 %v701_v18 }
 0x11e   : > { %v1051_v25 = vpop.eup %1050  ;;  %891 = vst [vmem:[%s1312_s11] sm:$0xff] %v835_v23 }
 0x11f   : > { %v1053_v26 = vpop.eup %1052  ;;  %v836_v27 = vcombine.low %v1047_v22, %v1051_v25  ;;  %v739_v28 = vpop.f32.mrb[12].mxu0 }
 0x120   : > { %v837_v29 = vcombine.low %v1049_v24, %v1053_v26  ;;  %v740_v30 = vadd.f32 %v739_v28, %v1288_v36  ;;  %v780_v31 = vpop.f32.mrb[12].mxu1  ;;  %v741_v33 = vpop.f32.mrb[13].mxu0 }
 0x121   : > { %v844_v34 = vrot.slane %v836_v27, %v1300_v2  ;;  %v781_v35 = vadd.f32 %v780_v31, %v1288_v36  ;;  %v742_v37 = vadd.f32 %v741_v33, %v1288_v36  ;;  %v782_v38 = vpop.f32.mrb[13].mxu1  ;;  %v743_v39 = vpop.f32.mrb[14].mxu0 }
 0x122   : > { %v851_v40 = vrot.slane %v837_v29, %v1300_v2  ;;  %1062 = vtanh.f32 %v740_v30  ;;  %v783_v41 = vadd.f32 %v782_v38, %v1288_v36  ;;  %v784_v32 = vpop.f32.mrb[14].mxu1  ;;  %v744_v42 = vpop.f32.mrb[15].mxu0 }
 0x123   : > { %1064 = vtanh.f32 %v781_v35  ;;  %v785_v43 = vpop.f32.mrb[15].mxu1 }
 0x124   : > { %v1055_v44 = vpop.eup %1054  ;;  %v852_v45 = vcombine.low %v844_v34, %v851_v40  ;;  %1066 = vtanh.f32 %v742_v37 }
 0x125   : > { %v1057_v46 = vpop.eup %1056  ;;  %1068 = vtanh.f32 %v783_v41 }
 0x126   : > { %v1059_v47 = vpop.eup %1058  ;;  %892 = vst [vmem:[%s1312_s11 + $0x8] sm:$0xff] %v852_v45 }
 0x127   : > { %v1061_v48 = vpop.eup %1060  ;;  %v853_v49 = vcombine.low %v1055_v44, %v1059_v47 }
 0x128   : > { %v854_v50 = vcombine.low %v1057_v46, %v1061_v48 }
 0x129   : > { %v861_v51 = vrot.slane %v853_v49, %v1300_v2 }
 0x12a   : > { %v868_v36 = vrot.slane %v854_v50, %v1300_v2 }
 0x12c   : > { %v1063_v52 = vpop.eup %1062  ;;  %v869_v53 = vcombine.low %v861_v51, %v868_v36 }
 0x12d   : > { %v1065_v54 = vpop.eup %1064 }
 0x12e   : > { %v1067_v55 = vpop.eup %1066  ;;  %893 = vst [vmem:[%s1312_s11 + $0x10] sm:$0xff] %v869_v53 }
 0x12f   : > { %v1069_v56 = vpop.eup %1068  ;;  %v870_v57 = vcombine.low %v1063_v52, %v1067_v55 }
 0x130   : > { %v871_v58 = vcombine.low %v1065_v54, %v1069_v56 }
 0x131   : > { %v878_v59 = vrot.slane %v870_v57, %v1300_v2 }
 0x132   : > { %v885_v60 = vrot.slane %v871_v58, %v1300_v2 }
 0x134   : > { %v886_v61 = vcombine.low %v878_v59, %v885_v60 }
 0x136   : > { %894 = vst [vmem:[%s1312_s11 + $0x18] sm:$0xff] %v886_v61 }
 0x137 PF: > { %p10_p9 = scmp.ge.s32.totalorder %s1133_s16, 6   ;;  %s1342_s12 = smov %s1088_s13 }
 0x138   : > { %s1343_s13 = smov %s1142_s19  ;;  %s1344_s14 = smov %s1133_s16 }
 0x139   :  { %12 = sbr.rel (!%p10_p9) target bundleno = 2 (0x2), region = 90 }

</bundles_post_ra>
